<compile_context>
chip_gen: v6e
topology: v6e:2x2x1
jax: 0.10.0
libtpu: 0.0.40
codegen_flags: <defaults>
</compile_context>

<pallas_src>
import math
from functools import partial

import jax
import jax.numpy as jnp
from jax.experimental import pallas as pl
from jax.experimental.pallas import tpu as pltpu


def _silu_kernel(v):
    # f32 SiLU inside the kernel: exp + approximate reciprocal both land on
    # the EUP slot, keeping VALU/store bundles free (matters most on v5e).
    return v * pl.reciprocal(1.0 + jnp.exp(-v), approx=True)


def _silu_ref(v):
    return v * jax.nn.sigmoid(v)


def _kernel_stream(node_ref, rbf_ref, w_rbf_ref, b_rbf_ref, w3_ref, out_ref):
    """Large-N path: node_pre = (x_emb@W1)[i] + (x_emb@W2)[j] + b_lin streamed."""
    rbf_h = jnp.dot(rbf_ref[...], w_rbf_ref[...],
                    preferred_element_type=jnp.float32) + b_rbf_ref[...]
    rbf_h = _silu_kernel(rbf_h)
    h = jnp.dot(rbf_h.astype(w3_ref.dtype), w3_ref[...],
                preferred_element_type=jnp.float32)
    h = h + node_ref[...].astype(jnp.float32)
    out_ref[...] = _silu_kernel(h).astype(out_ref.dtype)


def _kernel_gather(i_ref, j_ref, rbf_ref, y1_ref, y2_ref,
                   w_rbf_ref, b_rbf_ref, w3_ref, out_ref):
    """Small-N path: node gather done in-kernel via one-hot MXU matmuls."""
    rbf_h = jnp.dot(rbf_ref[...], w_rbf_ref[...],
                    preferred_element_type=jnp.float32) + b_rbf_ref[...]
    rbf_h = _silu_kernel(rbf_h)
    h = jnp.dot(rbf_h.astype(w3_ref.dtype), w3_ref[...],
                preferred_element_type=jnp.float32)

    et = i_ref.shape[0]
    n_pad = y1_ref.shape[0]
    lanes = jax.lax.broadcasted_iota(jnp.int32, (et, n_pad), 1)
    oh_i = (lanes == i_ref[...]).astype(y1_ref.dtype)    # [et, n_pad] one-hot
    oh_j = (lanes == j_ref[...]).astype(y2_ref.dtype)
    h = h + jnp.dot(oh_i, y1_ref[...], preferred_element_type=jnp.float32)
    h = h + jnp.dot(oh_j, y2_ref[...], preferred_element_type=jnp.float32)
    out_ref[...] = _silu_kernel(h).astype(out_ref.dtype)


def embedding_block_forward(x, rbf, i, j, params, *, edge_tile=1024,
                            out_dtype=jnp.bfloat16, max_gather_nodes=256):
    """x: [N] int32 atomic numbers; rbf: [E, R]; i, j: [E] int32 edge indices.

    Returns act(lin(cat([emb(x)[i], emb(x)[j], act(lin_rbf(rbf))], -1)))
    in `out_dtype` (default bf16: the kernel is HBM-bound and the f32 output
    was its single largest stream).
    """
    emb_w = params["emb_weight"]        # [95, H] f32
    w_rbf = params["w_rbf"]             # [R, H]   (in, out) layout
    b_rbf = params["b_rbf"]             # [1, H]   f32 (added to f32 accumulator)
    w_lin = params["w_lin"]             # [3H, H]  (in, out) layout
    b_lin = params["b_lin"]             # [1, H]

    H = emb_w.shape[1]
    E, R = rbf.shape
    N = x.shape[0]

    # Split the cat-Linear weight into its three per-branch HxH blocks.
    w1, w2, w3 = w_lin[0:H], w_lin[H:2 * H], w_lin[2 * H:3 * H]

    # ---- XLA glue, per NODE only (N << E): embedding lookup + hoisted matmuls
    x_emb = emb_w[x]                                        # [N, H] f32
    y1 = (x_emb @ w1 + b_lin).astype(jnp.bfloat16)          # b_lin folded once
    y2 = (x_emb @ w2).astype(jnp.bfloat16)

    # ---- edge tiling: multiples of 16 (bf16 sublane packing), >= 2 grid steps
    edge_tile = max(16, (edge_tile // 16) * 16)
    if E > edge_tile:
        edge_tile = min(edge_tile, pl.cdiv(pl.cdiv(E, 2), 16) * 16)
    else:
        edge_tile = pl.cdiv(E, 16) * 16
    grid = (pl.cdiv(E, edge_tile),)     # last block partial -> masked stores

    rbf_b = rbf.astype(jnp.bfloat16)
    w_rbf_b = w_rbf.astype(jnp.bfloat16)
    w3_b = w3.astype(jnp.bfloat16)

    out_shape = jax.ShapeDtypeStruct((E, H), out_dtype)
    out_bytes = E * H * jnp.dtype(out_dtype).itemsize
    cparams = pltpu.CompilerParams(
        dimension_semantics=("parallel",),
        vmem_limit_bytes=16 * 1024 * 1024,   # actual use < ~4 MiB; v7x-friendly
    )

    if N <= max_gather_nodes:
        # In-kernel gather: stream 8 B/edge of indices instead of 2H B/edge of
        # node_pre; gather via one-hot [tile, N] MXU matmuls against
        # VMEM-resident bf16 [N, H] tables. Gated on small N so the extra
        # 2*N*H flops/edge keep the kernel under the compute roofline.
        n_pad = max(128, pl.cdiv(N, 128) * 128)             # lane-dense K dim
        y1p = jnp.pad(y1, ((0, n_pad - N), (0, 0)))
        y2p = jnp.pad(y2, ((0, n_pad - N), (0, 0)))
        i2 = i.astype(jnp.int32).reshape(E, 1)
        j2 = j.astype(jnp.int32).reshape(E, 1)

        cost = pl.CostEstimate(
            flops=2 * E * H * (R + H + 2 * n_pad),
            transcendentals=2 * E * H,
            bytes_accessed=E * (2 * R + 8) + out_bytes
                           + 2 * (R * H + H * H + 2 * n_pad * H) + 4 * H,
        )
        return pl.pallas_call(
            _kernel_gather,
            out_shape=out_shape,
            grid_spec=pltpu.PrefetchScalarGridSpec(
                num_scalar_prefetch=0,
                grid=grid,
                in_specs=[
                    pl.BlockSpec((edge_tile, 1), lambda e: (e, 0)),   # i
                    pl.BlockSpec((edge_tile, 1), lambda e: (e, 0)),   # j
                    pl.BlockSpec((edge_tile, R), lambda e: (e, 0)),   # rbf
                    pl.BlockSpec((n_pad, H), lambda e: (0, 0)),       # y1 table
                    pl.BlockSpec((n_pad, H), lambda e: (0, 0)),       # y2 table
                    pl.BlockSpec((R, H), lambda e: (0, 0)),           # w_rbf
                    pl.BlockSpec((1, H), lambda e: (0, 0)),           # b_rbf
                    pl.BlockSpec((H, H), lambda e: (0, 0)),           # w3
                ],
                out_specs=pl.BlockSpec((edge_tile, H), lambda e: (e, 0)),
            ),
            compiler_params=cparams,
            cost_estimate=cost,
        )(i2, j2, rbf_b, y1p, y2p, w_rbf_b, b_rbf, w3_b)

    # Large-N fallback: single precomputed bf16 node stream per edge.
    node_pre = y1[i] + y2[j]                                # [E, H] bf16
    cost = pl.CostEstimate(
        flops=2 * E * H * (R + H),
        transcendentals=2 * E * H,
        bytes_accessed=E * (2 * H + 2 * R) + out_bytes
                       + 2 * (R * H + H * H) + 4 * H,
    )
    return pl.pallas_call(
        _kernel_stream,
        out_shape=out_shape,
        grid_spec=pltpu.PrefetchScalarGridSpec(
            num_scalar_prefetch=0,
            grid=grid,
            in_specs=[
                pl.BlockSpec((edge_tile, H), lambda e: (e, 0)),   # node_pre
                pl.BlockSpec((edge_tile, R), lambda e: (e, 0)),   # rbf
                pl.BlockSpec((R, H), lambda e: (0, 0)),           # w_rbf
                pl.BlockSpec((1, H), lambda e: (0, 0)),           # b_rbf
                pl.BlockSpec((H, H), lambda e: (0, 0)),           # w3
            ],
            out_specs=pl.BlockSpec((edge_tile, H), lambda e: (e, 0)),
        ),
        compiler_params=cparams,
        cost_estimate=cost,
    )(node_pre, rbf_b, w_rbf_b, b_rbf, w3_b)


def init_params(key, num_radial, hidden_channels):
    k_emb, k_wr, k_br, k_wl, k_bl = jax.random.split(key, 5)
    sqrt3 = math.sqrt(3.0)
    # emb.weight ~ U(-sqrt(3), sqrt(3))
    emb_weight = jax.random.uniform(k_emb, (95, hidden_channels),
                                    minval=-sqrt3, maxval=sqrt3,
                                    dtype=jnp.float32)
    # torch Linear default init: U(-1/sqrt(fan_in), 1/sqrt(fan_in)) (approx.)
    bound_rbf = 1.0 / math.sqrt(num_radial)
    w_rbf = jax.random.uniform(k_wr, (num_radial, hidden_channels),
                               minval=-bound_rbf, maxval=bound_rbf,
                               dtype=jnp.float32)
    b_rbf = jax.random.uniform(k_br, (1, hidden_channels),
                               minval=-bound_rbf, maxval=bound_rbf,
                               dtype=jnp.float32)
    bound_lin = 1.0 / math.sqrt(3 * hidden_channels)
    w_lin = jax.random.uniform(k_wl, (3 * hidden_channels, hidden_channels),
                               minval=-bound_lin, maxval=bound_lin,
                               dtype=jnp.float32)
    b_lin = jax.random.uniform(k_bl, (1, hidden_channels),
                               minval=-bound_lin, maxval=bound_lin,
                               dtype=jnp.float32)
    return dict(emb_weight=emb_weight, w_rbf=w_rbf, b_rbf=b_rbf,
                w_lin=w_lin, b_lin=b_lin)


def reference_forward(x, rbf, i, j, params):
    """Pure-JAX f32 reference matching the PyTorch module exactly."""
    x_emb = params["emb_weight"][x]
    rbf_h = _silu_ref(rbf @ params["w_rbf"] + params["b_rbf"])
    cat = jnp.concatenate([x_emb[i], x_emb[j], rbf_h], axis=-1)
    return _silu_ref(cat @ params["w_lin"] + params["b_lin"])


if __name__ == "__main__":
    num_radial = 6          # DimeNet default
    hidden_channels = 128   # DimeNet default; lane-dense (multiple of 128)
    num_nodes = 64
    num_edges = 2000        # deliberately NOT a multiple of the edge tile

    key = jax.random.PRNGKey(0)
    k_params, k_x, k_rbf, k_i, k_j = jax.random.split(key, 5)

    params = init_params(k_params, num_radial, hidden_channels)

    x = jax.random.randint(k_x, (num_nodes,), 0, 95, dtype=jnp.int32)
    rbf = jax.random.normal(k_rbf, (num_edges, num_radial), dtype=jnp.float32)
    i = jax.random.randint(k_i, (num_edges,), 0, num_nodes, dtype=jnp.int32)
    j = jax.random.randint(k_j, (num_edges,), 0, num_nodes, dtype=jnp.int32)

    ref = reference_forward(x, rbf, i, j, params)

    # Path 1: small-N in-kernel one-hot gather (default gate: N=64 <= 256).
    fwd_gather = jax.jit(embedding_block_forward)
    out_g = jax.block_until_ready(fwd_gather(x, rbf, i, j, params))
    assert out_g.shape == (num_edges, hidden_channels)
    err_g = float(jnp.max(jnp.abs(out_g.astype(jnp.float32) - ref)))
    assert jnp.allclose(out_g.astype(jnp.float32), ref, atol=4e-2, rtol=4e-2), (
        f"gather path max_abs_err={err_g}")

    # Path 2: streamed node_pre fallback (forced by disabling the gate).
    fwd_stream = jax.jit(partial(embedding_block_forward, max_gather_nodes=0))
    out_s = jax.block_until_ready(fwd_stream(x, rbf, i, j, params))
    assert out_s.shape == (num_edges, hidden_channels)
    err_s = float(jnp.max(jnp.abs(out_s.astype(jnp.float32) - ref)))
    assert jnp.allclose(out_s.astype(jnp.float32), ref, atol=4e-2, rtol=4e-2), (
        f"stream path max_abs_err={err_s}")

    print("KERNEL_OK")
</pallas_src>

<mosaic_0001>
module attributes {stable_mosaic.version = 11 : i64} {
  func.func @_kernel_gather(%arg0: i32, %arg1: memref<1008x1xi32, #tpu.memory_space<vmem>>, %arg2: memref<1008x1xi32, #tpu.memory_space<vmem>>, %arg3: memref<1008x6xbf16, #tpu.memory_space<vmem>>, %arg4: memref<128x128xbf16, #tpu.memory_space<vmem>>, %arg5: memref<128x128xbf16, #tpu.memory_space<vmem>>, %arg6: memref<6x128xbf16, #tpu.memory_space<vmem>>, %arg7: memref<1x128xf32, #tpu.memory_space<vmem>>, %arg8: memref<128x128xbf16, #tpu.memory_space<vmem>>, %arg9: memref<1008x128xbf16, #tpu.memory_space<vmem>>) attributes {dimension_semantics = [#tpu.dimension_semantics<parallel>], iteration_bounds = array<i64: 2>, scalar_prefetch = 0 : i64, scratch_operands = 0 : i64, tpu.core_type = #tpu.core_type<tc>, window_params = [{transform_indices = @transform_0, window_bounds = array<i64: 1008, 1>}, {transform_indices = @transform_1, window_bounds = array<i64: 1008, 1>}, {transform_indices = @transform_2, window_bounds = array<i64: 1008, 6>}, {pipeline_mode = #tpu.pipeline_mode<synchronous>, transform_indices = @transform_3, window_bounds = array<i64: 128, 128>}, {pipeline_mode = #tpu.pipeline_mode<synchronous>, transform_indices = @transform_4, window_bounds = array<i64: 128, 128>}, {pipeline_mode = #tpu.pipeline_mode<synchronous>, transform_indices = @transform_5, window_bounds = array<i64: 6, 128>}, {pipeline_mode = #tpu.pipeline_mode<synchronous>, transform_indices = @transform_6, window_bounds = array<i64: 1, 128>}, {pipeline_mode = #tpu.pipeline_mode<synchronous>, transform_indices = @transform_7, window_bounds = array<i64: 128, 128>}, {transform_indices = @transform_8, window_bounds = array<i64: 1008, 128>}]} {
    %c0 = arith.constant 0 : index
    %c0_0 = arith.constant 0 : index
    %0 = vector.load %arg3[%c0, %c0_0] : memref<1008x6xbf16, #tpu.memory_space<vmem>>, vector<1008x6xbf16>
    %c0_1 = arith.constant 0 : index
    %c0_2 = arith.constant 0 : index
    %1 = vector.load %arg6[%c0_1, %c0_2] : memref<6x128xbf16, #tpu.memory_space<vmem>>, vector<6x128xbf16>
    %cst = arith.constant dense<0.000000e+00> : vector<1008x128xf32>
    %2 = tpu.matmul %0, %1, %cst {dimension_numbers = #tpu.dot_dimension_numbers<[1], [0], [0], [1], [0, 0, 1, 1], [], []>} : vector<1008x6xbf16>, vector<6x128xbf16>, vector<1008x128xf32> -> vector<1008x128xf32>
    %c0_3 = arith.constant 0 : index
    %c0_4 = arith.constant 0 : index
    %3 = vector.load %arg7[%c0_3, %c0_4] : memref<1x128xf32, #tpu.memory_space<vmem>>, vector<1x128xf32>
    %4 = vector.broadcast %3 : vector<1x128xf32> to vector<1008x128xf32>
    %5 = arith.addf %2, %4 : vector<1008x128xf32>
    %cst_5 = arith.constant 0.000000e+00 : f32
    %6 = vector.broadcast %cst_5 : f32 to vector<1008x128xf32>
    %7 = arith.subf %6, %5 : vector<1008x128xf32>
    %8 = math.exp %7 : vector<1008x128xf32>
    %cst_6 = arith.constant 1.000000e+00 : f32
    %9 = vector.broadcast %cst_6 : f32 to vector<1008x128xf32>
    %10 = arith.addf %9, %8 : vector<1008x128xf32>
    %11 = tpu.reciprocal %10 {approx = true} : vector<1008x128xf32> -> vector<1008x128xf32>
    %12 = arith.mulf %5, %11 : vector<1008x128xf32>
    %13 = arith.truncf %12 : vector<1008x128xf32> to vector<1008x128xbf16>
    %c0_7 = arith.constant 0 : index
    %c0_8 = arith.constant 0 : index
    %14 = vector.load %arg8[%c0_7, %c0_8] : memref<128x128xbf16, #tpu.memory_space<vmem>>, vector<128x128xbf16>
    %cst_9 = arith.constant dense<0.000000e+00> : vector<1008x128xf32>
    %15 = tpu.matmul %13, %14, %cst_9 {dimension_numbers = #tpu.dot_dimension_numbers<[1], [0], [0], [1], [0, 0, 1, 1], [], []>} : vector<1008x128xbf16>, vector<128x128xbf16>, vector<1008x128xf32> -> vector<1008x128xf32>
    %16 = tpu.iota {dimensions = array<i32: 1>} : vector<1008x128xi32>
    %c0_10 = arith.constant 0 : index
    %c0_11 = arith.constant 0 : index
    %17 = vector.load %arg1[%c0_10, %c0_11] : memref<1008x1xi32, #tpu.memory_space<vmem>>, vector<1008x1xi32>
    %18 = vector.broadcast %17 : vector<1008x1xi32> to vector<1008x128xi32>
    %19 = arith.cmpi eq, %16, %18 : vector<1008x128xi32>
    %20 = arith.extui %19 : vector<1008x128xi1> to vector<1008x128xi32>
    %21 = arith.sitofp %20 : vector<1008x128xi32> to vector<1008x128xf32>
    %22 = arith.truncf %21 : vector<1008x128xf32> to vector<1008x128xbf16>
    %c0_12 = arith.constant 0 : index
    %c0_13 = arith.constant 0 : index
    %23 = vector.load %arg2[%c0_12, %c0_13] : memref<1008x1xi32, #tpu.memory_space<vmem>>, vector<1008x1xi32>
    %24 = vector.broadcast %23 : vector<1008x1xi32> to vector<1008x128xi32>
    %25 = arith.cmpi eq, %16, %24 : vector<1008x128xi32>
    %26 = arith.extui %25 : vector<1008x128xi1> to vector<1008x128xi32>
    %27 = arith.sitofp %26 : vector<1008x128xi32> to vector<1008x128xf32>
    %28 = arith.truncf %27 : vector<1008x128xf32> to vector<1008x128xbf16>
    %c0_14 = arith.constant 0 : index
    %c0_15 = arith.constant 0 : index
    %29 = vector.load %arg4[%c0_14, %c0_15] : memref<128x128xbf16, #tpu.memory_space<vmem>>, vector<128x128xbf16>
    %cst_16 = arith.constant dense<0.000000e+00> : vector<1008x128xf32>
    %30 = tpu.matmul %22, %29, %cst_16 {dimension_numbers = #tpu.dot_dimension_numbers<[1], [0], [0], [1], [0, 0, 1, 1], [], []>} : vector<1008x128xbf16>, vector<128x128xbf16>, vector<1008x128xf32> -> vector<1008x128xf32>
    %31 = arith.addf %15, %30 : vector<1008x128xf32>
    %c0_17 = arith.constant 0 : index
    %c0_18 = arith.constant 0 : index
    %32 = vector.load %arg5[%c0_17, %c0_18] : memref<128x128xbf16, #tpu.memory_space<vmem>>, vector<128x128xbf16>
    %cst_19 = arith.constant dense<0.000000e+00> : vector<1008x128xf32>
    %33 = tpu.matmul %28, %32, %cst_19 {dimension_numbers = #tpu.dot_dimension_numbers<[1], [0], [0], [1], [0, 0, 1, 1], [], []>} : vector<1008x128xbf16>, vector<128x128xbf16>, vector<1008x128xf32> -> vector<1008x128xf32>
    %34 = arith.addf %31, %33 : vector<1008x128xf32>
    %cst_20 = arith.constant 0.000000e+00 : f32
    %35 = vector.broadcast %cst_20 : f32 to vector<1008x128xf32>
    %36 = arith.subf %35, %34 : vector<1008x128xf32>
    %37 = math.exp %36 : vector<1008x128xf32>
    %cst_21 = arith.constant 1.000000e+00 : f32
    %38 = vector.broadcast %cst_21 : f32 to vector<1008x128xf32>
    %39 = arith.addf %38, %37 : vector<1008x128xf32>
    %40 = tpu.reciprocal %39 {approx = true} : vector<1008x128xf32> -> vector<1008x128xf32>
    %41 = arith.mulf %34, %40 : vector<1008x128xf32>
    %42 = arith.truncf %41 : vector<1008x128xf32> to vector<1008x128xbf16>
    %c0_22 = arith.constant 0 : index
    %c0_23 = arith.constant 0 : index
    %43 = vector.load %arg9[%c0_22, %c0_23] : memref<1008x128xbf16, #tpu.memory_space<vmem>>, vector<1008x128xbf16>
    tpu.vector_store %arg9[%c0_22, %c0_23], %42 {strides = array<i32>} : memref<1008x128xbf16, #tpu.memory_space<vmem>>, vector<1008x128xbf16>,
    return
  }
  func.func @transform_0(%arg0: i32) -> (i32, i32) {
    %c0_i32 = arith.constant 0 : i32
    %c0_i32_0 = arith.constant 0 : i32
    return %arg0, %c0_i32 : i32, i32
  }
  func.func @transform_1(%arg0: i32) -> (i32, i32) {
    %c0_i32 = arith.constant 0 : i32
    %c0_i32_0 = arith.constant 0 : i32
    return %arg0, %c0_i32 : i32, i32
  }
  func.func @transform_2(%arg0: i32) -> (i32, i32) {
    %c0_i32 = arith.constant 0 : i32
    %c0_i32_0 = arith.constant 0 : i32
    return %arg0, %c0_i32 : i32, i32
  }
  func.func @transform_3(%arg0: i32) -> (i32, i32) {
    %c0_i32 = arith.constant 0 : i32
    %c0_i32_0 = arith.constant 0 : i32
    %c0_i32_1 = arith.constant 0 : i32
    return %c0_i32, %c0_i32_0 : i32, i32
  }
  func.func @transform_4(%arg0: i32) -> (i32, i32) {
    %c0_i32 = arith.constant 0 : i32
    %c0_i32_0 = arith.constant 0 : i32
    %c0_i32_1 = arith.constant 0 : i32
    return %c0_i32, %c0_i32_0 : i32, i32
  }
  func.func @transform_5(%arg0: i32) -> (i32, i32) {
    %c0_i32 = arith.constant 0 : i32
    %c0_i32_0 = arith.constant 0 : i32
    %c0_i32_1 = arith.constant 0 : i32
    return %c0_i32, %c0_i32_0 : i32, i32
  }
  func.func @transform_6(%arg0: i32) -> (i32, i32) {
    %c0_i32 = arith.constant 0 : i32
    %c0_i32_0 = arith.constant 0 : i32
    %c0_i32_1 = arith.constant 0 : i32
    return %c0_i32, %c0_i32_0 : i32, i32
  }
  func.func @transform_7(%arg0: i32) -> (i32, i32) {
    %c0_i32 = arith.constant 0 : i32
    %c0_i32_0 = arith.constant 0 : i32
    %c0_i32_1 = arith.constant 0 : i32
    return %c0_i32, %c0_i32_0 : i32, i32
  }
  func.func @transform_8(%arg0: i32) -> (i32, i32) {
    %c0_i32 = arith.constant 0 : i32
    %c0_i32_0 = arith.constant 0 : i32
    return %arg0, %c0_i32 : i32, i32
  }
}

</mosaic_0001>

<bundles_post_ra>
// kernel: embedding_block_forward.1
= control target key start
LH: loop header
LB: loop body
LE: loop exit
PB: predicated region body
PF: predicated region fallthrough
CT: control target
= control target key end

     0   :  { %13 = vsyncpa [#allocation3], 0  ;;  %s16717_s0 = inlined_call_operand.vmem [shape: s32[2000,1], index: 0, kind: input, shape index: {}]   ;;  %s16718_s1 = inlined_call_operand.vmem [shape: s32[2000,1], index: 1, kind: input, shape index: {}]   ;;  %s16719_s2 = inlined_call_operand.vmem [shape: bf16[2000,6], index: 2, kind: input, shape index: {}]   ;;  %s16720_s3 = inlined_call_operand.vmem [shape: bf16[128,128], index: 3, kind: input, shape index: {}]   ;;  %s16721_s4 = inlined_call_operand.vmem [shape: bf16[128,128], index: 4, kind: input, shape index: {}]   ;;  %s16722_s5 = inlined_call_operand.vmem [shape: bf16[6,128], index: 5, kind: input, shape index: {}]   ;;  %s16723_s6 = inlined_call_operand.vmem [shape: f32[1,128], index: 6, kind: input, shape index: {}]   ;;  %s16724_s7 = inlined_call_operand.vmem [shape: bf16[128,128], index: 7, kind: input, shape index: {}]   ;;  %s16725_s8 = inlined_call_operand.hbm [shape: bf16[2000,128], index: 8, kind: output, shape index: {}]  }
   0x1   :  { %15 = vsyncpa [#allocation3 + $0x1], 0  ;;  %s11646_s27 = smov 0   ;;  %s11648_s28 = smov 0  }
   0x2   :  { %s11650_s29 = smov 0   ;;  %s11652_s30 = smov 0  }
   0x3 LB: > { %s11667_s9 = sadd.s32 4294967295, %s11592_s30   ;;  %s7728_s10 = sadd.s32 4294967294, %s11592_s30   ;;  %s11592_s30 = sphi %s11652_s30, %s17679_s30   ;;  %s11588_s29 = sphi %s11650_s29, %s17678_s29   ;;  %s11584_s28 = sphi %s11648_s28, %s17677_s28   ;;  %s11580_s27 = sphi %s11646_s27, %s17676_s27  }
   0x4   : > { %s11671_s11 = sadd.s32 1, %s11592_s30   ;;  %s211_s12 = sadd.s32 1, %s11588_s29 }
   0x5   : > { %s208_s13 = ssub.s32 %s11592_s30, %s11671_s11  ;;  %p221_p0 = scmp.ne.s32.totalorder %s11588_s29, %s11584_s28 }
   0x6   : > { %p209_p1 = scmp.eq.s32.totalorder %s208_s13, 0  ;;  %p222_p2 = scmp.eq.s32.totalorder %s11667_s9, 1 }
   0x7   : > { %p227_p3 = scmp.ne.s32.totalorder %s11584_s28, %s11580_s27  ;;  %p228_p4 = scmp.eq.s32.totalorder %s7728_s10, 1 }
   0x8   : > { %s11682_s14 = scalar_select %p209_p1, %s11588_s29, %s211_s12  }
   0x9   : > { %p11684_p5 = por %p222_p2, %p221_p0  ;;  %p11688_p6 = por %p228_p4, %p227_p3 }
   0xa   : > { %p7731_p7 = scmp.ge.s32.totalorder %s11592_s30, 1  ;;  %p312_p8 = scmp.lt.s32.totalorder %s11592_s30, 3 }
   0xc   : > { %p313_p9 = pnand %p7731_p7, %p312_p8 }
   0xe   : > { %316 = sbr.rel (%p313_p9) target bundleno = 1426 (0x592), region = 52 }
  0x13   : > { %v542_v0 = vld [vmem:[%s16722_s5] sm:$0x7]  ;;  %vm1055_vm0 = vcmask 1042432   ;;  %s11698_s19 = smul.u32 126, %s11667_s9  ;;  %v16726_v1 = vmov 0.0   ;;  %v11595_v2 = vmov 0  }
  0x14   : > { %9304 = vmatprep.subr.bf16.mxu0 %v16726_v1  ;;  %10424 = vset.pattern.permute.xlu1 %v11595_v2  ;;  %v1057_v3 = vsel %vm1055_vm0, %v542_v0, 0  ;;  %v10438_v4 = vld [vmem:[%s16720_s3 + $0x38] sm:$0xff]   ;;  %vm16826_vm1 = vmmov 0   ;;  %v10439_v5 = vld [vmem:[%s16720_s3 + $0x30] sm:$0xff]   ;;  %vm865_vm2 = vcmask 48128   ;;  %v10441_v8 = vld [vmem:[%s16720_s3 + $0x28] sm:$0xff]  }
  0x15   : > { %10423 = vset.pattern.permute.xlu0 %v11595_v2  ;;  %9305 = vmatpush3.bf16.msra.mxu0 %v1057_v3  ;;  %p373_p10 = scmp.lt.s32.totalorder %s11698_s19, 249  ;;  %v10445_v12 = vld [vmem:[%s16724_s7 + $0x38] sm:$0xff]   ;;  %v10442_v13 = vld [vmem:[%s16720_s3 + $0x20] sm:$0xff]   ;;  %v10446_v35 = vld [vmem:[%s16720_s3 + $0x10] sm:$0xff]   ;;  %s365_s10 = sand.u32 1, %s11584_s28  }
  0x16   : > { %9306 = vmatprep.mubr.msk.bf16.mxu0 %vm16826_vm1, %v16726_v1  ;;  %9558 = vmatprep.subr.bf16.mxu1 %v16726_v1  ;;  %v10444_v17 = vld [vmem:[%s16720_s3 + $0x18] sm:$0xff]   ;;  %v10448_v38 = vld [vmem:[%s16720_s3 + $0x8] sm:$0xff]   ;;  %v10449_v42 = vld [vmem:[%s16720_s3] sm:$0xff]   ;;  %s15424_s12 = smul.u32 504, %s365_s10  ;;  %s16657_s18 = scalar_lea.sflag [#allocation3], %s365_s10 }
  0x17   : > { %s11709_s22 = scalar_select %p373_p10, %s11698_s19, 249  ;;  %9559 = vmatpush3.bf16.msra.mxu1 %v10438_v4  ;;  %9826 = vmatprep.subr.bf16.mxu0 %v16726_v1  ;;  %v10457_v51 = vld [vmem:[%s16724_s7 + $0x30] sm:$0xff]  }
  0x18   : > { %9560 = vmatprep.subr.bf16.mxu1 %v16726_v1  ;;  %9574 = vmatprep.mubr.msk.bf16.mxu1 %vm16826_vm1, %v16726_v1  ;;  %s15453_s17 = scalar_lea.vmem [#allocation2], %s15424_s12 }
  0x19   : > { %s7732_s25 = sshll.u32 %s11709_s22, 3  ;;  %s7734_s26 = sshll.u32 %s11709_s22, 2 }
  0x1a   : > { %s11725_s13 = scalar_lea.vmem %s16717_s0, %s7732_s25  ;;  %s11730_s20 = scalar_lea.vmem %s16719_s2, %s7734_s26 }
  0x1b   : > { %v2435_v6 = vld [vmem:[%s11725_s13 + $0x10] sm:$0xff]  ;;  %v2433_v7 = vld [vmem:[%s11725_s13] sm:$0xff]  ;;  %9561 = vmatpush3.bf16.msra.mxu1 %v10439_v5  ;;  %v2436_v10 = vld [vmem:[%s11725_s13 + $0x18] sm:$0xff]  ;;  %s12335_s21 = scalar_lea.vmem %s16718_s1, %s7732_s25  ;;  %s7631_s22 = ssub.s32 (%p11684_p5), 250, %s11698_s19 }
  0x1c   : > { %2566 = vperm.xlu1 %10424, %v2435_v6   ;;  %2560 = vperm.xlu0 %10423, %v2433_v7   ;;  %v10425_v9 = vld [vmem:[%s11730_s20] sm:$0xff]   ;;  %v2434_v11 = vld [vmem:[%s11725_s13 + $0x8] sm:$0xff]  ;;  %v2440_v18 = vld [vmem:[%s11725_s13 + $0x38] sm:$0xff]  ;;  %p7632_p11 = scmp.lt.s32.totalorder (%p11684_p5), %s7631_s22, 126 }
  0x1d   : > { %9562 = vmatprep.subr.bf16.mxu1 %v16726_v1  ;;  %9307 = vmatmul.mubr.msk.bf16.vlgmr.msra.gmra.mxu0 %vm865_vm2, %v10425_v9  ;;  %v2438_v14 = vld [vmem:[%s11725_s13 + $0x28] sm:$0xff]  ;;  %v2437_v15 = vld [vmem:[%s11725_s13 + $0x20] sm:$0xff]  ;;  %v2439_v19 = vld [vmem:[%s11725_s13 + $0x30] sm:$0xff] }
  0x1e   : > { %9310 = vmatprep.mubr.msk.bf16.mxu0 %vm16826_vm1, %v16726_v1  ;;  %9827 = vmatpush3.bf16.msra.mxu0 %v10445_v12  ;;  %v10426_v16 = vld [vmem:[%s11730_s20 + $0x8] sm:$0xff]   ;;  %v2441_v21 = vld [vmem:[%s11725_s13 + $0x40] sm:$0xff]  ;;  %v10427_v22 = vld [vmem:[%s11730_s20 + $0x10] sm:$0xff]  }
  0x1f   : > { %9563 = vmatpush3.bf16.msra.mxu1 %v10441_v8  ;;  %9828 = vmatprep.subr.bf16.mxu0 %v16726_v1  ;;  %v2442_v20 = vld [vmem:[%s11725_s13 + $0x48] sm:$0xff]  ;;  %v2444_v23 = vld [vmem:[%s11725_s13 + $0x58] sm:$0xff]  ;;  %v2443_v24 = vld [vmem:[%s11725_s13 + $0x50] sm:$0xff] }
  0x20   : > { %2569 = vperm.xlu1 %10424, %v2436_v10   ;;  %2563 = vperm.xlu0 %10423, %v2434_v11   ;;  %v2446_v25 = vld [vmem:[%s11725_s13 + $0x68] sm:$0xff]  ;;  %v2445_v26 = vld [vmem:[%s11725_s13 + $0x60] sm:$0xff]  ;;  %v10428_v27 = vld [vmem:[%s11730_s20 + $0x18] sm:$0xff]  }
  0x21   : > { %9564 = vmatprep.subr.bf16.mxu1 %v16726_v1  ;;  %v2448_v28 = vld [vmem:[%s11725_s13 + $0x78] sm:$0xff]  ;;  %v2447_v29 = vld [vmem:[%s11725_s13 + $0x70] sm:$0xff]  ;;  %v2450_v30 = vld [vmem:[%s11725_s13 + $0x88] sm:$0xff] }
  0x22   : > { %v2449_v31 = vld [vmem:[%s11725_s13 + $0x80] sm:$0xff]  ;;  %v2452_v33 = vld [vmem:[%s11725_s13 + $0x98] sm:$0xff]  ;;  %v2451_v34 = vld [vmem:[%s11725_s13 + $0x90] sm:$0xff]  ;;  %9829 = vmatpush3.bf16.msra.mxu0 %v10457_v51 }
  0x23   : > { %9565 = vmatpush3.bf16.msra.mxu1 %v10442_v13  ;;  %v10429_v32 = vld [vmem:[%s11730_s20 + $0x20] sm:$0xff]   ;;  %v2454_v36 = vld [vmem:[%s11725_s13 + $0xa8] sm:$0xff]  ;;  %v2456_v40 = vld [vmem:[%s11725_s13 + $0xb8] sm:$0xff]  ;;  %9830 = vmatprep.subr.bf16.mxu0 %v16726_v1 }
  0x24   : > { %2575 = vperm.xlu1 %10424, %v2438_v14   ;;  %2572 = vperm.xlu0 %10423, %v2437_v15   ;;  %v2453_v37 = vld [vmem:[%s11725_s13 + $0xa0] sm:$0xff]  ;;  %v10430_v39 = vld [vmem:[%s11730_s20 + $0x28] sm:$0xff]   ;;  %v2455_v41 = vld [vmem:[%s11725_s13 + $0xb0] sm:$0xff] }
  0x25   : > { %9566 = vmatprep.subr.bf16.mxu1 %v16726_v1  ;;  %9311 = vmatmul.mubr.msk.bf16.gmra.mxu0 %vm865_vm2, %v10426_v16  ;;  %v2458_v43 = vld [vmem:[%s11725_s13 + $0xc8] sm:$0xff]  ;;  %v2457_v44 = vld [vmem:[%s11725_s13 + $0xc0] sm:$0xff]  ;;  %v10431_v45 = vld [vmem:[%s11730_s20 + $0x30] sm:$0xff]  }
  0x26   : > { %9314 = vmatprep.mubr.msk.bf16.mxu0 %vm16826_vm1, %v16726_v1  ;;  %v2460_v46 = vld [vmem:[%s11725_s13 + $0xd8] sm:$0xff]  ;;  %v2459_v47 = vld [vmem:[%s11725_s13 + $0xd0] sm:$0xff]  ;;  %v2462_v48 = vld [vmem:[%s11725_s13 + $0xe8] sm:$0xff] }
  0x27   : > { %9567 = vmatpush3.bf16.msra.mxu1 %v10444_v17  ;;  %v2461_v49 = vld [vmem:[%s11725_s13 + $0xe0] sm:$0xff]  ;;  %v10432_v50 = vld [vmem:[%s11730_s20 + $0x38] sm:$0xff]   ;;  %v2463_v53 = vld [vmem:[%s11725_s13 + $0xf0] sm:$0xff] }
  0x28   : > { %2581 = vperm.xlu1 %10424, %v2440_v18   ;;  %2578 = vperm.xlu0 %10423, %v2439_v19   ;;  %v2464_v52 = vld [vmem:[%s11725_s13 + $0xf8] sm:$0xff]  ;;  %v2466_v54 = vld [vmem:[%s11725_s13 + $0x108] sm:$0xff]  ;;  %v2465_v55 = vld [vmem:[%s11725_s13 + $0x100] sm:$0xff] }
  0x29   : > { %9568 = vmatprep.subr.bf16.mxu1 %v16726_v1  ;;  %v10433_v56 = vld [vmem:[%s11730_s20 + $0x40] sm:$0xff]   ;;  %v2468_v57 = vld [vmem:[%s11725_s13 + $0x118] sm:$0xff]  ;;  %v2467_v58 = vld [vmem:[%s11725_s13 + $0x110] sm:$0xff] }
  0x2a   : > { %v2470_v59 = vld [vmem:[%s11725_s13 + $0x128] sm:$0xff]  ;;  %v2469_v60 = vld [vmem:[%s11725_s13 + $0x120] sm:$0xff]  ;;  %v2472_v62 = vld [vmem:[%s11725_s13 + $0x138] sm:$0xff] }
  0x2b   : > { %9569 = vmatpush3.bf16.msra.mxu1 %v10446_v35  ;;  %v10434_v61 = vld [vmem:[%s11730_s20 + $0x48] sm:$0xff]   ;;  %v2471_v63 = vld [vmem:[%s11725_s13 + $0x130] sm:$0xff]  ;;  %v2473_v2 = vld [vmem:[%s11725_s13 + $0x140] sm:$0xff] }
  0x2c   : > { %2587 = vperm.xlu1 %10424, %v2442_v20   ;;  %2584 = vperm.xlu0 %10423, %v2441_v21   ;;  %v2474_v0 = vld [vmem:[%s11725_s13 + $0x148] sm:$0xff]  ;;  %v10435_v3 = vld [vmem:[%s11730_s20 + $0x50] sm:$0xff]   ;;  %v2476_v4 = vld [vmem:[%s11725_s13 + $0x158] sm:$0xff] }
  0x2d   : > { %9315 = vmatmul.mubr.msk.bf16.gmra.mxu0 %vm865_vm2, %v10427_v22  ;;  %9570 = vmatprep.subr.bf16.mxu1 %v16726_v1  ;;  %v2475_v5 = vld [vmem:[%s11725_s13 + $0x150] sm:$0xff]  ;;  %v2478_v6 = vld [vmem:[%s11725_s13 + $0x168] sm:$0xff]  ;;  %v2477_v7 = vld [vmem:[%s11725_s13 + $0x160] sm:$0xff] }
  0x2e   : > { %9318 = vmatprep.mubr.msk.bf16.mxu0 %vm16826_vm1, %v16726_v1  ;;  %v10436_v8 = vld [vmem:[%s11730_s20 + $0x58] sm:$0xff]   ;;  %v2479_v10 = vld [vmem:[%s11725_s13 + $0x170] sm:$0xff]  ;;  %v2482_v11 = vld [vmem:[%s11725_s13 + $0x188] sm:$0xff] }
  0x2f   : > { %9571 = vmatpush3.bf16.msra.mxu1 %v10448_v38  ;;  %v2480_v9 = vld [vmem:[%s11725_s13 + $0x178] sm:$0xff]  ;;  %v2481_v12 = vld [vmem:[%s11725_s13 + $0x180] sm:$0xff]  ;;  %v2483_v15 = vld [vmem:[%s11725_s13 + $0x190] sm:$0xff] }
  0x30   : > { %2593 = vperm.xlu1 %10424, %v2444_v23   ;;  %2590 = vperm.xlu0 %10423, %v2443_v24   ;;  %v10437_v13 = vld [vmem:[%s11730_s20 + $0x60] sm:$0xff]   ;;  %v2484_v14 = vld [vmem:[%s11725_s13 + $0x198] sm:$0xff]  ;;  %v2486_v16 = vld [vmem:[%s11725_s13 + $0x1a8] sm:$0xff] }
  0x31   : > { %9572 = vmatprep.subr.bf16.mxu1 %v16726_v1  ;;  %v2485_v17 = vld [vmem:[%s11725_s13 + $0x1a0] sm:$0xff]  ;;  %v10440_v18 = vld [vmem:[%s11730_s20 + $0x68] sm:$0xff]   ;;  %v2488_v19 = vld [vmem:[%s11725_s13 + $0x1b8] sm:$0xff] }
  0x32   : > { %v2487_v20 = vld [vmem:[%s11725_s13 + $0x1b0] sm:$0xff]  ;;  %v2490_v21 = vld [vmem:[%s11725_s13 + $0x1c8] sm:$0xff]  ;;  %v2489_v22 = vld [vmem:[%s11725_s13 + $0x1c0] sm:$0xff] }
  0x33   : > { %9573 = vmatpush3.bf16.msra.mxu1 %v10449_v42  ;;  %v10443_v23 = vld [vmem:[%s11730_s20 + $0x70] sm:$0xff]   ;;  %v2492_v24 = vld [vmem:[%s11725_s13 + $0x1d8] sm:$0xff]  ;;  %v2498_v35 = vld [vmem:[%s11725_s13 + $0x208] sm:$0xff] }
  0x34   : > { %2599 = vperm.xlu1 %10424, %v2446_v25   ;;  %2596 = vperm.xlu0 %10423, %v2445_v26   ;;  %v2491_v25 = vld [vmem:[%s11725_s13 + $0x1d0] sm:$0xff]  ;;  %v2494_v26 = vld [vmem:[%s11725_s13 + $0x1e8] sm:$0xff] }
  0x35   : > { %9319 = vmatmul.mubr.msk.bf16.gmra.mxu0 %vm865_vm2, %v10428_v27  ;;  %10362 = vmatprep.subr.bf16.mxu1 %v16726_v1  ;;  %v2493_v27 = vld [vmem:[%s11725_s13 + $0x1e0] sm:$0xff]  ;;  %v2499_v42 = vld [vmem:[%s11725_s13 + $0x210] sm:$0xff] }
  0x36   : > { %9322 = vmatprep.mubr.msk.bf16.mxu0 %vm16826_vm1, %v16726_v1 }
  0x38   : > { %2605 = vperm.xlu1 %10424, %v2448_v28   ;;  %2602 = vperm.xlu0 %10423, %v2447_v29   ;;  %v10447_v28 = vld [vmem:[%s11730_s20 + $0x78] sm:$0xff]   ;;  %v2431_v29 = vlaneseq }
  0x3c   : > { %2611 = vperm.xlu1 %10424, %v2450_v30   ;;  %2608 = vperm.xlu0 %10423, %v2449_v31   ;;  %v2496_v30 = vld [vmem:[%s11725_s13 + $0x1f8] sm:$0xff]  ;;  %v2495_v31 = vld [vmem:[%s11725_s13 + $0x1f0] sm:$0xff] }
  0x3d   : > { %9323 = vmatmul.mubr.msk.bf16.gmra.mxu0 %vm865_vm2, %v10429_v32 }
  0x3e   : > { %9326 = vmatprep.mubr.msk.bf16.mxu0 %vm16826_vm1, %v16726_v1 }
  0x40   : > { %2617 = vperm.xlu1 %10424, %v2452_v33   ;;  %2614 = vperm.xlu0 %10423, %v2451_v34   ;;  %v11893_v34 = vand.u32 127, %v2431_v29 }
  0x44   : > { %2623 = vperm.xlu1 %10424, %v2454_v36   ;;  %2620 = vperm.xlu0 %10423, %v2453_v37   ;;  %v2497_v36 = vld [vmem:[%s11725_s13 + $0x200] sm:$0xff] }
  0x45   : > { %9327 = vmatmul.mubr.msk.bf16.gmra.mxu0 %vm865_vm2, %v10430_v39  ;;  %v10450_v37 = vld [vmem:[%s11730_s20 + $0x80] sm:$0xff]  }
  0x46   : > { %9330 = vmatprep.mubr.msk.bf16.mxu0 %vm16826_vm1, %v16726_v1 }
  0x48   : > { %2629 = vperm.xlu1 %10424, %v2456_v40   ;;  %2626 = vperm.xlu0 %10423, %v2455_v41   ;;  %v10451_v40 = vld [vmem:[%s16721_s4 + $0x38] sm:$0xff]  }
  0x49   : > { %v2500_v41 = vld [vmem:[%s11725_s13 + $0x218] sm:$0xff] }
  0x4c   : > { %2635 = vperm.xlu1 %10424, %v2458_v43   ;;  %2632 = vperm.xlu0 %10423, %v2457_v44   ;;  %v16728_v43 = vmov 1.0|1.0  }
  0x4d   : > { %9331 = vmatmul.mubr.msk.bf16.gmra.mxu0 %vm865_vm2, %v10431_v45 }
  0x4e   : > { %9334 = vmatprep.mubr.msk.bf16.mxu0 %vm16826_vm1, %v16726_v1 }
  0x50   : > { %2641 = vperm.xlu1 %10424, %v2460_v46   ;;  %2638 = vperm.xlu0 %10423, %v2459_v47   ;;  %v10460_v46 = vld [vmem:[%s16721_s4 + $0x30] sm:$0xff]   ;;  %v2502_v47 = vld [vmem:[%s11725_s13 + $0x228] sm:$0xff] }
  0x54   : > { %2647 = vperm.xlu1 %10424, %v2462_v48   ;;  %2644 = vperm.xlu0 %10423, %v2461_v49   ;;  %v2501_v48 = vld [vmem:[%s11725_s13 + $0x220] sm:$0xff]  ;;  %v10452_v49 = vld [vmem:[%s11730_s20 + $0x88] sm:$0xff]  }
  0x55   : > { %9335 = vmatmul.mubr.msk.bf16.gmra.mxu0 %vm865_vm2, %v10432_v50 }
  0x56   : > { %9338 = vmatprep.mubr.msk.bf16.mxu0 %vm16826_vm1, %v16726_v1 }
  0x58   : > { %2653 = vperm.xlu1 %10424, %v2464_v52   ;;  %2650 = vperm.xlu0 %10423, %v2463_v53   ;;  %v2504_v52 = vld [vmem:[%s11725_s13 + $0x238] sm:$0xff]  ;;  %v2503_v53 = vld [vmem:[%s11725_s13 + $0x230] sm:$0xff] }
  0x5c   : > { %2659 = vperm.xlu1 %10424, %v2466_v54   ;;  %2656 = vperm.xlu0 %10423, %v2465_v55  }
  0x5d   : > { %9339 = vmatmul.mubr.msk.bf16.gmra.mxu0 %vm865_vm2, %v10433_v56  ;;  %v2506_v56 = vld [vmem:[%s11725_s13 + $0x248] sm:$0xff] }
  0x5e   : > { %9342 = vmatprep.mubr.msk.bf16.mxu0 %vm16826_vm1, %v16726_v1 }
  0x60   : > { %2665 = vperm.xlu1 %10424, %v2468_v57   ;;  %2662 = vperm.xlu0 %10423, %v2467_v58   ;;  %v2505_v57 = vld [vmem:[%s11725_s13 + $0x240] sm:$0xff]  ;;  %v10453_v58 = vld [vmem:[%s11730_s20 + $0x90] sm:$0xff]  }
  0x64   : > { %2671 = vperm.xlu1 %10424, %v2470_v59   ;;  %2668 = vperm.xlu0 %10423, %v2469_v60  }
  0x65   : > { %9343 = vmatmul.mubr.msk.bf16.gmra.mxu0 %vm865_vm2, %v10434_v61  ;;  %v2508_v61 = vld [vmem:[%s11725_s13 + $0x258] sm:$0xff] }
  0x66   : > { %9346 = vmatprep.mubr.msk.bf16.mxu0 %vm16826_vm1, %v16726_v1 }
  0x68   : > { %2677 = vperm.xlu1 %10424, %v2472_v62   ;;  %2674 = vperm.xlu0 %10423, %v2471_v63   ;;  %v2507_v62 = vld [vmem:[%s11725_s13 + $0x250] sm:$0xff] }
  0x6c   : > { %2683 = vperm.xlu1 %10424, %v2474_v0   ;;  %2680 = vperm.xlu0 %10423, %v2473_v2   ;;  %v2510_v2 = vld [vmem:[%s11725_s13 + $0x268] sm:$0xff] }
  0x6d   : > { %9347 = vmatmul.mubr.msk.bf16.gmra.mxu0 %vm865_vm2, %v10435_v3  ;;  %v10467_v3 = vld [vmem:[%s16724_s7 + $0x28] sm:$0xff]  }
  0x6e   : > { %9350 = vmatprep.mubr.msk.bf16.mxu0 %vm16826_vm1, %v16726_v1  ;;  %9831 = vmatpush3.bf16.msra.mxu0 %v10467_v3 }
  0x6f   : > { %9832 = vmatprep.subr.bf16.mxu0 %v16726_v1 }
  0x70   : > { %2689 = vperm.xlu1 %10424, %v2476_v4   ;;  %2686 = vperm.xlu0 %10423, %v2475_v5   ;;  %v2509_v4 = vld [vmem:[%s11725_s13 + $0x260] sm:$0xff]  ;;  %v10454_v5 = vld [vmem:[%s11730_s20 + $0x98] sm:$0xff]  }
  0x74   : > { %2695 = vperm.xlu1 %10424, %v2478_v6   ;;  %2692 = vperm.xlu0 %10423, %v2477_v7  }
  0x75   : > { %9351 = vmatmul.mubr.msk.bf16.gmra.mxu0 %vm865_vm2, %v10436_v8  ;;  %v2512_v8 = vld [vmem:[%s11725_s13 + $0x278] sm:$0xff] }
  0x76   : > { %9354 = vmatprep.mubr.msk.bf16.mxu0 %vm16826_vm1, %v16726_v1 }
  0x78   : > { %2701 = vperm.xlu1 %10424, %v2480_v9   ;;  %2698 = vperm.xlu0 %10423, %v2479_v10   ;;  %v2511_v9 = vld [vmem:[%s11725_s13 + $0x270] sm:$0xff] }
  0x7c   : > { %2707 = vperm.xlu1 %10424, %v2482_v11   ;;  %2704 = vperm.xlu0 %10423, %v2481_v12   ;;  %v2514_v12 = vld [vmem:[%s11725_s13 + $0x288] sm:$0xff] }
  0x7d   : > { %9355 = vmatmul.mubr.msk.bf16.gmra.mxu0 %vm865_vm2, %v10437_v13  ;;  %v2513_v13 = vld [vmem:[%s11725_s13 + $0x280] sm:$0xff] }
  0x7e   : > { %9358 = vmatprep.mubr.msk.bf16.mxu0 %vm16826_vm1, %v16726_v1 }
  0x80   : > { %2713 = vperm.xlu1 %10424, %v2484_v14   ;;  %2710 = vperm.xlu0 %10423, %v2483_v15   ;;  %v10455_v14 = vld [vmem:[%s11730_s20 + $0xa0] sm:$0xff]  }
  0x84   : > { %2719 = vperm.xlu1 %10424, %v2486_v16   ;;  %2716 = vperm.xlu0 %10423, %v2485_v17   ;;  %v2516_v17 = vld [vmem:[%s11725_s13 + $0x298] sm:$0xff] }
  0x85   : > { %9359 = vmatmul.mubr.msk.bf16.gmra.mxu0 %vm865_vm2, %v10440_v18  ;;  %v2515_v18 = vld [vmem:[%s11725_s13 + $0x290] sm:$0xff] }
  0x86   : > { %9362 = vmatprep.mubr.msk.bf16.mxu0 %vm16826_vm1, %v16726_v1 }
  0x88   : > { %2725 = vperm.xlu1 %10424, %v2488_v19   ;;  %2722 = vperm.xlu0 %10423, %v2487_v20  }
  0x8c   : > { %2731 = vperm.xlu1 %10424, %v2490_v21   ;;  %2728 = vperm.xlu0 %10423, %v2489_v22   ;;  %v2518_v21 = vld [vmem:[%s11725_s13 + $0x2a8] sm:$0xff]  ;;  %v2517_v22 = vld [vmem:[%s11725_s13 + $0x2a0] sm:$0xff] }
  0x8d   : > { %9363 = vmatmul.mubr.msk.bf16.gmra.mxu0 %vm865_vm2, %v10443_v23  ;;  %v10456_v23 = vld [vmem:[%s11730_s20 + $0xa8] sm:$0xff]  }
  0x8e   : > { %9366 = vmatprep.mubr.msk.bf16.mxu0 %vm16826_vm1, %v16726_v1 }
  0x90   : > { %2737 = vperm.xlu1 %10424, %v2492_v24   ;;  %2734 = vperm.xlu0 %10423, %v2491_v25   ;;  %v10470_v24 = vld [vmem:[%s16721_s4 + $0x28] sm:$0xff]  }
  0x94   : > { %2743 = vperm.xlu1 %10424, %v2494_v26   ;;  %2740 = vperm.xlu0 %10423, %v2493_v27   ;;  %v2520_v27 = vld [vmem:[%s11725_s13 + $0x2b8] sm:$0xff] }
  0x95   : > { %9367 = vmatmul.mubr.msk.bf16.gmra.mxu0 %vm865_vm2, %v10447_v28  ;;  %v2519_v28 = vld [vmem:[%s11725_s13 + $0x2b0] sm:$0xff] }
  0x96   : > { %9370 = vmatprep.mubr.msk.bf16.mxu0 %vm16826_vm1, %v16726_v1 }
  0x97   : > { %v2567_v32 = vpop.permute.xlu1 %2566  ;;  %v2561_v33 = vpop.permute.xlu0 %2560 }
  0x98   : > { %2749 = vperm.xlu1 %10424, %v2496_v30   ;;  %2746 = vperm.xlu0 %10423, %v2495_v31   ;;  %vm2937_vm4 = vcmp.eq.s32.totalorder %v11893_v34, %v2561_v33  ;;  %vm2939_vm6 = vcmp.eq.s32.totalorder %v11893_v34, %v2567_v32  ;;  %v2522_v31 = vld [vmem:[%s11725_s13 + $0x2c8] sm:$0xff]  ;;  %v2521_v32 = vld [vmem:[%s11725_s13 + $0x2c0] sm:$0xff]  ;;  %v10458_v33 = vld [vmem:[%s11730_s20 + $0xb0] sm:$0xff]  }
  0x9b   : > { %v2570_v38 = vpop.permute.xlu1 %2569  ;;  %v2564_v39 = vpop.permute.xlu0 %2563 }
  0x9c   : > { %vm2938_vm3 = vcmp.eq.s32.totalorder %v11893_v34, %v2564_v39  ;;  %2755 = vperm.xlu1 %10424, %v2498_v35   ;;  %2752 = vperm.xlu0 %10423, %v2497_v36   ;;  %vm2940_vm7 = vcmp.eq.s32.totalorder %v11893_v34, %v2570_v38  ;;  %v2523_v38 = vld [vmem:[%s11725_s13 + $0x2d0] sm:$0xff] }
  0x9d   : > { %vm8122_vm5 = vmpackc.low %vm2938_vm3, %vm2937_vm4  ;;  %9371 = vmatmul.mubr.msk.bf16.gmra.mxu0 %vm865_vm2, %v10450_v37  ;;  %v2524_v37 = vld [vmem:[%s11725_s13 + $0x2d8] sm:$0xff] }
  0x9e   : > { %9575 = vmatmul.mubr.msk.bf16.vlgmr.msra.gmra.mxu1 %vm8122_vm5, %v16728_v43  ;;  %9374 = vmatprep.mubr.msk.bf16.mxu0 %vm16826_vm1, %v16726_v1  ;;  %vm8124_vm8 = vmpackc.low %vm2940_vm7, %vm2939_vm6 }
  0x9f   : > { %v2576_v44 = vpop.permute.xlu1 %2575  ;;  %v2573_v45 = vpop.permute.xlu0 %2572  ;;  %10370 = vmatpush3.bf16.msra.mxu1 %v10451_v40  ;;  %9578 = vmatprep.mubr.msk.bf16.mxu1 %vm16826_vm1, %v16726_v1 }
  0xa0   : > { %2761 = vperm.xlu1 %10424, %v2500_v41   ;;  %2758 = vperm.xlu0 %10423, %v2499_v42   ;;  %vm2942_vm9 = vcmp.eq.s32.totalorder %v11893_v34, %v2576_v44  ;;  %vm2941_vm10 = vcmp.eq.s32.totalorder %v11893_v34, %v2573_v45  ;;  %v2526_v41 = vld [vmem:[%s11725_s13 + $0x2e8] sm:$0xff]  ;;  %v2525_v42 = vld [vmem:[%s11725_s13 + $0x2e0] sm:$0xff]  ;;  %v10459_v44 = vld [vmem:[%s11730_s20 + $0xb8] sm:$0xff]  }
  0xa1   : > { %10363 = vmatprep.subr.bf16.mxu1 %v16726_v1  ;;  %vm8126_vm11 = vmpackc.low %vm2942_vm9, %vm2941_vm10 }
  0xa3   : > { %v2582_v50 = vpop.permute.xlu1 %2581  ;;  %v2579_v51 = vpop.permute.xlu0 %2578  ;;  %10371 = vmatpush3.bf16.msra.mxu1 %v10460_v46 }
  0xa4   : > { %2767 = vperm.xlu1 %10424, %v2502_v47   ;;  %2764 = vperm.xlu0 %10423, %v2501_v48   ;;  %vm2944_vm12 = vcmp.eq.s32.totalorder %v11893_v34, %v2582_v50  ;;  %vm2943_vm13 = vcmp.eq.s32.totalorder %v11893_v34, %v2579_v51  ;;  %v2528_v47 = vld [vmem:[%s11725_s13 + $0x2f8] sm:$0xff]  ;;  %v2527_v48 = vld [vmem:[%s11725_s13 + $0x2f0] sm:$0xff]  ;;  %v2530_v51 = vld [vmem:[%s11725_s13 + $0x308] sm:$0xff] }
  0xa5   : > { %10364 = vmatprep.subr.bf16.mxu1 %v16726_v1  ;;  %9375 = vmatmul.mubr.msk.bf16.gmra.mxu0 %vm865_vm2, %v10452_v49  ;;  %vm8128_vm14 = vmpackc.low %vm2944_vm12, %vm2943_vm13 }
  0xa6   : > { %9579 = vmatmul.mubr.msk.bf16.gmra.mxu1 %vm8124_vm8, %v16728_v43  ;;  %9378 = vmatprep.mubr.msk.bf16.mxu0 %vm16826_vm1, %v16726_v1 }
  0xa7   : > { %v2588_v54 = vpop.permute.xlu1 %2587  ;;  %v2585_v55 = vpop.permute.xlu0 %2584  ;;  %9582 = vmatprep.mubr.msk.bf16.mxu1 %vm16826_vm1, %v16726_v1  ;;  %10372 = vmatpush3.bf16.msra.mxu1 %v10470_v24 }
  0xa8   : > { %2773 = vperm.xlu1 %10424, %v2504_v52   ;;  %2770 = vperm.xlu0 %10423, %v2503_v53   ;;  %vm2946_vm15 = vcmp.eq.s32.totalorder %v11893_v34, %v2588_v54  ;;  %vm2945_vm0 = vcmp.eq.s32.totalorder %v11893_v34, %v2585_v55  ;;  %v2529_v52 = vld [vmem:[%s11725_s13 + $0x300] sm:$0xff] }
  0xa9   : > { %vm8130_vm3 = vmpackc.low %vm2946_vm15, %vm2945_vm0  ;;  %10365 = vmatprep.subr.bf16.mxu1 %v16726_v1  ;;  %v10461_v53 = vld [vmem:[%s11730_s20 + $0xc0] sm:$0xff]  }
  0xab   : > { %v11934_v59 = vpop.permute.xlu1 %2593  ;;  %v11936_v60 = vpop.permute.xlu0 %2590 }
  0xac   : > { %2779 = vperm.xlu1 %10424, %v2506_v56   ;;  %2776 = vperm.xlu0 %10423, %v2505_v57   ;;  %vm2948_vm4 = vcmp.eq.s32.totalorder %v11893_v34, %v11934_v59  ;;  %vm2947_vm5 = vcmp.eq.s32.totalorder %v11893_v34, %v11936_v60  ;;  %v12083_v56 = vld [vmem:[%s16723_s6] ss:$0 sm:$0xff]  ;;  %v2532_v57 = vld [vmem:[%s11725_s13 + $0x318] sm:$0xff]  ;;  %v2531_v59 = vld [vmem:[%s11725_s13 + $0x310] sm:$0xff] }
  0xad   : > { %9379 = vmatmul.mubr.msk.bf16.gmra.mxu0 %vm865_vm2, %v10453_v58  ;;  %vm8132_vm6 = vmpackc.low %vm2948_vm4, %vm2947_vm5 }
  0xae   : > { %9583 = vmatmul.mubr.msk.bf16.gmra.mxu1 %vm8126_vm11, %v16728_v43  ;;  %9382 = vmatprep.mubr.msk.bf16.mxu0 %vm16826_vm1, %v16726_v1 }
  0xaf   : > { %v11942_v63 = vpop.permute.xlu1 %2599  ;;  %v11944_v0 = vpop.permute.xlu0 %2596  ;;  %9586 = vmatprep.mubr.msk.bf16.mxu1 %vm16826_vm1, %v16726_v1 }
  0xb0   : > { %2785 = vperm.xlu1 %10424, %v2508_v61   ;;  %2782 = vperm.xlu0 %10423, %v2507_v62   ;;  %vm2950_vm7 = vcmp.eq.s32.totalorder %v11893_v34, %v11942_v63  ;;  %vm2949_vm8 = vcmp.eq.s32.totalorder %v11893_v34, %v11944_v0 }
  0xb1   : > { %vm8134_vm9 = vmpackc.low %vm2950_vm7, %vm2949_vm8 }
  0xb3   : > { %v11958_v6 = vpop.permute.xlu1 %2605  ;;  %v11960_v7 = vpop.permute.xlu0 %2602 }
  0xb4   : > { %2791 = vperm.xlu1 %10424, %v2510_v2   ;;  %2788 = vperm.xlu0 %10423, %v2509_v4   ;;  %vm2952_vm10 = vcmp.eq.s32.totalorder %v11893_v34, %v11958_v6  ;;  %vm2951_vm11 = vcmp.eq.s32.totalorder %v11893_v34, %v11960_v7  ;;  %v2534_v2 = vld [vmem:[%s11725_s13 + $0x328] sm:$0xff]  ;;  %v2533_v4 = vld [vmem:[%s11725_s13 + $0x320] sm:$0xff] }
  0xb5   : > { %9383 = vmatmul.mubr.msk.bf16.gmra.mxu0 %vm865_vm2, %v10454_v5  ;;  %vm8136_vm12 = vmpackc.low %vm2952_vm10, %vm2951_vm11  ;;  %v10462_v5 = vld [vmem:[%s11730_s20 + $0xc8] sm:$0xff]  }
  0xb6   : > { %9587 = vmatmul.mubr.msk.bf16.gmra.mxu1 %vm8128_vm14, %v16728_v43  ;;  %9386 = vmatprep.mubr.msk.bf16.mxu0 %vm16826_vm1, %v16726_v1 }
  0xb7   : > { %v11967_v10 = vpop.permute.xlu1 %2611  ;;  %v11969_v11 = vpop.permute.xlu0 %2608  ;;  %9590 = vmatprep.mubr.msk.bf16.mxu1 %vm16826_vm1, %v16726_v1 }
  0xb8   : > { %2797 = vperm.xlu1 %10424, %v2512_v8   ;;  %2794 = vperm.xlu0 %10423, %v2511_v9   ;;  %vm2954_vm13 = vcmp.eq.s32.totalorder %v11893_v34, %v11967_v10  ;;  %vm2953_vm14 = vcmp.eq.s32.totalorder %v11893_v34, %v11969_v11 }
  0xb9   : > { %vm8138_vm15 = vmpackc.low %vm2954_vm13, %vm2953_vm14 }
  0xbb   : > { %v11980_v15 = vpop.permute.xlu1 %2617  ;;  %v11982_v16 = vpop.permute.xlu0 %2614 }
  0xbc   : > { %2803 = vperm.xlu1 %10424, %v2514_v12   ;;  %2800 = vperm.xlu0 %10423, %v2513_v13   ;;  %vm2956_vm0 = vcmp.eq.s32.totalorder %v11893_v34, %v11980_v15  ;;  %v2536_v12 = vld [vmem:[%s11725_s13 + $0x338] sm:$0xff] }
  0xbd   : > { %9387 = vmatmul.mubr.msk.bf16.gmra.mxu0 %vm865_vm2, %v10455_v14  ;;  %v2535_v14 = vld [vmem:[%s11725_s13 + $0x330] sm:$0xff] }
  0xbe   : > { %9591 = vmatmul.mubr.msk.bf16.gmra.mxu1 %vm8130_vm3, %v16728_v43  ;;  %9390 = vmatprep.mubr.msk.bf16.mxu0 %vm16826_vm1, %v16726_v1  ;;  %vm2955_vm3 = vcmp.eq.s32.totalorder %v11893_v34, %v11982_v16 }
  0xbf   : > { %v11988_v19 = vpop.permute.xlu1 %2623  ;;  %v11990_v20 = vpop.permute.xlu0 %2620  ;;  %9594 = vmatprep.mubr.msk.bf16.mxu1 %vm16826_vm1, %v16726_v1  ;;  %vm8140_vm4 = vmpackc.low %vm2956_vm0, %vm2955_vm3 }
  0xc0   : > { %2809 = vperm.xlu1 %10424, %v2516_v17   ;;  %2806 = vperm.xlu0 %10423, %v2515_v18   ;;  %vm2958_vm5 = vcmp.eq.s32.totalorder %v11893_v34, %v11988_v19 }
  0xc3   : > { %v12006_v25 = vpop.permute.xlu1 %2629  ;;  %v12008_v26 = vpop.permute.xlu0 %2626 }
  0xc4   : > { %2815 = vperm.xlu1 %10424, %v2518_v21   ;;  %2812 = vperm.xlu0 %10423, %v2517_v22   ;;  %vm2960_vm8 = vcmp.eq.s32.totalorder %v11893_v34, %v12006_v25 }
  0xc5   : > { %9391 = vmatmul.mubr.msk.bf16.gmra.mxu0 %vm865_vm2, %v10456_v23  ;;  %v2538_v23 = vld [vmem:[%s11725_s13 + $0x348] sm:$0xff] }
  0xc6   : > { %9595 = vmatmul.mubr.msk.bf16.gmra.mxu1 %vm8132_vm6, %v16728_v43  ;;  %9394 = vmatprep.mubr.msk.bf16.mxu0 %vm16826_vm1, %v16726_v1  ;;  %vm2957_vm6 = vcmp.eq.s32.totalorder %v11893_v34, %v11990_v20  ;;  %v2539_v20 = vld [vmem:[%s11725_s13 + $0x350] sm:$0xff] }
  0xc7   : > { %v12015_v29 = vpop.permute.xlu1 %2635  ;;  %v12017_v30 = vpop.permute.xlu0 %2632  ;;  %9598 = vmatprep.mubr.msk.bf16.mxu1 %vm16826_vm1, %v16726_v1  ;;  %vm8142_vm7 = vmpackc.low %vm2958_vm5, %vm2957_vm6 }
  0xc8   : > { %2821 = vperm.xlu1 %10424, %v2520_v27   ;;  %2818 = vperm.xlu0 %10423, %v2519_v28   ;;  %v2537_v27 = vld [vmem:[%s11725_s13 + $0x340] sm:$0xff]  ;;  %v10463_v28 = vld [vmem:[%s11730_s20 + $0xd0] sm:$0xff]   ;;  %vm2962_vm11 = vcmp.eq.s32.totalorder %v11893_v34, %v12015_v29 }
  0xcb   : > { %v12030_v35 = vpop.permute.xlu1 %2641  ;;  %v12032_v36 = vpop.permute.xlu0 %2638 }
  0xcc   : > { %2827 = vperm.xlu1 %10424, %v2522_v31   ;;  %2824 = vperm.xlu0 %10423, %v2521_v32   ;;  %vm2964_vm14 = vcmp.eq.s32.totalorder %v11893_v34, %v12030_v35 }
  0xcd   : > { %9395 = vmatmul.mubr.msk.bf16.gmra.mxu0 %vm865_vm2, %v10458_v33 }
  0xce   : > { %9599 = vmatmul.mubr.msk.bf16.gmra.mxu1 %vm8134_vm9, %v16728_v43  ;;  %9398 = vmatprep.mubr.msk.bf16.mxu0 %vm16826_vm1, %v16726_v1  ;;  %vm2959_vm9 = vcmp.eq.s32.totalorder %v11893_v34, %v12008_v26 }
  0xcf   : > { %v12038_v39 = vpop.permute.xlu1 %2647  ;;  %v12040_v40 = vpop.permute.xlu0 %2644  ;;  %9602 = vmatprep.mubr.msk.bf16.mxu1 %vm16826_vm1, %v16726_v1  ;;  %vm8144_vm10 = vmpackc.low %vm2960_vm8, %vm2959_vm9 }
  0xd0   : > { %2833 = vperm.xlu1 %10424, %v2524_v37   ;;  %2830 = vperm.xlu0 %10423, %v2523_v38   ;;  %vm2966_vm3 = vcmp.eq.s32.totalorder %v11893_v34, %v12038_v39 }
  0xd3   : > { %v12053_v45 = vpop.permute.xlu1 %2653  ;;  %v12055_v46 = vpop.permute.xlu0 %2650 }
  0xd4   : > { %2839 = vperm.xlu1 %10424, %v2526_v41   ;;  %2836 = vperm.xlu0 %10423, %v2525_v42   ;;  %v2540_v42 = vld [vmem:[%s11725_s13 + $0x358] sm:$0xff]  ;;  %vm2968_vm6 = vcmp.eq.s32.totalorder %v11893_v34, %v12053_v45 }
  0xd5   : > { %9399 = vmatmul.mubr.msk.bf16.gmra.mxu0 %vm865_vm2, %v10459_v44 }
  0xd6   : > { %9603 = vmatmul.mubr.msk.bf16.gmra.mxu1 %vm8136_vm12, %v16728_v43  ;;  %9402 = vmatprep.mubr.msk.bf16.mxu0 %vm16826_vm1, %v16726_v1  ;;  %vm2961_vm12 = vcmp.eq.s32.totalorder %v11893_v34, %v12017_v30 }
  0xd7   : > { %v12061_v49 = vpop.permute.xlu1 %2659  ;;  %v12063_v50 = vpop.permute.xlu0 %2656  ;;  %9606 = vmatprep.mubr.msk.bf16.mxu1 %vm16826_vm1, %v16726_v1  ;;  %vm8146_vm13 = vmpackc.low %vm2962_vm11, %vm2961_vm12 }
  0xd8   : > { %2845 = vperm.xlu1 %10424, %v2528_v47   ;;  %2842 = vperm.xlu0 %10423, %v2527_v48   ;;  %vm2970_vm9 = vcmp.eq.s32.totalorder %v11893_v34, %v12061_v49 }
  0xdb   : > { %v12076_v54 = vpop.permute.xlu1 %2665  ;;  %v12078_v55 = vpop.permute.xlu0 %2662 }
  0xdc   : > { %2851 = vperm.xlu1 %10424, %v2530_v51   ;;  %2848 = vperm.xlu0 %10423, %v2529_v52   ;;  %vm2972_vm12 = vcmp.eq.s32.totalorder %v11893_v34, %v12076_v54 }
  0xdd   : > { %v1093_v58 = vpop.f32.mrf.mxu0  ;;  %9403 = vmatmul.mubr.msk.bf16.gmra.mxu0 %vm865_vm2, %v10461_v53 }
  0xde   : > { %v12089_v60 = vadd.f32 %v12083_v56, %v1093_v58  ;;  %9607 = vmatmul.mubr.msk.bf16.gmra.mxu1 %vm8138_vm15, %v16728_v43  ;;  %9406 = vmatprep.mubr.msk.bf16.mxu0 %vm16826_vm1, %v16726_v1  ;;  %v10477_v58 = vld [vmem:[%s16724_s7 + $0x20] sm:$0xff]   ;;  %vm2963_vm15 = vcmp.eq.s32.totalorder %v11893_v34, %v12032_v36 }
  0xdf   : > { %v12092_v61 = vpop.permute.xlu1 %2671  ;;  %v12094_v62 = vpop.permute.xlu0 %2668  ;;  %9610 = vmatprep.mubr.msk.bf16.mxu1 %vm16826_vm1, %v16726_v1  ;;  %9833 = vmatpush3.bf16.msra.mxu0 %v10477_v58  ;;  %vm8148_vm0 = vmpackc.low %vm2964_vm14, %vm2963_vm15 }
  0xe0   : > { %v9308_v63 = vpop.f32.mrf.mxu0  ;;  %2857 = vperm.xlu1 %10424, %v2532_v57   ;;  %v1596_v0 = vsub.f32 0.0, %v12089_v60  ;;  %2854 = vperm.xlu0 %10423, %v2531_v59   ;;  %v2542_v57 = vld [vmem:[%s11725_s13 + $0x368] sm:$0xff]  ;;  %vm2974_vm15 = vcmp.eq.s32.totalorder %v11893_v34, %v12092_v61 }
  0xe1   : > { %9834 = vmatprep.subr.bf16.mxu0 %v16726_v1 }
  0xe2   : > { %v1096_v3 = vpop.f32.mrf.mxu0  ;;  %v1722_v6 = vmul.f32 1.442695, %v1596_v0  ;;  %v2541_v0 = vld [vmem:[%s11725_s13 + $0x360] sm:$0xff] }
  0xe3   : > { %v12109_v7 = vadd.f32 %v12083_v56, %v1096_v3  ;;  %v12111_v8 = vpop.permute.xlu1 %2677  ;;  %v12113_v9 = vpop.permute.xlu0 %2674 }
  0xe4   : > { %v9309_v10 = vpop.f32.mrf.mxu0  ;;  %2863 = vperm.xlu1 %10424, %v2534_v2   ;;  %10512 = vpow2.f32 %v1722_v6  ;;  %2860 = vperm.xlu0 %10423, %v2533_v4   ;;  %v10464_v2 = vld [vmem:[%s11730_s20 + $0xd8] sm:$0xff]  }
  0xe5   : > { %v1597_v11 = vsub.f32 0.0, %v12109_v7  ;;  %9407 = vmatmul.mubr.msk.bf16.gmra.mxu0 %vm865_vm2, %v10462_v5 }
  0xe6   : > { %v1101_v13 = vpop.f32.mrf.mxu0  ;;  %9611 = vmatmul.mubr.msk.bf16.gmra.mxu1 %vm8140_vm4, %v16728_v43  ;;  %9410 = vmatprep.mubr.msk.bf16.mxu0 %vm16826_vm1, %v16726_v1  ;;  %vm2965_vm4 = vcmp.eq.s32.totalorder %v11893_v34, %v12040_v40  ;;  %v2556_v40 = vld [vmem:[%s11725_s13 + $0x3d8] sm:$0xff] }
  0xe7   : > { %v1724_v15 = vmul.f32 1.442695, %v1597_v11  ;;  %v12120_v16 = vadd.f32 %v12083_v56, %v1101_v13  ;;  %v12123_v17 = vpop.permute.xlu1 %2683  ;;  %v12125_v18 = vpop.permute.xlu0 %2680  ;;  %9614 = vmatprep.mubr.msk.bf16.mxu1 %vm16826_vm1, %v16726_v1  ;;  %v2544_v13 = vld [vmem:[%s11725_s13 + $0x378] sm:$0xff]  ;;  %vm8150_vm5 = vmpackc.low %vm2966_vm3, %vm2965_vm4  ;;  %vm2976_vm4 = vcmp.eq.s32.totalorder %v11893_v34, %v12111_v8 }
  0xe8   : > { %v9312_v21 = vpop.f32.mrf.mxu0  ;;  %2869 = vperm.xlu1 %10424, %v2536_v12   ;;  %2866 = vperm.xlu0 %10423, %v2535_v14  }
  0xe9   : > { %10514 = vpow2.f32 %v1724_v15  ;;  %v1598_v22 = vsub.f32 0.0, %v12120_v16  ;;  %v2543_v21 = vld [vmem:[%s11725_s13 + $0x370] sm:$0xff] }
  0xea   : > { %v1104_v24 = vpop.f32.mrf.mxu0 }
  0xeb   : > { %v1726_v31 = vmul.f32 1.442695, %v1598_v22  ;;  %v12140_v32 = vadd.f32 %v12083_v56, %v1104_v24  ;;  %v12142_v33 = vpop.permute.xlu1 %2689  ;;  %v12144_v37 = vpop.permute.xlu0 %2686 }
  0xec   : > { %v9313_v38 = vpop.f32.mrf.mxu0  ;;  %2875 = vperm.xlu1 %10424, %v2538_v23   ;;  %2872 = vperm.xlu0 %10423, %v2537_v27  }
  0xed   : > { %10516 = vpow2.f32 %v1726_v31  ;;  %v1599_v41 = vsub.f32 0.0, %v12140_v32  ;;  %9411 = vmatmul.mubr.msk.bf16.gmra.mxu0 %vm865_vm2, %v10463_v28  ;;  %v2546_v31 = vld [vmem:[%s11725_s13 + $0x388] sm:$0xff] }
  0xee   : > { %v1109_v19 = vpop.f32.mrf.mxu0  ;;  %9615 = vmatmul.mubr.msk.bf16.gmra.mxu1 %vm8142_vm7, %v16728_v43  ;;  %9414 = vmatprep.mubr.msk.bf16.mxu0 %vm16826_vm1, %v16726_v1  ;;  %vm2967_vm7 = vcmp.eq.s32.totalorder %v11893_v34, %v12055_v46 }
  0xef   : > { %v1728_v44 = vmul.f32 1.442695, %v1599_v41  ;;  %v12151_v47 = vadd.f32 %v12083_v56, %v1109_v19  ;;  %v12154_v48 = vpop.permute.xlu1 %2695  ;;  %v12156_v51 = vpop.permute.xlu0 %2692  ;;  %9618 = vmatprep.mubr.msk.bf16.mxu1 %vm16826_vm1, %v16726_v1  ;;  %v10465_v19 = vld [vmem:[%s11730_s20 + $0xe0] sm:$0xff]   ;;  %vm8152_vm8 = vmpackc.low %vm2968_vm6, %vm2967_vm7  ;;  %vm2978_vm7 = vcmp.eq.s32.totalorder %v11893_v34, %v12123_v17 }
  0xf0   : > { %v9316_v52 = vpop.f32.mrf.mxu0  ;;  %2881 = vperm.xlu1 %10424, %v2540_v42   ;;  %2878 = vperm.xlu0 %10423, %v2539_v20   ;;  %v2545_v42 = vld [vmem:[%s11725_s13 + $0x380] sm:$0xff] }
  0xf1   : > { %10518 = vpow2.f32 %v1728_v44  ;;  %v1600_v53 = vsub.f32 0.0, %v12151_v47  ;;  %v10513_v59 = vpop.eup %10512 }
  0xf2   : > { %v1112_v63 = vpop.f32.mrf.mxu0  ;;  %v1974_v3 = vadd.f32 1.0, %v10513_v59 }
  0xf3   : > { %v1730_v4 = vmul.f32 1.442695, %v1600_v53  ;;  %v12174_v5 = vadd.f32 %v12083_v56, %v1112_v63  ;;  %v12176_v6 = vpop.permute.xlu1 %2701  ;;  %v12178_v10 = vpop.permute.xlu0 %2698  ;;  %v2548_v63 = vld [vmem:[%s11725_s13 + $0x398] sm:$0xff] }
  0xf4   : > { %v9317_v11 = vpop.f32.mrf.mxu0  ;;  %2887 = vperm.xlu1 %10424, %v2542_v57   ;;  %10520 = vrcp.f32 %v1974_v3  ;;  %2884 = vperm.xlu0 %10423, %v2541_v0  }
  0xf5   : > { %v1601_v12 = vsub.f32 0.0, %v12174_v5  ;;  %10522 = vpow2.f32 %v1730_v4  ;;  %9415 = vmatmul.mubr.msk.bf16.gmra.mxu0 %vm865_vm2, %v10464_v2  ;;  %v2547_v2 = vld [vmem:[%s11725_s13 + $0x390] sm:$0xff] }
  0xf6   : > { %v10515_v14 = vpop.eup %10514  ;;  %v1117_v15 = vpop.f32.mrf.mxu0  ;;  %9619 = vmatmul.mubr.msk.bf16.gmra.mxu1 %vm8144_vm10, %v16728_v43  ;;  %9418 = vmatprep.mubr.msk.bf16.mxu0 %vm16826_vm1, %v16726_v1  ;;  %vm2969_vm10 = vcmp.eq.s32.totalorder %v11893_v34, %v12063_v50 }
  0xf7   : > { %v1975_v22 = vadd.f32 1.0, %v10515_v14  ;;  %v1732_v23 = vmul.f32 1.442695, %v1601_v12  ;;  %v12192_v24 = vadd.f32 %v12083_v56, %v1117_v15  ;;  %v12195_v26 = vpop.permute.xlu1 %2707  ;;  %v12197_v27 = vpop.permute.xlu0 %2704  ;;  %9622 = vmatprep.mubr.msk.bf16.mxu1 %vm16826_vm1, %v16726_v1  ;;  %v2550_v15 = vld [vmem:[%s11725_s13 + $0x3a8] sm:$0xff]  ;;  %vm8154_vm11 = vmpackc.low %vm2970_vm9, %vm2969_vm10  ;;  %vm2980_vm10 = vcmp.eq.s32.totalorder %v11893_v34, %v12142_v33 }
  0xf8   : > { %v9320_v25 = vpop.f32.mrf.mxu0  ;;  %2893 = vperm.xlu1 %10424, %v2544_v13   ;;  %2890 = vperm.xlu0 %10423, %v2543_v21  }
  0xf9   : > { %10524 = vrcp.f32 %v1975_v22  ;;  %v1602_v28 = vsub.f32 0.0, %v12192_v24  ;;  %v10466_v25 = vld [vmem:[%s11730_s20 + $0xe8] sm:$0xff]  }
  0xfa   : > { %v10517_v38 = vpop.eup %10516  ;;  %10526 = vpow2.f32 %v1732_v23  ;;  %v1120_v41 = vpop.f32.mrf.mxu0  ;;  %v2549_v23 = vld [vmem:[%s11725_s13 + $0x3a0] sm:$0xff] }
  0xfb   : > { %v1976_v20 = vadd.f32 1.0, %v10517_v38  ;;  %v1734_v44 = vmul.f32 1.442695, %v1602_v28  ;;  %v12212_v52 = vadd.f32 %v12083_v56, %v1120_v41  ;;  %v12214_v53 = vpop.permute.xlu1 %2713  ;;  %v12216_v57 = vpop.permute.xlu0 %2710  ;;  %v10480_v28 = vld [vmem:[%s16721_s4 + $0x20] sm:$0xff]  }
  0xfc   : > { %v9321_v58 = vpop.f32.mrf.mxu0  ;;  %2899 = vperm.xlu1 %10424, %v2546_v31   ;;  %2896 = vperm.xlu0 %10423, %v2545_v42  }
  0xfd   : > { %10528 = vrcp.f32 %v1976_v20  ;;  %v1603_v59 = vsub.f32 0.0, %v12212_v52  ;;  %9419 = vmatmul.mubr.msk.bf16.gmra.mxu0 %vm865_vm2, %v10465_v19  ;;  %10373 = vmatpush3.bf16.msra.mxu1 %v10480_v28  ;;  %v2553_v28 = vld [vmem:[%s11725_s13 + $0x3c0] sm:$0xff] }
  0xfe   : > { %v10519_v0 = vpop.eup %10518  ;;  %10530 = vpow2.f32 %v1734_v44  ;;  %v1125_v30 = vpop.f32.mrf.mxu0  ;;  %9623 = vmatmul.mubr.msk.bf16.gmra.mxu1 %vm8146_vm13, %v16728_v43  ;;  %9422 = vmatprep.mubr.msk.bf16.mxu0 %vm16826_vm1, %v16726_v1  ;;  %vm2971_vm13 = vcmp.eq.s32.totalorder %v11893_v34, %v12078_v55  ;;  %v3389_v55 = vld [vmem:[%s12335_s21 + $0x58] sm:$0xff] }
  0xff   : > { %v1977_v3 = vadd.f32 1.0, %v10519_v0  ;;  %v1736_v4 = vmul.f32 1.442695, %v1603_v59  ;;  %v12226_v11 = vadd.f32 %v12083_v56, %v1125_v30  ;;  %v12229_v12 = vpop.permute.xlu1 %2719  ;;  %v12231_v13 = vpop.permute.xlu0 %2716  ;;  %9626 = vmatprep.mubr.msk.bf16.mxu1 %vm16826_vm1, %v16726_v1  ;;  %10366 = vmatprep.subr.bf16.mxu1 %v16726_v1  ;;  %vm8156_vm14 = vmpackc.low %vm2972_vm12, %vm2971_vm13  ;;  %vm2982_vm13 = vcmp.eq.s32.totalorder %v11893_v34, %v12154_v48 }
 0x100   : > { %v9324_v29 = vpop.f32.mrf.mxu0  ;;  %2905 = vperm.xlu1 %10424, %v2548_v63   ;;  %2902 = vperm.xlu0 %10423, %v2547_v2   ;;  %v2552_v63 = vld [vmem:[%s11725_s13 + $0x3b8] sm:$0xff] }
 0x101   : > { %10532 = vrcp.f32 %v1977_v3  ;;  %v1604_v14 = vsub.f32 0.0, %v12226_v11  ;;  %v10521_v21 = vpop.eup %10520 }
 0x102   : > { %10534 = vpow2.f32 %v1736_v4  ;;  %v1128_v22 = vpop.f32.mrf.mxu0  ;;  %v10523_v31 = vpop.eup %10522  ;;  %v12256_v58 = vmul.f32 %v10521_v21, %v12089_v60  ;;  %v2551_v60 = vld [vmem:[%s11725_s13 + $0x3b0] sm:$0xff] }
 0x103   : > { %v1738_v38 = vmul.f32 1.442695, %v1604_v14  ;;  %v12249_v41 = vadd.f32 %v12083_v56, %v1128_v22  ;;  %v12251_v42 = vpop.permute.xlu1 %2725  ;;  %v12253_v19 = vpop.permute.xlu0 %2722  ;;  %v1978_v20 = vadd.f32 1.0, %v10523_v31  ;;  %v2554_v22 = vld [vmem:[%s11725_s13 + $0x3c8] sm:$0xff]  ;;  %v10468_v31 = vld [vmem:[%s11730_s20 + $0xf0] sm:$0xff]  }
 0x104   : > { %v9325_v44 = vpop.f32.mrf.mxu0  ;;  %2911 = vperm.xlu1 %10424, %v2550_v15   ;;  %16855 = vst [vmem:[#allocation5_spill] sm:$0xff] %v12256_v58  ;;  %2908 = vperm.xlu0 %10423, %v2549_v23  }
 0x105   : > { %10536 = vpow2.f32 %v1738_v38  ;;  %v1605_v59 = vsub.f32 0.0, %v12249_v41  ;;  %9423 = vmatmul.mubr.msk.bf16.gmra.mxu0 %vm865_vm2, %v10466_v25 }
 0x106   : > { %v10525_v0 = vpop.eup %10524  ;;  %10538 = vrcp.f32 %v1978_v20  ;;  %v1133_v30 = vpop.f32.mrf.mxu0  ;;  %9627 = vmatmul.mubr.msk.bf16.gmra.mxu1 %vm8148_vm0, %v16728_v43  ;;  %9426 = vmatprep.mubr.msk.bf16.mxu0 %vm16826_vm1, %v16726_v1  ;;  %vm2973_vm0 = vcmp.eq.s32.totalorder %v11893_v34, %v12094_v62  ;;  %v3393_v62 = vld [vmem:[%s12335_s21 + $0x78] sm:$0xff] }
 0x107   : > { %v10527_v2 = vpop.eup %10526  ;;  %v12270_v3 = vmul.f32 %v10525_v0, %v12109_v7  ;;  %v1740_v4 = vmul.f32 1.442695, %v1605_v59  ;;  %v12273_v29 = vadd.f32 %v12083_v56, %v1133_v30  ;;  %v12276_v36 = vpop.permute.xlu1 %2731  ;;  %9630 = vmatprep.mubr.msk.bf16.mxu1 %vm16826_vm1, %v16726_v1  ;;  %v3381_v7 = vld [vmem:[%s12335_s21 + $0x18] sm:$0xff]  ;;  %vm8158_vm3 = vmpackc.low %vm2974_vm15, %vm2973_vm0  ;;  %vm2984_vm0 = vcmp.eq.s32.totalorder %v11893_v34, %v12176_v6 }
 0x108   : > { %v12278_v35 = vpop.permute.xlu0 %2728  ;;  %v1979_v14 = vadd.f32 1.0, %v10527_v2  ;;  %v9328_v15 = vpop.f32.mrf.mxu0  ;;  %2917 = vperm.xlu1 %10424, %v2552_v63   ;;  %2914 = vperm.xlu0 %10423, %v2551_v60  }
 0x109   : > { %16856 = vst [vmem:[#allocation6_spill] sm:$0xff] %v12270_v3  ;;  %10540 = vpow2.f32 %v1740_v4  ;;  %v1606_v21 = vsub.f32 0.0, %v12273_v29  ;;  %v2555_v15 = vld [vmem:[%s11725_s13 + $0x3d0] sm:$0xff] }
 0x10a   : > { %v10529_v23 = vpop.eup %10528  ;;  %10542 = vrcp.f32 %v1979_v14  ;;  %v1136_v25 = vpop.f32.mrf.mxu0 }
 0x10b   : > { %v10531_v38 = vpop.eup %10530  ;;  %v1742_v20 = vmul.f32 1.442695, %v1606_v21  ;;  %v12295_v44 = vadd.f32 %v12083_v56, %v1136_v25  ;;  %v12297_v59 = vpop.permute.xlu1 %2737  ;;  %v12302_v60 = vmul.f32 %v10529_v23, %v12120_v16 }
 0x10c   : > { %v12299_v63 = vpop.permute.xlu0 %2734  ;;  %v1980_v0 = vadd.f32 1.0, %v10531_v38  ;;  %v9329_v30 = vpop.f32.mrf.mxu0  ;;  %2923 = vperm.xlu1 %10424, %v2554_v22   ;;  %2920 = vperm.xlu0 %10423, %v2553_v28  }
 0x10d   : > { %16857 = vst [vmem:[#allocation7_spill] sm:$0xff] %v12302_v60  ;;  %10544 = vpow2.f32 %v1742_v20  ;;  %v1607_v2 = vsub.f32 0.0, %v12295_v44  ;;  %9427 = vmatmul.mubr.msk.bf16.gmra.mxu0 %vm865_vm2, %v10468_v31  ;;  %v2558_v20 = vld [vmem:[%s11725_s13 + $0x3e8] sm:$0xff] }
 0x10e   : > { %v10533_v4 = vpop.eup %10532  ;;  %10546 = vrcp.f32 %v1980_v0  ;;  %v1141_v14 = vpop.f32.mrf.mxu0  ;;  %9631 = vmatmul.mubr.msk.bf16.gmra.mxu1 %vm8150_vm5, %v16728_v43  ;;  %9430 = vmatprep.mubr.msk.bf16.mxu0 %vm16826_vm1, %v16726_v1  ;;  %vm2975_vm5 = vcmp.eq.s32.totalorder %v11893_v34, %v12113_v9 }
 0x10f   : > { %v10535_v21 = vpop.eup %10534  ;;  %v12312_v16 = vmul.f32 %v10533_v4, %v12140_v32  ;;  %v1744_v22 = vmul.f32 1.442695, %v1607_v2  ;;  %v12315_v23 = vadd.f32 %v12083_v56, %v1141_v14  ;;  %v12318_v25 = vpop.permute.xlu1 %2743  ;;  %9634 = vmatprep.mubr.msk.bf16.mxu1 %vm16826_vm1, %v16726_v1  ;;  %v2557_v2 = vld [vmem:[%s11725_s13 + $0x3e0] sm:$0xff]  ;;  %vm8160_vm6 = vmpackc.low %vm2976_vm4, %vm2975_vm5  ;;  %vm2986_vm5 = vcmp.eq.s32.totalorder %v11893_v34, %v12195_v26 }
 0x110   : > { %v12320_v39 = vpop.permute.xlu0 %2740  ;;  %v1981_v28 = vadd.f32 1.0, %v10535_v21  ;;  %v9332_v31 = vpop.f32.mrf.mxu0  ;;  %2929 = vperm.xlu1 %10424, %v2556_v40   ;;  %2926 = vperm.xlu0 %10423, %v2555_v15   ;;  %v10469_v40 = vld [vmem:[%s11730_s20 + $0xf8] sm:$0xff]  }
 0x111   : > { %16858 = vst [vmem:[#allocation8_spill] sm:$0xff] %v12312_v16  ;;  %10548 = vpow2.f32 %v1744_v22  ;;  %v1608_v38 = vsub.f32 0.0, %v12315_v23 }
 0x112   : > { %v10537_v0 = vpop.eup %10536  ;;  %10550 = vrcp.f32 %v1981_v28  ;;  %v1144_v30 = vpop.f32.mrf.mxu0 }
 0x113   : > { %v10539_v4 = vpop.eup %10538  ;;  %v1982_v14 = vadd.f32 1.0, %v10537_v0  ;;  %v1746_v15 = vmul.f32 1.442695, %v1608_v38  ;;  %v12344_v21 = vadd.f32 %v12083_v56, %v1144_v30  ;;  %v12346_v22 = vpop.permute.xlu1 %2749  ;;  %v3380_v0 = vld [vmem:[%s12335_s21 + $0x10] sm:$0xff] }
 0x114   : > { %v12348_v31 = vpop.permute.xlu0 %2746  ;;  %v9333_v32 = vpop.f32.mrf.mxu0  ;;  %2935 = vperm.xlu1 %10424, %v2558_v20   ;;  %2932 = vperm.xlu0 %10423, %v2557_v2   ;;  %v12356_v46 = vmul.f32 %v10539_v4, %v12151_v47  ;;  %v16860_v47 = vmov 0.0  }
 0x115   : > { %10552 = vrcp.f32 %v1982_v14  ;;  %v1609_v28 = vsub.f32 0.0, %v12344_v21  ;;  %9431 = vmatmul.mubr.msk.bf16.gmra.mxu0 %vm865_vm2, %v10469_v40 }
 0x116   : > { %v10541_v1 = vpop.eup %10540  ;;  %16859 = vst [vmem:[#allocation9_spill] sm:$0xff] %v12356_v46  ;;  %10554 = vpow2.f32 %v1746_v15  ;;  %v1149_v38 = vpop.f32.mrf.mxu0  ;;  %9635 = vmatmul.mubr.msk.bf16.gmra.mxu1 %vm8152_vm8, %v16728_v43  ;;  %9434 = vmatprep.mubr.msk.bf16.mxu0 %vm16826_vm1, %v16860_v47  ;;  %v3383_v15 = vld [vmem:[%s12335_s21 + $0x28] sm:$0xff]  ;;  %v3385_v46 = vld [vmem:[%s12335_s21 + $0x38] sm:$0xff]  ;;  %vm2977_vm8 = vcmp.eq.s32.totalorder %v11893_v34, %v12125_v18 }
 0x117   : > { %v10543_v32 = vpop.eup %10542  ;;  %v1983_v20 = vadd.f32 1.0, %v10541_v1  ;;  %v1748_v30 = vmul.f32 1.442695, %v1609_v28  ;;  %v12361_v2 = vadd.f32 %v12083_v56, %v1149_v38  ;;  %v12364_v14 = vpop.permute.xlu1 %2755  ;;  %9638 = vmatprep.mubr.msk.bf16.mxu1 %vm16826_vm1, %v16860_v47  ;;  %vm8162_vm9 = vmpackc.low %vm2978_vm7, %vm2977_vm8  ;;  %vm2988_vm8 = vcmp.eq.s32.totalorder %v11893_v34, %v12214_v53 }
 0x118   : > { %v12366_v45 = vpop.permute.xlu0 %2752  ;;  %v12371_v40 = vmul.f32 %v10543_v32, %v12174_v5  ;;  %v9336_v4 = vpop.f32.mrf.mxu0  ;;  %3514 = vperm.xlu1 %10424, %v3381_v7   ;;  %3511 = vperm.xlu0 %10423, %v3380_v0   ;;  %v3382_v32 = vld [vmem:[%s12335_s21 + $0x20] sm:$0xff] }
 0x119   : > { %10556 = vrcp.f32 %v1983_v20  ;;  %v1610_v1 = vsub.f32 0.0, %v12361_v2  ;;  %v10471_v7 = vld [vmem:[%s11730_s20 + $0x100] sm:$0xff]  }
 0x11a   : > { %16861 = vst [vmem:[#allocation10_spill] sm:$0xff] %v12371_v40  ;;  %v10545_v28 = vpop.eup %10544  ;;  %10558 = vpow2.f32 %v1748_v30  ;;  %v1152_v5 = vpop.f32.mrf.mxu0 }
 0x11b   : > { %v10547_v4 = vpop.eup %10546  ;;  %v1984_v20 = vadd.f32 1.0, %v10545_v28  ;;  %v1750_v43 = vmul.f32 1.442695, %v1610_v1  ;;  %v12386_v0 = vadd.f32 %v12083_v56, %v1152_v5  ;;  %v12388_v60 = vpop.permute.xlu1 %2761  ;;  %v3384_v28 = vld [vmem:[%s12335_s21 + $0x30] sm:$0xff] }
 0x11c   : > { %v12390_v16 = vpop.permute.xlu0 %2758  ;;  %v9337_v38 = vpop.f32.mrf.mxu0  ;;  %3520 = vperm.xlu1 %10424, %v3383_v15   ;;  %3517 = vperm.xlu0 %10423, %v3382_v32   ;;  %v12398_v50 = vmul.f32 %v10547_v4, %v12192_v24  ;;  %v3387_v4 = vld [vmem:[%s12335_s21 + $0x48] sm:$0xff] }
 0x11d   : > { %10560 = vrcp.f32 %v1984_v20  ;;  %v1611_v30 = vsub.f32 0.0, %v12386_v0  ;;  %9435 = vmatmul.mubr.msk.bf16.gmra.mxu0 %vm865_vm2, %v10471_v7  ;;  %v16863_v20 = vmov 1.0|1.0  }
 0x11e   : > { %v10549_v40 = vpop.eup %10548  ;;  %16862 = vst [vmem:[#allocation11_spill] sm:$0xff] %v12398_v50  ;;  %10562 = vpow2.f32 %v1750_v43  ;;  %v1157_v1 = vpop.f32.mrf.mxu0  ;;  %9639 = vmatmul.mubr.msk.bf16.gmra.mxu1 %vm8154_vm11, %v16863_v20  ;;  %9438 = vmatprep.mubr.msk.bf16.mxu0 %vm16826_vm1, %v16860_v47  ;;  %vm2979_vm11 = vcmp.eq.s32.totalorder %v11893_v34, %v12144_v37 }
 0x11f   : > { %v10551_v15 = vpop.eup %10550  ;;  %v1985_v38 = vadd.f32 1.0, %v10549_v40  ;;  %v1752_v5 = vmul.f32 1.442695, %v1611_v30  ;;  %v12403_v32 = vadd.f32 %v12083_v56, %v1157_v1  ;;  %v12406_v49 = vpop.permute.xlu1 %2767  ;;  %9642 = vmatprep.mubr.msk.bf16.mxu1 %vm16826_vm1, %v16860_v47  ;;  %vm8164_vm12 = vmpackc.low %vm2980_vm10, %vm2979_vm11  ;;  %vm2990_vm11 = vcmp.eq.s32.totalorder %v11893_v34, %v12229_v12 }
 0x120   : > { %v12411_v43 = vmul.f32 %v10551_v15, %v12212_v52  ;;  %v12413_v24 = vpop.permute.xlu0 %2764  ;;  %v9340_v7 = vpop.f32.mrf.mxu0  ;;  %3526 = vperm.xlu1 %10424, %v3385_v46   ;;  %3523 = vperm.xlu0 %10423, %v3384_v28   ;;  %v3386_v52 = vld [vmem:[%s12335_s21 + $0x40] sm:$0xff]  ;;  %v10472_v15 = vld [vmem:[%s11730_s20 + $0x108] sm:$0xff]  }
 0x121   : > { %10564 = vrcp.f32 %v1985_v38  ;;  %v1612_v40 = vsub.f32 0.0, %v12403_v32 }
 0x122   : > { %16864 = vst [vmem:[#allocation12_spill] sm:$0xff] %v12411_v43  ;;  %v10553_v30 = vpop.eup %10552  ;;  %10566 = vpow2.f32 %v1752_v5  ;;  %v1160_v58 = vpop.f32.mrf.mxu0 }
 0x123   : > { %v10555_v3 = vpop.eup %10554  ;;  %v1754_v46 = vmul.f32 1.442695, %v1612_v40  ;;  %v12428_v28 = vadd.f32 %v12083_v56, %v1160_v58  ;;  %v12430_v38 = vpop.permute.xlu1 %2773  ;;  %v12435_v50 = vmul.f32 %v10553_v30, %v12226_v11 }
 0x124   : > { %v1986_v7 = vadd.f32 1.0, %v10555_v3  ;;  %v12432_v5 = vpop.permute.xlu0 %2770  ;;  %v9341_v1 = vpop.f32.mrf.mxu0  ;;  %3532 = vperm.xlu1 %10424, %v3387_v4   ;;  %3529 = vperm.xlu0 %10423, %v3386_v52   ;;  %v3388_v3 = vld [vmem:[%s12335_s21 + $0x50] sm:$0xff] }
 0x125   : > { %16865 = vst [vmem:[#allocation13_spill] sm:$0xff] %v12435_v50  ;;  %10568 = vpow2.f32 %v1754_v46  ;;  %v1613_v43 = vsub.f32 0.0, %v12428_v28  ;;  %9439 = vmatmul.mubr.msk.bf16.gmra.mxu0 %vm865_vm2, %v10472_v15 }
 0x126   : > { %v10557_v40 = vpop.eup %10556  ;;  %10570 = vrcp.f32 %v1986_v7  ;;  %v1165_v58 = vpop.f32.mrf.mxu0  ;;  %9643 = vmatmul.mubr.msk.bf16.gmra.mxu1 %vm8156_vm14, %v16863_v20  ;;  %9442 = vmatprep.mubr.msk.bf16.mxu0 %vm16826_vm1, %v16860_v47  ;;  %v3391_v7 = vld [vmem:[%s12335_s21 + $0x68] sm:$0xff]  ;;  %vm2981_vm14 = vcmp.eq.s32.totalorder %v11893_v34, %v12156_v51  ;;  %v3409_v51 = vld [vmem:[%s12335_s21 + $0xf8] sm:$0xff] }
 0x127   : > { %v10559_v1 = vpop.eup %10558  ;;  %v12445_v11 = vmul.f32 %v10557_v40, %v12249_v41  ;;  %v1756_v4 = vmul.f32 1.442695, %v1613_v43  ;;  %v12448_v30 = vadd.f32 %v12083_v56, %v1165_v58  ;;  %v12451_v52 = vpop.permute.xlu1 %2779  ;;  %9646 = vmatprep.mubr.msk.bf16.mxu1 %vm16826_vm1, %v16860_v47  ;;  %vm8166_vm15 = vmpackc.low %vm2982_vm13, %vm2981_vm14  ;;  %vm2992_vm14 = vcmp.eq.s32.totalorder %v11893_v34, %v12251_v42 }
 0x128   : > { %16867 = vst [vmem:[#allocation15_spill] sm:$0xff] %v12451_v52  ;;  %v1987_v54 = vadd.f32 1.0, %v10559_v1  ;;  %v12455_v15 = vpop.permute.xlu0 %2776  ;;  %v9344_v46 = vpop.f32.mrf.mxu0  ;;  %3538 = vperm.xlu1 %10424, %v3389_v55   ;;  %3535 = vperm.xlu0 %10423, %v3388_v3   ;;  %v3390_v52 = vld [vmem:[%s12335_s21 + $0x60] sm:$0xff]  ;;  %v10473_v1 = vld [vmem:[%s11730_s20 + $0x110] sm:$0xff]  }
 0x129   : > { %16866 = vst [vmem:[#allocation14_spill] sm:$0xff] %v12445_v11  ;;  %16868 = vst [vmem:[#allocation16_spill] sm:$0xff] %v12455_v15  ;;  %10572 = vpow2.f32 %v1756_v4  ;;  %v1614_v43 = vsub.f32 0.0, %v12448_v30 }
 0x12a   : > { %v10561_v40 = vpop.eup %10560  ;;  %10574 = vrcp.f32 %v1987_v54  ;;  %v1168_v58 = vpop.f32.mrf.mxu0 }
 0x12b   : > { %v10563_v15 = vpop.eup %10562  ;;  %v1758_v55 = vmul.f32 1.442695, %v1614_v43  ;;  %v12470_v4 = vadd.f32 %v12083_v56, %v1168_v58  ;;  %v12472_v3 = vpop.permute.xlu1 %2785  ;;  %v12477_v50 = vmul.f32 %v10561_v40, %v12273_v29 }
 0x12c   : > { %v1988_v46 = vadd.f32 1.0, %v10563_v15  ;;  %v12474_v54 = vpop.permute.xlu0 %2782  ;;  %v9345_v41 = vpop.f32.mrf.mxu0  ;;  %3544 = vperm.xlu1 %10424, %v3391_v7   ;;  %3541 = vperm.xlu0 %10423, %v3390_v52   ;;  %v3392_v15 = vld [vmem:[%s12335_s21 + $0x70] sm:$0xff] }
 0x12d   : > { %16869 = vst [vmem:[#allocation17_spill] sm:$0xff] %v12474_v54  ;;  %16870 = vst [vmem:[#allocation18_spill] sm:$0xff] %v12477_v50  ;;  %10576 = vpow2.f32 %v1758_v55  ;;  %v1615_v11 = vsub.f32 0.0, %v12470_v4  ;;  %9443 = vmatmul.mubr.msk.bf16.gmra.mxu0 %vm865_vm2, %v10473_v1  ;;  %v3397_v54 = vld [vmem:[%s12335_s21 + $0x98] sm:$0xff] }
 0x12e   : > { %v10565_v43 = vpop.eup %10564  ;;  %10578 = vrcp.f32 %v1988_v46  ;;  %v1173_v58 = vpop.f32.mrf.mxu0  ;;  %9647 = vmatmul.mubr.msk.bf16.gmra.mxu1 %vm8158_vm3, %v16863_v20  ;;  %9446 = vmatprep.mubr.msk.bf16.mxu0 %vm16826_vm1, %v16860_v47  ;;  %v3395_v46 = vld [vmem:[%s12335_s21 + $0x88] sm:$0xff]  ;;  %vm2983_vm3 = vcmp.eq.s32.totalorder %v11893_v34, %v12178_v10 }
 0x12f   : > { %v10567_v41 = vpop.eup %10566  ;;  %v12487_v29 = vmul.f32 %v10565_v43, %v12295_v44  ;;  %v1760_v7 = vmul.f32 1.442695, %v1615_v11  ;;  %v12490_v40 = vadd.f32 %v12083_v56, %v1173_v58  ;;  %v12493_v52 = vpop.permute.xlu1 %2791  ;;  %9650 = vmatprep.mubr.msk.bf16.mxu1 %vm16826_vm1, %v16860_v47  ;;  %v10487_v43 = vld [vmem:[%s16724_s7 + $0x18] sm:$0xff]   ;;  %vm8168_vm4 = vmpackc.low %vm2984_vm0, %vm2983_vm3  ;;  %vm2994_vm3 = vcmp.eq.s32.totalorder %v11893_v34, %v12276_v36 }
 0x130   : > { %16872 = vst [vmem:[#allocation20_spill] sm:$0xff] %v12493_v52  ;;  %v1989_v61 = vadd.f32 1.0, %v10567_v41  ;;  %v12497_v1 = vpop.permute.xlu0 %2788  ;;  %v9348_v55 = vpop.f32.mrf.mxu0  ;;  %3550 = vperm.xlu1 %10424, %v3393_v62   ;;  %3547 = vperm.xlu0 %10423, %v3392_v15   ;;  %v3394_v41 = vld [vmem:[%s12335_s21 + $0x80] sm:$0xff] }
 0x131   : > { %16871 = vst [vmem:[#allocation19_spill] sm:$0xff] %v12487_v29  ;;  %16873 = vst [vmem:[#allocation21_spill] sm:$0xff] %v12497_v1  ;;  %10580 = vpow2.f32 %v1760_v7  ;;  %v1616_v11 = vsub.f32 0.0, %v12490_v40  ;;  %v10474_v55 = vld [vmem:[%s11730_s20 + $0x118] sm:$0xff]   ;;  %9835 = vmatpush3.bf16.msra.mxu0 %v10487_v43  ;;  %v3396_v43 = vld [vmem:[%s12335_s21 + $0x90] sm:$0xff] }
 0x132   : > { %v10569_v58 = vpop.eup %10568  ;;  %10582 = vrcp.f32 %v1989_v61  ;;  %v1176_v62 = vpop.f32.mrf.mxu0  ;;  %9836 = vmatprep.subr.bf16.mxu0 %v16860_v47 }
 0x133   : > { %v10571_v1 = vpop.eup %10570  ;;  %v1990_v7 = vadd.f32 1.0, %v10569_v58  ;;  %v1762_v15 = vmul.f32 1.442695, %v1616_v11  ;;  %v12515_v44 = vadd.f32 %v12083_v56, %v1176_v62  ;;  %v12517_v50 = vpop.permute.xlu1 %2797 }
 0x134   : > { %v12519_v29 = vpop.permute.xlu0 %2794  ;;  %v9349_v61 = vpop.f32.mrf.mxu0  ;;  %3556 = vperm.xlu1 %10424, %v3395_v46   ;;  %3553 = vperm.xlu0 %10423, %v3394_v41   ;;  %v12531_v11 = vmul.f32 %v10571_v1, %v12315_v23 }
 0x135   : > { %10584 = vrcp.f32 %v1990_v7  ;;  %v1617_v52 = vsub.f32 0.0, %v12515_v44  ;;  %9447 = vmatmul.mubr.msk.bf16.gmra.mxu0 %vm865_vm2, %v10474_v55  ;;  %v3399_v55 = vld [vmem:[%s12335_s21 + $0xa8] sm:$0xff] }
 0x136   : > { %v10573_v58 = vpop.eup %10572  ;;  %16874 = vst [vmem:[#allocation22_spill] sm:$0xff] %v12531_v11  ;;  %10586 = vpow2.f32 %v1762_v15  ;;  %v1181_v46 = vpop.f32.mrf.mxu0  ;;  %9651 = vmatmul.mubr.msk.bf16.gmra.mxu1 %vm8160_vm6, %v16863_v20  ;;  %9450 = vmatprep.mubr.msk.bf16.mxu0 %vm16826_vm1, %v16860_v47  ;;  %v3401_v11 = vld [vmem:[%s12335_s21 + $0xb8] sm:$0xff]  ;;  %vm2985_vm6 = vcmp.eq.s32.totalorder %v11893_v34, %v12197_v27 }
 0x137   : > { %v10575_v62 = vpop.eup %10574  ;;  %v1991_v41 = vadd.f32 1.0, %v10573_v58  ;;  %v1764_v7 = vmul.f32 1.442695, %v1617_v52  ;;  %v12536_v61 = vadd.f32 %v12083_v56, %v1181_v46  ;;  %v12539_v9 = vpop.permute.xlu1 %2803  ;;  %9654 = vmatprep.mubr.msk.bf16.mxu1 %vm16826_vm1, %v16860_v47  ;;  %v3398_v46 = vld [vmem:[%s12335_s21 + $0xa0] sm:$0xff]  ;;  %vm8170_vm7 = vmpackc.low %vm2986_vm5, %vm2985_vm6  ;;  %vm2996_vm6 = vcmp.eq.s32.totalorder %v11893_v34, %v12297_v59 }
 0x138   : > { %16875 = vst [vmem:[#allocation23_spill] sm:$0xff] %v12539_v9  ;;  %v12544_v8 = vmul.f32 %v10575_v62, %v12344_v21  ;;  %v12546_v23 = vpop.permute.xlu0 %2800  ;;  %v9352_v1 = vpop.f32.mrf.mxu0  ;;  %3562 = vperm.xlu1 %10424, %v3397_v54   ;;  %3559 = vperm.xlu0 %10423, %v3396_v43   ;;  %v10475_v54 = vld [vmem:[%s11730_s20 + $0x120] sm:$0xff]  }
 0x139   : > { %16877 = vst [vmem:[#allocation25_spill] sm:$0xff] %v12546_v23  ;;  %10588 = vrcp.f32 %v1991_v41  ;;  %v1618_v52 = vsub.f32 0.0, %v12536_v61 }
 0x13a   : > { %16876 = vst [vmem:[#allocation24_spill] sm:$0xff] %v12544_v8  ;;  %v10577_v15 = vpop.eup %10576  ;;  %10590 = vpow2.f32 %v1764_v7  ;;  %v1184_v58 = vpop.f32.mrf.mxu0 }
 0x13b   : > { %v10579_v62 = vpop.eup %10578  ;;  %v1992_v41 = vadd.f32 1.0, %v10577_v15  ;;  %v1766_v1 = vmul.f32 1.442695, %v1618_v52  ;;  %v12561_v43 = vadd.f32 %v12083_v56, %v1184_v58  ;;  %v12563_v23 = vpop.permute.xlu1 %2809  ;;  %v3400_v15 = vld [vmem:[%s12335_s21 + $0xb0] sm:$0xff] }
 0x13c   : > { %v12565_v9 = vpop.permute.xlu0 %2806  ;;  %v9353_v21 = vpop.f32.mrf.mxu0  ;;  %3568 = vperm.xlu1 %10424, %v3399_v55   ;;  %3565 = vperm.xlu0 %10423, %v3398_v46   ;;  %v12573_v18 = vmul.f32 %v10579_v62, %v12361_v2 }
 0x13d   : > { %10592 = vrcp.f32 %v1992_v41  ;;  %v1619_v7 = vsub.f32 0.0, %v12561_v43  ;;  %9451 = vmatmul.mubr.msk.bf16.gmra.mxu0 %vm865_vm2, %v10475_v54 }
 0x13e   : > { %v10581_v8 = vpop.eup %10580  ;;  %16878 = vst [vmem:[#allocation26_spill] sm:$0xff] %v12573_v18  ;;  %10594 = vpow2.f32 %v1766_v1  ;;  %v1189_v52 = vpop.f32.mrf.mxu0  ;;  %9655 = vmatmul.mubr.msk.bf16.gmra.mxu1 %vm8162_vm9, %v16863_v20  ;;  %9454 = vmatprep.mubr.msk.bf16.mxu0 %vm16826_vm1, %v16860_v47  ;;  %vm2987_vm9 = vcmp.eq.s32.totalorder %v11893_v34, %v12216_v57 }
 0x13f   : > { %v10583_v55 = vpop.eup %10582  ;;  %v1993_v21 = vadd.f32 1.0, %v10581_v8  ;;  %v1768_v58 = vmul.f32 1.442695, %v1619_v7  ;;  %v12578_v46 = vadd.f32 %v12083_v56, %v1189_v52  ;;  %v12581_v17 = vpop.permute.xlu1 %2815  ;;  %9658 = vmatprep.mubr.msk.bf16.mxu1 %vm16826_vm1, %v16860_v47  ;;  %v3403_v8 = vld [vmem:[%s12335_s21 + $0xc8] sm:$0xff]  ;;  %vm8172_vm10 = vmpackc.low %vm2988_vm8, %vm2987_vm9  ;;  %vm2998_vm9 = vcmp.eq.s32.totalorder %v11893_v34, %v12318_v25 }
 0x140   : > { %16879 = vst [vmem:[#allocation27_spill] sm:$0xff] %v12581_v17  ;;  %v12586_v2 = vmul.f32 %v10583_v55, %v12386_v0  ;;  %v12588_v54 = vpop.permute.xlu0 %2812  ;;  %v9356_v62 = vpop.f32.mrf.mxu0  ;;  %3574 = vperm.xlu1 %10424, %v3401_v11   ;;  %3571 = vperm.xlu0 %10423, %v3400_v15   ;;  %v3402_v0 = vld [vmem:[%s12335_s21 + $0xc0] sm:$0xff]  ;;  %v10476_v52 = vld [vmem:[%s11730_s20 + $0x128] sm:$0xff]   ;;  %v10490_v11 = vld [vmem:[%s16721_s4 + $0x18] sm:$0xff]  }
 0x141   : > { %16881 = vst [vmem:[#allocation29_spill] sm:$0xff] %v12588_v54  ;;  %10596 = vrcp.f32 %v1993_v21  ;;  %v1620_v56 = vsub.f32 0.0, %v12578_v46  ;;  %v12608_v21 = vld [vmem:[%s16723_s6] ss:$0 sm:$0xff]  ;;  %10374 = vmatpush3.bf16.msra.mxu1 %v10490_v11  ;;  %v3405_v17 = vld [vmem:[%s12335_s21 + $0xd8] sm:$0xff] }
 0x142   : > { %16880 = vst [vmem:[#allocation28_spill] sm:$0xff] %v12586_v2  ;;  %v10585_v41 = vpop.eup %10584  ;;  %10598 = vpow2.f32 %v1768_v58  ;;  %v1192_v7 = vpop.f32.mrf.mxu0  ;;  %10367 = vmatprep.subr.bf16.mxu1 %v16860_v47 }
 0x143   : > { %v10587_v55 = vpop.eup %10586  ;;  %v1770_v15 = vmul.f32 1.442695, %v1620_v56  ;;  %v12611_v58 = vadd.f32 %v12608_v21, %v1192_v7  ;;  %v12613_v62 = vpop.permute.xlu1 %2821  ;;  %v12618_v54 = vmul.f32 %v10585_v41, %v12403_v32  ;;  %v3404_v32 = vld [vmem:[%s12335_s21 + $0xd0] sm:$0xff] }
 0x144   : > { %v1994_v1 = vadd.f32 1.0, %v10587_v55  ;;  %v12615_v18 = vpop.permute.xlu0 %2818  ;;  %v9357_v2 = vpop.f32.mrf.mxu0  ;;  %3580 = vperm.xlu1 %10424, %v3403_v8   ;;  %3577 = vperm.xlu0 %10423, %v3402_v0  }
 0x145   : > { %16882 = vst [vmem:[#allocation30_spill] sm:$0xff] %v12618_v54  ;;  %10600 = vpow2.f32 %v1770_v15  ;;  %v1621_v56 = vsub.f32 0.0, %v12611_v58  ;;  %9455 = vmatmul.mubr.msk.bf16.gmra.mxu0 %vm865_vm2, %v10476_v52  ;;  %v3407_v15 = vld [vmem:[%s12335_s21 + $0xe8] sm:$0xff] }
 0x146   : > { %v10589_v7 = vpop.eup %10588  ;;  %10602 = vrcp.f32 %v1994_v1  ;;  %v1197_v2 = vpop.f32.mrf.mxu0  ;;  %9659 = vmatmul.mubr.msk.bf16.gmra.mxu1 %vm8164_vm12, %v16863_v20  ;;  %9458 = vmatprep.mubr.msk.bf16.mxu0 %vm16826_vm1, %v16860_v47  ;;  %vm2989_vm12 = vcmp.eq.s32.totalorder %v11893_v34, %v12231_v13 }
 0x147   : > { %v10591_v8 = vpop.eup %10590  ;;  %v12632_v41 = vmul.f32 %v10589_v7, %v12428_v28  ;;  %v1772_v0 = vmul.f32 1.442695, %v1621_v56  ;;  %v12635_v11 = vadd.f32 %v12608_v21, %v1197_v2  ;;  %v12638_v37 = vpop.permute.xlu1 %2827  ;;  %9662 = vmatprep.mubr.msk.bf16.mxu1 %vm16826_vm1, %v16860_v47  ;;  %v3406_v2 = vld [vmem:[%s12335_s21 + $0xe0] sm:$0xff]  ;;  %vm8174_vm13 = vmpackc.low %vm2990_vm11, %vm2989_vm12  ;;  %vm3000_vm12 = vcmp.eq.s32.totalorder %v11893_v34, %v12346_v22 }
 0x148   : > { %v1995_v33 = vadd.f32 1.0, %v10591_v8  ;;  %v12642_v1 = vpop.permute.xlu0 %2824  ;;  %v9360_v52 = vpop.f32.mrf.mxu0  ;;  %3586 = vperm.xlu1 %10424, %v3405_v17   ;;  %3583 = vperm.xlu0 %10423, %v3404_v32   ;;  %v10478_v8 = vld [vmem:[%s11730_s20 + $0x130] sm:$0xff]  }
 0x149   : > { %16883 = vst [vmem:[#allocation31_spill] sm:$0xff] %v12632_v41  ;;  %16884 = vst [vmem:[#allocation32_spill] sm:$0xff] %v12642_v1  ;;  %10604 = vpow2.f32 %v1772_v0  ;;  %v1622_v55 = vsub.f32 0.0, %v12635_v11 }
 0x14a   : > { %v10593_v56 = vpop.eup %10592  ;;  %10606 = vrcp.f32 %v1995_v33  ;;  %v1200_v7 = vpop.f32.mrf.mxu0 }
 0x14b   : > { %v10595_v1 = vpop.eup %10594  ;;  %v1774_v17 = vmul.f32 1.442695, %v1622_v55  ;;  %v12657_v0 = vadd.f32 %v12608_v21, %v1200_v7  ;;  %v12659_v32 = vpop.permute.xlu1 %2833  ;;  %v12664_v54 = vmul.f32 %v10593_v56, %v12448_v30 }
 0x14c   : > { %v1996_v52 = vadd.f32 1.0, %v10595_v1  ;;  %v12661_v33 = vpop.permute.xlu0 %2830  ;;  %v9361_v28 = vpop.f32.mrf.mxu0  ;;  %3592 = vperm.xlu1 %10424, %v3407_v15   ;;  %3589 = vperm.xlu0 %10423, %v3406_v2   ;;  %v3408_v1 = vld [vmem:[%s12335_s21 + $0xf0] sm:$0xff] }
 0x14d   : > { %16885 = vst [vmem:[#allocation33_spill] sm:$0xff] %v12661_v33  ;;  %16886 = vst [vmem:[#allocation34_spill] sm:$0xff] %v12664_v54  ;;  %10608 = vpow2.f32 %v1774_v17  ;;  %v1623_v41 = vsub.f32 0.0, %v12657_v0  ;;  %9459 = vmatmul.mubr.msk.bf16.gmra.mxu0 %vm865_vm2, %v10478_v8 }
 0x14e   : > { %v10597_v55 = vpop.eup %10596  ;;  %10610 = vrcp.f32 %v1996_v52  ;;  %v1205_v7 = vpop.f32.mrf.mxu0  ;;  %9663 = vmatmul.mubr.msk.bf16.gmra.mxu1 %vm8166_vm15, %v16863_v20  ;;  %9462 = vmatprep.mubr.msk.bf16.mxu0 %vm16826_vm1, %v16860_v47  ;;  %v3411_v52 = vld [vmem:[%s12335_s21 + $0x108] sm:$0xff]  ;;  %vm2991_vm15 = vcmp.eq.s32.totalorder %v11893_v34, %v12253_v19 }
 0x14f   : > { %v10599_v28 = vpop.eup %10598  ;;  %v12674_v30 = vmul.f32 %v10597_v55, %v12470_v4  ;;  %v1776_v15 = vmul.f32 1.442695, %v1623_v41  ;;  %v12677_v56 = vadd.f32 %v12608_v21, %v1205_v7  ;;  %v12680_v2 = vpop.permute.xlu1 %2839  ;;  %9666 = vmatprep.mubr.msk.bf16.mxu1 %vm16826_vm1, %v16860_v47  ;;  %vm8176_vm0 = vmpackc.low %vm2992_vm14, %vm2991_vm15  ;;  %vm3002_vm15 = vcmp.eq.s32.totalorder %v11893_v34, %v12364_v14 }
 0x150   : > { %16888 = vst [vmem:[#allocation36_spill] sm:$0xff] %v12680_v2  ;;  %v1997_v48 = vadd.f32 1.0, %v10599_v28  ;;  %v12684_v8 = vpop.permute.xlu0 %2836  ;;  %v9364_v17 = vpop.f32.mrf.mxu0  ;;  %3598 = vperm.xlu1 %10424, %v3409_v51   ;;  %3595 = vperm.xlu0 %10423, %v3408_v1   ;;  %v3410_v28 = vld [vmem:[%s12335_s21 + $0x100] sm:$0xff]  ;;  %v10479_v51 = vld [vmem:[%s11730_s20 + $0x138] sm:$0xff]  }
 0x151   : > { %16887 = vst [vmem:[#allocation35_spill] sm:$0xff] %v12674_v30  ;;  %16889 = vst [vmem:[#allocation37_spill] sm:$0xff] %v12684_v8  ;;  %10612 = vpow2.f32 %v1776_v15  ;;  %v1624_v41 = vsub.f32 0.0, %v12677_v56  ;;  %v3413_v2 = vld [vmem:[%s12335_s21 + $0x118] sm:$0xff] }
 0x152   : > { %v10601_v55 = vpop.eup %10600  ;;  %10614 = vrcp.f32 %v1997_v48  ;;  %v1208_v7 = vpop.f32.mrf.mxu0 }
 0x153   : > { %v10603_v17 = vpop.eup %10602  ;;  %v1998_v8 = vadd.f32 1.0, %v10601_v55  ;;  %v1778_v4 = vmul.f32 1.442695, %v1624_v41  ;;  %v12699_v15 = vadd.f32 %v12608_v21, %v1208_v7  ;;  %v12701_v1 = vpop.permute.xlu1 %2845  ;;  %v3412_v55 = vld [vmem:[%s12335_s21 + $0x110] sm:$0xff] }
 0x154   : > { %v12703_v54 = vpop.permute.xlu0 %2842  ;;  %v9365_v30 = vpop.f32.mrf.mxu0  ;;  %3604 = vperm.xlu1 %10424, %v3411_v52   ;;  %3601 = vperm.xlu0 %10423, %v3410_v28   ;;  %v12711_v10 = vmul.f32 %v10603_v17, %v12490_v40 }
 0x155   : > { %10616 = vrcp.f32 %v1998_v8  ;;  %v1625_v48 = vsub.f32 0.0, %v12699_v15  ;;  %9463 = vmatmul.mubr.msk.bf16.gmra.mxu0 %vm865_vm2, %v10479_v51  ;;  %v3415_v51 = vld [vmem:[%s12335_s21 + $0x128] sm:$0xff] }
 0x156   : > { %v10605_v33 = vpop.eup %10604  ;;  %16890 = vst [vmem:[#allocation38_spill] sm:$0xff] %v12711_v10  ;;  %10618 = vpow2.f32 %v1778_v4  ;;  %v1213_v41 = vpop.f32.mrf.mxu0  ;;  %9667 = vmatmul.mubr.msk.bf16.gmra.mxu1 %vm8168_vm4, %v16863_v20  ;;  %9466 = vmatprep.mubr.msk.bf16.mxu0 %vm16826_vm1, %v16860_v47  ;;  %v3417_v10 = vld [vmem:[%s12335_s21 + $0x138] sm:$0xff]  ;;  %vm2993_vm4 = vcmp.eq.s32.totalorder %v11893_v34, %v12278_v35 }
 0x157   : > { %v10607_v30 = vpop.eup %10606  ;;  %v1999_v8 = vadd.f32 1.0, %v10605_v33  ;;  %v1780_v52 = vmul.f32 1.442695, %v1625_v48  ;;  %v12716_v7 = vadd.f32 %v12608_v21, %v1213_v41  ;;  %v12719_v28 = vpop.permute.xlu1 %2851  ;;  %9670 = vmatprep.mubr.msk.bf16.mxu1 %vm16826_vm1, %v16860_v47  ;;  %v3414_v41 = vld [vmem:[%s12335_s21 + $0x120] sm:$0xff]  ;;  %vm8178_vm5 = vmpackc.low %vm2994_vm3, %vm2993_vm4  ;;  %vm3004_vm4 = vcmp.eq.s32.totalorder %v11893_v34, %v12388_v60 }
 0x158   : > { %16891 = vst [vmem:[#allocation39_spill] sm:$0xff] %v12719_v28  ;;  %v12724_v6 = vmul.f32 %v10607_v30, %v12515_v44  ;;  %v12726_v40 = vpop.permute.xlu0 %2848  ;;  %v9368_v4 = vpop.f32.mrf.mxu0  ;;  %3610 = vperm.xlu1 %10424, %v3413_v2   ;;  %3607 = vperm.xlu0 %10423, %v3412_v55   ;;  %v10481_v2 = vld [vmem:[%s11730_s20 + $0x140] sm:$0xff]  }
 0x159   : > { %16893 = vst [vmem:[#allocation41_spill] sm:$0xff] %v12726_v40  ;;  %10620 = vrcp.f32 %v1999_v8  ;;  %v1626_v33 = vsub.f32 0.0, %v12716_v7 }
 0x15a   : > { %16892 = vst [vmem:[#allocation40_spill] sm:$0xff] %v12724_v6  ;;  %v10609_v17 = vpop.eup %10608  ;;  %10622 = vpow2.f32 %v1780_v52  ;;  %v1216_v48 = vpop.f32.mrf.mxu0 }
 0x15b   : > { %v10611_v30 = vpop.eup %10610  ;;  %v2000_v8 = vadd.f32 1.0, %v10609_v17  ;;  %v1782_v4 = vmul.f32 1.442695, %v1626_v33  ;;  %v12741_v55 = vadd.f32 %v12608_v21, %v1216_v48  ;;  %v12743_v40 = vpop.permute.xlu1 %2857  ;;  %v3416_v17 = vld [vmem:[%s12335_s21 + $0x130] sm:$0xff] }
 0x15c   : > { %v12745_v28 = vpop.permute.xlu0 %2854  ;;  %v9369_v44 = vpop.f32.mrf.mxu0  ;;  %3616 = vperm.xlu1 %10424, %v3415_v51   ;;  %3613 = vperm.xlu0 %10423, %v3414_v41   ;;  %v12753_v27 = vmul.f32 %v10611_v30, %v12536_v61 }
 0x15d   : > { %16894 = vst [vmem:[#allocation42_spill] sm:$0xff] %v12745_v28  ;;  %10624 = vrcp.f32 %v2000_v8  ;;  %v1627_v52 = vsub.f32 0.0, %v12741_v55  ;;  %9467 = vmatmul.mubr.msk.bf16.gmra.mxu0 %vm865_vm2, %v10481_v2 }
 0x15e   : > { %v10613_v6 = vpop.eup %10612  ;;  %16895 = vst [vmem:[#allocation43_spill] sm:$0xff] %v12753_v27  ;;  %10626 = vpow2.f32 %v1782_v4  ;;  %v1221_v33 = vpop.f32.mrf.mxu0  ;;  %9671 = vmatmul.mubr.msk.bf16.gmra.mxu1 %vm8170_vm7, %v16863_v20  ;;  %9470 = vmatprep.mubr.msk.bf16.mxu0 %vm16826_vm1, %v16860_v47  ;;  %vm2995_vm7 = vcmp.eq.s32.totalorder %v11893_v34, %v12299_v63 }
 0x15f   : > { %v10615_v44 = vpop.eup %10614  ;;  %v2001_v51 = vadd.f32 1.0, %v10613_v6  ;;  %v1784_v48 = vmul.f32 1.442695, %v1627_v52  ;;  %v12758_v41 = vadd.f32 %v12608_v21, %v1221_v33  ;;  %v12760_v8 = vpop.f32.mrf.mxu1  ;;  %9674 = vmatprep.mubr.msk.bf16.mxu1 %vm16826_vm1, %v16860_v47  ;;  %v3419_v52 = vld [vmem:[%s12335_s21 + $0x148] sm:$0xff]  ;;  %vm8180_vm8 = vmpackc.low %vm2996_vm6, %vm2995_vm7  ;;  %vm3006_vm7 = vcmp.eq.s32.totalorder %v11893_v34, %v12406_v49 }
 0x160   : > { %16896 = vst [vmem:[#allocation44_spill] sm:$0xff] %v12760_v8  ;;  %v12763_v26 = vpop.permute.xlu1 %2863  ;;  %v12768_v61 = vmul.f32 %v10615_v44, %v12561_v43  ;;  %v12770_v6 = vpop.permute.xlu0 %2860  ;;  %3622 = vperm.xlu1 %10424, %v3417_v10   ;;  %3619 = vperm.xlu0 %10423, %v3416_v17   ;;  %v3418_v44 = vld [vmem:[%s12335_s21 + $0x140] sm:$0xff] }
 0x161   : > { %16897 = vst [vmem:[#allocation45_spill] sm:$0xff] %v12763_v26  ;;  %16899 = vst [vmem:[#allocation47_spill] sm:$0xff] %v12770_v6  ;;  %v9372_v2 = vpop.f32.mrf.mxu0  ;;  %10628 = vrcp.f32 %v2001_v51  ;;  %v1628_v30 = vsub.f32 0.0, %v12758_v41  ;;  %v9576_v4 = vpop.f32.mrf.mxu1  ;;  %v10482_v26 = vld [vmem:[%s11730_s20 + $0x148] sm:$0xff]  }
 0x162   : > { %16898 = vst [vmem:[#allocation46_spill] sm:$0xff] %v12768_v61  ;;  %v10617_v33 = vpop.eup %10616  ;;  %10630 = vpow2.f32 %v1784_v48 }
 0x163   : > { %v1224_v43 = vpop.f32.mrf.mxu0  ;;  %v10619_v6 = vpop.eup %10618  ;;  %v1786_v10 = vmul.f32 1.442695, %v1628_v30  ;;  %v12794_v27 = vmul.f32 %v10617_v33, %v12578_v46  ;;  %v3420_v46 = vld [vmem:[%s12335_s21 + $0x150] sm:$0xff] }
 0x164   : > { %v12785_v17 = vadd.f32 %v12608_v21, %v1224_v43  ;;  %v12787_v51 = vpop.f32.mrf.mxu1  ;;  %v12789_v2 = vpop.permute.xlu1 %2869  ;;  %v2002_v48 = vadd.f32 1.0, %v10619_v6  ;;  %3628 = vperm.xlu1 %10424, %v3419_v52   ;;  %3625 = vperm.xlu0 %10423, %v3418_v44   ;;  %v3421_v43 = vld [vmem:[%s12335_s21 + $0x158] sm:$0xff] }
 0x165   : > { %16900 = vst [vmem:[#allocation48_spill] sm:$0xff] %v12787_v51  ;;  %v12791_v4 = vpop.permute.xlu0 %2866  ;;  %v9373_v8 = vpop.f32.mrf.mxu0  ;;  %16901 = vst [vmem:[#allocation49_spill] sm:$0xff] %v12794_v27  ;;  %10632 = vpow2.f32 %v1786_v10  ;;  %9471 = vmatmul.mubr.msk.bf16.gmra.mxu0 %vm865_vm2, %v10482_v26 }
 0x166   : > { %v1629_v61 = vsub.f32 0.0, %v12785_v17  ;;  %v9577_v30 = vpop.f32.mrf.mxu1  ;;  %v10621_v28 = vpop.eup %10620  ;;  %10634 = vrcp.f32 %v2002_v48  ;;  %9675 = vmatmul.mubr.msk.bf16.gmra.mxu1 %vm8172_vm10, %v16863_v20  ;;  %9474 = vmatprep.mubr.msk.bf16.mxu0 %vm16826_vm1, %v16860_v47  ;;  %vm2997_vm10 = vcmp.eq.s32.totalorder %v11893_v34, %v12320_v39 }
 0x167   : > { %v1229_v8 = vpop.f32.mrf.mxu0  ;;  %v10623_v6 = vpop.eup %10622  ;;  %v12807_v52 = vmul.f32 %v10621_v28, %v12611_v58  ;;  %9678 = vmatprep.mubr.msk.bf16.mxu1 %vm16826_vm1, %v16860_v47  ;;  %v3423_v30 = vld [vmem:[%s12335_s21 + $0x168] sm:$0xff]  ;;  %vm8182_vm11 = vmpackc.low %vm2998_vm9, %vm2997_vm10  ;;  %vm3008_vm10 = vcmp.eq.s32.totalorder %v11893_v34, %v12430_v38 }
 0x168   : > { %v1788_v33 = vmul.f32 1.442695, %v1629_v61  ;;  %v12810_v44 = vadd.f32 %v12608_v21, %v1229_v8  ;;  %v12812_v10 = vpop.f32.mrf.mxu1  ;;  %v12815_v53 = vpop.permute.xlu1 %2875  ;;  %v2003_v57 = vadd.f32 1.0, %v10623_v6  ;;  %3634 = vperm.xlu1 %10424, %v3421_v43   ;;  %3631 = vperm.xlu0 %10423, %v3420_v46   ;;  %v3422_v6 = vld [vmem:[%s12335_s21 + $0x160] sm:$0xff] }
 0x169   : > { %16902 = vst [vmem:[#allocation50_spill] sm:$0xff] %v12807_v52  ;;  %16903 = vst [vmem:[#allocation51_spill] sm:$0xff] %v12812_v10  ;;  %v12819_v26 = vpop.permute.xlu0 %2872  ;;  %v9376_v58 = vpop.f32.mrf.mxu0  ;;  %v10483_v10 = vld [vmem:[%s11730_s20 + $0x150] sm:$0xff]  }
 0x16a   : > { %16904 = vst [vmem:[#allocation52_spill] sm:$0xff] %v12819_v26  ;;  %10636 = vpow2.f32 %v1788_v33  ;;  %v1630_v61 = vsub.f32 0.0, %v12810_v44  ;;  %v9580_v48 = vpop.f32.mrf.mxu1  ;;  %v10625_v8 = vpop.eup %10624 }
 0x16b   : > { %10638 = vrcp.f32 %v2003_v57  ;;  %v1232_v51 = vpop.f32.mrf.mxu0  ;;  %v10627_v26 = vpop.eup %10626  ;;  %v10497_v57 = vld [vmem:[%s16724_s7 + $0x10] sm:$0xff]   ;;  %v12846_v52 = vmul.f32 %v10625_v8, %v12635_v11 }
 0x16c   : > { %v1790_v43 = vmul.f32 1.442695, %v1630_v61  ;;  %v12834_v33 = vadd.f32 %v12608_v21, %v1232_v51  ;;  %v12836_v58 = vpop.f32.mrf.mxu1  ;;  %v12838_v46 = vpop.permute.xlu1 %2881  ;;  %v2004_v48 = vadd.f32 1.0, %v10627_v26  ;;  %3640 = vperm.xlu1 %10424, %v3423_v30   ;;  %3637 = vperm.xlu0 %10423, %v3422_v6   ;;  %v3424_v11 = vld [vmem:[%s12335_s21 + $0x170] sm:$0xff] }
 0x16d   : > { %16905 = vst [vmem:[#allocation53_spill] sm:$0xff] %v12836_v58  ;;  %16906 = vst [vmem:[#allocation54_spill] sm:$0xff] %v12838_v46  ;;  %v12843_v28 = vpop.permute.xlu0 %2878  ;;  %v9377_v27 = vpop.f32.mrf.mxu0  ;;  %v3425_v58 = vld [vmem:[%s12335_s21 + $0x178] sm:$0xff]  ;;  %9837 = vmatpush3.bf16.msra.mxu0 %v10497_v57 }
 0x16e   : > { %16907 = vst [vmem:[#allocation55_spill] sm:$0xff] %v12846_v52  ;;  %10640 = vpow2.f32 %v1790_v43  ;;  %v1631_v51 = vsub.f32 0.0, %v12834_v33  ;;  %v9581_v61 = vpop.f32.mrf.mxu1  ;;  %v10629_v46 = vpop.eup %10628  ;;  %9475 = vmatmul.mubr.msk.bf16.gmra.mxu0 %vm865_vm2, %v10483_v10  ;;  %9838 = vmatprep.subr.bf16.mxu0 %v16860_v47 }
 0x16f   : > { %10642 = vrcp.f32 %v2004_v48  ;;  %v1237_v27 = vpop.f32.mrf.mxu0  ;;  %v10631_v26 = vpop.eup %10630  ;;  %v12860_v30 = vmul.f32 %v10629_v46, %v12657_v0  ;;  %9679 = vmatmul.mubr.msk.bf16.gmra.mxu1 %vm8174_vm13, %v16863_v20  ;;  %9478 = vmatprep.mubr.msk.bf16.mxu0 %vm16826_vm1, %v16860_v47  ;;  %vm2999_vm13 = vcmp.eq.s32.totalorder %v11893_v34, %v12348_v31 }
 0x170   : > { %v1792_v8 = vmul.f32 1.442695, %v1631_v51  ;;  %v12863_v6 = vadd.f32 %v12608_v21, %v1237_v27  ;;  %v12865_v13 = vpop.f32.mrf.mxu1  ;;  %v12868_v12 = vpop.permute.xlu1 %2887  ;;  %v2005_v10 = vadd.f32 1.0, %v10631_v26  ;;  %3646 = vperm.xlu1 %10424, %v3425_v58   ;;  %9682 = vmatprep.mubr.msk.bf16.mxu1 %vm16826_vm1, %v16860_v47  ;;  %v3427_v51 = vld [vmem:[%s12335_s21 + $0x188] sm:$0xff]  ;;  %v3426_v26 = vld [vmem:[%s12335_s21 + $0x180] sm:$0xff]  ;;  %v10484_v58 = vld [vmem:[%s11730_s20 + $0x158] sm:$0xff]  }
 0x171   : > { %16908 = vst [vmem:[#allocation56_spill] sm:$0xff] %v12860_v30  ;;  %16909 = vst [vmem:[#allocation57_spill] sm:$0xff] %v12865_v13  ;;  %v12872_v43 = vpop.permute.xlu0 %2884  ;;  %v9380_v0 = vpop.f32.mrf.mxu0  ;;  %3643 = vperm.xlu0 %10423, %v3424_v11  }
 0x172   : > { %16910 = vst [vmem:[#allocation58_spill] sm:$0xff] %v12868_v12  ;;  %16911 = vst [vmem:[#allocation59_spill] sm:$0xff] %v12872_v43  ;;  %10644 = vpow2.f32 %v1792_v8  ;;  %v1632_v57 = vsub.f32 0.0, %v12863_v6  ;;  %v9584_v48 = vpop.f32.mrf.mxu1  ;;  %v10633_v61 = vpop.eup %10632  ;;  %v3429_v12 = vld [vmem:[%s12335_s21 + $0x198] sm:$0xff] }
 0x173   : > { %10646 = vrcp.f32 %v2005_v10  ;;  %v1240_v27 = vpop.f32.mrf.mxu0  ;;  %v10635_v0 = vpop.eup %10634  ;;  %v2006_v46 = vadd.f32 1.0, %v10633_v61  ;;  %vm8184_vm14 = vmpackc.low %vm3000_vm12, %vm2999_vm13 }
 0x174   : > { %v1794_v8 = vmul.f32 1.442695, %v1632_v57  ;;  %v12887_v13 = vadd.f32 %v12608_v21, %v1240_v27  ;;  %v12889_v11 = vpop.f32.mrf.mxu1  ;;  %v12891_v48 = vpop.permute.xlu1 %2893  ;;  %3652 = vperm.xlu1 %10424, %v3427_v51   ;;  %v12904_v57 = vmul.f32 %v10635_v0, %v12677_v56 }
 0x175   : > { %16912 = vst [vmem:[#allocation60_spill] sm:$0xff] %v12889_v11  ;;  %v12893_v52 = vpop.permute.xlu0 %2890  ;;  %v9381_v10 = vpop.f32.mrf.mxu0  ;;  %10648 = vrcp.f32 %v2006_v46  ;;  %3649 = vperm.xlu0 %10423, %v3426_v26   ;;  %v3428_v46 = vld [vmem:[%s12335_s21 + $0x190] sm:$0xff] }
 0x176   : > { %v1633_v30 = vsub.f32 0.0, %v12887_v13  ;;  %v9585_v43 = vpop.f32.mrf.mxu1  ;;  %16913 = vst [vmem:[#allocation61_spill] sm:$0xff] %v12904_v57  ;;  %10650 = vpow2.f32 %v1794_v8  ;;  %9479 = vmatmul.mubr.msk.bf16.gmra.mxu0 %vm865_vm2, %v10484_v58  ;;  %v10500_v57 = vld [vmem:[%s16721_s4 + $0x10] sm:$0xff]  }
 0x177   : > { %v10637_v61 = vpop.eup %10636  ;;  %v1245_v27 = vpop.f32.mrf.mxu0  ;;  %9683 = vmatmul.mubr.msk.bf16.gmra.mxu1 %vm8176_vm0, %v16863_v20  ;;  %9482 = vmatprep.mubr.msk.bf16.mxu0 %vm16826_vm1, %v16860_v47  ;;  %vm3001_vm0 = vcmp.eq.s32.totalorder %v11893_v34, %v12366_v45 }
 0x178   : > { %v10639_v51 = vpop.eup %10638  ;;  %v2007_v43 = vadd.f32 1.0, %v10637_v61  ;;  %v1796_v26 = vmul.f32 1.442695, %v1633_v30  ;;  %v12909_v10 = vadd.f32 %v12608_v21, %v1245_v27  ;;  %v12911_v19 = vpop.f32.mrf.mxu1  ;;  %3658 = vperm.xlu1 %10424, %v3429_v12   ;;  %9686 = vmatprep.mubr.msk.bf16.mxu1 %vm16826_vm1, %v16860_v47  ;;  %v3431_v61 = vld [vmem:[%s12335_s21 + $0x1a8] sm:$0xff]  ;;  %v10485_v12 = vld [vmem:[%s11730_s20 + $0x160] sm:$0xff]   ;;  %vm8186_vm3 = vmpackc.low %vm3002_vm15, %vm3001_vm0  ;;  %vm3012_vm0 = vcmp.eq.s32.totalorder %v11893_v34, %v12472_v3 }
 0x179   : > { %16914 = vst [vmem:[#allocation62_spill] sm:$0xff] %v12911_v19  ;;  %v12914_v42 = vpop.permute.xlu1 %2899  ;;  %v12919_v56 = vmul.f32 %v10639_v51, %v12699_v15  ;;  %v12921_v58 = vpop.permute.xlu0 %2896  ;;  %3655 = vperm.xlu0 %10423, %v3428_v46   ;;  %10375 = vmatpush3.bf16.msra.mxu1 %v10500_v57 }
 0x17a   : > { %16916 = vst [vmem:[#allocation64_spill] sm:$0xff] %v12921_v58  ;;  %v9384_v30 = vpop.f32.mrf.mxu0  ;;  %10652 = vrcp.f32 %v2007_v43  ;;  %v1634_v0 = vsub.f32 0.0, %v12909_v10  ;;  %v9588_v8 = vpop.f32.mrf.mxu1  ;;  %10368 = vmatprep.subr.bf16.mxu1 %v16860_v47 }
 0x17b   : > { %16915 = vst [vmem:[#allocation63_spill] sm:$0xff] %v12919_v56  ;;  %v10641_v27 = vpop.eup %10640  ;;  %10654 = vpow2.f32 %v1796_v26  ;;  %v3430_v30 = vld [vmem:[%s12335_s21 + $0x1a0] sm:$0xff] }
 0x17c   : > { %v1248_v51 = vpop.f32.mrf.mxu0  ;;  %v10643_v19 = vpop.eup %10642  ;;  %v2008_v43 = vadd.f32 1.0, %v10641_v27  ;;  %v1798_v8 = vmul.f32 1.442695, %v1634_v0  ;;  %3664 = vperm.xlu1 %10424, %v3431_v61  }
 0x17d   : > { %v12936_v46 = vadd.f32 %v12608_v21, %v1248_v51  ;;  %v12938_v11 = vpop.f32.mrf.mxu1  ;;  %v12940_v58 = vpop.permute.xlu1 %2905  ;;  %3661 = vperm.xlu0 %10423, %v3430_v30   ;;  %v3433_v51 = vld [vmem:[%s12335_s21 + $0x1b8] sm:$0xff]  ;;  %v12956_v61 = vmul.f32 %v10643_v19, %v12716_v7 }
 0x17e   : > { %16917 = vst [vmem:[#allocation65_spill] sm:$0xff] %v12938_v11  ;;  %v12942_v15 = vpop.permute.xlu0 %2902  ;;  %v9385_v26 = vpop.f32.mrf.mxu0  ;;  %10656 = vrcp.f32 %v2008_v43  ;;  %9483 = vmatmul.mubr.msk.bf16.gmra.mxu0 %vm865_vm2, %v10485_v12  ;;  %v3432_v43 = vld [vmem:[%s12335_s21 + $0x1b0] sm:$0xff] }
 0x17f   : > { %16918 = vst [vmem:[#allocation66_spill] sm:$0xff] %v12942_v15  ;;  %v1635_v27 = vsub.f32 0.0, %v12936_v46  ;;  %v9589_v0 = vpop.f32.mrf.mxu1  ;;  %v10645_v56 = vpop.eup %10644  ;;  %16919 = vst [vmem:[#allocation67_spill] sm:$0xff] %v12956_v61  ;;  %10658 = vpow2.f32 %v1798_v8  ;;  %9687 = vmatmul.mubr.msk.bf16.gmra.mxu1 %vm8178_vm5, %v16863_v20  ;;  %9486 = vmatprep.mubr.msk.bf16.mxu0 %vm16826_vm1, %v16860_v47  ;;  %v3435_v8 = vld [vmem:[%s12335_s21 + $0x1c8] sm:$0xff]  ;;  %vm3003_vm5 = vcmp.eq.s32.totalorder %v11893_v34, %v12390_v16 }
 0x180   : > { %v1253_v26 = vpop.f32.mrf.mxu0  ;;  %v10647_v0 = vpop.eup %10646  ;;  %v2009_v30 = vadd.f32 1.0, %v10645_v56  ;;  %3670 = vperm.xlu1 %10424, %v3433_v51   ;;  %9690 = vmatprep.mubr.msk.bf16.mxu1 %vm16826_vm1, %v16860_v47  ;;  %vm8188_vm6 = vmpackc.low %vm3004_vm4, %vm3003_vm5 }
 0x181   : > { %v1800_v11 = vmul.f32 1.442695, %v1635_v27  ;;  %v12961_v15 = vadd.f32 %v12608_v21, %v1253_v26  ;;  %v12963_v35 = vpop.f32.mrf.mxu1  ;;  %v12966_v36 = vpop.permute.xlu1 %2911  ;;  %v12971_v7 = vmul.f32 %v10647_v0, %v12741_v55  ;;  %3667 = vperm.xlu0 %10423, %v3432_v43   ;;  %v3434_v0 = vld [vmem:[%s12335_s21 + $0x1c0] sm:$0xff] }
 0x182   : > { %16920 = vst [vmem:[#allocation68_spill] sm:$0xff] %v12963_v35  ;;  %16921 = vst [vmem:[#allocation69_spill] sm:$0xff] %v12966_v36  ;;  %v12973_v57 = vpop.permute.xlu0 %2908  ;;  %v9388_v19 = vpop.f32.mrf.mxu0  ;;  %10660 = vrcp.f32 %v2009_v30 }
 0x183   : > { %16922 = vst [vmem:[#allocation70_spill] sm:$0xff] %v12971_v7  ;;  %16923 = vst [vmem:[#allocation71_spill] sm:$0xff] %v12973_v57  ;;  %v1636_v56 = vsub.f32 0.0, %v12961_v15  ;;  %v9592_v12 = vpop.f32.mrf.mxu1  ;;  %v10649_v27 = vpop.eup %10648  ;;  %10662 = vpow2.f32 %v1800_v11  ;;  %v10486_v19 = vld [vmem:[%s11730_s20 + $0x168] sm:$0xff]  }
 0x184   : > { %v1256_v26 = vpop.f32.mrf.mxu0  ;;  %v10651_v51 = vpop.eup %10650  ;;  %3676 = vperm.xlu1 %10424, %v3435_v8   ;;  %v12998_v7 = vmul.f32 %v10649_v27, %v12758_v41  ;;  %v3436_v41 = vld [vmem:[%s12335_s21 + $0x1d0] sm:$0xff] }
 0x185   : > { %v1802_v43 = vmul.f32 1.442695, %v1636_v56  ;;  %v12989_v30 = vadd.f32 %v12608_v21, %v1256_v26  ;;  %v12991_v12 = vpop.f32.mrf.mxu1  ;;  %v12993_v35 = vpop.permute.xlu1 %2917  ;;  %v2010_v11 = vadd.f32 1.0, %v10651_v51  ;;  %3673 = vperm.xlu0 %10423, %v3434_v0   ;;  %v3437_v26 = vld [vmem:[%s12335_s21 + $0x1d8] sm:$0xff] }
 0x186   : > { %16924 = vst [vmem:[#allocation72_spill] sm:$0xff] %v12991_v12  ;;  %v12995_v55 = vpop.permute.xlu0 %2914  ;;  %v9389_v61 = vpop.f32.mrf.mxu0  ;;  %16925 = vst [vmem:[#allocation73_spill] sm:$0xff] %v12998_v7  ;;  %9487 = vmatmul.mubr.msk.bf16.gmra.mxu0 %vm865_vm2, %v10486_v19  ;;  %v10488_v12 = vld [vmem:[%s11730_s20 + $0x170] sm:$0xff]  }
 0x187   : > { %10664 = vpow2.f32 %v1802_v43  ;;  %v1637_v57 = vsub.f32 0.0, %v12989_v30  ;;  %v9593_v56 = vpop.f32.mrf.mxu1  ;;  %v10653_v36 = vpop.eup %10652  ;;  %9691 = vmatmul.mubr.msk.bf16.gmra.mxu1 %vm8180_vm8, %v16863_v20  ;;  %9490 = vmatprep.mubr.msk.bf16.mxu0 %vm16826_vm1, %v16860_v47  ;;  %vm3005_vm8 = vcmp.eq.s32.totalorder %v11893_v34, %v12413_v24 }
 0x188   : > { %10666 = vrcp.f32 %v2010_v11  ;;  %v1261_v61 = vpop.f32.mrf.mxu0  ;;  %v10655_v8 = vpop.eup %10654  ;;  %v13011_v27 = vmul.f32 %v10653_v36, %v12785_v17  ;;  %3682 = vperm.xlu1 %10424, %v3437_v26   ;;  %9694 = vmatprep.mubr.msk.bf16.mxu1 %vm16826_vm1, %v16860_v47  ;;  %v3439_v56 = vld [vmem:[%s12335_s21 + $0x1e8] sm:$0xff]  ;;  %vm8190_vm9 = vmpackc.low %vm3006_vm7, %vm3005_vm8  ;;  %vm3016_vm8 = vcmp.eq.s32.totalorder %v11893_v34, %v12517_v50 }
 0x189   : > { %v1804_v51 = vmul.f32 1.442695, %v1637_v57  ;;  %v13014_v0 = vadd.f32 %v12608_v21, %v1261_v61  ;;  %v13016_v43 = vpop.f32.mrf.mxu1  ;;  %v13019_v59 = vpop.permute.xlu1 %2923  ;;  %v2011_v63 = vadd.f32 1.0, %v10655_v8  ;;  %3679 = vperm.xlu0 %10423, %v3436_v41   ;;  %v3438_v8 = vld [vmem:[%s12335_s21 + $0x1e0] sm:$0xff] }
 0x18a   : > { %16926 = vst [vmem:[#allocation74_spill] sm:$0xff] %v13011_v27  ;;  %16927 = vst [vmem:[#allocation75_spill] sm:$0xff] %v13016_v43  ;;  %v13023_v19 = vpop.permute.xlu0 %2920  ;;  %v9392_v17 = vpop.f32.mrf.mxu0 }
 0x18b   : > { %16928 = vst [vmem:[#allocation76_spill] sm:$0xff] %v13023_v19  ;;  %10668 = vpow2.f32 %v1804_v51  ;;  %v1638_v57 = vsub.f32 0.0, %v13014_v0  ;;  %v9596_v11 = vpop.f32.mrf.mxu1  ;;  %v10657_v61 = vpop.eup %10656 }
 0x18c   : > { %10670 = vrcp.f32 %v2011_v63  ;;  %v1264_v43 = vpop.f32.mrf.mxu0  ;;  %v10659_v19 = vpop.eup %10658  ;;  %3688 = vperm.xlu1 %10424, %v3439_v56   ;;  %v13047_v7 = vmul.f32 %v10657_v61, %v12810_v44 }
 0x18d   : > { %v1806_v26 = vmul.f32 1.442695, %v1638_v57  ;;  %v13038_v51 = vadd.f32 %v12608_v21, %v1264_v43  ;;  %v13040_v17 = vpop.f32.mrf.mxu1  ;;  %v13042_v41 = vpop.permute.xlu1 %2929  ;;  %v2012_v63 = vadd.f32 1.0, %v10659_v19  ;;  %3685 = vperm.xlu0 %10423, %v3438_v8   ;;  %v3441_v43 = vld [vmem:[%s12335_s21 + $0x1f8] sm:$0xff]  ;;  %v3440_v19 = vld [vmem:[%s12335_s21 + $0x1f0] sm:$0xff] }
 0x18e   : > { %16929 = vst [vmem:[#allocation77_spill] sm:$0xff] %v13040_v17  ;;  %16930 = vst [vmem:[#allocation78_spill] sm:$0xff] %v13042_v41  ;;  %v13044_v11 = vpop.permute.xlu0 %2926  ;;  %v9393_v36 = vpop.f32.mrf.mxu0  ;;  %v10507_v17 = vld [vmem:[%s16724_s7 + $0x8] sm:$0xff]   ;;  %9491 = vmatmul.mubr.msk.bf16.gmra.mxu0 %vm865_vm2, %v10488_v12 }
 0x18f   : > { %16931 = vst [vmem:[#allocation79_spill] sm:$0xff] %v13044_v11  ;;  %16932 = vst [vmem:[#allocation80_spill] sm:$0xff] %v13047_v7  ;;  %10672 = vpow2.f32 %v1806_v26  ;;  %v1639_v27 = vsub.f32 0.0, %v13038_v51  ;;  %v9597_v57 = vpop.f32.mrf.mxu1  ;;  %v10661_v41 = vpop.eup %10660  ;;  %9695 = vmatmul.mubr.msk.bf16.gmra.mxu1 %vm8182_vm11, %v16863_v20  ;;  %9494 = vmatprep.mubr.msk.bf16.mxu0 %vm16826_vm1, %v16860_v47  ;;  %v3445_v11 = vld [vmem:[%s12335_s21 + $0x218] sm:$0xff]  ;;  %vm3007_vm11 = vcmp.eq.s32.totalorder %v11893_v34, %v12432_v5 }
 0x190   : > { %10674 = vrcp.f32 %v2012_v63  ;;  %v1269_v44 = vpop.f32.mrf.mxu0  ;;  %v10663_v36 = vpop.eup %10662  ;;  %v13063_v56 = vmul.f32 %v10661_v41, %v12834_v33  ;;  %3694 = vperm.xlu1 %10424, %v3441_v43   ;;  %9698 = vmatprep.mubr.msk.bf16.mxu1 %vm16826_vm1, %v16860_v47  ;;  %v3443_v57 = vld [vmem:[%s12335_s21 + $0x208] sm:$0xff]  ;;  %vm8192_vm12 = vmpackc.low %vm3008_vm10, %vm3007_vm11 }
 0x191   : > { %v1808_v61 = vmul.f32 1.442695, %v1639_v27  ;;  %v13066_v8 = vadd.f32 %v12608_v21, %v1269_v44  ;;  %v13068_v26 = vpop.f32.mrf.mxu1  ;;  %v13071_v25 = vpop.permute.xlu1 %2935  ;;  %v2013_v39 = vadd.f32 1.0, %v10663_v36  ;;  %3691 = vperm.xlu0 %10423, %v3440_v19   ;;  %9839 = vmatpush3.bf16.msra.mxu0 %v10507_v17  ;;  %v10509_v44 = vld [vmem:[%s16724_s7] sm:$0xff]  }
 0x192   : > { %16933 = vst [vmem:[#allocation81_spill] sm:$0xff] %v13063_v56  ;;  %16934 = vst [vmem:[#allocation82_spill] sm:$0xff] %v13068_v26  ;;  %v13075_v12 = vpop.permute.xlu0 %2932  ;;  %v9396_v33 = vpop.f32.mrf.mxu0  ;;  %v10489_v26 = vld [vmem:[%s11730_s20 + $0x178] sm:$0xff]   ;;  %9840 = vmatprep.subr.bf16.mxu0 %v16860_v47 }
 0x193   : > { %16935 = vst [vmem:[#allocation83_spill] sm:$0xff] %v13071_v25  ;;  %16936 = vst [vmem:[#allocation84_spill] sm:$0xff] %v13075_v12  ;;  %10676 = vpow2.f32 %v1808_v61  ;;  %v1640_v41 = vsub.f32 0.0, %v13066_v8  ;;  %v9600_v63 = vpop.f32.mrf.mxu1  ;;  %v3442_v33 = vld [vmem:[%s12335_s21 + $0x200] sm:$0xff] }
 0x194   : > { %v10665_v36 = vpop.eup %10664  ;;  %10678 = vrcp.f32 %v2013_v39  ;;  %v1272_v43 = vpop.f32.mrf.mxu0  ;;  %3700 = vperm.xlu1 %10424, %v3443_v57   ;;  %v3444_v57 = vld [vmem:[%s12335_s21 + $0x210] sm:$0xff] }
 0x195   : > { %v10667_v61 = vpop.eup %10666  ;;  %v2014_v17 = vadd.f32 1.0, %v10665_v36  ;;  %v1810_v19 = vmul.f32 1.442695, %v1640_v41  ;;  %v13094_v63 = vadd.f32 %v12608_v21, %v1272_v43  ;;  %v13096_v27 = vpop.f32.mrf.mxu1  ;;  %3697 = vperm.xlu0 %10423, %v3442_v33   ;;  %9841 = vmatpush3.bf16.msra.mxu0 %v10509_v44 }
 0x196   : > { %16937 = vst [vmem:[#allocation85_spill] sm:$0xff] %v13096_v27  ;;  %v13098_v7 = vpop.permute.xlu1 %3514  ;;  %v13100_v39 = vpop.permute.xlu0 %3511  ;;  %v13111_v36 = vmul.f32 %v10667_v61, %v12863_v6  ;;  %9495 = vmatmul.mubr.msk.bf16.gmra.mxu0 %vm865_vm2, %v10489_v26  ;;  %10094 = vmatprep.subr.bf16.mxu0 %v16860_v47 }
 0x197   : > { %v9397_v56 = vpop.f32.mrf.mxu0  ;;  %10680 = vrcp.f32 %v2014_v17  ;;  %v1641_v12 = vsub.f32 0.0, %v13094_v63  ;;  %v9601_v25 = vpop.f32.mrf.mxu1  ;;  %9699 = vmatmul.mubr.msk.bf16.gmra.mxu1 %vm8184_vm14, %v16863_v20  ;;  %9498 = vmatprep.mubr.msk.bf16.mxu0 %vm16826_vm1, %v16860_v47  ;;  %v3447_v17 = vld [vmem:[%s12335_s21 + $0x228] sm:$0xff] }
 0x198   : > { %v10669_v41 = vpop.eup %10668  ;;  %16938 = vst [vmem:[#allocation86_spill] sm:$0xff] %v13111_v36  ;;  %10682 = vpow2.f32 %v1810_v19  ;;  %3706 = vperm.xlu1 %10424, %v3445_v11   ;;  %9702 = vmatprep.mubr.msk.bf16.mxu1 %vm16826_vm1, %v16860_v47  ;;  %v10491_v11 = vld [vmem:[%s11730_s20 + $0x180] sm:$0xff]   ;;  %v3449_v36 = vld [vmem:[%s12335_s21 + $0x238] sm:$0xff] }
 0x199   : > { %v1277_v56 = vpop.f32.mrf.mxu0  ;;  %v10671_v25 = vpop.eup %10670  ;;  %v2015_v44 = vadd.f32 1.0, %v10669_v41  ;;  %v1812_v43 = vmul.f32 1.442695, %v1641_v12  ;;  %3703 = vperm.xlu0 %10423, %v3444_v57   ;;  %v13146_v57 = vld [vmem:[%s16723_s6] ss:$0 sm:$0xff] }
 0x19a   : > { %v13117_v31 = vadd.f32 %v12608_v21, %v1277_v56  ;;  %v13119_v33 = vpop.f32.mrf.mxu1  ;;  %v13122_v22 = vpop.permute.xlu1 %3520  ;;  %v13127_v6 = vmul.f32 %v10671_v25, %v12887_v13  ;;  %v3446_v56 = vld [vmem:[%s12335_s21 + $0x220] sm:$0xff] }
 0x19b   : > { %16939 = vst [vmem:[#allocation87_spill] sm:$0xff] %v13119_v33  ;;  %v13129_v26 = vpop.permute.xlu0 %3517  ;;  %v9400_v12 = vpop.f32.mrf.mxu0  ;;  %10684 = vrcp.f32 %v2015_v44 }
 0x19c   : > { %16940 = vst [vmem:[#allocation88_spill] sm:$0xff] %v13127_v6  ;;  %v1642_v21 = vsub.f32 0.0, %v13117_v31  ;;  %v9604_v61 = vpop.f32.mrf.mxu1  ;;  %v10673_v19 = vpop.eup %10672  ;;  %10686 = vpow2.f32 %v1812_v43  ;;  %3712 = vperm.xlu1 %10424, %v3447_v17   ;;  %v3448_v17 = vld [vmem:[%s12335_s21 + $0x230] sm:$0xff] }
 0x19d   : > { %v1280_v41 = vpop.f32.mrf.mxu0  ;;  %v10675_v25 = vpop.eup %10674  ;;  %v2016_v44 = vadd.f32 1.0, %v10673_v19  ;;  %3709 = vperm.xlu0 %10423, %v3446_v56  }
 0x19e   : > { %v1814_v12 = vmul.f32 1.442695, %v1642_v21  ;;  %v13149_v61 = vadd.f32 %v13146_v57, %v1280_v41  ;;  %v13151_v13 = vpop.f32.mrf.mxu1  ;;  %v13153_v43 = vpop.permute.xlu1 %3526  ;;  %v13166_v41 = vmul.f32 %v10675_v25, %v12909_v10  ;;  %9499 = vmatmul.mubr.msk.bf16.gmra.mxu0 %vm865_vm2, %v10491_v11 }
 0x19f   : > { %16941 = vst [vmem:[#allocation89_spill] sm:$0xff] %v13151_v13  ;;  %v13155_v33 = vpop.permute.xlu0 %3523  ;;  %v9401_v27 = vpop.f32.mrf.mxu0  ;;  %10688 = vrcp.f32 %v2016_v44  ;;  %9703 = vmatmul.mubr.msk.bf16.gmra.mxu1 %vm8186_vm3, %v16863_v20  ;;  %9502 = vmatprep.mubr.msk.bf16.mxu0 %vm16826_vm1, %v16860_v47 }
 0x1a0   : > { %16942 = vst [vmem:[#allocation90_spill] sm:$0xff] %v13155_v33  ;;  %v1643_v21 = vsub.f32 0.0, %v13149_v61  ;;  %v9605_v19 = vpop.f32.mrf.mxu1  ;;  %v10677_v6 = vpop.eup %10676  ;;  %16943 = vst [vmem:[#allocation91_spill] sm:$0xff] %v13166_v41  ;;  %10690 = vpow2.f32 %v1814_v12  ;;  %3718 = vperm.xlu1 %10424, %v3449_v36   ;;  %9706 = vmatprep.mubr.msk.bf16.mxu1 %vm16826_vm1, %v16860_v47 }
 0x1a1   : > { %v1285_v27 = vpop.f32.mrf.mxu0  ;;  %v10679_v44 = vpop.eup %10678  ;;  %v2017_v19 = vadd.f32 1.0, %v10677_v6  ;;  %3715 = vperm.xlu0 %10423, %v3448_v17  }
 0x1a2   : > { %v1816_v56 = vmul.f32 1.442695, %v1643_v21  ;;  %v13171_v13 = vadd.f32 %v13146_v57, %v1285_v27  ;;  %v13173_v45 = vpop.f32.mrf.mxu1  ;;  %v13176_v14 = vpop.permute.xlu1 %3532  ;;  %v13181_v10 = vmul.f32 %v10679_v44, %v12936_v46  ;;  %v3451_v21 = vld [vmem:[%s12335_s21 + $0x248] sm:$0xff]  ;;  %v3450_v44 = vld [vmem:[%s12335_s21 + $0x240] sm:$0xff] }
 0x1a3   : > { %16944 = vst [vmem:[#allocation92_spill] sm:$0xff] %v13173_v45  ;;  %16945 = vst [vmem:[#allocation93_spill] sm:$0xff] %v13176_v14  ;;  %v13183_v6 = vpop.permute.xlu0 %3529  ;;  %v9404_v11 = vpop.f32.mrf.mxu0  ;;  %10692 = vrcp.f32 %v2017_v19  ;;  %v10492_v14 = vld [vmem:[%s11730_s20 + $0x188] sm:$0xff]  }
 0x1a4   : > { %16946 = vst [vmem:[#allocation94_spill] sm:$0xff] %v13181_v10  ;;  %16947 = vst [vmem:[#allocation95_spill] sm:$0xff] %v13183_v6  ;;  %v1644_v25 = vsub.f32 0.0, %v13171_v13  ;;  %v9608_v12 = vpop.f32.mrf.mxu1  ;;  %v10681_v27 = vpop.eup %10680  ;;  %10694 = vpow2.f32 %v1816_v56  ;;  %3724 = vperm.xlu1 %10424, %v3451_v21  }
 0x1a5   : > { %v1288_v46 = vpop.f32.mrf.mxu0  ;;  %v10683_v6 = vpop.eup %10682  ;;  %v13207_v41 = vmul.f32 %v10681_v27, %v12961_v15  ;;  %3721 = vperm.xlu0 %10423, %v3450_v44   ;;  %v3452_v15 = vld [vmem:[%s12335_s21 + $0x250] sm:$0xff] }
 0x1a6   : > { %v1818_v36 = vmul.f32 1.442695, %v1644_v25  ;;  %v13198_v17 = vadd.f32 %v13146_v57, %v1288_v46  ;;  %v13200_v19 = vpop.f32.mrf.mxu1  ;;  %v13202_v11 = vpop.permute.xlu1 %3538  ;;  %v2018_v56 = vadd.f32 1.0, %v10683_v6  ;;  %v3453_v46 = vld [vmem:[%s12335_s21 + $0x258] sm:$0xff]  ;;  %9503 = vmatmul.mubr.msk.bf16.gmra.mxu0 %vm865_vm2, %v10492_v14 }
 0x1a7   : > { %16948 = vst [vmem:[#allocation96_spill] sm:$0xff] %v13200_v19  ;;  %v13204_v12 = vpop.permute.xlu0 %3535  ;;  %v9405_v45 = vpop.f32.mrf.mxu0  ;;  %16949 = vst [vmem:[#allocation97_spill] sm:$0xff] %v13207_v41  ;;  %9707 = vmatmul.mubr.msk.bf16.gmra.mxu1 %vm8188_vm6, %v16863_v20  ;;  %9506 = vmatprep.mubr.msk.bf16.mxu0 %vm16826_vm1, %v16860_v47  ;;  %v10493_v19 = vld [vmem:[%s11730_s20 + $0x190] sm:$0xff]  }
 0x1a8   : > { %10696 = vpow2.f32 %v1818_v36  ;;  %v1645_v10 = vsub.f32 0.0, %v13198_v17  ;;  %v9609_v25 = vpop.f32.mrf.mxu1  ;;  %v10685_v33 = vpop.eup %10684  ;;  %3730 = vperm.xlu1 %10424, %v3453_v46   ;;  %9710 = vmatprep.mubr.msk.bf16.mxu1 %vm16826_vm1, %v16860_v47 }
 0x1a9   : > { %10698 = vrcp.f32 %v2018_v56  ;;  %v1293_v45 = vpop.f32.mrf.mxu0  ;;  %v10687_v6 = vpop.eup %10686  ;;  %v13220_v21 = vmul.f32 %v10685_v33, %v12989_v30  ;;  %3727 = vperm.xlu0 %10423, %v3452_v15   ;;  %v3455_v25 = vld [vmem:[%s12335_s21 + $0x268] sm:$0xff] }
 0x1aa   : > { %v1820_v27 = vmul.f32 1.442695, %v1645_v10  ;;  %v13223_v44 = vadd.f32 %v13146_v57, %v1293_v45  ;;  %v13225_v36 = vpop.f32.mrf.mxu1  ;;  %v13228_v60 = vpop.permute.xlu1 %3544  ;;  %v2019_v16 = vadd.f32 1.0, %v10687_v6  ;;  %v3454_v6 = vld [vmem:[%s12335_s21 + $0x260] sm:$0xff] }
 0x1ab   : > { %16950 = vst [vmem:[#allocation98_spill] sm:$0xff] %v13220_v21  ;;  %16951 = vst [vmem:[#allocation99_spill] sm:$0xff] %v13225_v36  ;;  %v13232_v14 = vpop.permute.xlu0 %3541  ;;  %v9408_v30 = vpop.f32.mrf.mxu0 }
 0x1ac   : > { %16952 = vst [vmem:[#allocation100_spill] sm:$0xff] %v13228_v60  ;;  %16953 = vst [vmem:[#allocation101_spill] sm:$0xff] %v13232_v14  ;;  %10700 = vpow2.f32 %v1820_v27  ;;  %v1646_v10 = vsub.f32 0.0, %v13223_v44  ;;  %v9612_v56 = vpop.f32.mrf.mxu1  ;;  %v10689_v45 = vpop.eup %10688  ;;  %3736 = vperm.xlu1 %10424, %v3455_v25  }
 0x1ad   : > { %10702 = vrcp.f32 %v2019_v16  ;;  %v1296_v36 = vpop.f32.mrf.mxu0  ;;  %v10691_v14 = vpop.eup %10690  ;;  %v13256_v60 = vmul.f32 %v10689_v45, %v13014_v0  ;;  %3733 = vperm.xlu0 %10423, %v3454_v6   ;;  %v3456_v0 = vld [vmem:[%s12335_s21 + $0x270] sm:$0xff] }
 0x1ae   : > { %v1822_v46 = vmul.f32 1.442695, %v1646_v10  ;;  %v13247_v27 = vadd.f32 %v13146_v57, %v1296_v36  ;;  %v13249_v30 = vpop.f32.mrf.mxu1  ;;  %v13251_v15 = vpop.permute.xlu1 %3550  ;;  %v2020_v16 = vadd.f32 1.0, %v10691_v14  ;;  %v3457_v36 = vld [vmem:[%s12335_s21 + $0x278] sm:$0xff]  ;;  %9507 = vmatmul.mubr.msk.bf16.gmra.mxu0 %vm865_vm2, %v10493_v19 }
 0x1af   : > { %16954 = vst [vmem:[#allocation102_spill] sm:$0xff] %v13249_v30  ;;  %16955 = vst [vmem:[#allocation103_spill] sm:$0xff] %v13251_v15  ;;  %v13253_v56 = vpop.permute.xlu0 %3547  ;;  %v9409_v33 = vpop.f32.mrf.mxu0  ;;  %9711 = vmatmul.mubr.msk.bf16.gmra.mxu1 %vm8190_vm9, %v16863_v20  ;;  %9510 = vmatprep.mubr.msk.bf16.mxu0 %vm16826_vm1, %v16860_v47  ;;  %v3461_v15 = vld [vmem:[%s12335_s21 + $0x298] sm:$0xff]  ;;  %vm3015_vm9 = vcmp.eq.s32.totalorder %v11893_v34, %v12519_v29 }
 0x1b0   : > { %16956 = vst [vmem:[#allocation104_spill] sm:$0xff] %v13253_v56  ;;  %10704 = vpow2.f32 %v1822_v46  ;;  %v1647_v41 = vsub.f32 0.0, %v13247_v27  ;;  %v9613_v10 = vpop.f32.mrf.mxu1  ;;  %v10693_v21 = vpop.eup %10692  ;;  %3742 = vperm.xlu1 %10424, %v3457_v36   ;;  %9714 = vmatprep.mubr.msk.bf16.mxu1 %vm16826_vm1, %v16860_v47  ;;  %v10494_v36 = vld [vmem:[%s11730_s20 + $0x198] sm:$0xff]   ;;  %vm8200_vm10 = vmpackc.low %vm3016_vm8, %vm3015_vm9  ;;  %vm3026_vm9 = vcmp.eq.s32.totalorder %v11893_v34, %v12638_v37 }
 0x1b1   : > { %10706 = vrcp.f32 %v2020_v16  ;;  %v1301_v14 = vpop.f32.mrf.mxu0  ;;  %v10695_v33 = vpop.eup %10694  ;;  %v13269_v25 = vmul.f32 %v10693_v21, %v13038_v51  ;;  %3739 = vperm.xlu0 %10423, %v3456_v0   ;;  %v3459_v10 = vld [vmem:[%s12335_s21 + $0x288] sm:$0xff] }
 0x1b2   : > { %v1824_v45 = vmul.f32 1.442695, %v1647_v41  ;;  %v13272_v6 = vadd.f32 %v13146_v57, %v1301_v14  ;;  %v13274_v46 = vpop.f32.mrf.mxu1  ;;  %v13277_v49 = vpop.permute.xlu1 %3556  ;;  %v2021_v24 = vadd.f32 1.0, %v10695_v33 }
 0x1b3   : > { %16957 = vst [vmem:[#allocation105_spill] sm:$0xff] %v13274_v46  ;;  %16958 = vst [vmem:[#allocation106_spill] sm:$0xff] %v13277_v49  ;;  %v13281_v19 = vpop.permute.xlu0 %3553  ;;  %v9412_v51 = vpop.f32.mrf.mxu0 }
 0x1b4   : > { %16959 = vst [vmem:[#allocation107_spill] sm:$0xff] %v13281_v19  ;;  %10708 = vpow2.f32 %v1824_v45  ;;  %v1648_v21 = vsub.f32 0.0, %v13272_v6  ;;  %v9616_v16 = vpop.f32.mrf.mxu1  ;;  %v3458_v51 = vld [vmem:[%s12335_s21 + $0x280] sm:$0xff]  ;;  %3748 = vperm.xlu1 %10424, %v3459_v10  }
 0x1b5   : > { %v10697_v14 = vpop.eup %10696  ;;  %10710 = vrcp.f32 %v2021_v24  ;;  %v1304_v33 = vpop.f32.mrf.mxu0  ;;  %3745 = vperm.xlu0 %10423, %v3458_v51  }
 0x1b6   : > { %v10699_v46 = vpop.eup %10698  ;;  %v2022_v41 = vadd.f32 1.0, %v10697_v14  ;;  %v1826_v45 = vmul.f32 1.442695, %v1648_v21  ;;  %v13296_v30 = vadd.f32 %v13146_v57, %v1304_v33  ;;  %v13298_v0 = vpop.f32.mrf.mxu1  ;;  %9511 = vmatmul.mubr.msk.bf16.gmra.mxu0 %vm865_vm2, %v10494_v36 }
 0x1b7   : > { %16960 = vst [vmem:[#allocation108_spill] sm:$0xff] %v13298_v0  ;;  %v13300_v16 = vpop.permute.xlu1 %3562  ;;  %v13302_v19 = vpop.permute.xlu0 %3559  ;;  %v13313_v21 = vmul.f32 %v10699_v46, %v13066_v8  ;;  %9715 = vmatmul.mubr.msk.bf16.gmra.mxu1 %vm8192_vm12, %v16863_v20  ;;  %9514 = vmatprep.mubr.msk.bf16.mxu0 %vm16826_vm1, %v16860_v47 }
 0x1b8   : > { %16961 = vst [vmem:[#allocation109_spill] sm:$0xff] %v13300_v16  ;;  %16962 = vst [vmem:[#allocation110_spill] sm:$0xff] %v13302_v19  ;;  %v9413_v24 = vpop.f32.mrf.mxu0  ;;  %10712 = vrcp.f32 %v2022_v41  ;;  %v1649_v49 = vsub.f32 0.0, %v13296_v30  ;;  %v9617_v56 = vpop.f32.mrf.mxu1  ;;  %v3460_v41 = vld [vmem:[%s12335_s21 + $0x290] sm:$0xff]  ;;  %3754 = vperm.xlu1 %10424, %v3461_v15   ;;  %9718 = vmatprep.mubr.msk.bf16.mxu1 %vm16826_vm1, %v16860_v47  ;;  %v10495_v15 = vld [vmem:[%s11730_s20 + $0x1a0] sm:$0xff]  }
 0x1b9   : > { %v10701_v14 = vpop.eup %10700  ;;  %16963 = vst [vmem:[#allocation111_spill] sm:$0xff] %v13313_v21  ;;  %10714 = vpow2.f32 %v1826_v45  ;;  %3751 = vperm.xlu0 %10423, %v3460_v41   ;;  %v10510_v16 = vld [vmem:[%s16721_s4 + $0x8] sm:$0xff]  }
 0x1ba   : > { %v1309_v33 = vpop.f32.mrf.mxu0  ;;  %v10703_v10 = vpop.eup %10702  ;;  %v2023_v56 = vadd.f32 1.0, %v10701_v14  ;;  %v1828_v51 = vmul.f32 1.442695, %v1649_v49  ;;  %v3463_v14 = vld [vmem:[%s12335_s21 + $0x2a8] sm:$0xff]  ;;  %10376 = vmatpush3.bf16.msra.mxu1 %v10510_v16 }
 0x1bb   : > { %v13318_v24 = vadd.f32 %v13146_v57, %v1309_v33  ;;  %v13320_v5 = vpop.f32.mrf.mxu1  ;;  %v13323_v38 = vpop.permute.xlu1 %3568  ;;  %v13328_v8 = vmul.f32 %v10703_v10, %v13094_v63  ;;  %10369 = vmatprep.subr.bf16.mxu1 %v16860_v47 }
 0x1bc   : > { %16964 = vst [vmem:[#allocation112_spill] sm:$0xff] %v13320_v5  ;;  %16965 = vst [vmem:[#allocation113_spill] sm:$0xff] %v13323_v38  ;;  %v13330_v46 = vpop.permute.xlu0 %3565  ;;  %v9416_v49 = vpop.f32.mrf.mxu0  ;;  %10716 = vrcp.f32 %v2023_v56  ;;  %v16967_v5 = vld [vmem:[#allocation15_spill] sm:$0xff]  ;;  %3760 = vperm.xlu1 %10424, %v3463_v14  }
 0x1bd   : > { %16966 = vst [vmem:[#allocation114_spill] sm:$0xff] %v13330_v46  ;;  %v1650_v36 = vsub.f32 0.0, %v13318_v24  ;;  %v9620_v45 = vpop.f32.mrf.mxu1  ;;  %v10705_v33 = vpop.eup %10704  ;;  %vm3010_vm13 = vcmp.eq.s32.totalorder %v11893_v34, %v16967_v5  ;;  %10718 = vpow2.f32 %v1828_v51  ;;  %v3462_v49 = vld [vmem:[%s12335_s21 + $0x2a0] sm:$0xff]  ;;  %v16968_v46 = vld [vmem:[#allocation16_spill] sm:$0xff] }
 0x1be   : > { %v1312_v10 = vpop.f32.mrf.mxu0  ;;  %v10707_v0 = vpop.eup %10706  ;;  %vm3009_vm14 = vcmp.eq.s32.totalorder %v11893_v34, %v16968_v46  ;;  %v2024_v56 = vadd.f32 1.0, %v10705_v33  ;;  %3757 = vperm.xlu0 %10423, %v3462_v49   ;;  %9515 = vmatmul.mubr.msk.bf16.gmra.mxu0 %vm865_vm2, %v10495_v15 }
 0x1bf   : > { %v1830_v45 = vmul.f32 1.442695, %v1650_v36  ;;  %v13345_v41 = vadd.f32 %v13146_v57, %v1312_v10  ;;  %v13347_v38 = vpop.f32.mrf.mxu1  ;;  %v13349_v19 = vpop.permute.xlu1 %3574  ;;  %v3465_v10 = vld [vmem:[%s12335_s21 + $0x2b8] sm:$0xff]  ;;  %vm8194_vm15 = vmpackc.low %vm3010_vm13, %vm3009_vm14  ;;  %v13365_v14 = vmul.f32 %v10707_v0, %v13117_v31  ;;  %9518 = vmatprep.mubr.msk.bf16.mxu0 %vm16826_vm1, %v16860_v47  ;;  %vm3020_vm14 = vcmp.eq.s32.totalorder %v11893_v34, %v12563_v23 }
 0x1c0   : > { %16969 = vst [vmem:[#allocation15_spill] sm:$0xff] %v13347_v38  ;;  %16970 = vst [vmem:[#allocation16_spill] sm:$0xff] %v13349_v19  ;;  %v13351_v63 = vpop.permute.xlu0 %3571  ;;  %v9417_v51 = vpop.f32.mrf.mxu0  ;;  %10720 = vrcp.f32 %v2024_v56  ;;  %v3464_v56 = vld [vmem:[%s12335_s21 + $0x2b0] sm:$0xff]  ;;  %9719 = vmatmul.mubr.msk.bf16.gmra.mxu1 %vm8194_vm15, %v16863_v20  ;;  %3766 = vperm.xlu1 %10424, %v3465_v10   ;;  %vm3019_vm15 = vcmp.eq.s32.totalorder %v11893_v34, %v12565_v9 }
 0x1c1   : > { %16971 = vst [vmem:[#allocation115_spill] sm:$0xff] %v13351_v63  ;;  %v1651_v33 = vsub.f32 0.0, %v13345_v41  ;;  %v9621_v36 = vpop.f32.mrf.mxu1  ;;  %v10709_v21 = vpop.eup %10708  ;;  %16972 = vst [vmem:[#allocation116_spill] sm:$0xff] %v13365_v14  ;;  %10722 = vpow2.f32 %v1830_v45  ;;  %9722 = vmatprep.mubr.msk.bf16.mxu1 %vm16826_vm1, %v16860_v47  ;;  %v3467_v45 = vld [vmem:[%s12335_s21 + $0x2c8] sm:$0xff] }
 0x1c2   : > { %v1317_v51 = vpop.f32.mrf.mxu0  ;;  %v10711_v36 = vpop.eup %10710  ;;  %v2025_v49 = vadd.f32 1.0, %v10709_v21  ;;  %3763 = vperm.xlu0 %10423, %v3464_v56  }
 0x1c3   : > { %v1832_v38 = vmul.f32 1.442695, %v1651_v33  ;;  %v13370_v63 = vadd.f32 %v13146_v57, %v1317_v51  ;;  %v13372_v46 = vpop.f32.mrf.mxu1  ;;  %v13375_v5 = vpop.permute.xlu1 %3580  ;;  %v13380_v31 = vmul.f32 %v10711_v36, %v13149_v61  ;;  %v3466_v36 = vld [vmem:[%s12335_s21 + $0x2c0] sm:$0xff] }
 0x1c4   : > { %16973 = vst [vmem:[#allocation117_spill] sm:$0xff] %v13372_v46  ;;  %16974 = vst [vmem:[#allocation118_spill] sm:$0xff] %v13375_v5  ;;  %v13382_v0 = vpop.permute.xlu0 %3577  ;;  %v9420_v16 = vpop.f32.mrf.mxu0  ;;  %10724 = vrcp.f32 %v2025_v49  ;;  %v16977_v49 = vld [vmem:[#allocation17_spill] sm:$0xff]  ;;  %3772 = vperm.xlu1 %10424, %v3467_v45  }
 0x1c5   : > { %16975 = vst [vmem:[#allocation119_spill] sm:$0xff] %v13380_v31  ;;  %16976 = vst [vmem:[#allocation120_spill] sm:$0xff] %v13382_v0  ;;  %v1652_v21 = vsub.f32 0.0, %v13370_v63  ;;  %v9624_v15 = vpop.f32.mrf.mxu1  ;;  %v10713_v33 = vpop.eup %10712  ;;  %10726 = vpow2.f32 %v1832_v38  ;;  %v10496_v16 = vld [vmem:[%s11730_s20 + $0x1a8] sm:$0xff]   ;;  %vm3011_vm3 = vcmp.eq.s32.totalorder %v11893_v34, %v16977_v49 }
 0x1c6   : > { %v1320_v51 = vpop.f32.mrf.mxu0  ;;  %v10715_v10 = vpop.eup %10714  ;;  %v13407_v19 = vmul.f32 %v10713_v33, %v13171_v13  ;;  %3769 = vperm.xlu0 %10423, %v3466_v36   ;;  %vm8196_vm4 = vmpackc.low %vm3012_vm0, %vm3011_vm3  ;;  %9519 = vmatmul.mubr.msk.bf16.gmra.mxu0 %vm865_vm2, %v10496_v16  ;;  %v3468_v13 = vld [vmem:[%s12335_s21 + $0x2d0] sm:$0xff] }
 0x1c7   : > { %v1834_v56 = vmul.f32 1.442695, %v1652_v21  ;;  %v13398_v15 = vadd.f32 %v13146_v57, %v1320_v51  ;;  %v13400_v46 = vpop.f32.mrf.mxu1  ;;  %v13402_v0 = vpop.permute.xlu1 %3586  ;;  %v2026_v38 = vadd.f32 1.0, %v10715_v10  ;;  %v3469_v51 = vld [vmem:[%s12335_s21 + $0x2d8] sm:$0xff]  ;;  %9522 = vmatprep.mubr.msk.bf16.mxu0 %vm16826_vm1, %v16860_v47  ;;  %vm8204_vm0 = vmpackc.low %vm3020_vm14, %vm3019_vm15 }
 0x1c8   : > { %16978 = vst [vmem:[#allocation17_spill] sm:$0xff] %v13400_v46  ;;  %16979 = vst [vmem:[#allocation121_spill] sm:$0xff] %v13402_v0  ;;  %v13404_v61 = vpop.permute.xlu0 %3583  ;;  %v9421_v5 = vpop.f32.mrf.mxu0  ;;  %9723 = vmatmul.mubr.msk.bf16.gmra.mxu1 %vm8196_vm4, %v16863_v20  ;;  %3778 = vperm.xlu1 %10424, %v3469_v51   ;;  %v10498_v46 = vld [vmem:[%s11730_s20 + $0x1b0] sm:$0xff]  }
 0x1c9   : > { %16980 = vst [vmem:[#allocation122_spill] sm:$0xff] %v13404_v61  ;;  %16981 = vst [vmem:[#allocation123_spill] sm:$0xff] %v13407_v19  ;;  %10728 = vpow2.f32 %v1834_v56  ;;  %v1653_v14 = vsub.f32 0.0, %v13398_v15  ;;  %v9625_v21 = vpop.f32.mrf.mxu1  ;;  %v10717_v31 = vpop.eup %10716  ;;  %9726 = vmatprep.mubr.msk.bf16.mxu1 %vm16826_vm1, %v16860_v47  ;;  %v16987_v51 = vld [vmem:[#allocation21_spill] sm:$0xff] }
 0x1ca   : > { %10730 = vrcp.f32 %v2026_v38  ;;  %v1325_v5 = vpop.f32.mrf.mxu0  ;;  %v10719_v45 = vpop.eup %10718  ;;  %v13420_v33 = vmul.f32 %v10717_v31, %v13198_v17  ;;  %3775 = vperm.xlu0 %10423, %v3468_v13   ;;  %v3471_v21 = vld [vmem:[%s12335_s21 + $0x2e8] sm:$0xff]  ;;  %vm3013_vm6 = vcmp.eq.s32.totalorder %v11893_v34, %v16987_v51 }
 0x1cb   : > { %v1836_v10 = vmul.f32 1.442695, %v1653_v14  ;;  %v13423_v36 = vadd.f32 %v13146_v57, %v1325_v5  ;;  %v13425_v56 = vpop.f32.mrf.mxu1  ;;  %v13428_v3 = vpop.permute.xlu1 %3592  ;;  %v2027_v16 = vadd.f32 1.0, %v10719_v45  ;;  %v3470_v45 = vld [vmem:[%s12335_s21 + $0x2e0] sm:$0xff] }
 0x1cc   : > { %16982 = vst [vmem:[#allocation124_spill] sm:$0xff] %v13420_v33  ;;  %16983 = vst [vmem:[#allocation125_spill] sm:$0xff] %v13425_v56  ;;  %v13432_v49 = vpop.permute.xlu0 %3589  ;;  %v9424_v17 = vpop.f32.mrf.mxu0  ;;  %3784 = vperm.xlu1 %10424, %v3471_v21  }
 0x1cd   : > { %16984 = vst [vmem:[#allocation126_spill] sm:$0xff] %v13428_v3  ;;  %16985 = vst [vmem:[#allocation127_spill] sm:$0xff] %v13432_v49  ;;  %10732 = vpow2.f32 %v1836_v10  ;;  %v1654_v31 = vsub.f32 0.0, %v13423_v36  ;;  %v9628_v38 = vpop.f32.mrf.mxu1  ;;  %v10721_v5 = vpop.eup %10720  ;;  %v16986_v17 = vld [vmem:[#allocation20_spill] sm:$0xff] }
 0x1ce   : > { %10734 = vrcp.f32 %v2027_v16  ;;  %v1328_v56 = vpop.f32.mrf.mxu0  ;;  %v10723_v49 = vpop.eup %10722  ;;  %vm3014_vm5 = vcmp.eq.s32.totalorder %v11893_v34, %v16986_v17  ;;  %v13456_v0 = vmul.f32 %v10721_v5, %v13223_v44  ;;  %3781 = vperm.xlu0 %10423, %v3470_v45   ;;  %9523 = vmatmul.mubr.msk.bf16.gmra.mxu0 %vm865_vm2, %v10498_v46  ;;  %v3472_v44 = vld [vmem:[%s12335_s21 + $0x2f0] sm:$0xff] }
 0x1cf   : > { %v1838_v14 = vmul.f32 1.442695, %v1654_v31  ;;  %v13447_v10 = vadd.f32 %v13146_v57, %v1328_v56  ;;  %v13449_v38 = vpop.f32.mrf.mxu1  ;;  %v13451_v13 = vpop.permute.xlu1 %3598  ;;  %v2028_v16 = vadd.f32 1.0, %v10723_v49  ;;  %v3473_v56 = vld [vmem:[%s12335_s21 + $0x2f8] sm:$0xff]  ;;  %vm8198_vm7 = vmpackc.low %vm3014_vm5, %vm3013_vm6  ;;  %9526 = vmatprep.mubr.msk.bf16.mxu0 %vm16826_vm1, %v16860_v47  ;;  %vm3024_vm6 = vcmp.eq.s32.totalorder %v11893_v34, %v12613_v62 }
 0x1d0   : > { %16988 = vst [vmem:[#allocation20_spill] sm:$0xff] %v13449_v38  ;;  %16989 = vst [vmem:[#allocation21_spill] sm:$0xff] %v13451_v13  ;;  %v13453_v3 = vpop.permute.xlu0 %3595  ;;  %v9425_v61 = vpop.f32.mrf.mxu0  ;;  %9727 = vmatmul.mubr.msk.bf16.gmra.mxu1 %vm8198_vm7, %v16863_v20  ;;  %3790 = vperm.xlu1 %10424, %v3473_v56   ;;  %v10499_v56 = vld [vmem:[%s11730_s20 + $0x1b8] sm:$0xff]   ;;  %vm3023_vm7 = vcmp.eq.s32.totalorder %v11893_v34, %v12615_v18 }
 0x1d1   : > { %16990 = vst [vmem:[#allocation128_spill] sm:$0xff] %v13453_v3  ;;  %10736 = vpow2.f32 %v1838_v14  ;;  %v1655_v19 = vsub.f32 0.0, %v13447_v10  ;;  %v9629_v31 = vpop.f32.mrf.mxu1  ;;  %v10725_v33 = vpop.eup %10724  ;;  %9730 = vmatprep.mubr.msk.bf16.mxu1 %vm16826_vm1, %v16860_v47  ;;  %v3477_v13 = vld [vmem:[%s12335_s21 + $0x318] sm:$0xff]  ;;  %vm8208_vm8 = vmpackc.low %vm3024_vm6, %vm3023_vm7 }
 0x1d2   : > { %10738 = vrcp.f32 %v2028_v16  ;;  %v1333_v61 = vpop.f32.mrf.mxu0  ;;  %v10727_v49 = vpop.eup %10726  ;;  %v13469_v14 = vmul.f32 %v10725_v33, %v13247_v27  ;;  %3787 = vperm.xlu0 %10423, %v3472_v44   ;;  %v3475_v31 = vld [vmem:[%s12335_s21 + $0x308] sm:$0xff] }
 0x1d3   : > { %v1840_v21 = vmul.f32 1.442695, %v1655_v19  ;;  %v13472_v5 = vadd.f32 %v13146_v57, %v1333_v61  ;;  %v13474_v45 = vpop.f32.mrf.mxu1  ;;  %v13477_v17 = vpop.permute.xlu1 %3604  ;;  %v2029_v46 = vadd.f32 1.0, %v10727_v49 }
 0x1d4   : > { %16991 = vst [vmem:[#allocation129_spill] sm:$0xff] %v13474_v45  ;;  %16992 = vst [vmem:[#allocation130_spill] sm:$0xff] %v13477_v17  ;;  %v13481_v51 = vpop.permute.xlu0 %3601  ;;  %v9428_v27 = vpop.f32.mrf.mxu0  ;;  %3796 = vperm.xlu1 %10424, %v3475_v31  }
 0x1d5   : > { %16993 = vst [vmem:[#allocation131_spill] sm:$0xff] %v13481_v51  ;;  %10740 = vpow2.f32 %v1840_v21  ;;  %v1656_v33 = vsub.f32 0.0, %v13472_v5  ;;  %v9632_v16 = vpop.f32.mrf.mxu1  ;;  %v3474_v27 = vld [vmem:[%s12335_s21 + $0x300] sm:$0xff] }
 0x1d6   : > { %v10729_v61 = vpop.eup %10728  ;;  %10742 = vrcp.f32 %v2029_v46  ;;  %v1336_v49 = vpop.f32.mrf.mxu0  ;;  %3793 = vperm.xlu0 %10423, %v3474_v27   ;;  %9527 = vmatmul.mubr.msk.bf16.gmra.mxu0 %vm865_vm2, %v10499_v56 }
 0x1d7   : > { %v10731_v45 = vpop.eup %10730  ;;  %v2030_v19 = vadd.f32 1.0, %v10729_v61  ;;  %v1842_v21 = vmul.f32 1.442695, %v1656_v33  ;;  %v13496_v38 = vadd.f32 %v13146_v57, %v1336_v49  ;;  %v13498_v44 = vpop.f32.mrf.mxu1  ;;  %9530 = vmatprep.mubr.msk.bf16.mxu0 %vm16826_vm1, %v16860_v47 }
 0x1d8   : > { %16994 = vst [vmem:[#allocation132_spill] sm:$0xff] %v13498_v44  ;;  %v13500_v16 = vpop.permute.xlu1 %3610  ;;  %v13502_v51 = vpop.permute.xlu0 %3607  ;;  %v13513_v33 = vmul.f32 %v10731_v45, %v13272_v6  ;;  %9731 = vmatmul.mubr.msk.bf16.gmra.mxu1 %vm8200_vm10, %v16863_v20  ;;  %3802 = vperm.xlu1 %10424, %v3477_v13   ;;  %v10501_v13 = vld [vmem:[%s11730_s20 + $0x1c0] sm:$0xff]  }
 0x1d9   : > { %16995 = vst [vmem:[#allocation133_spill] sm:$0xff] %v13500_v16  ;;  %16996 = vst [vmem:[#allocation134_spill] sm:$0xff] %v13502_v51  ;;  %v9429_v46 = vpop.f32.mrf.mxu0  ;;  %10744 = vrcp.f32 %v2030_v19  ;;  %v1657_v17 = vsub.f32 0.0, %v13496_v38  ;;  %v9633_v3 = vpop.f32.mrf.mxu1  ;;  %v3476_v19 = vld [vmem:[%s12335_s21 + $0x310] sm:$0xff]  ;;  %9734 = vmatprep.mubr.msk.bf16.mxu1 %vm16826_vm1, %v16860_v47 }
 0x1da   : > { %v10733_v61 = vpop.eup %10732  ;;  %16997 = vst [vmem:[#allocation135_spill] sm:$0xff] %v13513_v33  ;;  %10746 = vpow2.f32 %v1842_v21  ;;  %3799 = vperm.xlu0 %10423, %v3476_v19  }
 0x1db   : > { %v1341_v49 = vpop.f32.mrf.mxu0  ;;  %v10735_v31 = vpop.eup %10734  ;;  %v2031_v3 = vadd.f32 1.0, %v10733_v61  ;;  %v1844_v27 = vmul.f32 1.442695, %v1657_v17  ;;  %v3479_v61 = vld [vmem:[%s12335_s21 + $0x328] sm:$0xff] }
 0x1dc   : > { %v13518_v46 = vadd.f32 %v13146_v57, %v1341_v49  ;;  %v13520_v29 = vpop.f32.mrf.mxu1  ;;  %v13523_v50 = vpop.permute.xlu1 %3616  ;;  %v13528_v6 = vmul.f32 %v10735_v31, %v13296_v30  ;;  %3808 = vperm.xlu1 %10424, %v3479_v61   ;;  %v3480_v61 = vld [vmem:[%s12335_s21 + $0x330] sm:$0xff] }
 0x1dd   : > { %16998 = vst [vmem:[#allocation136_spill] sm:$0xff] %v13520_v29  ;;  %16999 = vst [vmem:[#allocation137_spill] sm:$0xff] %v13523_v50  ;;  %v13530_v45 = vpop.permute.xlu0 %3613  ;;  %v9432_v17 = vpop.f32.mrf.mxu0  ;;  %10748 = vrcp.f32 %v2031_v3  ;;  %v17002_v29 = vld [vmem:[#allocation23_spill] sm:$0xff] }
 0x1de   : > { %17000 = vst [vmem:[#allocation138_spill] sm:$0xff] %v13528_v6  ;;  %17001 = vst [vmem:[#allocation139_spill] sm:$0xff] %v13530_v45  ;;  %v1658_v56 = vsub.f32 0.0, %v13518_v46  ;;  %v9636_v21 = vpop.f32.mrf.mxu1  ;;  %v10737_v49 = vpop.eup %10736  ;;  %vm3018_vm11 = vcmp.eq.s32.totalorder %v11893_v34, %v17002_v29  ;;  %10750 = vpow2.f32 %v1844_v27  ;;  %v3478_v17 = vld [vmem:[%s12335_s21 + $0x320] sm:$0xff]  ;;  %v17003_v45 = vld [vmem:[#allocation25_spill] sm:$0xff]  ;;  %9531 = vmatmul.mubr.msk.bf16.gmra.mxu0 %vm865_vm2, %v10501_v13 }
 0x1df   : > { %v1344_v31 = vpop.f32.mrf.mxu0  ;;  %v10739_v44 = vpop.eup %10738  ;;  %vm3017_vm12 = vcmp.eq.s32.totalorder %v11893_v34, %v17003_v45  ;;  %v2032_v3 = vadd.f32 1.0, %v10737_v49  ;;  %3805 = vperm.xlu0 %10423, %v3478_v17   ;;  %v3481_v6 = vld [vmem:[%s12335_s21 + $0x338] sm:$0xff]  ;;  %9534 = vmatprep.mubr.msk.bf16.mxu0 %vm16826_vm1, %v16860_v47 }
 0x1e0   : > { %v1846_v21 = vmul.f32 1.442695, %v1658_v56  ;;  %v13545_v19 = vadd.f32 %v13146_v57, %v1344_v31  ;;  %v13547_v50 = vpop.f32.mrf.mxu1  ;;  %v13549_v51 = vpop.permute.xlu1 %3622  ;;  %vm8202_vm13 = vmpackc.low %vm3018_vm11, %vm3017_vm12  ;;  %v13562_v56 = vmul.f32 %v10739_v44, %v13318_v24  ;;  %3814 = vperm.xlu1 %10424, %v3481_v6   ;;  %vm3028_vm12 = vcmp.eq.s32.totalorder %v11893_v34, %v12659_v32 }
 0x1e1   : > { %17004 = vst [vmem:[#allocation23_spill] sm:$0xff] %v13547_v50  ;;  %17005 = vst [vmem:[#allocation25_spill] sm:$0xff] %v13549_v51  ;;  %v13551_v30 = vpop.permute.xlu0 %3619  ;;  %v9433_v27 = vpop.f32.mrf.mxu0  ;;  %10752 = vrcp.f32 %v2032_v3  ;;  %9735 = vmatmul.mubr.msk.bf16.gmra.mxu1 %vm8202_vm13, %v16863_v20  ;;  %v10502_v50 = vld [vmem:[%s11730_s20 + $0x1c8] sm:$0xff]  }
 0x1e2   : > { %17006 = vst [vmem:[#allocation140_spill] sm:$0xff] %v13551_v30  ;;  %v1659_v16 = vsub.f32 0.0, %v13545_v19  ;;  %v9637_v33 = vpop.f32.mrf.mxu1  ;;  %v10741_v49 = vpop.eup %10740  ;;  %10754 = vpow2.f32 %v1846_v21  ;;  %9738 = vmatprep.mubr.msk.bf16.mxu1 %vm16826_vm1, %v16860_v47 }
 0x1e3   : > { %v1349_v31 = vpop.f32.mrf.mxu0  ;;  %v10743_v3 = vpop.eup %10742  ;;  %v2033_v33 = vadd.f32 1.0, %v10741_v49  ;;  %3811 = vperm.xlu0 %10423, %v3480_v61   ;;  %v3483_v49 = vld [vmem:[%s12335_s21 + $0x348] sm:$0xff] }
 0x1e4   : > { %v1848_v17 = vmul.f32 1.442695, %v1659_v16  ;;  %v13567_v27 = vadd.f32 %v13146_v57, %v1349_v31  ;;  %v13569_v45 = vpop.f32.mrf.mxu1  ;;  %v13572_v29 = vpop.permute.xlu1 %3628  ;;  %v13577_v24 = vmul.f32 %v10743_v3, %v13345_v41  ;;  %v3482_v3 = vld [vmem:[%s12335_s21 + $0x340] sm:$0xff]  ;;  %3820 = vperm.xlu1 %10424, %v3483_v49  }
 0x1e5   : > { %17007 = vst [vmem:[#allocation141_spill] sm:$0xff] %v13569_v45  ;;  %17008 = vst [vmem:[#allocation142_spill] sm:$0xff] %v13572_v29  ;;  %v13579_v44 = vpop.permute.xlu0 %3625  ;;  %v9436_v16 = vpop.f32.mrf.mxu0  ;;  %10756 = vrcp.f32 %v2033_v33 }
 0x1e6   : > { %17009 = vst [vmem:[#allocation143_spill] sm:$0xff] %v13579_v44  ;;  %v1660_v13 = vsub.f32 0.0, %v13567_v27  ;;  %v9640_v21 = vpop.f32.mrf.mxu1  ;;  %v10745_v31 = vpop.eup %10744  ;;  %10758 = vpow2.f32 %v1848_v17  ;;  %9535 = vmatmul.mubr.msk.bf16.gmra.mxu0 %vm865_vm2, %v10502_v50 }
 0x1e7   : > { %v1352_v41 = vpop.f32.mrf.mxu0  ;;  %v10747_v44 = vpop.eup %10746  ;;  %v13603_v29 = vmul.f32 %v10745_v31, %v13370_v63  ;;  %3817 = vperm.xlu0 %10423, %v3482_v3   ;;  %v3484_v63 = vld [vmem:[%s12335_s21 + $0x350] sm:$0xff]  ;;  %9538 = vmatprep.mubr.msk.bf16.mxu0 %vm16826_vm1, %v16860_v47 }
 0x1e8   : > { %v1850_v6 = vmul.f32 1.442695, %v1660_v13  ;;  %v13594_v61 = vadd.f32 %v13146_v57, %v1352_v41  ;;  %v13596_v33 = vpop.f32.mrf.mxu1  ;;  %v13598_v16 = vpop.permute.xlu1 %3634  ;;  %v2034_v17 = vadd.f32 1.0, %v10747_v44  ;;  %v3485_v41 = vld [vmem:[%s12335_s21 + $0x358] sm:$0xff] }
 0x1e9   : > { %17010 = vst [vmem:[#allocation144_spill] sm:$0xff] %v13596_v33  ;;  %17011 = vst [vmem:[#allocation145_spill] sm:$0xff] %v13598_v16  ;;  %v13600_v21 = vpop.permute.xlu0 %3631  ;;  %v9437_v45 = vpop.f32.mrf.mxu0  ;;  %9739 = vmatmul.mubr.msk.bf16.gmra.mxu1 %vm8204_vm0, %v16863_v20  ;;  %3826 = vperm.xlu1 %10424, %v3485_v41   ;;  %v10503_v33 = vld [vmem:[%s11730_s20 + $0x1d0] sm:$0xff]  }
 0x1ea   : > { %17012 = vst [vmem:[#allocation146_spill] sm:$0xff] %v13600_v21  ;;  %17013 = vst [vmem:[#allocation147_spill] sm:$0xff] %v13603_v29  ;;  %10760 = vpow2.f32 %v1850_v6  ;;  %v1661_v30 = vsub.f32 0.0, %v13594_v61  ;;  %v9641_v13 = vpop.f32.mrf.mxu1  ;;  %v10749_v51 = vpop.eup %10748  ;;  %9742 = vmatprep.mubr.msk.bf16.mxu1 %vm16826_vm1, %v16860_v47  ;;  %v17019_v41 = vld [vmem:[#allocation29_spill] sm:$0xff] }
 0x1eb   : > { %10762 = vrcp.f32 %v2034_v17  ;;  %v1357_v45 = vpop.f32.mrf.mxu0  ;;  %v10751_v44 = vpop.eup %10750  ;;  %v13616_v49 = vmul.f32 %v10749_v51, %v13398_v15  ;;  %3823 = vperm.xlu0 %10423, %v3484_v63   ;;  %v3487_v13 = vld [vmem:[%s12335_s21 + $0x368] sm:$0xff]  ;;  %vm3021_vm4 = vcmp.eq.s32.totalorder %v11893_v34, %v17019_v41 }
 0x1ec   : > { %v1852_v31 = vmul.f32 1.442695, %v1661_v30  ;;  %v13619_v3 = vadd.f32 %v13146_v57, %v1357_v45  ;;  %v13621_v6 = vpop.f32.mrf.mxu1  ;;  %v13624_v9 = vpop.permute.xlu1 %3640  ;;  %v2035_v23 = vadd.f32 1.0, %v10751_v44  ;;  %v3486_v44 = vld [vmem:[%s12335_s21 + $0x360] sm:$0xff] }
 0x1ed   : > { %17014 = vst [vmem:[#allocation148_spill] sm:$0xff] %v13616_v49  ;;  %17015 = vst [vmem:[#allocation149_spill] sm:$0xff] %v13621_v6  ;;  %v13628_v50 = vpop.permute.xlu0 %3637  ;;  %v9440_v15 = vpop.f32.mrf.mxu0  ;;  %3832 = vperm.xlu1 %10424, %v3487_v13  }
 0x1ee   : > { %17016 = vst [vmem:[#allocation150_spill] sm:$0xff] %v13624_v9  ;;  %17017 = vst [vmem:[#allocation151_spill] sm:$0xff] %v13628_v50  ;;  %10764 = vpow2.f32 %v1852_v31  ;;  %v1662_v30 = vsub.f32 0.0, %v13619_v3  ;;  %v9644_v17 = vpop.f32.mrf.mxu1  ;;  %v10753_v45 = vpop.eup %10752  ;;  %v17018_v15 = vld [vmem:[#allocation27_spill] sm:$0xff]  ;;  %9539 = vmatmul.mubr.msk.bf16.gmra.mxu0 %vm865_vm2, %v10503_v33 }
 0x1ef   : > { %10766 = vrcp.f32 %v2035_v23  ;;  %v1360_v6 = vpop.f32.mrf.mxu0  ;;  %v10755_v50 = vpop.eup %10754  ;;  %vm3022_vm3 = vcmp.eq.s32.totalorder %v11893_v34, %v17018_v15  ;;  %v13652_v16 = vmul.f32 %v10753_v45, %v13423_v36  ;;  %3829 = vperm.xlu0 %10423, %v3486_v44   ;;  %v3488_v36 = vld [vmem:[%s12335_s21 + $0x370] sm:$0xff]  ;;  %9542 = vmatprep.mubr.msk.bf16.mxu0 %vm16826_vm1, %v16860_v47 }
 0x1f0   : > { %v1854_v51 = vmul.f32 1.442695, %v1662_v30  ;;  %v13643_v31 = vadd.f32 %v13146_v57, %v1360_v6  ;;  %v13645_v17 = vpop.f32.mrf.mxu1  ;;  %v13647_v63 = vpop.permute.xlu1 %3646  ;;  %v2036_v23 = vadd.f32 1.0, %v10755_v50  ;;  %v3489_v6 = vld [vmem:[%s12335_s21 + $0x378] sm:$0xff]  ;;  %vm8206_vm5 = vmpackc.low %vm3022_vm3, %vm3021_vm4  ;;  %vm3031_vm4 = vcmp.eq.s32.totalorder %v11893_v34, %v12703_v54 }
 0x1f1   : > { %17020 = vst [vmem:[#allocation27_spill] sm:$0xff] %v13645_v17  ;;  %17021 = vst [vmem:[#allocation29_spill] sm:$0xff] %v13647_v63  ;;  %v13649_v9 = vpop.permute.xlu0 %3643  ;;  %v9441_v21 = vpop.f32.mrf.mxu0  ;;  %9743 = vmatmul.mubr.msk.bf16.gmra.mxu1 %vm8206_vm5, %v16863_v20  ;;  %3838 = vperm.xlu1 %10424, %v3489_v6   ;;  %v10504_v6 = vld [vmem:[%s11730_s20 + $0x1d8] sm:$0xff]  }
 0x1f2   : > { %17022 = vst [vmem:[#allocation152_spill] sm:$0xff] %v13649_v9  ;;  %10768 = vpow2.f32 %v1854_v51  ;;  %v1663_v29 = vsub.f32 0.0, %v13643_v31  ;;  %v9645_v30 = vpop.f32.mrf.mxu1  ;;  %v10757_v49 = vpop.eup %10756  ;;  %9746 = vmatprep.mubr.msk.bf16.mxu1 %vm16826_vm1, %v16860_v47 }
 0x1f3   : > { %10770 = vrcp.f32 %v2036_v23  ;;  %v1365_v21 = vpop.f32.mrf.mxu0  ;;  %v10759_v50 = vpop.eup %10758  ;;  %v13665_v51 = vmul.f32 %v10757_v49, %v13447_v10  ;;  %3835 = vperm.xlu0 %10423, %v3488_v36   ;;  %v3491_v23 = vld [vmem:[%s12335_s21 + $0x388] sm:$0xff]  ;;  %v13694_v36 = vld [vmem:[%s16723_s6] ss:$0 sm:$0xff] }
 0x1f4   : > { %v1856_v13 = vmul.f32 1.442695, %v1663_v29  ;;  %v13668_v45 = vadd.f32 %v13146_v57, %v1365_v21  ;;  %v13670_v44 = vpop.f32.mrf.mxu1  ;;  %v13673_v15 = vpop.permute.xlu1 %3652  ;;  %v2037_v33 = vadd.f32 1.0, %v10759_v50  ;;  %v3490_v50 = vld [vmem:[%s12335_s21 + $0x380] sm:$0xff] }
 0x1f5   : > { %17023 = vst [vmem:[#allocation153_spill] sm:$0xff] %v13670_v44  ;;  %17024 = vst [vmem:[#allocation154_spill] sm:$0xff] %v13673_v15  ;;  %v13677_v41 = vpop.permute.xlu0 %3649  ;;  %v9444_v10 = vpop.f32.mrf.mxu0  ;;  %3844 = vperm.xlu1 %10424, %v3491_v23   ;;  %v3493_v15 = vld [vmem:[%s12335_s21 + $0x398] sm:$0xff] }
 0x1f6   : > { %17025 = vst [vmem:[#allocation155_spill] sm:$0xff] %v13677_v41  ;;  %10772 = vpow2.f32 %v1856_v13  ;;  %v1664_v29 = vsub.f32 0.0, %v13668_v45  ;;  %v9648_v49 = vpop.f32.mrf.mxu1  ;;  %9543 = vmatmul.mubr.msk.bf16.gmra.mxu0 %vm865_vm2, %v10504_v6 }
 0x1f7   : > { %v10761_v30 = vpop.eup %10760  ;;  %10774 = vrcp.f32 %v2037_v33  ;;  %v1368_v21 = vpop.f32.mrf.mxu0  ;;  %3841 = vperm.xlu0 %10423, %v3490_v50   ;;  %9546 = vmatprep.mubr.msk.bf16.mxu0 %vm16826_vm1, %v16860_v47 }
 0x1f8   : > { %v10763_v10 = vpop.eup %10762  ;;  %v2038_v57 = vadd.f32 1.0, %v10761_v30  ;;  %v1858_v13 = vmul.f32 1.442695, %v1664_v29  ;;  %v13697_v49 = vadd.f32 %v13694_v36, %v1368_v21  ;;  %v13699_v44 = vpop.f32.mrf.mxu1 }
 0x1f9   : > { %17026 = vst [vmem:[#allocation156_spill] sm:$0xff] %v13699_v44  ;;  %v13701_v33 = vpop.permute.xlu1 %3658  ;;  %v13703_v17 = vpop.permute.xlu0 %3655  ;;  %v13714_v21 = vmul.f32 %v10763_v10, %v13472_v5  ;;  %9747 = vmatmul.mubr.msk.bf16.gmra.mxu1 %vm8208_vm8, %v16863_v20  ;;  %3850 = vperm.xlu1 %10424, %v3493_v15   ;;  %v10505_v15 = vld [vmem:[%s11730_s20 + $0x1e0] sm:$0xff]  }
 0x1fa   : > { %17027 = vst [vmem:[#allocation157_spill] sm:$0xff] %v13701_v33  ;;  %17028 = vst [vmem:[#allocation158_spill] sm:$0xff] %v13703_v17  ;;  %v9445_v41 = vpop.f32.mrf.mxu0  ;;  %10776 = vrcp.f32 %v2038_v57  ;;  %v1665_v29 = vsub.f32 0.0, %v13697_v49  ;;  %v9649_v30 = vpop.f32.mrf.mxu1  ;;  %v3492_v57 = vld [vmem:[%s12335_s21 + $0x390] sm:$0xff]  ;;  %9750 = vmatprep.mubr.msk.bf16.mxu1 %vm16826_vm1, %v16860_v47  ;;  %v13757_v33 = vld [vmem:[%s16721_s4] sm:$0xff]  }
 0x1fb   : > { %v10765_v9 = vpop.eup %10764  ;;  %17029 = vst [vmem:[#allocation159_spill] sm:$0xff] %v13714_v21  ;;  %10778 = vpow2.f32 %v1858_v13  ;;  %3847 = vperm.xlu0 %10423, %v3492_v57   ;;  %10377 = vmatpush3.bf16.msra.mxu1 %v13757_v33 }
 0x1fc   : > { %v1373_v41 = vpop.f32.mrf.mxu0  ;;  %v10767_v23 = vpop.eup %10766  ;;  %v2039_v30 = vadd.f32 1.0, %v10765_v9  ;;  %v1860_v50 = vmul.f32 1.442695, %v1665_v29  ;;  %v3495_v29 = vld [vmem:[%s12335_s21 + $0x3a8] sm:$0xff] }
 0x1fd   : > { %v13719_v44 = vadd.f32 %v13694_v36, %v1373_v41  ;;  %v13721_v18 = vpop.f32.mrf.mxu1  ;;  %v13724_v62 = vpop.permute.xlu1 %3664  ;;  %v13729_v5 = vmul.f32 %v10767_v23, %v13496_v38  ;;  %3856 = vperm.xlu1 %10424, %v3495_v29  }
 0x1fe   : > { %17030 = vst [vmem:[#allocation160_spill] sm:$0xff] %v13721_v18  ;;  %17031 = vst [vmem:[#allocation161_spill] sm:$0xff] %v13724_v62  ;;  %v13731_v9 = vpop.permute.xlu0 %3661  ;;  %v9448_v6 = vpop.f32.mrf.mxu0  ;;  %10780 = vrcp.f32 %v2039_v30  ;;  %9547 = vmatmul.mubr.msk.bf16.gmra.mxu0 %vm865_vm2, %v10505_v15 }
 0x1ff   : > { %17032 = vst [vmem:[#allocation162_spill] sm:$0xff] %v13731_v9  ;;  %v1666_v10 = vsub.f32 0.0, %v13719_v44  ;;  %v9652_v13 = vpop.f32.mrf.mxu1  ;;  %v10769_v41 = vpop.eup %10768  ;;  %10782 = vpow2.f32 %v1860_v50  ;;  %v3494_v6 = vld [vmem:[%s12335_s21 + $0x3a0] sm:$0xff]  ;;  %v17033_v9 = vld [vmem:[#allocation32_spill] sm:$0xff]  ;;  %9550 = vmatprep.mubr.msk.bf16.mxu0 %vm16826_vm1, %v16860_v47 }
 0x200   : > { %v1376_v23 = vpop.f32.mrf.mxu0  ;;  %v10771_v18 = vpop.eup %10770  ;;  %vm3025_vm10 = vcmp.eq.s32.totalorder %v11893_v34, %v17033_v9  ;;  %v2040_v30 = vadd.f32 1.0, %v10769_v41  ;;  %3853 = vperm.xlu0 %10423, %v3494_v6  }
 0x201   : > { %v1862_v13 = vmul.f32 1.442695, %v1666_v10  ;;  %v13746_v57 = vadd.f32 %v13694_v36, %v1376_v23  ;;  %v13748_v62 = vpop.f32.mrf.mxu1  ;;  %v13750_v17 = vpop.permute.xlu1 %3670  ;;  %v3497_v23 = vld [vmem:[%s12335_s21 + $0x3b8] sm:$0xff]  ;;  %vm8210_vm11 = vmpackc.low %vm3026_vm9, %vm3025_vm10  ;;  %v13768_v29 = vmul.f32 %v10771_v18, %v13518_v46  ;;  %vm3036_vm9 = vcmp.eq.s32.totalorder %v11893_v34, %v12743_v40 }
 0x202   : > { %17034 = vst [vmem:[#allocation32_spill] sm:$0xff] %v13748_v62  ;;  %17035 = vst [vmem:[#allocation163_spill] sm:$0xff] %v13750_v17  ;;  %v13752_v38 = vpop.permute.xlu0 %3667  ;;  %v9449_v50 = vpop.f32.mrf.mxu0  ;;  %10784 = vrcp.f32 %v2040_v30  ;;  %v3496_v30 = vld [vmem:[%s12335_s21 + $0x3b0] sm:$0xff]  ;;  %9751 = vmatmul.mubr.msk.bf16.gmra.mxu1 %vm8210_vm11, %v16863_v20  ;;  %3862 = vperm.xlu1 %10424, %v3497_v23  }
 0x203   : > { %17036 = vst [vmem:[#allocation164_spill] sm:$0xff] %v13752_v38  ;;  %v1667_v10 = vsub.f32 0.0, %v13746_v57  ;;  %v9653_v41 = vpop.f32.mrf.mxu1  ;;  %v10773_v63 = vpop.eup %10772  ;;  %17037 = vst [vmem:[#allocation165_spill] sm:$0xff] %v13768_v29  ;;  %10786 = vpow2.f32 %v1862_v13  ;;  %9754 = vmatprep.mubr.msk.bf16.mxu1 %vm16826_vm1, %v16860_v47  ;;  %v17042_v23 = vld [vmem:[#allocation33_spill] sm:$0xff] }
 0x204   : > { %v1381_v50 = vpop.f32.mrf.mxu0  ;;  %v10775_v6 = vpop.eup %10774  ;;  %v2041_v41 = vadd.f32 1.0, %v10773_v63  ;;  %3859 = vperm.xlu0 %10423, %v3496_v30   ;;  %vm3027_vm13 = vcmp.eq.s32.totalorder %v11893_v34, %v17042_v23 }
 0x205   : > { %v1864_v62 = vmul.f32 1.442695, %v1667_v10  ;;  %v13774_v9 = vadd.f32 %v13694_v36, %v1381_v50  ;;  %v13776_v38 = vpop.f32.mrf.mxu1  ;;  %v13779_v37 = vpop.permute.xlu1 %3676  ;;  %v13784_v46 = vmul.f32 %v10775_v6, %v13545_v19  ;;  %v3499_v10 = vld [vmem:[%s12335_s21 + $0x3c8] sm:$0xff]  ;;  %v3498_v6 = vld [vmem:[%s12335_s21 + $0x3c0] sm:$0xff]  ;;  %vm8212_vm14 = vmpackc.low %vm3028_vm12, %vm3027_vm13 }
 0x206   : > { %17038 = vst [vmem:[#allocation166_spill] sm:$0xff] %v13776_v38  ;;  %17039 = vst [vmem:[#allocation167_spill] sm:$0xff] %v13779_v37  ;;  %v13786_v63 = vpop.permute.xlu0 %3673  ;;  %v9452_v18 = vpop.f32.mrf.mxu0  ;;  %10788 = vrcp.f32 %v2041_v41  ;;  %v10506_v37 = vld [vmem:[%s11730_s20 + $0x1e8] sm:$0xff]   ;;  %3868 = vperm.xlu1 %10424, %v3499_v10  }
 0x207   : > { %17040 = vst [vmem:[#allocation168_spill] sm:$0xff] %v13784_v46  ;;  %17041 = vst [vmem:[#allocation169_spill] sm:$0xff] %v13786_v63  ;;  %v1668_v15 = vsub.f32 0.0, %v13774_v9  ;;  %v9656_v13 = vpop.f32.mrf.mxu1  ;;  %v10777_v50 = vpop.eup %10776  ;;  %10790 = vpow2.f32 %v1864_v62  ;;  %9551 = vmatmul.mubr.msk.bf16.gmra.mxu0 %vm865_vm2, %v10506_v37 }
 0x208   : > { %v1384_v19 = vpop.f32.mrf.mxu0  ;;  %v10779_v63 = vpop.eup %10778  ;;  %v13810_v29 = vmul.f32 %v10777_v50, %v13567_v27  ;;  %3865 = vperm.xlu0 %10423, %v3498_v6   ;;  %v3500_v27 = vld [vmem:[%s12335_s21 + $0x3d0] sm:$0xff]  ;;  %9554 = vmatprep.mubr.msk.bf16.mxu0 %vm16826_vm1, %v16860_v47 }
 0x209   : > { %v1866_v41 = vmul.f32 1.442695, %v1668_v15  ;;  %v13801_v30 = vadd.f32 %v13694_v36, %v1384_v19  ;;  %v13803_v18 = vpop.f32.mrf.mxu1  ;;  %v13805_v13 = vpop.permute.xlu1 %3682  ;;  %v2042_v62 = vadd.f32 1.0, %v10779_v63  ;;  %v3501_v19 = vld [vmem:[%s12335_s21 + $0x3d8] sm:$0xff] }
 0x20a   : > { %17043 = vst [vmem:[#allocation33_spill] sm:$0xff] %v13803_v18  ;;  %17044 = vst [vmem:[#allocation170_spill] sm:$0xff] %v13805_v13  ;;  %v13807_v38 = vpop.permute.xlu0 %3679  ;;  %v9453_v17 = vpop.f32.mrf.mxu0  ;;  %9755 = vmatmul.mubr.msk.bf16.gmra.mxu1 %vm8212_vm14, %v16863_v20  ;;  %3874 = vperm.xlu1 %10424, %v3501_v19   ;;  %v10508_v18 = vld [vmem:[%s11730_s20 + $0x1f0] sm:$0xff]  }
 0x20b   : > { %17045 = vst [vmem:[#allocation171_spill] sm:$0xff] %v13807_v38  ;;  %17046 = vst [vmem:[#allocation172_spill] sm:$0xff] %v13810_v29  ;;  %10792 = vpow2.f32 %v1866_v41  ;;  %v1669_v46 = vsub.f32 0.0, %v13801_v30  ;;  %v9657_v15 = vpop.f32.mrf.mxu1  ;;  %v10781_v21 = vpop.eup %10780  ;;  %9758 = vmatprep.mubr.msk.bf16.mxu1 %vm16826_vm1, %v16860_v47  ;;  %v17052_v19 = vld [vmem:[#allocation37_spill] sm:$0xff] }
 0x20c   : > { %10794 = vrcp.f32 %v2042_v62  ;;  %v1389_v17 = vpop.f32.mrf.mxu0  ;;  %v10783_v63 = vpop.eup %10782  ;;  %v13823_v10 = vmul.f32 %v10781_v21, %v13594_v61  ;;  %3871 = vperm.xlu0 %10423, %v3500_v27   ;;  %v3379_v15 = vld [vmem:[%s12335_s21 + $0x8] sm:$0xff]  ;;  %vm3029_vm0 = vcmp.eq.s32.totalorder %v11893_v34, %v17052_v19 }
 0x20d   : > { %v1868_v50 = vmul.f32 1.442695, %v1669_v46  ;;  %v13826_v6 = vadd.f32 %v13694_v36, %v1389_v17  ;;  %v13828_v41 = vpop.f32.mrf.mxu1  ;;  %v13831_v32 = vpop.permute.xlu1 %3688  ;;  %v2043_v37 = vadd.f32 1.0, %v10783_v63  ;;  %v3378_v63 = vld [vmem:[%s12335_s21] sm:$0xff] }
 0x20e   : > { %17047 = vst [vmem:[#allocation173_spill] sm:$0xff] %v13823_v10  ;;  %17048 = vst [vmem:[#allocation174_spill] sm:$0xff] %v13828_v41  ;;  %v13835_v23 = vpop.permute.xlu0 %3685  ;;  %v9456_v61 = vpop.f32.mrf.mxu0  ;;  %3508 = vperm.xlu1 %10424, %v3379_v15  }
 0x20f   : > { %17049 = vst [vmem:[#allocation175_spill] sm:$0xff] %v13831_v32  ;;  %17050 = vst [vmem:[#allocation176_spill] sm:$0xff] %v13835_v23  ;;  %10796 = vpow2.f32 %v1868_v50  ;;  %v1670_v46 = vsub.f32 0.0, %v13826_v6  ;;  %v9660_v62 = vpop.f32.mrf.mxu1  ;;  %v10785_v17 = vpop.eup %10784  ;;  %v17051_v61 = vld [vmem:[#allocation36_spill] sm:$0xff]  ;;  %9555 = vmatmul.mubr.msk.bf16.gmra.mxu0 %vm865_vm2, %v10508_v18  ;;  %vm3032_vm2 = vcmp.eq.s32.totalorder %v11893_v34, %v12701_v1 }
 0x210   : > { %10798 = vrcp.f32 %v2043_v37  ;;  %v1392_v41 = vpop.f32.mrf.mxu0  ;;  %v10787_v23 = vpop.eup %10786  ;;  %vm3030_vm15 = vcmp.eq.s32.totalorder %v11893_v34, %v17051_v61  ;;  %v13859_v13 = vmul.f32 %v10785_v17, %v13619_v3  ;;  %3505 = vperm.xlu0 %10423, %v3378_v63   ;;  %v3502_v3 = vld [vmem:[%s12335_s21 + $0x3e0] sm:$0xff]  ;;  %9842 = vmatprep.mubr.msk.bf16.mxu0 %vm16826_vm1, %v16860_v47  ;;  %vm8216_vm5 = vmpackc.low %vm3032_vm2, %vm3031_vm4  ;;  %vm3042_vm2 = vcmp.eq.s32.totalorder %v11893_v34, %v12815_v53 }
 0x211   : > { %v1870_v21 = vmul.f32 1.442695, %v1670_v46  ;;  %v13850_v50 = vadd.f32 %v13694_v36, %v1392_v41  ;;  %v13852_v62 = vpop.f32.mrf.mxu1  ;;  %v13854_v27 = vpop.permute.xlu1 %3694  ;;  %v2044_v37 = vadd.f32 1.0, %v10787_v23  ;;  %v3503_v41 = vld [vmem:[%s12335_s21 + $0x3e8] sm:$0xff]  ;;  %vm8214_vm3 = vmpackc.low %vm3030_vm15, %vm3029_vm0  ;;  %vm3040_vm15 = vcmp.eq.s32.totalorder %v11893_v34, %v12789_v2 }
 0x212   : > { %17053 = vst [vmem:[#allocation36_spill] sm:$0xff] %v13852_v62  ;;  %17054 = vst [vmem:[#allocation37_spill] sm:$0xff] %v13854_v27  ;;  %v13856_v32 = vpop.permute.xlu0 %3691  ;;  %v9457_v38 = vpop.f32.mrf.mxu0  ;;  %9759 = vmatmul.mubr.msk.bf16.gmra.mxu1 %vm8214_vm3, %v16863_v20  ;;  %3880 = vperm.xlu1 %10424, %v3503_v41   ;;  %v11528_v27 = vld [vmem:[%s16721_s4 + $0x10] sm:$0xff]   ;;  %vm3039_vm0 = vcmp.eq.s32.totalorder %v11893_v34, %v12791_v4 }
 0x213   : > { %17055 = vst [vmem:[#allocation177_spill] sm:$0xff] %v13856_v32  ;;  %10800 = vpow2.f32 %v1870_v21  ;;  %v1671_v29 = vsub.f32 0.0, %v13850_v50  ;;  %v9661_v46 = vpop.f32.mrf.mxu1  ;;  %v10789_v10 = vpop.eup %10788  ;;  %9762 = vmatprep.mubr.msk.bf16.mxu1 %vm16826_vm1, %v16860_v47  ;;  %vm8224_vm3 = vmpackc.low %vm3040_vm15, %vm3039_vm0 }
 0x214   : > { %10802 = vrcp.f32 %v2044_v37  ;;  %v1397_v38 = vpop.f32.mrf.mxu0  ;;  %v10791_v23 = vpop.eup %10790  ;;  %v13872_v21 = vmul.f32 %v10789_v10, %v13643_v31  ;;  %3877 = vperm.xlu0 %10423, %v3502_v3  }
 0x215   : > { %v1872_v15 = vmul.f32 1.442695, %v1671_v29  ;;  %v13875_v17 = vadd.f32 %v13694_v36, %v1397_v38  ;;  %v13877_v63 = vpop.f32.mrf.mxu1  ;;  %v13880_v19 = vpop.permute.xlu1 %3700  ;;  %v2045_v61 = vadd.f32 1.0, %v10791_v23 }
 0x216   : > { %17056 = vst [vmem:[#allocation178_spill] sm:$0xff] %v13877_v63  ;;  %17057 = vst [vmem:[#allocation179_spill] sm:$0xff] %v13880_v19  ;;  %v13884_v18 = vpop.permute.xlu0 %3697  ;;  %v9460_v37 = vpop.f32.mrf.mxu0 }
 0x217   : > { %17058 = vst [vmem:[#allocation180_spill] sm:$0xff] %v13884_v18  ;;  %10804 = vpow2.f32 %v1872_v15  ;;  %v1672_v29 = vsub.f32 0.0, %v13875_v17  ;;  %v9664_v10 = vpop.f32.mrf.mxu1 }
 0x218   : > { %v10793_v46 = vpop.eup %10792  ;;  %10806 = vrcp.f32 %v2045_v61  ;;  %v1400_v38 = vpop.f32.mrf.mxu0 }
 0x219   : > { %v10795_v23 = vpop.eup %10794  ;;  %v2046_v41 = vadd.f32 1.0, %v10793_v46  ;;  %v1874_v37 = vmul.f32 1.442695, %v1672_v29  ;;  %v13896_v63 = vadd.f32 %v13694_v36, %v1400_v38  ;;  %v13898_v15 = vpop.f32.mrf.mxu1  ;;  %v17062_v46 = vld [vmem:[#allocation6_spill] sm:$0xff]  ;;  %v17063_v38 = vld [vmem:[#allocation5_spill] sm:$0xff] }
 0x21a   : > { %17059 = vst [vmem:[#allocation181_spill] sm:$0xff] %v13898_v15  ;;  %v13900_v31 = vpop.permute.xlu1 %3706  ;;  %v13902_v3 = vpop.permute.xlu0 %3703  ;;  %v13909_v54 = vmul.f32 %v10795_v23, %v13668_v45  ;;  %v17064_v15 = vpack.c.bf16 %v17062_v46, %v17063_v38  ;;  %9763 = vmatmul.mubr.msk.bf16.gmra.mxu1 %vm8216_vm5, %v16863_v20 }
 0x21b   : > { %17060 = vst [vmem:[#allocation182_spill] sm:$0xff] %v13900_v31  ;;  %17061 = vst [vmem:[#allocation183_spill] sm:$0xff] %v13902_v3  ;;  %v9461_v10 = vpop.f32.mrf.mxu0  ;;  %10808 = vrcp.f32 %v2046_v41  ;;  %v1673_v61 = vsub.f32 0.0, %v13896_v63  ;;  %v9665_v62 = vpop.f32.mrf.mxu1  ;;  %9766 = vmatprep.mubr.msk.bf16.mxu1 %vm16826_vm1, %v16860_v47 }
 0x21c   : > { %v10797_v18 = vpop.eup %10796  ;;  %10810 = vpow2.f32 %v1874_v37  ;;  %9843 = vmatmul.mubr.bf16.vlgmr.msra.gmra.mxu0 %v17064_v15 }
 0x21d   : > { %v1405_v29 = vpop.f32.mrf.mxu0  ;;  %v10799_v3 = vpop.eup %10798  ;;  %v2047_v10 = vadd.f32 1.0, %v10797_v18  ;;  %v1876_v41 = vmul.f32 1.442695, %v1673_v61  ;;  %9846 = vmatprep.mubr.msk.bf16.mxu0 %vm16826_vm1, %v16860_v47  ;;  %v11523_v18 = vld [vmem:[%s16721_s4 + $0x38] sm:$0xff]  }
 0x21e   : > { %v13915_v31 = vadd.f32 %v13694_v36, %v1405_v29  ;;  %v13917_v62 = vpop.f32.mrf.mxu1  ;;  %v13920_v1 = vpop.permute.xlu1 %3712  ;;  %v13925_v45 = vmul.f32 %v10799_v3, %v13697_v49  ;;  %10095 = vmatpush3.bf16.msra.mxu0 %v11523_v18  ;;  %v17068_v49 = vld [vmem:[#allocation39_spill] sm:$0xff] }
 0x21f   : > { %17065 = vst [vmem:[#allocation6_spill] sm:$0xff] %v13917_v62  ;;  %17066 = vst [vmem:[#allocation5_spill] sm:$0xff] %v13920_v1  ;;  %v13927_v23 = vpop.permute.xlu0 %3709  ;;  %v9464_v37 = vpop.f32.mrf.mxu0  ;;  %10812 = vrcp.f32 %v2047_v10  ;;  %10096 = vmatprep.subr.bf16.mxu0 %v16860_v47  ;;  %vm3034_vm6 = vcmp.eq.s32.totalorder %v11893_v34, %v17068_v49 }
 0x220   : > { %17067 = vst [vmem:[#allocation184_spill] sm:$0xff] %v13927_v23  ;;  %v1674_v15 = vsub.f32 0.0, %v13915_v31  ;;  %v9668_v61 = vpop.f32.mrf.mxu1  ;;  %v10801_v29 = vpop.eup %10800  ;;  %10814 = vpow2.f32 %v1876_v41  ;;  %v17069_v37 = vld [vmem:[#allocation41_spill] sm:$0xff] }
 0x221   : > { %v1408_v46 = vpop.f32.mrf.mxu0  ;;  %v10803_v38 = vpop.eup %10802  ;;  %vm3033_vm7 = vcmp.eq.s32.totalorder %v11893_v34, %v17069_v37  ;;  %v2048_v18 = vadd.f32 1.0, %v10801_v29  ;;  %v11524_v41 = vld [vmem:[%s16721_s4 + $0x30] sm:$0xff]  }
 0x222   : > { %v1878_v10 = vmul.f32 1.442695, %v1674_v15  ;;  %v13943_v62 = vadd.f32 %v13694_v36, %v1408_v46  ;;  %v13945_v61 = vpop.f32.mrf.mxu1  ;;  %v13947_v23 = vpop.permute.xlu1 %3718  ;;  %10097 = vmatpush3.bf16.msra.mxu0 %v11524_v41  ;;  %vm8218_vm8 = vmpackc.low %vm3034_vm6, %vm3033_vm7  ;;  %v17073_v41 = vld [vmem:[#allocation8_spill] sm:$0xff]  ;;  %vm3043_vm7 = vcmp.eq.s32.totalorder %v11893_v34, %v12843_v28 }
 0x223   : > { %17070 = vst [vmem:[#allocation39_spill] sm:$0xff] %v13945_v61  ;;  %17071 = vst [vmem:[#allocation41_spill] sm:$0xff] %v13947_v23  ;;  %v13949_v1 = vpop.permute.xlu0 %3715  ;;  %v9465_v19 = vpop.f32.mrf.mxu0  ;;  %10816 = vrcp.f32 %v2048_v18  ;;  %10098 = vmatprep.subr.bf16.mxu0 %v16860_v47  ;;  %v17074_v18 = vld [vmem:[#allocation7_spill] sm:$0xff]  ;;  %9767 = vmatmul.mubr.msk.bf16.gmra.mxu1 %vm8218_vm8, %v16863_v20 }
 0x224   : > { %17072 = vst [vmem:[#allocation185_spill] sm:$0xff] %v13949_v1  ;;  %v1675_v3 = vsub.f32 0.0, %v13943_v62  ;;  %v9669_v29 = vpop.f32.mrf.mxu1  ;;  %v10805_v15 = vpop.eup %10804  ;;  %v13963_v19 = vmul.f32 %v10803_v38, %v13719_v44  ;;  %10818 = vpow2.f32 %v1878_v10  ;;  %v17075_v61 = vpack.c.bf16 %v17073_v41, %v17074_v18  ;;  %9770 = vmatprep.mubr.msk.bf16.mxu1 %vm16826_vm1, %v16860_v47 }
 0x225   : > { %v1413_v46 = vpop.f32.mrf.mxu0  ;;  %v10807_v29 = vpop.eup %10806  ;;  %v2049_v1 = vadd.f32 1.0, %v10805_v15 }
 0x226   : > { %9847 = vmatmul.mubr.bf16.gmra.mxu0 %v17075_v61  ;;  %v1880_v23 = vmul.f32 1.442695, %v1675_v3  ;;  %v13969_v32 = vadd.f32 %v13694_v36, %v1413_v46  ;;  %v13971_v37 = vpop.f32.mrf.mxu1  ;;  %v13974_v49 = vpop.permute.xlu1 %3724  ;;  %v13979_v44 = vmul.f32 %v10807_v29, %v13746_v57  ;;  %v11525_v3 = vld [vmem:[%s16721_s4 + $0x28] sm:$0xff]   ;;  %v17079_v29 = vld [vmem:[#allocation42_spill] sm:$0xff]  ;;  %v11526_v57 = vld [vmem:[%s16721_s4 + $0x20] sm:$0xff]  }
 0x227   : > { %17076 = vst [vmem:[#allocation8_spill] sm:$0xff] %v13971_v37  ;;  %17077 = vst [vmem:[#allocation7_spill] sm:$0xff] %v13974_v49  ;;  %9850 = vmatprep.mubr.msk.bf16.mxu0 %vm16826_vm1, %v16860_v47  ;;  %v13981_v38 = vpop.permute.xlu0 %3721  ;;  %v9468_v10 = vpop.f32.mrf.mxu0  ;;  %10099 = vmatpush3.bf16.msra.mxu0 %v11525_v3  ;;  %10820 = vrcp.f32 %v2049_v1  ;;  %vm3035_vm10 = vcmp.eq.s32.totalorder %v11893_v34, %v17079_v29 }
 0x228   : > { %17078 = vst [vmem:[#allocation186_spill] sm:$0xff] %v13981_v38  ;;  %v1676_v61 = vsub.f32 0.0, %v13969_v32  ;;  %v9672_v15 = vpop.f32.mrf.mxu1  ;;  %10100 = vmatprep.subr.bf16.mxu0 %v16860_v47  ;;  %v10809_v46 = vpop.eup %10808  ;;  %10822 = vpow2.f32 %v1880_v23  ;;  %vm8220_vm11 = vmpackc.low %vm3036_vm9, %vm3035_vm10 }
 0x229   : > { %v1416_v41 = vpop.f32.mrf.mxu0  ;;  %v10811_v18 = vpop.eup %10810  ;;  %v14009_v49 = vmul.f32 %v10809_v46, %v13774_v9 }
 0x22a   : > { %v1882_v10 = vmul.f32 1.442695, %v1676_v61  ;;  %v13997_v1 = vadd.f32 %v13694_v36, %v1416_v41  ;;  %v13999_v3 = vpop.f32.mrf.mxu1  ;;  %v14001_v15 = vpop.permute.xlu1 %3730  ;;  %v2050_v37 = vadd.f32 1.0, %v10811_v18 }
 0x22b   : > { %17080 = vst [vmem:[#allocation42_spill] sm:$0xff] %v13999_v3  ;;  %17081 = vst [vmem:[#allocation187_spill] sm:$0xff] %v14001_v15  ;;  %v14003_v38 = vpop.permute.xlu0 %3727  ;;  %v9469_v23 = vpop.f32.mrf.mxu0  ;;  %10101 = vmatpush3.bf16.msra.mxu0 %v11526_v57  ;;  %v17084_v57 = vld [vmem:[#allocation10_spill] sm:$0xff]  ;;  %9771 = vmatmul.mubr.msk.bf16.gmra.mxu1 %vm8220_vm11, %v16863_v20 }
 0x22c   : > { %17082 = vst [vmem:[#allocation188_spill] sm:$0xff] %v14003_v38  ;;  %17083 = vst [vmem:[#allocation189_spill] sm:$0xff] %v14009_v49  ;;  %10824 = vpow2.f32 %v1882_v10  ;;  %v1677_v61 = vsub.f32 0.0, %v13997_v1  ;;  %v9673_v41 = vpop.f32.mrf.mxu1  ;;  %10102 = vmatprep.subr.bf16.mxu0 %v16860_v47  ;;  %v10813_v3 = vpop.eup %10812  ;;  %v17085_v23 = vld [vmem:[#allocation9_spill] sm:$0xff]  ;;  %9774 = vmatprep.mubr.msk.bf16.mxu1 %vm16826_vm1, %v16860_v47 }
 0x22d   : > { %10826 = vrcp.f32 %v2050_v37  ;;  %v1421_v18 = vpop.f32.mrf.mxu0  ;;  %v17086_v9 = vpack.c.bf16 %v17084_v57, %v17085_v23  ;;  %v10815_v46 = vpop.eup %10814  ;;  %v14023_v10 = vmul.f32 %v10813_v3, %v13801_v30  ;;  %v11527_v30 = vld [vmem:[%s16721_s4 + $0x18] sm:$0xff]  }
 0x22e   : > { %v1884_v41 = vmul.f32 1.442695, %v1677_v61  ;;  %v14026_v38 = vadd.f32 %v13694_v36, %v1421_v18  ;;  %v14028_v15 = vpop.f32.mrf.mxu1  ;;  %v14031_v40 = vpop.permute.xlu1 %3736  ;;  %v2051_v37 = vadd.f32 1.0, %v10815_v46 }
 0x22f   : > { %9851 = vmatmul.mubr.bf16.gmra.mxu0 %v17086_v9  ;;  %17087 = vst [vmem:[#allocation10_spill] sm:$0xff] %v14028_v15  ;;  %17088 = vst [vmem:[#allocation9_spill] sm:$0xff] %v14031_v40  ;;  %v14035_v29 = vpop.permute.xlu0 %3733  ;;  %v9472_v57 = vpop.f32.mrf.mxu0  ;;  %v17091_v15 = vld [vmem:[#allocation47_spill] sm:$0xff] }
 0x230   : > { %9854 = vmatprep.mubr.msk.bf16.mxu0 %vm16826_vm1, %v16860_v47  ;;  %17089 = vst [vmem:[#allocation190_spill] sm:$0xff] %v14035_v29  ;;  %10103 = vmatpush3.bf16.msra.mxu0 %v11527_v30  ;;  %10828 = vpow2.f32 %v1884_v41  ;;  %v1678_v61 = vsub.f32 0.0, %v14026_v38  ;;  %v9676_v18 = vpop.f32.mrf.mxu1  ;;  %v10817_v23 = vpop.eup %10816  ;;  %v17090_v57 = vld [vmem:[#allocation45_spill] sm:$0xff]  ;;  %vm3037_vm13 = vcmp.eq.s32.totalorder %v11893_v34, %v17091_v15 }
 0x231   : > { %10104 = vmatprep.subr.bf16.mxu0 %v16860_v47  ;;  %10830 = vrcp.f32 %v2051_v37  ;;  %v1424_v9 = vpop.f32.mrf.mxu0  ;;  %v10819_v46 = vpop.eup %10818  ;;  %vm3038_vm12 = vcmp.eq.s32.totalorder %v11893_v34, %v17090_v57  ;;  %v14063_v49 = vmul.f32 %v10817_v23, %v13826_v6 }
 0x232   : > { %v1886_v30 = vmul.f32 1.442695, %v1678_v61  ;;  %v14051_v29 = vadd.f32 %v13694_v36, %v1424_v9  ;;  %v14053_v41 = vpop.f32.mrf.mxu1  ;;  %v14055_v3 = vpop.permute.xlu1 %3742  ;;  %v2052_v18 = vadd.f32 1.0, %v10819_v46  ;;  %vm8222_vm14 = vmpackc.low %vm3038_vm12, %vm3037_vm13  ;;  %vm3048_vm12 = vcmp.eq.s32.totalorder %v11893_v34, %v12891_v48 }
 0x233   : > { %17092 = vst [vmem:[#allocation45_spill] sm:$0xff] %v14053_v41  ;;  %17093 = vst [vmem:[#allocation47_spill] sm:$0xff] %v14055_v3  ;;  %v14057_v40 = vpop.permute.xlu0 %3739  ;;  %v9473_v37 = vpop.f32.mrf.mxu0  ;;  %9775 = vmatmul.mubr.msk.bf16.gmra.mxu1 %vm8222_vm14, %v16863_v20  ;;  %vm3047_vm13 = vcmp.eq.s32.totalorder %v11893_v34, %v12893_v52 }
 0x234   : > { %17094 = vst [vmem:[#allocation191_spill] sm:$0xff] %v14057_v40  ;;  %10105 = vmatpush3.bf16.msra.mxu0 %v11528_v27  ;;  %17095 = vst [vmem:[#allocation192_spill] sm:$0xff] %v14063_v49  ;;  %10832 = vpow2.f32 %v1886_v30  ;;  %v1679_v61 = vsub.f32 0.0, %v14051_v29  ;;  %v9677_v9 = vpop.f32.mrf.mxu1  ;;  %v10821_v41 = vpop.eup %10820  ;;  %v17096_v27 = vld [vmem:[#allocation12_spill] sm:$0xff]  ;;  %v17097_v37 = vld [vmem:[#allocation11_spill] sm:$0xff]  ;;  %9778 = vmatprep.mubr.msk.bf16.mxu1 %vm16826_vm1, %v16860_v47 }
 0x235   : > { %10106 = vmatprep.subr.bf16.mxu0 %v16860_v47  ;;  %10834 = vrcp.f32 %v2052_v18  ;;  %v1429_v46 = vpop.f32.mrf.mxu0  ;;  %v17098_v6 = vpack.c.bf16 %v17096_v27, %v17097_v37  ;;  %v10823_v23 = vpop.eup %10822  ;;  %v14077_v30 = vmul.f32 %v10821_v41, %v13850_v50  ;;  %v11529_v50 = vld [vmem:[%s16721_s4 + $0x8] sm:$0xff]   ;;  %vm8232_vm14 = vmpackc.low %vm3048_vm12, %vm3047_vm13 }
 0x236   : > { %v1888_v9 = vmul.f32 1.442695, %v1679_v61  ;;  %v14080_v40 = vadd.f32 %v13694_v36, %v1429_v46  ;;  %v14082_v3 = vpop.f32.mrf.mxu1  ;;  %v14085_v15 = vpop.permute.xlu1 %3748  ;;  %v2053_v57 = vadd.f32 1.0, %v10823_v23 }
 0x237   : > { %9855 = vmatmul.mubr.bf16.gmra.mxu0 %v17098_v6  ;;  %17099 = vst [vmem:[#allocation12_spill] sm:$0xff] %v14082_v3  ;;  %17100 = vst [vmem:[#allocation11_spill] sm:$0xff] %v14085_v15  ;;  %v14089_v18 = vpop.permute.xlu0 %3745  ;;  %v9476_v27 = vpop.f32.mrf.mxu0 }
 0x238   : > { %9858 = vmatprep.mubr.msk.bf16.mxu0 %vm16826_vm1, %v16860_v47  ;;  %17101 = vst [vmem:[#allocation193_spill] sm:$0xff] %v14089_v18  ;;  %10107 = vmatpush3.bf16.msra.mxu0 %v11529_v50  ;;  %10836 = vpow2.f32 %v1888_v9  ;;  %v1680_v61 = vsub.f32 0.0, %v14080_v40  ;;  %v9680_v46 = vpop.f32.mrf.mxu1 }
 0x239   : > { %10108 = vmatprep.subr.bf16.mxu0 %v16860_v47  ;;  %v10825_v37 = vpop.eup %10824  ;;  %10838 = vrcp.f32 %v2053_v57  ;;  %v1432_v6 = vpop.f32.mrf.mxu0 }
 0x23a   : > { %v10827_v23 = vpop.eup %10826  ;;  %v2054_v27 = vadd.f32 1.0, %v10825_v37  ;;  %v1890_v50 = vmul.f32 1.442695, %v1680_v61  ;;  %v14105_v41 = vadd.f32 %v13694_v36, %v1432_v6  ;;  %v14107_v9 = vpop.f32.mrf.mxu1  ;;  %v17105_v37 = vld [vmem:[#allocation14_spill] sm:$0xff]  ;;  %v17106_v6 = vld [vmem:[#allocation13_spill] sm:$0xff] }
 0x23b   : > { %17102 = vst [vmem:[#allocation194_spill] sm:$0xff] %v14107_v9  ;;  %v14109_v46 = vpop.permute.xlu1 %3754  ;;  %v14111_v3 = vpop.permute.xlu0 %3751  ;;  %v14119_v4 = vmul.f32 %v10827_v23, %v13875_v17  ;;  %v17107_v9 = vpack.c.bf16 %v17105_v37, %v17106_v6  ;;  %9779 = vmatmul.mubr.msk.bf16.gmra.mxu1 %vm8224_vm3, %v16863_v20  ;;  %v17111_v6 = vld [vmem:[#allocation52_spill] sm:$0xff]  ;;  %vm3050_vm3 = vcmp.eq.s32.totalorder %v11893_v34, %v12914_v42 }
 0x23c   : > { %17103 = vst [vmem:[#allocation195_spill] sm:$0xff] %v14109_v46  ;;  %17104 = vst [vmem:[#allocation196_spill] sm:$0xff] %v14111_v3  ;;  %v9477_v18 = vpop.f32.mrf.mxu0  ;;  %10109 = vmatpush3.bf16.msra.mxu0 %v13757_v33  ;;  %10840 = vrcp.f32 %v2054_v27  ;;  %v1681_v57 = vsub.f32 0.0, %v14105_v41  ;;  %v9681_v15 = vpop.f32.mrf.mxu1  ;;  %9782 = vmatprep.mubr.msk.bf16.mxu1 %vm16826_vm1, %v16860_v47  ;;  %vm3041_vm4 = vcmp.eq.s32.totalorder %v11893_v34, %v17111_v6  ;;  %v17117_v6 = vld [vmem:[#allocation18_spill] sm:$0xff] }
 0x23d   : > { %v10829_v49 = vpop.eup %10828  ;;  %10842 = vpow2.f32 %v1890_v50  ;;  %vm8226_vm5 = vmpackc.low %vm3042_vm2, %vm3041_vm4 }
 0x23e   : > { %v1437_v61 = vpop.f32.mrf.mxu0  ;;  %v10831_v18 = vpop.eup %10830  ;;  %v2055_v33 = vadd.f32 1.0, %v10829_v49  ;;  %v1892_v27 = vmul.f32 1.442695, %v1681_v57 }
 0x23f   : > { %9859 = vmatmul.mubr.bf16.gmra.mxu0 %v17107_v9  ;;  %v14125_v3 = vadd.f32 %v13694_v36, %v1437_v61  ;;  %v14127_v15 = vpop.f32.mrf.mxu1  ;;  %v14130_v2 = vpop.permute.xlu1 %3760  ;;  %v14135_v17 = vmul.f32 %v10831_v18, %v13896_v63 }
 0x240   : > { %17108 = vst [vmem:[#allocation14_spill] sm:$0xff] %v14127_v15  ;;  %17109 = vst [vmem:[#allocation13_spill] sm:$0xff] %v14130_v2  ;;  %9862 = vmatprep.mubr.msk.bf16.mxu0 %vm16826_vm1, %v16860_v47  ;;  %v14137_v23 = vpop.permute.xlu0 %3757  ;;  %v9480_v50 = vpop.f32.mrf.mxu0  ;;  %10844 = vrcp.f32 %v2055_v33 }
 0x241   : > { %17110 = vst [vmem:[#allocation197_spill] sm:$0xff] %v14137_v23  ;;  %v1682_v49 = vsub.f32 0.0, %v14125_v3  ;;  %v9684_v9 = vpop.f32.mrf.mxu1  ;;  %v10833_v57 = vpop.eup %10832  ;;  %10846 = vpow2.f32 %v1892_v27 }
 0x242   : > { %v1440_v63 = vpop.f32.mrf.mxu0  ;;  %v10835_v37 = vpop.eup %10834  ;;  %v2056_v18 = vadd.f32 1.0, %v10833_v57 }
 0x243   : > { %v1894_v50 = vmul.f32 1.442695, %v1682_v49  ;;  %v14149_v33 = vadd.f32 %v13694_v36, %v1440_v63  ;;  %v14151_v15 = vpop.f32.mrf.mxu1  ;;  %v14153_v9 = vpop.permute.xlu1 %3766  ;;  %v14162_v49 = vmul.f32 %v10835_v37, %v13915_v31  ;;  %v17116_v63 = vld [vmem:[#allocation19_spill] sm:$0xff]  ;;  %9783 = vmatmul.mubr.msk.bf16.gmra.mxu1 %vm8226_vm5, %v16863_v20 }
 0x244   : > { %17112 = vst [vmem:[#allocation52_spill] sm:$0xff] %v14151_v15  ;;  %17113 = vst [vmem:[#allocation198_spill] sm:$0xff] %v14153_v9  ;;  %v14155_v23 = vpop.permute.xlu0 %3763  ;;  %v9481_v2 = vpop.f32.mrf.mxu0  ;;  %10848 = vrcp.f32 %v2056_v18  ;;  %v17118_v15 = vpack.c.bf16 %v17116_v63, %v17117_v6  ;;  %9786 = vmatprep.mubr.msk.bf16.mxu1 %vm16826_vm1, %v16860_v47 }
 0x245   : > { %17114 = vst [vmem:[#allocation199_spill] sm:$0xff] %v14155_v23  ;;  %v1683_v27 = vsub.f32 0.0, %v14149_v33  ;;  %v9685_v61 = vpop.f32.mrf.mxu1  ;;  %v10837_v46 = vpop.eup %10836  ;;  %17115 = vst [vmem:[#allocation200_spill] sm:$0xff] %v14162_v49  ;;  %10850 = vpow2.f32 %v1894_v50  ;;  %v17128_v49 = vld [vmem:[#allocation22_spill] sm:$0xff] }
 0x246   : > { %v1445_v57 = vpop.f32.mrf.mxu0  ;;  %v10839_v23 = vpop.eup %10838  ;;  %v2057_v2 = vadd.f32 1.0, %v10837_v46 }
 0x247   : > { %9863 = vmatmul.mubr.bf16.gmra.mxu0 %v17118_v15  ;;  %v1896_v18 = vmul.f32 1.442695, %v1683_v27  ;;  %v14168_v9 = vadd.f32 %v13694_v36, %v1445_v57  ;;  %v14170_v61 = vpop.f32.mrf.mxu1  ;;  %v14173_v53 = vpop.permute.xlu1 %3772  ;;  %v14178_v31 = vmul.f32 %v10839_v23, %v13943_v62 }
 0x248   : > { %17119 = vst [vmem:[#allocation19_spill] sm:$0xff] %v14170_v61  ;;  %17120 = vst [vmem:[#allocation18_spill] sm:$0xff] %v14173_v53  ;;  %9866 = vmatprep.mubr.msk.bf16.mxu0 %vm16826_vm1, %v16860_v47  ;;  %v14180_v37 = vpop.permute.xlu0 %3769  ;;  %v9484_v15 = vpop.f32.mrf.mxu0  ;;  %10852 = vrcp.f32 %v2057_v2  ;;  %v17122_v61 = vld [vmem:[#allocation54_spill] sm:$0xff] }
 0x249   : > { %17121 = vst [vmem:[#allocation201_spill] sm:$0xff] %v14180_v37  ;;  %v1684_v46 = vsub.f32 0.0, %v14168_v9  ;;  %v9688_v50 = vpop.f32.mrf.mxu1  ;;  %v10841_v27 = vpop.eup %10840  ;;  %10854 = vpow2.f32 %v1896_v18  ;;  %vm3044_vm6 = vcmp.eq.s32.totalorder %v11893_v34, %v17122_v61 }
 0x24a   : > { %v1448_v63 = vpop.f32.mrf.mxu0  ;;  %v10843_v6 = vpop.eup %10842  ;;  %v14201_v57 = vmul.f32 %v10841_v27, %v13969_v32  ;;  %vm8228_vm8 = vmpackc.low %vm3044_vm6, %vm3043_vm7 }
 0x24b   : > { %v1898_v62 = vmul.f32 1.442695, %v1684_v46  ;;  %v14192_v23 = vadd.f32 %v13694_v36, %v1448_v63  ;;  %v14194_v2 = vpop.f32.mrf.mxu1  ;;  %v14196_v15 = vpop.permute.xlu1 %3778  ;;  %v2058_v50 = vadd.f32 1.0, %v10843_v6  ;;  %v17127_v63 = vld [vmem:[#allocation24_spill] sm:$0xff]  ;;  %9787 = vmatmul.mubr.msk.bf16.gmra.mxu1 %vm8228_vm8, %v16863_v20 }
 0x24c   : > { %17123 = vst [vmem:[#allocation54_spill] sm:$0xff] %v14194_v2  ;;  %17124 = vst [vmem:[#allocation202_spill] sm:$0xff] %v14196_v15  ;;  %v14198_v37 = vpop.permute.xlu0 %3775  ;;  %v9485_v18 = vpop.f32.mrf.mxu0  ;;  %v17129_v2 = vpack.c.bf16 %v17127_v63, %v17128_v49  ;;  %9790 = vmatprep.mubr.msk.bf16.mxu1 %vm16826_vm1, %v16860_v47 }
 0x24d   : > { %17125 = vst [vmem:[#allocation203_spill] sm:$0xff] %v14198_v37  ;;  %17126 = vst [vmem:[#allocation204_spill] sm:$0xff] %v14201_v57  ;;  %10856 = vpow2.f32 %v1898_v62  ;;  %v1685_v61 = vsub.f32 0.0, %v14192_v23  ;;  %v9689_v53 = vpop.f32.mrf.mxu1  ;;  %v10845_v28 = vpop.eup %10844 }
 0x24e   : > { %10858 = vrcp.f32 %v2058_v50  ;;  %v1453_v46 = vpop.f32.mrf.mxu0  ;;  %v10847_v15 = vpop.eup %10846  ;;  %v14208_v6 = vmul.f32 %v10845_v28, %v13997_v1 }
 0x24f   : > { %9867 = vmatmul.mubr.bf16.gmra.mxu0 %v17129_v2  ;;  %v1900_v18 = vmul.f32 1.442695, %v1685_v61  ;;  %v14211_v32 = vadd.f32 %v13694_v36, %v1453_v46  ;;  %v14213_v27 = vpop.f32.mrf.mxu1  ;;  %v14216_v53 = vpop.permute.xlu1 %3784  ;;  %v2059_v62 = vadd.f32 1.0, %v10847_v15  ;;  %v17135_v15 = vld [vmem:[#allocation59_spill] sm:$0xff] }
 0x250   : > { %17130 = vst [vmem:[#allocation24_spill] sm:$0xff] %v14208_v6  ;;  %17131 = vst [vmem:[#allocation22_spill] sm:$0xff] %v14213_v27  ;;  %9870 = vmatprep.mubr.msk.bf16.mxu0 %vm16826_vm1, %v16860_v47  ;;  %v14220_v49 = vpop.permute.xlu0 %3781  ;;  %v9488_v2 = vpop.f32.mrf.mxu0  ;;  %v17134_v27 = vld [vmem:[#allocation58_spill] sm:$0xff]  ;;  %vm3045_vm10 = vcmp.eq.s32.totalorder %v11893_v34, %v17135_v15 }
 0x251   : > { %17132 = vst [vmem:[#allocation205_spill] sm:$0xff] %v14216_v53  ;;  %17133 = vst [vmem:[#allocation206_spill] sm:$0xff] %v14220_v49  ;;  %10860 = vpow2.f32 %v1900_v18  ;;  %v1686_v50 = vsub.f32 0.0, %v14211_v32  ;;  %v9692_v61 = vpop.f32.mrf.mxu1  ;;  %v10849_v28 = vpop.eup %10848  ;;  %vm3046_vm9 = vcmp.eq.s32.totalorder %v11893_v34, %v17134_v27  ;;  %v17140_v6 = vld [vmem:[#allocation26_spill] sm:$0xff] }
 0x252   : > { %10862 = vrcp.f32 %v2059_v62  ;;  %v1456_v46 = vpop.f32.mrf.mxu0  ;;  %v10851_v63 = vpop.eup %10850  ;;  %v14241_v37 = vmul.f32 %v10849_v28, %v14026_v38  ;;  %vm8230_vm11 = vmpackc.low %vm3046_vm9, %vm3045_vm10 }
 0x253   : > { %v1902_v2 = vmul.f32 1.442695, %v1686_v50  ;;  %v14232_v49 = vadd.f32 %v13694_v36, %v1456_v46  ;;  %v14234_v53 = vpop.f32.mrf.mxu1  ;;  %v14236_v18 = vpop.permute.xlu1 %3790  ;;  %v2060_v1 = vadd.f32 1.0, %v10851_v63  ;;  %v17139_v46 = vld [vmem:[#allocation28_spill] sm:$0xff]  ;;  %9791 = vmatmul.mubr.msk.bf16.gmra.mxu1 %vm8230_vm11, %v16863_v20  ;;  %vm3052_vm11 = vcmp.eq.s32.totalorder %v11893_v34, %v12940_v58 }
 0x254   : > { %17136 = vst [vmem:[#allocation58_spill] sm:$0xff] %v14234_v53  ;;  %17137 = vst [vmem:[#allocation59_spill] sm:$0xff] %v14236_v18  ;;  %v14238_v61 = vpop.permute.xlu0 %3787  ;;  %v9489_v62 = vpop.f32.mrf.mxu0  ;;  %v17141_v53 = vpack.c.bf16 %v17139_v46, %v17140_v6  ;;  %9794 = vmatprep.mubr.msk.bf16.mxu1 %vm16826_vm1, %v16860_v47 }
 0x255   : > { %17138 = vst [vmem:[#allocation207_spill] sm:$0xff] %v14238_v61  ;;  %10864 = vpow2.f32 %v1902_v2  ;;  %v1687_v27 = vsub.f32 0.0, %v14232_v49  ;;  %v9693_v57 = vpop.f32.mrf.mxu1  ;;  %v10853_v15 = vpop.eup %10852 }
 0x256   : > { %10866 = vrcp.f32 %v2060_v1  ;;  %v1461_v50 = vpop.f32.mrf.mxu0  ;;  %v10855_v18 = vpop.eup %10854  ;;  %v14248_v63 = vmul.f32 %v10853_v15, %v14051_v29 }
 0x257   : > { %9871 = vmatmul.mubr.bf16.gmra.mxu0 %v17141_v53  ;;  %v1904_v62 = vmul.f32 1.442695, %v1687_v27  ;;  %v14251_v38 = vadd.f32 %v13694_v36, %v1461_v50  ;;  %v14253_v28 = vpop.f32.mrf.mxu1  ;;  %v14256_v57 = vpop.permute.xlu1 %3796  ;;  %v2061_v1 = vadd.f32 1.0, %v10855_v18 }
 0x258   : > { %17142 = vst [vmem:[#allocation28_spill] sm:$0xff] %v14253_v28  ;;  %17143 = vst [vmem:[#allocation26_spill] sm:$0xff] %v14256_v57  ;;  %9874 = vmatprep.mubr.msk.bf16.mxu0 %vm16826_vm1, %v16860_v47  ;;  %v14260_v6 = vpop.permute.xlu0 %3793  ;;  %v9492_v53 = vpop.f32.mrf.mxu0 }
 0x259   : > { %17144 = vst [vmem:[#allocation208_spill] sm:$0xff] %v14260_v6  ;;  %10868 = vpow2.f32 %v1904_v62  ;;  %v1688_v2 = vsub.f32 0.0, %v14251_v38  ;;  %v9696_v27 = vpop.f32.mrf.mxu1 }
 0x25a   : > { %v10857_v15 = vpop.eup %10856  ;;  %10870 = vrcp.f32 %v2061_v1  ;;  %v1464_v50 = vpop.f32.mrf.mxu0 }
 0x25b   : > { %v10859_v18 = vpop.eup %10858  ;;  %v2062_v46 = vadd.f32 1.0, %v10857_v15  ;;  %v1906_v53 = vmul.f32 1.442695, %v1688_v2  ;;  %v14272_v28 = vadd.f32 %v13694_v36, %v1464_v50  ;;  %v14274_v29 = vpop.f32.mrf.mxu1  ;;  %v17149_v2 = vld [vmem:[#allocation31_spill] sm:$0xff]  ;;  %v17150_v15 = vld [vmem:[#allocation30_spill] sm:$0xff]  ;;  %9795 = vmatmul.mubr.msk.bf16.gmra.mxu1 %vm8232_vm14, %v16863_v20 }
 0x25c   : > { %17145 = vst [vmem:[#allocation209_spill] sm:$0xff] %v14274_v29  ;;  %v14276_v62 = vpop.permute.xlu1 %3802  ;;  %v14278_v27 = vpop.permute.xlu0 %3799  ;;  %v14285_v52 = vmul.f32 %v10859_v18, %v14080_v40  ;;  %v17151_v50 = vpack.c.bf16 %v17149_v2, %v17150_v15  ;;  %9798 = vmatprep.mubr.msk.bf16.mxu1 %vm16826_vm1, %v16860_v47  ;;  %v17154_v15 = vld [vmem:[#allocation64_spill] sm:$0xff] }
 0x25d   : > { %17146 = vst [vmem:[#allocation210_spill] sm:$0xff] %v14276_v62  ;;  %17147 = vst [vmem:[#allocation211_spill] sm:$0xff] %v14278_v27  ;;  %v9493_v6 = vpop.f32.mrf.mxu0  ;;  %10872 = vrcp.f32 %v2062_v46  ;;  %v1689_v1 = vsub.f32 0.0, %v14272_v28  ;;  %v9697_v57 = vpop.f32.mrf.mxu1  ;;  %vm3049_vm2 = vcmp.eq.s32.totalorder %v11893_v34, %v17154_v15 }
 0x25e   : > { %v10861_v61 = vpop.eup %10860  ;;  %17148 = vst [vmem:[#allocation212_spill] sm:$0xff] %v14285_v52  ;;  %10874 = vpow2.f32 %v1906_v53  ;;  %v14293_v57 = vld [vmem:[%s16723_s6] ss:$0 sm:$0xff]  ;;  %vm14330_vm6 = vmpackc.low %vm3050_vm3, %vm3049_vm2 }
 0x25f   : > { %v1469_v36 = vpop.f32.mrf.mxu0  ;;  %9875 = vmatmul.mubr.bf16.gmra.mxu0 %v17151_v50  ;;  %v10863_v29 = vpop.eup %10862  ;;  %v2063_v6 = vadd.f32 1.0, %v10861_v61  ;;  %v1908_v46 = vmul.f32 1.442695, %v1689_v1 }
 0x260   : > { %v14296_v48 = vadd.f32 %v14293_v57, %v1469_v36  ;;  %v14298_v27 = vpop.f32.mrf.mxu1  ;;  %v3809_v40 = vpop.permute.xlu1 %3808  ;;  %9878 = vmatprep.mubr.msk.bf16.mxu0 %vm16826_vm1, %v16860_v47  ;;  %v14304_v18 = vmul.f32 %v10863_v29, %v14105_v41  ;;  %v17155_v29 = vmov 0 }
 0x261   : > { %17152 = vst [vmem:[#allocation31_spill] sm:$0xff] %v14298_v27  ;;  %vm3983_vm15 = vcmp.eq.s32.totalorder %v11893_v34, %v3809_v40  ;;  %v3806_v61 = vpop.permute.xlu0 %3805  ;;  %v9496_v53 = vpop.f32.mrf.mxu0  ;;  %10876 = vrcp.f32 %v2063_v6 }
 0x262   : > { %17153 = vst [vmem:[#allocation30_spill] sm:$0xff] %v14304_v18  ;;  %v1690_v1 = vsub.f32 0.0, %v14296_v48  ;;  %vm3982_vm0 = vcmp.eq.s32.totalorder %v11893_v34, %v3806_v61  ;;  %v9700_v36 = vpop.f32.mrf.mxu1  ;;  %v10865_v2 = vpop.eup %10864  ;;  %10878 = vpow2.f32 %v1908_v46 }
 0x263   : > { %vm14317_vm4 = vmpackc.low %vm3983_vm15, %vm3982_vm0  ;;  %v1472_v50 = vpop.f32.mrf.mxu0  ;;  %v10867_v6 = vpop.eup %10866  ;;  %v2064_v40 = vadd.f32 1.0, %v10865_v2  ;;  %9799 = vmatmul.mubr.msk.bf16.gmra.mxu1 %vm14330_vm6, %v16863_v20 }
 0x264   : > { %v17156_v29 = vsel %vm14317_vm4, 4294967295, %v17155_v29  ;;  %v1910_v61 = vmul.f32 1.442695, %v1690_v1  ;;  %v14322_v53 = vadd.f32 %v14293_v57, %v1472_v50  ;;  %v14324_v36 = vpop.f32.mrf.mxu1  ;;  %v3815_v27 = vpop.permute.xlu1 %3814  ;;  %v14337_v41 = vmul.f32 %v10867_v6, %v14125_v3  ;;  %9802 = vmatprep.mubr.msk.bf16.mxu1 %vm16826_vm1, %v16860_v47 }
 0x265   : > { %17157 = vst [vmem:[#allocation64_spill] sm:$0xff] %v17156_v29  ;;  %17158 = vst [vmem:[#allocation213_spill] sm:$0xff] %v14324_v36  ;;  %vm3985_vm5 = vcmp.eq.s32.totalorder %v11893_v34, %v3815_v27  ;;  %v3812_v15 = vpop.permute.xlu0 %3811  ;;  %v9497_v62 = vpop.f32.mrf.mxu0  ;;  %10880 = vrcp.f32 %v2064_v40  ;;  %v17164_v27 = vld [vmem:[#allocation35_spill] sm:$0xff]  ;;  %v17165_v36 = vld [vmem:[#allocation34_spill] sm:$0xff] }
 0x266   : > { %v1691_v1 = vsub.f32 0.0, %v14322_v53  ;;  %vm3984_vm7 = vcmp.eq.s32.totalorder %v11893_v34, %v3812_v15  ;;  %v9701_v2 = vpop.f32.mrf.mxu1  ;;  %v10869_v50 = vpop.eup %10868  ;;  %10882 = vpow2.f32 %v1910_v61  ;;  %v17161_v62 = vmov 0 }
 0x267   : > { %vm14339_vm8 = vmpackc.low %vm3985_vm5, %vm3984_vm7  ;;  %v1477_v42 = vpop.f32.mrf.mxu0  ;;  %v17166_v29 = vpack.c.bf16 %v17164_v27, %v17165_v36  ;;  %v10871_v40 = vpop.eup %10870  ;;  %v2065_v52 = vadd.f32 1.0, %v10869_v50  ;;  %v17168_v50 = vld [vmem:[#allocation66_spill] sm:$0xff] }
 0x268   : > { %v17162_v62 = vsel %vm14339_vm8, 4294967295, %v17161_v62  ;;  %v1912_v18 = vmul.f32 1.442695, %v1691_v1  ;;  %v14347_v15 = vadd.f32 %v14293_v57, %v1477_v42  ;;  %v14349_v2 = vpop.f32.mrf.mxu1  ;;  %v3821_v3 = vpop.permute.xlu1 %3820  ;;  %v14357_v6 = vmul.f32 %v10871_v40, %v14149_v33 }
 0x269   : > { %17163 = vst [vmem:[#allocation214_spill] sm:$0xff] %v17162_v62  ;;  %9879 = vmatmul.mubr.bf16.gmra.mxu0 %v17166_v29  ;;  %17167 = vst [vmem:[#allocation35_spill] sm:$0xff] %v14349_v2  ;;  %vm3987_vm9 = vcmp.eq.s32.totalorder %v11893_v34, %v3821_v3  ;;  %v3818_v29 = vpop.permute.xlu0 %3817  ;;  %v9500_v61 = vpop.f32.mrf.mxu0  ;;  %10884 = vrcp.f32 %v2065_v52  ;;  %vm3051_vm12 = vcmp.eq.s32.totalorder %v11893_v34, %v17168_v50  ;;  %v17169_v42 = vmov 0 }
 0x26a   : > { %9882 = vmatprep.mubr.msk.bf16.mxu0 %vm16826_vm1, %v16860_v47  ;;  %v1692_v36 = vsub.f32 0.0, %v14347_v15  ;;  %vm3986_vm10 = vcmp.eq.s32.totalorder %v11893_v34, %v3818_v29  ;;  %v9704_v46 = vpop.f32.mrf.mxu1  ;;  %v10873_v1 = vpop.eup %10872  ;;  %10886 = vpow2.f32 %v1912_v18  ;;  %vm14383_vm15 = vmpackc.low %vm3052_vm11, %vm3051_vm12 }
 0x26b   : > { %vm14370_vm13 = vmpackc.low %vm3987_vm9, %vm3986_vm10  ;;  %v1480_v52 = vpop.f32.mrf.mxu0  ;;  %v10875_v27 = vpop.eup %10874  ;;  %9803 = vmatmul.mubr.msk.bf16.gmra.mxu1 %vm14383_vm15, %v16863_v20 }
 0x26c   : > { %v17170_v42 = vsel %vm14370_vm13, 4294967295, %v17169_v42  ;;  %v1914_v40 = vmul.f32 1.442695, %v1692_v36  ;;  %v14375_v3 = vadd.f32 %v14293_v57, %v1480_v52  ;;  %v14377_v29 = vpop.f32.mrf.mxu1  ;;  %v3827_v61 = vpop.permute.xlu1 %3826  ;;  %v2066_v46 = vadd.f32 1.0, %v10875_v27  ;;  %9806 = vmatprep.mubr.msk.bf16.mxu1 %vm16826_vm1, %v16860_v47 }
 0x26d   : > { %17171 = vst [vmem:[#allocation34_spill] sm:$0xff] %v17170_v42  ;;  %17172 = vst [vmem:[#allocation66_spill] sm:$0xff] %v14377_v29  ;;  %vm3989_vm14 = vcmp.eq.s32.totalorder %v11893_v34, %v3827_v61  ;;  %v3824_v50 = vpop.permute.xlu0 %3823  ;;  %v9501_v2 = vpop.f32.mrf.mxu0  ;;  %v14388_v36 = vmul.f32 %v10873_v1, %v14168_v9  ;;  %v17179_v61 = vld [vmem:[#allocation40_spill] sm:$0xff]  ;;  %v17180_v29 = vld [vmem:[#allocation38_spill] sm:$0xff] }
 0x26e   : > { %10888 = vpow2.f32 %v1914_v40  ;;  %v1693_v52 = vsub.f32 0.0, %v14375_v3  ;;  %vm3988_vm0 = vcmp.eq.s32.totalorder %v11893_v34, %v3824_v50  ;;  %v9705_v27 = vpop.f32.mrf.mxu1  ;;  %v10877_v33 = vpop.eup %10876  ;;  %v17176_v2 = vmov 0 }
 0x26f   : > { %17175 = vst [vmem:[#allocation215_spill] sm:$0xff] %v14388_v36  ;;  %10890 = vrcp.f32 %v2066_v46  ;;  %vm14392_vm3 = vmpackc.low %vm3989_vm14, %vm3988_vm0  ;;  %v1485_v58 = vpop.f32.mrf.mxu0  ;;  %v17181_v42 = vpack.c.bf16 %v17179_v61, %v17180_v29  ;;  %v10879_v62 = vpop.eup %10878  ;;  %v14400_v9 = vmul.f32 %v10877_v33, %v14192_v23  ;;  %v17186_v61 = vmov 0 }
 0x270   : > { %v17177_v2 = vsel %vm14392_vm3, 4294967295, %v17176_v2  ;;  %v1916_v1 = vmul.f32 1.442695, %v1693_v52  ;;  %v14403_v40 = vadd.f32 %v14293_v57, %v1485_v58  ;;  %v14405_v50 = vpop.f32.mrf.mxu1  ;;  %v3833_v46 = vpop.permute.xlu1 %3832  ;;  %v2067_v29 = vadd.f32 1.0, %v10879_v62  ;;  %v17184_v58 = vld [vmem:[#allocation69_spill] sm:$0xff]  ;;  %v17185_v62 = vld [vmem:[#allocation71_spill] sm:$0xff] }
 0x271   : > { %17178 = vst [vmem:[#allocation216_spill] sm:$0xff] %v17177_v2  ;;  %9883 = vmatmul.mubr.bf16.gmra.mxu0 %v17181_v42  ;;  %17182 = vst [vmem:[#allocation40_spill] sm:$0xff] %v14400_v9  ;;  %vm3991_vm2 = vcmp.eq.s32.totalorder %v11893_v34, %v3833_v46  ;;  %v3830_v42 = vpop.permute.xlu0 %3829  ;;  %v9504_v23 = vpop.f32.mrf.mxu0  ;;  %vm3054_vm6 = vcmp.eq.s32.totalorder %v11893_v34, %v17184_v58  ;;  %vm3053_vm7 = vcmp.eq.s32.totalorder %v11893_v34, %v17185_v62 }
 0x272   : > { %17183 = vst [vmem:[#allocation38_spill] sm:$0xff] %v14405_v50  ;;  %9886 = vmatprep.mubr.msk.bf16.mxu0 %vm16826_vm1, %v16860_v47  ;;  %10892 = vpow2.f32 %v1916_v1  ;;  %v1694_v52 = vsub.f32 0.0, %v14403_v40  ;;  %vm3990_vm5 = vcmp.eq.s32.totalorder %v11893_v34, %v3830_v42  ;;  %v9708_v18 = vpop.f32.mrf.mxu1  ;;  %v10881_v27 = vpop.eup %10880  ;;  %vm14433_vm11 = vmpackc.low %vm3054_vm6, %vm3053_vm7 }
 0x273   : > { %10894 = vrcp.f32 %v2067_v29  ;;  %vm14423_vm9 = vmpackc.low %vm3991_vm2, %vm3990_vm5  ;;  %v1488_v46 = vpop.f32.mrf.mxu0  ;;  %v10883_v23 = vpop.eup %10882  ;;  %v14438_v62 = vmul.f32 %v10881_v27, %v14211_v32  ;;  %9807 = vmatmul.mubr.msk.bf16.gmra.mxu1 %vm14433_vm11, %v16863_v20  ;;  %vm3056_vm2 = vcmp.eq.s32.totalorder %v11893_v34, %v12993_v35  ;;  %vm3055_vm5 = vcmp.eq.s32.totalorder %v11893_v34, %v12995_v55 }
 0x274   : > { %v17187_v61 = vsel %vm14423_vm9, 4294967295, %v17186_v61  ;;  %v1918_v1 = vmul.f32 1.442695, %v1694_v52  ;;  %v14428_v33 = vadd.f32 %v14293_v57, %v1488_v46  ;;  %v14430_v42 = vpop.f32.mrf.mxu1  ;;  %v3839_v18 = vpop.permute.xlu1 %3838  ;;  %v2068_v50 = vadd.f32 1.0, %v10883_v23  ;;  %9810 = vmatprep.mubr.msk.bf16.mxu1 %vm16826_vm1, %v16860_v47 }
 0x275   : > { %17188 = vst [vmem:[#allocation69_spill] sm:$0xff] %v17187_v61  ;;  %17189 = vst [vmem:[#allocation71_spill] sm:$0xff] %v14430_v42  ;;  %vm3993_vm10 = vcmp.eq.s32.totalorder %v11893_v34, %v3839_v18  ;;  %v3836_v58 = vpop.permute.xlu0 %3835  ;;  %v9505_v2 = vpop.f32.mrf.mxu0  ;;  %v17193_v23 = vmov 0  ;;  %v17196_v18 = vld [vmem:[#allocation46_spill] sm:$0xff]  ;;  %v17197_v61 = vld [vmem:[#allocation43_spill] sm:$0xff] }
 0x276   : > { %17192 = vst [vmem:[#allocation217_spill] sm:$0xff] %v14438_v62  ;;  %10896 = vpow2.f32 %v1918_v1  ;;  %v1695_v52 = vsub.f32 0.0, %v14428_v33  ;;  %vm3992_vm12 = vcmp.eq.s32.totalorder %v11893_v34, %v3836_v58  ;;  %v9709_v46 = vpop.f32.mrf.mxu1  ;;  %v10885_v42 = vpop.eup %10884  ;;  %v17198_v36 = vpack.c.bf16 %v17196_v18, %v17197_v61 }
 0x277   : > { %10898 = vrcp.f32 %v2068_v50  ;;  %vm14442_vm14 = vmpackc.low %vm3993_vm10, %vm3992_vm12  ;;  %v1493_v2 = vpop.f32.mrf.mxu0  ;;  %v10887_v9 = vpop.eup %10886  ;;  %v14450_v32 = vmul.f32 %v10885_v42, %v14232_v49 }
 0x278   : > { %v17194_v23 = vsel %vm14442_vm14, 4294967295, %v17193_v23  ;;  %v1920_v27 = vmul.f32 1.442695, %v1695_v52  ;;  %v14453_v1 = vadd.f32 %v14293_v57, %v1493_v2  ;;  %v14455_v58 = vpop.f32.mrf.mxu1  ;;  %v3845_v50 = vpop.permute.xlu1 %3844  ;;  %v2069_v61 = vadd.f32 1.0, %v10887_v9  ;;  %vm14483_vm10 = vmpackc.low %vm3056_vm2, %vm3055_vm5 }
 0x279   : > { %17195 = vst [vmem:[#allocation218_spill] sm:$0xff] %v17194_v23  ;;  %9887 = vmatmul.mubr.bf16.gmra.mxu0 %v17198_v36  ;;  %17199 = vst [vmem:[#allocation46_spill] sm:$0xff] %v14455_v58  ;;  %vm3995_vm15 = vcmp.eq.s32.totalorder %v11893_v34, %v3845_v50  ;;  %v3842_v36 = vpop.permute.xlu0 %3841  ;;  %v9508_v49 = vpop.f32.mrf.mxu0  ;;  %v17200_v9 = vmov 0  ;;  %v17211_v58 = vld [vmem:[#allocation49_spill] sm:$0xff]  ;;  %vm3058_vm2 = vcmp.eq.s32.totalorder %v11893_v34, %v13019_v59 }
 0x27a   : > { %9890 = vmatprep.mubr.msk.bf16.mxu0 %vm16826_vm1, %v16860_v47  ;;  %10900 = vpow2.f32 %v1920_v27  ;;  %v1696_v52 = vsub.f32 0.0, %v14453_v1  ;;  %vm3994_vm0 = vcmp.eq.s32.totalorder %v11893_v34, %v3842_v36  ;;  %v9712_v29 = vpop.f32.mrf.mxu1 }
 0x27b   : > { %v10889_v46 = vpop.eup %10888  ;;  %10902 = vrcp.f32 %v2069_v61  ;;  %vm14473_vm6 = vmpackc.low %vm3995_vm15, %vm3994_vm0  ;;  %v1496_v2 = vpop.f32.mrf.mxu0  ;;  %9811 = vmatmul.mubr.msk.bf16.gmra.mxu1 %vm14483_vm10, %v16863_v20 }
 0x27c   : > { %v17201_v9 = vsel %vm14473_vm6, 4294967295, %v17200_v9  ;;  %v10891_v18 = vpop.eup %10890  ;;  %v2070_v27 = vadd.f32 1.0, %v10889_v46  ;;  %v1922_v50 = vmul.f32 1.442695, %v1696_v52  ;;  %v14478_v49 = vadd.f32 %v14293_v57, %v1496_v2  ;;  %v14480_v36 = vpop.f32.mrf.mxu1  ;;  %9814 = vmatprep.mubr.msk.bf16.mxu1 %vm16826_vm1, %v16860_v47 }
 0x27d   : > { %17202 = vst [vmem:[#allocation43_spill] sm:$0xff] %v17201_v9  ;;  %17203 = vst [vmem:[#allocation219_spill] sm:$0xff] %v14480_v36  ;;  %v3851_v29 = vpop.permute.xlu1 %3850  ;;  %v3848_v35 = vpop.permute.xlu0 %3847  ;;  %v14490_v2 = vmul.f32 %v10891_v18, %v14251_v38  ;;  %v17207_v36 = vmov 0 }
 0x27e   : > { %vm3997_vm7 = vcmp.eq.s32.totalorder %v11893_v34, %v3851_v29  ;;  %v9509_v42 = vpop.f32.mrf.mxu0  ;;  %10904 = vrcp.f32 %v2070_v27  ;;  %v1697_v61 = vsub.f32 0.0, %v14478_v49  ;;  %vm3996_vm11 = vcmp.eq.s32.totalorder %v11893_v34, %v3848_v35  ;;  %v9713_v52 = vpop.f32.mrf.mxu1  ;;  %v17210_v29 = vld [vmem:[#allocation50_spill] sm:$0xff] }
 0x27f   : > { %v10893_v46 = vpop.eup %10892  ;;  %17206 = vst [vmem:[#allocation220_spill] sm:$0xff] %v14490_v2  ;;  %10906 = vpow2.f32 %v1922_v50  ;;  %vm14492_vm12 = vmpackc.low %vm3997_vm7, %vm3996_vm11  ;;  %v17212_v9 = vpack.c.bf16 %v17210_v29, %v17211_v58 }
 0x280   : > { %v17208_v36 = vsel %vm14492_vm12, 4294967295, %v17207_v36  ;;  %v1501_v42 = vpop.f32.mrf.mxu0  ;;  %v10895_v27 = vpop.eup %10894  ;;  %v2071_v23 = vadd.f32 1.0, %v10893_v46  ;;  %v1924_v62 = vmul.f32 1.442695, %v1697_v61  ;;  %v17214_v46 = vld [vmem:[#allocation76_spill] sm:$0xff] }
 0x281   : > { %17209 = vst [vmem:[#allocation221_spill] sm:$0xff] %v17208_v36  ;;  %9891 = vmatmul.mubr.bf16.gmra.mxu0 %v17212_v9  ;;  %v14500_v35 = vadd.f32 %v14293_v57, %v1501_v42  ;;  %v14502_v52 = vpop.f32.mrf.mxu1  ;;  %v3857_v38 = vpop.permute.xlu1 %3856  ;;  %v14510_v18 = vmul.f32 %v10895_v27, %v14272_v28  ;;  %vm3057_vm5 = vcmp.eq.s32.totalorder %v11893_v34, %v17214_v46  ;;  %v17215_v42 = vmov 0 }
 0x282   : > { %17213 = vst [vmem:[#allocation50_spill] sm:$0xff] %v14502_v52  ;;  %9894 = vmatprep.mubr.msk.bf16.mxu0 %vm16826_vm1, %v16860_v47  ;;  %vm3999_vm15 = vcmp.eq.s32.totalorder %v11893_v34, %v3857_v38  ;;  %v3854_v58 = vpop.permute.xlu0 %3853  ;;  %v9512_v9 = vpop.f32.mrf.mxu0  ;;  %10908 = vrcp.f32 %v2071_v23  ;;  %vm14536_vm11 = vmpackc.low %vm3058_vm2, %vm3057_vm5 }
 0x283   : > { %v1698_v50 = vsub.f32 0.0, %v14500_v35  ;;  %vm3998_vm0 = vcmp.eq.s32.totalorder %v11893_v34, %v3854_v58  ;;  %v9716_v55 = vpop.f32.mrf.mxu1  ;;  %v10897_v61 = vpop.eup %10896  ;;  %10910 = vpow2.f32 %v1924_v62  ;;  %9815 = vmatmul.mubr.msk.bf16.gmra.mxu1 %vm14536_vm11, %v16863_v20 }
 0x284   : > { %vm14523_vm7 = vmpackc.low %vm3999_vm15, %vm3998_vm0  ;;  %v1504_v23 = vpop.f32.mrf.mxu0  ;;  %v10899_v29 = vpop.eup %10898  ;;  %v2072_v27 = vadd.f32 1.0, %v10897_v61  ;;  %9818 = vmatprep.mubr.msk.bf16.mxu1 %vm16826_vm1, %v16860_v47 }
 0x285   : > { %v17216_v42 = vsel %vm14523_vm7, 4294967295, %v17215_v42  ;;  %v1926_v38 = vmul.f32 1.442695, %v1698_v50  ;;  %v14528_v58 = vadd.f32 %v14293_v57, %v1504_v23  ;;  %v14530_v9 = vpop.f32.mrf.mxu1  ;;  %v3863_v55 = vpop.permute.xlu1 %3862  ;;  %v14543_v28 = vmul.f32 %v10899_v29, %v14296_v48 }
 0x286   : > { %17217 = vst [vmem:[#allocation49_spill] sm:$0xff] %v17216_v42  ;;  %17218 = vst [vmem:[#allocation76_spill] sm:$0xff] %v14530_v9  ;;  %vm4001_vm10 = vcmp.eq.s32.totalorder %v11893_v34, %v3863_v55  ;;  %v3860_v46 = vpop.permute.xlu0 %3859  ;;  %v9513_v52 = vpop.f32.mrf.mxu0  ;;  %10912 = vrcp.f32 %v2072_v27  ;;  %v17225_v55 = vld [vmem:[#allocation56_spill] sm:$0xff]  ;;  %v17226_v9 = vld [vmem:[#allocation55_spill] sm:$0xff] }
 0x287   : > { %v1699_v50 = vsub.f32 0.0, %v14528_v58  ;;  %vm4000_vm15 = vcmp.eq.s32.totalorder %v11893_v34, %v3860_v46  ;;  %v9717_v61 = vpop.f32.mrf.mxu1  ;;  %v10901_v23 = vpop.eup %10900  ;;  %17221 = vst [vmem:[#allocation222_spill] sm:$0xff] %v14543_v28  ;;  %10914 = vpow2.f32 %v1926_v38  ;;  %v17222_v52 = vmov 0 }
 0x288   : > { %vm14545_vm0 = vmpackc.low %vm4001_vm10, %vm4000_vm15  ;;  %v1509_v59 = vpop.f32.mrf.mxu0  ;;  %v17227_v42 = vpack.c.bf16 %v17225_v55, %v17226_v9  ;;  %v10903_v27 = vpop.eup %10902  ;;  %v2073_v36 = vadd.f32 1.0, %v10901_v23  ;;  %v17229_v23 = vld [vmem:[#allocation78_spill] sm:$0xff]  ;;  %v17231_v55 = vmov 0 }
 0x289   : > { %v17223_v52 = vsel %vm14545_vm0, 4294967295, %v17222_v52  ;;  %v1928_v2 = vmul.f32 1.442695, %v1699_v50  ;;  %v14553_v46 = vadd.f32 %v14293_v57, %v1509_v59  ;;  %v14555_v61 = vpop.f32.mrf.mxu1  ;;  %v3869_v48 = vpop.permute.xlu1 %3868  ;;  %v14563_v29 = vmul.f32 %v10903_v27, %v14322_v53  ;;  %v17230_v59 = vld [vmem:[#allocation79_spill] sm:$0xff] }
 0x28a   : > { %17224 = vst [vmem:[#allocation223_spill] sm:$0xff] %v17223_v52  ;;  %9895 = vmatmul.mubr.bf16.gmra.mxu0 %v17227_v42  ;;  %17228 = vst [vmem:[#allocation56_spill] sm:$0xff] %v14555_v61  ;;  %vm4003_vm2 = vcmp.eq.s32.totalorder %v11893_v34, %v3869_v48  ;;  %v3866_v42 = vpop.permute.xlu0 %3865  ;;  %v9516_v38 = vpop.f32.mrf.mxu0  ;;  %10916 = vrcp.f32 %v2073_v36  ;;  %vm3060_vm10 = vcmp.eq.s32.totalorder %v11893_v34, %v17229_v23 }
 0x28b   : > { %9898 = vmatprep.mubr.msk.bf16.mxu0 %vm16826_vm1, %v16860_v47  ;;  %v1700_v9 = vsub.f32 0.0, %v14553_v46  ;;  %vm4002_vm5 = vcmp.eq.s32.totalorder %v11893_v34, %v3866_v42  ;;  %v9720_v62 = vpop.f32.mrf.mxu1  ;;  %v10905_v50 = vpop.eup %10904  ;;  %vm3059_vm11 = vcmp.eq.s32.totalorder %v11893_v34, %v17230_v59  ;;  %10918 = vpow2.f32 %v1928_v2 }
 0x28c   : > { %vm14576_vm15 = vmpackc.low %vm4003_vm2, %vm4002_vm5  ;;  %v1512_v36 = vpop.f32.mrf.mxu0  ;;  %v10907_v27 = vpop.eup %10906 }
 0x28d   : > { %v17232_v55 = vsel %vm14576_vm15, 4294967295, %v17231_v55  ;;  %v1930_v48 = vmul.f32 1.442695, %v1700_v9  ;;  %v14581_v42 = vadd.f32 %v14293_v57, %v1512_v36  ;;  %v14583_v38 = vpop.f32.mrf.mxu1  ;;  %v3875_v62 = vpop.permute.xlu1 %3874  ;;  %v2074_v61 = vadd.f32 1.0, %v10907_v27  ;;  %vm14589_vm2 = vmpackc.low %vm3060_vm10, %vm3059_vm11 }
 0x28e   : > { %17233 = vst [vmem:[#allocation55_spill] sm:$0xff] %v17232_v55  ;;  %17234 = vst [vmem:[#allocation78_spill] sm:$0xff] %v14583_v38  ;;  %vm4005_vm1 = vcmp.eq.s32.totalorder %v11893_v34, %v3875_v62  ;;  %v3872_v59 = vpop.permute.xlu0 %3871  ;;  %v9517_v52 = vpop.f32.mrf.mxu0  ;;  %v14594_v9 = vmul.f32 %v10905_v50, %v14347_v15  ;;  %v17241_v62 = vld [vmem:[#allocation63_spill] sm:$0xff]  ;;  %v17242_v38 = vld [vmem:[#allocation61_spill] sm:$0xff]  ;;  %9819 = vmatmul.mubr.msk.bf16.gmra.mxu1 %vm14589_vm2, %v16863_v20 }
 0x28f   : > { %10920 = vpow2.f32 %v1930_v48  ;;  %v1701_v36 = vsub.f32 0.0, %v14581_v42  ;;  %vm4004_vm5 = vcmp.eq.s32.totalorder %v11893_v34, %v3872_v59  ;;  %v9721_v27 = vpop.f32.mrf.mxu1  ;;  %v10909_v53 = vpop.eup %10908  ;;  %v17238_v52 = vmov 0 }
 0x290   : > { %17237 = vst [vmem:[#allocation79_spill] sm:$0xff] %v14594_v9  ;;  %10922 = vrcp.f32 %v2074_v61  ;;  %vm14598_vm15 = vmpackc.low %vm4005_vm1, %vm4004_vm5  ;;  %v1517_v23 = vpop.f32.mrf.mxu0  ;;  %v17243_v55 = vpack.c.bf16 %v17241_v62, %v17242_v38  ;;  %v10911_v28 = vpop.eup %10910  ;;  %v14606_v15 = vmul.f32 %v10909_v53, %v14375_v3  ;;  %vm17246_vm1 = vmmov 0   ;;  %v17248_v62 = vld [vmem:[#allocation84_spill] sm:$0xff] }
 0x291   : > { %v17239_v52 = vsel %vm14598_vm15, 4294967295, %v17238_v52  ;;  %v1932_v50 = vmul.f32 1.442695, %v1701_v36  ;;  %v14609_v48 = vadd.f32 %v14293_v57, %v1517_v23  ;;  %v14611_v59 = vpop.f32.mrf.mxu1  ;;  %v2075_v61 = vadd.f32 1.0, %v10911_v28  ;;  %9822 = vmatprep.mubr.msk.bf16.mxu1 %vm17246_vm1, %v16860_v47  ;;  %v17247_v23 = vld [vmem:[#allocation83_spill] sm:$0xff] }
 0x292   : > { %17240 = vst [vmem:[#allocation224_spill] sm:$0xff] %v17239_v52  ;;  %9899 = vmatmul.mubr.bf16.gmra.mxu0 %v17243_v55  ;;  %17244 = vst [vmem:[#allocation63_spill] sm:$0xff] %v14606_v15  ;;  %v9520_v38 = vpop.f32.mrf.mxu0  ;;  %vm3062_vm10 = vcmp.eq.s32.totalorder %v11893_v34, %v17247_v23  ;;  %vm3061_vm11 = vcmp.eq.s32.totalorder %v11893_v34, %v17248_v62  ;;  %v17251_v62 = vld [vmem:[#allocation70_spill] sm:$0xff]  ;;  %vm3885_vm5 = vcmp.eq.s32.totalorder %v11893_v34, %v13098_v7 }
 0x293   : > { %17245 = vst [vmem:[#allocation61_spill] sm:$0xff] %v14611_v59  ;;  %9902 = vmatprep.mubr.msk.bf16.mxu0 %vm17246_vm1, %v16860_v47  ;;  %10924 = vpow2.f32 %v1932_v50  ;;  %v1702_v53 = vsub.f32 0.0, %v14609_v48  ;;  %v9724_v55 = vpop.f32.mrf.mxu1  ;;  %v10913_v36 = vpop.eup %10912  ;;  %vm8246_vm2 = vmpackc.low %vm3062_vm10, %vm3061_vm11  ;;  %vm3884_vm10 = vcmp.eq.s32.totalorder %v11893_v34, %v13100_v39  ;;  %v17256_v39 = vld [vmem:[#allocation74_spill] sm:$0xff] }
 0x294   : > { %10926 = vrcp.f32 %v2075_v61  ;;  %v1520_v27 = vpop.f32.mrf.mxu0  ;;  %v10915_v2 = vpop.eup %10914  ;;  %v14633_v55 = vmul.f32 %v10913_v36, %v14403_v40  ;;  %vm8266_vm11 = vmpackc.low %vm3885_vm5, %vm3884_vm10  ;;  %vm3886_vm5 = vcmp.eq.s32.totalorder %v11893_v34, %v13129_v26 }
 0x295   : > { %v1934_v28 = vmul.f32 1.442695, %v1702_v53  ;;  %v14628_v38 = vadd.f32 %v14293_v57, %v1520_v27  ;;  %v14630_v52 = vpop.f32.mrf.mxu1  ;;  %v2076_v50 = vadd.f32 1.0, %v10915_v2  ;;  %v17252_v53 = vld [vmem:[#allocation67_spill] sm:$0xff] }
 0x296   : > { %17249 = vst [vmem:[#allocation83_spill] sm:$0xff] %v14630_v52  ;;  %v9521_v3 = vpop.f32.mrf.mxu0  ;;  %17250 = vst [vmem:[#allocation84_spill] sm:$0xff] %v14633_v55  ;;  %v17253_v15 = vpack.c.bf16 %v17251_v62, %v17252_v53  ;;  %9823 = vmatmul.mubr.msk.bf16.gmra.mxu1 %vm8246_vm2, %v16863_v20  ;;  %vm3887_vm2 = vcmp.eq.s32.totalorder %v11893_v34, %v13122_v22 }
 0x297   : > { %10928 = vpow2.f32 %v1934_v28  ;;  %v1703_v61 = vsub.f32 0.0, %v14628_v38  ;;  %v9725_v59 = vpop.f32.mrf.mxu1  ;;  %v10917_v9 = vpop.eup %10916  ;;  %10114 = vmatprep.mubr.msk.bf16.mxu1 %vm17246_vm1, %v16860_v47  ;;  %vm8268_vm10 = vmpackc.low %vm3887_vm2, %vm3886_vm5 }
 0x298   : > { %10930 = vrcp.f32 %v2076_v50  ;;  %v1525_v23 = vpop.f32.mrf.mxu0  ;;  %v10919_v27 = vpop.eup %10918  ;;  %v14640_v52 = vmul.f32 %v10917_v9, %v14428_v33 }
 0x299   : > { %v1936_v3 = vmul.f32 1.442695, %v1703_v61  ;;  %v14643_v40 = vadd.f32 %v14293_v57, %v1525_v23  ;;  %v14645_v36 = vpop.f32.mrf.mxu1  ;;  %v2077_v59 = vadd.f32 1.0, %v10919_v27 }
 0x29a   : > { %9903 = vmatmul.mubr.bf16.gmra.mxu0 %v17253_v15  ;;  %17254 = vst [vmem:[#allocation70_spill] sm:$0xff] %v14645_v36  ;;  %v9524_v2 = vpop.f32.mrf.mxu0 }
 0x29b   : > { %9906 = vmatprep.mubr.msk.bf16.mxu0 %vm17246_vm1, %v16860_v47  ;;  %10932 = vpow2.f32 %v1936_v3  ;;  %v1704_v9 = vsub.f32 0.0, %v14643_v40  ;;  %v9728_v15 = vpop.f32.mrf.mxu1 }
 0x29c   : > { %v10921_v28 = vpop.eup %10920  ;;  %10934 = vrcp.f32 %v2077_v59  ;;  %v1528_v50 = vpop.f32.mrf.mxu0 }
 0x29d   : > { %v10923_v61 = vpop.eup %10922  ;;  %v2078_v23 = vadd.f32 1.0, %v10921_v28  ;;  %v1938_v62 = vmul.f32 1.442695, %v1704_v9  ;;  %v14660_v53 = vadd.f32 %v14293_v57, %v1528_v50  ;;  %v14662_v27 = vpop.f32.mrf.mxu1  ;;  %v17257_v28 = vld [vmem:[#allocation73_spill] sm:$0xff] }
 0x29e   : > { %17255 = vst [vmem:[#allocation67_spill] sm:$0xff] %v14662_v27  ;;  %v9525_v3 = vpop.f32.mrf.mxu0  ;;  %v14666_v7 = vmul.f32 %v10923_v61, %v14453_v1  ;;  %v17258_v9 = vpack.c.bf16 %v17256_v39, %v17257_v28  ;;  %10115 = vmatmul.mubr.msk.bf16.vlgmr.msra.gmra.mxu1 %vm8266_vm11, %v16863_v20  ;;  %vm3889_vm11 = vcmp.eq.s32.totalorder %v11893_v34, %v13153_v43 }
 0x29f   : > { %10936 = vrcp.f32 %v2078_v23  ;;  %v1705_v2 = vsub.f32 0.0, %v14660_v53  ;;  %v9729_v15 = vpop.f32.mrf.mxu1  ;;  %10118 = vmatprep.mubr.msk.bf16.mxu1 %vm17246_vm1, %v16860_v47 }
 0x2a0   : > { %v10925_v33 = vpop.eup %10924  ;;  %10938 = vpow2.f32 %v1938_v62  ;;  %v1533_v59 = vpop.f32.mrf.mxu0 }
 0x2a1   : > { %v10927_v50 = vpop.eup %10926  ;;  %v2079_v36 = vadd.f32 1.0, %v10925_v33  ;;  %v1940_v55 = vmul.f32 1.442695, %v1705_v2  ;;  %v14672_v3 = vadd.f32 %v14293_v57, %v1533_v59  ;;  %v14674_v23 = vpop.f32.mrf.mxu1 }
 0x2a2   : > { %9907 = vmatmul.mubr.bf16.gmra.mxu0 %v17258_v9  ;;  %17259 = vst [vmem:[#allocation74_spill] sm:$0xff] %v14674_v23  ;;  %v14680_v1 = vmul.f32 %v10927_v50, %v14478_v49  ;;  %v9528_v61 = vpop.f32.mrf.mxu0 }
 0x2a3   : > { %9910 = vmatprep.mubr.msk.bf16.mxu0 %vm17246_vm1, %v16860_v47  ;;  %10940 = vrcp.f32 %v2079_v36  ;;  %v1706_v33 = vsub.f32 0.0, %v14672_v3  ;;  %v9732_v62 = vpop.f32.mrf.mxu1 }
 0x2a4   : > { %v10929_v2 = vpop.eup %10928  ;;  %10942 = vpow2.f32 %v1940_v55  ;;  %v1536_v59 = vpop.f32.mrf.mxu0 }
 0x2a5   : > { %v10931_v39 = vpop.eup %10930  ;;  %v2080_v49 = vadd.f32 1.0, %v10929_v2  ;;  %v1942_v28 = vmul.f32 1.442695, %v1706_v33  ;;  %v14692_v36 = vadd.f32 %v14293_v57, %v1536_v59  ;;  %v14694_v9 = vpop.f32.mrf.mxu1  ;;  %v17261_v33 = vld [vmem:[#allocation81_spill] sm:$0xff]  ;;  %v17262_v2 = vld [vmem:[#allocation80_spill] sm:$0xff] }
 0x2a6   : > { %17260 = vst [vmem:[#allocation73_spill] sm:$0xff] %v14694_v9  ;;  %v9529_v50 = vpop.f32.mrf.mxu0  ;;  %v14701_v55 = vmul.f32 %v10931_v39, %v14500_v35  ;;  %v17263_v59 = vpack.c.bf16 %v17261_v33, %v17262_v2  ;;  %10119 = vmatmul.mubr.msk.bf16.gmra.mxu1 %vm8268_vm10, %v16863_v20 }
 0x2a7   : > { %10944 = vrcp.f32 %v2080_v49  ;;  %v1707_v61 = vsub.f32 0.0, %v14692_v36  ;;  %v9733_v62 = vpop.f32.mrf.mxu1  ;;  %10122 = vmatprep.mubr.msk.bf16.mxu1 %vm17246_vm1, %v16860_v47 }
 0x2a8   : > { %v10933_v23 = vpop.eup %10932  ;;  %10946 = vpow2.f32 %v1942_v28  ;;  %v1541_v26 = vpop.f32.mrf.mxu0 }
 0x2a9   : > { %v10935_v15 = vpop.eup %10934  ;;  %v2081_v50 = vadd.f32 1.0, %v10933_v23  ;;  %v1944_v49 = vmul.f32 1.442695, %v1707_v61  ;;  %v14707_v9 = vadd.f32 %v14293_v57, %v1541_v26  ;;  %v14709_v62 = vpop.f32.mrf.mxu1 }
 0x2aa   : > { %9911 = vmatmul.mubr.bf16.gmra.mxu0 %v17263_v59  ;;  %17264 = vst [vmem:[#allocation81_spill] sm:$0xff] %v14709_v62  ;;  %v14715_v22 = vmul.f32 %v10935_v15, %v14528_v58  ;;  %v9532_v35 = vpop.f32.mrf.mxu0  ;;  %v17265_v58 = vld [vmem:[#allocation90_spill] sm:$0xff] }
 0x2ab   : > { %9914 = vmatprep.mubr.msk.bf16.mxu0 %vm17246_vm1, %v16860_v47  ;;  %10948 = vrcp.f32 %v2081_v50  ;;  %v1708_v23 = vsub.f32 0.0, %v14707_v9  ;;  %v9736_v39 = vpop.f32.mrf.mxu1  ;;  %vm3888_vm2 = vcmp.eq.s32.totalorder %v11893_v34, %v17265_v58  ;;  %v17268_v58 = vld [vmem:[#allocation88_spill] sm:$0xff] }
 0x2ac   : > { %v10937_v28 = vpop.eup %10936  ;;  %10950 = vpow2.f32 %v1944_v49  ;;  %v1544_v26 = vpop.f32.mrf.mxu0  ;;  %vm8270_vm5 = vmpackc.low %vm3889_vm11, %vm3888_vm2 }
 0x2ad   : > { %v10939_v33 = vpop.eup %10938  ;;  %v1946_v15 = vmul.f32 1.442695, %v1708_v23  ;;  %v14727_v2 = vadd.f32 %v14293_v57, %v1544_v26  ;;  %v14729_v59 = vpop.f32.mrf.mxu1  ;;  %v14732_v39 = vmul.f32 %v10937_v28, %v14553_v46  ;;  %v17269_v23 = vld [vmem:[#allocation86_spill] sm:$0xff] }
 0x2ae   : > { %17266 = vst [vmem:[#allocation80_spill] sm:$0xff] %v14729_v59  ;;  %v2082_v50 = vadd.f32 1.0, %v10939_v33  ;;  %v9533_v35 = vpop.f32.mrf.mxu0  ;;  %v17270_v27 = vpack.c.bf16 %v17268_v58, %v17269_v23  ;;  %10123 = vmatmul.mubr.msk.bf16.gmra.mxu1 %vm8270_vm5, %v16863_v20  ;;  %v17274_v58 = vld [vmem:[#allocation95_spill] sm:$0xff]  ;;  %vm3893_vm5 = vcmp.eq.s32.totalorder %v11893_v34, %v13202_v11 }
 0x2af   : > { %17267 = vst [vmem:[#allocation90_spill] sm:$0xff] %v14732_v39  ;;  %10952 = vpow2.f32 %v1946_v15  ;;  %v1709_v49 = vsub.f32 0.0, %v14727_v2  ;;  %v9737_v61 = vpop.f32.mrf.mxu1  ;;  %10126 = vmatprep.mubr.msk.bf16.mxu1 %vm17246_vm1, %v16860_v47  ;;  %vm3890_vm11 = vcmp.eq.s32.totalorder %v11893_v34, %v17274_v58  ;;  %v17277_v58 = vld [vmem:[#allocation94_spill] sm:$0xff] }
 0x2b0   : > { %v10941_v62 = vpop.eup %10940  ;;  %10954 = vrcp.f32 %v2082_v50  ;;  %v1549_v43 = vpop.f32.mrf.mxu0 }
 0x2b1   : > { %v10943_v26 = vpop.eup %10942  ;;  %v14739_v59 = vmul.f32 %v10941_v62, %v14581_v42  ;;  %v1948_v33 = vmul.f32 1.442695, %v1709_v49  ;;  %v14742_v46 = vadd.f32 %v14293_v57, %v1549_v43  ;;  %v14744_v28 = vpop.f32.mrf.mxu1  ;;  %v17273_v43 = vld [vmem:[#allocation93_spill] sm:$0xff] }
 0x2b2   : > { %9915 = vmatmul.mubr.bf16.gmra.mxu0 %v17270_v27  ;;  %17272 = vst [vmem:[#allocation86_spill] sm:$0xff] %v14744_v28  ;;  %v2083_v61 = vadd.f32 1.0, %v10943_v26  ;;  %v9536_v15 = vpop.f32.mrf.mxu0  ;;  %vm3891_vm10 = vcmp.eq.s32.totalorder %v11893_v34, %v17273_v43 }
 0x2b3   : > { %17271 = vst [vmem:[#allocation88_spill] sm:$0xff] %v14739_v59  ;;  %9918 = vmatprep.mubr.msk.bf16.mxu0 %vm17246_vm1, %v16860_v47  ;;  %10956 = vpow2.f32 %v1948_v33  ;;  %v1710_v27 = vsub.f32 0.0, %v14742_v46  ;;  %v9740_v62 = vpop.f32.mrf.mxu1  ;;  %vm8272_vm2 = vmpackc.low %vm3891_vm10, %vm3890_vm11  ;;  %vm3892_vm10 = vcmp.eq.s32.totalorder %v11893_v34, %v13204_v12  ;;  %v17283_v12 = vld [vmem:[#allocation98_spill] sm:$0xff] }
 0x2b4   : > { %v10945_v50 = vpop.eup %10944  ;;  %10958 = vrcp.f32 %v2083_v61  ;;  %v1552_v35 = vpop.f32.mrf.mxu0  ;;  %vm8274_vm11 = vmpackc.low %vm3893_vm5, %vm3892_vm10 }
 0x2b5   : > { %v10947_v49 = vpop.eup %10946  ;;  %v1950_v23 = vmul.f32 1.442695, %v1710_v27  ;;  %v14759_v26 = vadd.f32 %v14293_v57, %v1552_v35  ;;  %v14761_v15 = vpop.f32.mrf.mxu1  ;;  %v14764_v62 = vmul.f32 %v10945_v50, %v14609_v48  ;;  %v17278_v27 = vld [vmem:[#allocation91_spill] sm:$0xff] }
 0x2b6   : > { %17275 = vst [vmem:[#allocation93_spill] sm:$0xff] %v14761_v15  ;;  %v2084_v33 = vadd.f32 1.0, %v10947_v49  ;;  %v9537_v42 = vpop.f32.mrf.mxu0  ;;  %v17279_v59 = vpack.c.bf16 %v17277_v58, %v17278_v27  ;;  %10127 = vmatmul.mubr.msk.bf16.gmra.mxu1 %vm8272_vm2, %v16863_v20 }
 0x2b7   : > { %17276 = vst [vmem:[#allocation95_spill] sm:$0xff] %v14764_v62  ;;  %10960 = vpow2.f32 %v1950_v23  ;;  %v1711_v61 = vsub.f32 0.0, %v14759_v26  ;;  %v9741_v28 = vpop.f32.mrf.mxu1  ;;  %10130 = vmatprep.mubr.msk.bf16.mxu1 %vm17246_vm1, %v16860_v47 }
 0x2b8   : > { %v10949_v39 = vpop.eup %10948  ;;  %10962 = vrcp.f32 %v2084_v33  ;;  %v1557_v43 = vpop.f32.mrf.mxu0 }
 0x2b9   : > { %v10951_v35 = vpop.eup %10950  ;;  %v14771_v15 = vmul.f32 %v10949_v39, %v14628_v38  ;;  %v1952_v42 = vmul.f32 1.442695, %v1711_v61  ;;  %v14774_v48 = vadd.f32 %v14293_v57, %v1557_v43  ;;  %v14776_v50 = vpop.f32.mrf.mxu1 }
 0x2ba   : > { %9919 = vmatmul.mubr.bf16.gmra.mxu0 %v17279_v59  ;;  %17281 = vst [vmem:[#allocation91_spill] sm:$0xff] %v14776_v50  ;;  %v2085_v28 = vadd.f32 1.0, %v10951_v35  ;;  %v9540_v49 = vpop.f32.mrf.mxu0 }
 0x2bb   : > { %17280 = vst [vmem:[#allocation94_spill] sm:$0xff] %v14771_v15  ;;  %9922 = vmatprep.mubr.msk.bf16.mxu0 %vm17246_vm1, %v16860_v47  ;;  %10964 = vpow2.f32 %v1952_v42  ;;  %v1712_v59 = vsub.f32 0.0, %v14774_v48  ;;  %v9744_v39 = vpop.f32.mrf.mxu1 }
 0x2bc   : > { %v10953_v23 = vpop.eup %10952  ;;  %10966 = vrcp.f32 %v2085_v28  ;;  %v1560_v33 = vpop.f32.mrf.mxu0 }
 0x2bd   : > { %v10955_v61 = vpop.eup %10954  ;;  %v2086_v43 = vadd.f32 1.0, %v10953_v23  ;;  %v1954_v58 = vmul.f32 1.442695, %v1712_v59  ;;  %v14791_v27 = vadd.f32 %v14293_v57, %v1560_v33  ;;  %v14793_v35 = vpop.f32.mrf.mxu1  ;;  %v17284_v23 = vld [vmem:[#allocation97_spill] sm:$0xff] }
 0x2be   : > { %17282 = vst [vmem:[#allocation225_spill] sm:$0xff] %v14793_v35  ;;  %v9541_v42 = vpop.f32.mrf.mxu0  ;;  %v14797_v11 = vmul.f32 %v10955_v61, %v14643_v40  ;;  %v17285_v59 = vpack.c.bf16 %v17283_v12, %v17284_v23  ;;  %10131 = vmatmul.mubr.msk.bf16.gmra.mxu1 %vm8274_vm11, %v16863_v20 }
 0x2bf   : > { %10968 = vrcp.f32 %v2086_v43  ;;  %v1713_v49 = vsub.f32 0.0, %v14791_v27  ;;  %v9745_v39 = vpop.f32.mrf.mxu1  ;;  %10134 = vmatprep.mubr.msk.bf16.mxu1 %vm17246_vm1, %v16860_v47 }
 0x2c0   : > { %v10957_v38 = vpop.eup %10956  ;;  %10970 = vpow2.f32 %v1954_v58  ;;  %v1565_v28 = vpop.f32.mrf.mxu0  ;;  %v17287_v39 = vld [vmem:[#allocation100_spill] sm:$0xff] }
 0x2c1   : > { %v10959_v33 = vpop.eup %10958  ;;  %v2087_v50 = vadd.f32 1.0, %v10957_v38  ;;  %v1956_v62 = vmul.f32 1.442695, %v1713_v49  ;;  %v14803_v42 = vadd.f32 %v14293_v57, %v1565_v28  ;;  %v14805_v43 = vpop.f32.mrf.mxu1  ;;  %vm3895_vm2 = vcmp.eq.s32.totalorder %v11893_v34, %v17287_v39  ;;  %v17296_v28 = vld [vmem:[#allocation111_spill] sm:$0xff] }
 0x2c2   : > { %9923 = vmatmul.mubr.bf16.gmra.mxu0 %v17285_v59  ;;  %17286 = vst [vmem:[#allocation98_spill] sm:$0xff] %v14805_v43  ;;  %v14811_v40 = vmul.f32 %v10959_v33, %v14660_v53  ;;  %v9544_v61 = vpop.f32.mrf.mxu0  ;;  %v17288_v53 = vld [vmem:[#allocation101_spill] sm:$0xff] }
 0x2c3   : > { %9926 = vmatprep.mubr.msk.bf16.mxu0 %vm17246_vm1, %v16860_v47  ;;  %10972 = vrcp.f32 %v2087_v50  ;;  %v1714_v38 = vsub.f32 0.0, %v14803_v42  ;;  %v9748_v58 = vpop.f32.mrf.mxu1  ;;  %vm3894_vm5 = vcmp.eq.s32.totalorder %v11893_v34, %v17288_v53 }
 0x2c4   : > { %v10961_v49 = vpop.eup %10960  ;;  %10974 = vpow2.f32 %v1956_v62  ;;  %v1568_v12 = vpop.f32.mrf.mxu0  ;;  %vm8276_vm10 = vmpackc.low %vm3895_vm2, %vm3894_vm5 }
 0x2c5   : > { %v10963_v23 = vpop.eup %10962  ;;  %v2088_v59 = vadd.f32 1.0, %v10961_v49  ;;  %v1958_v33 = vmul.f32 1.442695, %v1714_v38  ;;  %v14823_v50 = vadd.f32 %v14293_v57, %v1568_v12  ;;  %v14825_v61 = vpop.f32.mrf.mxu1  ;;  %v17290_v49 = vpack.c.bf16 %v13269_v25, %v13256_v60 }
 0x2c6   : > { %17289 = vst [vmem:[#allocation97_spill] sm:$0xff] %v14825_v61  ;;  %v9545_v58 = vpop.f32.mrf.mxu0  ;;  %v14832_v62 = vmul.f32 %v10963_v23, %v14672_v3  ;;  %10135 = vmatmul.mubr.msk.bf16.gmra.mxu1 %vm8276_vm10, %v16863_v20 }
 0x2c7   : > { %10976 = vrcp.f32 %v2088_v59  ;;  %v1715_v43 = vsub.f32 0.0, %v14823_v50  ;;  %v9749_v35 = vpop.f32.mrf.mxu1  ;;  %10138 = vmatprep.mubr.msk.bf16.mxu1 %vm17246_vm1, %v16860_v47 }
 0x2c8   : > { %v10965_v15 = vpop.eup %10964  ;;  %10978 = vpow2.f32 %v1958_v33  ;;  %v1573_v38 = vpop.f32.mrf.mxu0  ;;  %v17292_v33 = vld [vmem:[#allocation103_spill] sm:$0xff] }
 0x2c9   : > { %v10967_v12 = vpop.eup %10966  ;;  %v2089_v53 = vadd.f32 1.0, %v10965_v15  ;;  %v1960_v59 = vmul.f32 1.442695, %v1715_v43  ;;  %v14838_v58 = vadd.f32 %v14293_v57, %v1573_v38  ;;  %v14840_v35 = vpop.f32.mrf.mxu1  ;;  %vm3897_vm11 = vcmp.eq.s32.totalorder %v11893_v34, %v17292_v33 }
 0x2ca   : > { %9927 = vmatmul.mubr.bf16.gmra.mxu0 %v17290_v49  ;;  %17291 = vst [vmem:[#allocation100_spill] sm:$0xff] %v14840_v35  ;;  %v14846_v3 = vmul.f32 %v10967_v12, %v14692_v36  ;;  %v9548_v39 = vpop.f32.mrf.mxu0  ;;  %v17293_v36 = vld [vmem:[#allocation104_spill] sm:$0xff]  ;;  %v14860_v49 = vld [vmem:[%s16723_s6] ss:$0 sm:$0xff]  ;;  %v17297_v35 = vpack.c.bf16 %v13328_v8, %v17296_v28 }
 0x2cb   : > { %9930 = vmatprep.mubr.msk.bf16.mxu0 %vm17246_vm1, %v16860_v47  ;;  %10980 = vrcp.f32 %v2089_v53  ;;  %v1716_v60 = vsub.f32 0.0, %v14838_v58  ;;  %v9752_v25 = vpop.f32.mrf.mxu1  ;;  %vm3896_vm2 = vcmp.eq.s32.totalorder %v11893_v34, %v17293_v36 }
 0x2cc   : > { %v10969_v57 = vpop.eup %10968  ;;  %10982 = vpow2.f32 %v1960_v59  ;;  %v1576_v43 = vpop.f32.mrf.mxu0  ;;  %vm8278_vm5 = vmpackc.low %vm3897_vm11, %vm3896_vm2 }
 0x2cd   : > { %v10971_v23 = vpop.eup %10970  ;;  %v1962_v38 = vmul.f32 1.442695, %v1716_v60  ;;  %v14863_v12 = vadd.f32 %v14860_v49, %v1576_v43  ;;  %v14865_v53 = vpop.f32.mrf.mxu1  ;;  %v14868_v25 = vmul.f32 %v10969_v57, %v14707_v9 }
 0x2ce   : > { %17294 = vst [vmem:[#allocation101_spill] sm:$0xff] %v14865_v53  ;;  %v2090_v59 = vadd.f32 1.0, %v10971_v23  ;;  %v9549_v39 = vpop.f32.mrf.mxu0  ;;  %10139 = vmatmul.mubr.msk.bf16.gmra.mxu1 %vm8278_vm5, %v16863_v20 }
 0x2cf   : > { %17295 = vst [vmem:[#allocation103_spill] sm:$0xff] %v14868_v25  ;;  %10984 = vpow2.f32 %v1962_v38  ;;  %v1717_v33 = vsub.f32 0.0, %v14863_v12  ;;  %v9753_v36 = vpop.f32.mrf.mxu1  ;;  %10142 = vmatprep.mubr.msk.bf16.mxu1 %vm17246_vm1, %v16860_v47 }
 0x2d0   : > { %v10973_v60 = vpop.eup %10972  ;;  %10986 = vrcp.f32 %v2090_v59  ;;  %v1581_v15 = vpop.f32.mrf.mxu0  ;;  %v17301_v36 = vld [vmem:[#allocation107_spill] sm:$0xff] }
 0x2d1   : > { %v10975_v43 = vpop.eup %10974  ;;  %v14875_v53 = vmul.f32 %v10973_v60, %v14727_v2  ;;  %v1964_v23 = vmul.f32 1.442695, %v1717_v33  ;;  %v14878_v9 = vadd.f32 %v14860_v49, %v1581_v15  ;;  %v14880_v57 = vpop.f32.mrf.mxu1  ;;  %v17300_v33 = vld [vmem:[#allocation106_spill] sm:$0xff]  ;;  %vm3898_vm11 = vcmp.eq.s32.totalorder %v11893_v34, %v17301_v36  ;;  %v17304_v36 = vld [vmem:[#allocation119_spill] sm:$0xff] }
 0x2d2   : > { %9931 = vmatmul.mubr.bf16.gmra.mxu0 %v17297_v35  ;;  %17299 = vst [vmem:[#allocation111_spill] sm:$0xff] %v14880_v57  ;;  %v2091_v38 = vadd.f32 1.0, %v10975_v43  ;;  %v9552_v59 = vpop.f32.mrf.mxu0  ;;  %vm3899_vm10 = vcmp.eq.s32.totalorder %v11893_v34, %v17300_v33 }
 0x2d3   : > { %17298 = vst [vmem:[#allocation104_spill] sm:$0xff] %v14875_v53  ;;  %9934 = vmatprep.mubr.msk.bf16.mxu0 %vm17246_vm1, %v16860_v47  ;;  %10988 = vpow2.f32 %v1964_v23  ;;  %v1718_v2 = vsub.f32 0.0, %v14878_v9  ;;  %v9756_v28 = vpop.f32.mrf.mxu1  ;;  %vm8280_vm2 = vmpackc.low %vm3899_vm10, %vm3898_vm11 }
 0x2d4   : > { %v10977_v35 = vpop.eup %10976  ;;  %10990 = vrcp.f32 %v2091_v38  ;;  %v1584_v15 = vpop.f32.mrf.mxu0 }
 0x2d5   : > { %v10979_v39 = vpop.eup %10978  ;;  %v1966_v60 = vmul.f32 1.442695, %v1718_v2  ;;  %v14895_v43 = vadd.f32 %v14860_v49, %v1584_v15  ;;  %v14897_v59 = vpop.f32.mrf.mxu1  ;;  %v14900_v28 = vmul.f32 %v10977_v35, %v14742_v46  ;;  %v17305_v2 = vld [vmem:[#allocation116_spill] sm:$0xff] }
 0x2d6   : > { %17302 = vst [vmem:[#allocation106_spill] sm:$0xff] %v14897_v59  ;;  %v2092_v23 = vadd.f32 1.0, %v10979_v39  ;;  %v9553_v8 = vpop.f32.mrf.mxu0  ;;  %v17306_v25 = vpack.c.bf16 %v17304_v36, %v17305_v2  ;;  %10143 = vmatmul.mubr.msk.bf16.gmra.mxu1 %vm8280_vm2, %v16863_v20  ;;  %v17310_v36 = vld [vmem:[#allocation110_spill] sm:$0xff] }
 0x2d7   : > { %17303 = vst [vmem:[#allocation107_spill] sm:$0xff] %v14900_v28  ;;  %10992 = vpow2.f32 %v1966_v60  ;;  %v1719_v38 = vsub.f32 0.0, %v14895_v43  ;;  %v9757_v57 = vpop.f32.mrf.mxu1  ;;  %10146 = vmatprep.mubr.msk.bf16.mxu1 %vm17246_vm1, %v16860_v47  ;;  %vm3900_vm10 = vcmp.eq.s32.totalorder %v11893_v34, %v17310_v36 }
 0x2d8   : > { %v10981_v61 = vpop.eup %10980  ;;  %10994 = vrcp.f32 %v2092_v23  ;;  %v1589_v33 = vpop.f32.mrf.mxu0  ;;  %v17309_v23 = vld [vmem:[#allocation109_spill] sm:$0xff] }
 0x2d9   : > { %v10983_v15 = vpop.eup %10982  ;;  %v14907_v59 = vmul.f32 %v10981_v61, %v14759_v26  ;;  %v1968_v8 = vmul.f32 1.442695, %v1719_v38  ;;  %v14910_v46 = vadd.f32 %v14860_v49, %v1589_v33  ;;  %v14912_v35 = vpop.f32.mrf.mxu1  ;;  %vm3901_vm5 = vcmp.eq.s32.totalorder %v11893_v34, %v17309_v23 }
 0x2da   : > { %9935 = vmatmul.mubr.bf16.gmra.mxu0 %v17306_v25  ;;  %17308 = vst [vmem:[#allocation116_spill] sm:$0xff] %v14912_v35  ;;  %v2093_v57 = vadd.f32 1.0, %v10983_v15  ;;  %v9556_v39 = vpop.f32.mrf.mxu0  ;;  %vm8282_vm11 = vmpackc.low %vm3901_vm5, %vm3900_vm10 }
 0x2db   : > { %17307 = vst [vmem:[#allocation119_spill] sm:$0xff] %v14907_v59  ;;  %9938 = vmatprep.mubr.msk.bf16.mxu0 %vm17246_vm1, %v16860_v47  ;;  %10996 = vpow2.f32 %v1968_v8  ;;  %v1720_v61 = vsub.f32 0.0, %v14910_v46  ;;  %v9760_v25 = vpop.f32.mrf.mxu1 }
 0x2dc   : > { %v10985_v60 = vpop.eup %10984  ;;  %10998 = vrcp.f32 %v2093_v57  ;;  %v1592_v38 = vpop.f32.mrf.mxu0 }
 0x2dd   : > { %v10987_v33 = vpop.eup %10986  ;;  %v2094_v2 = vadd.f32 1.0, %v10985_v60  ;;  %v1970_v15 = vmul.f32 1.442695, %v1720_v61  ;;  %v14927_v39 = vadd.f32 %v14860_v49, %v1592_v38  ;;  %v14929_v26 = vpop.f32.mrf.mxu1  ;;  %v17314_v60 = vld [vmem:[#allocation124_spill] sm:$0xff]  ;;  %v17315_v61 = vld [vmem:[#allocation123_spill] sm:$0xff] }
 0x2de   : > { %17311 = vst [vmem:[#allocation109_spill] sm:$0xff] %v14929_v26  ;;  %v9557_v8 = vpop.f32.mrf.mxu0  ;;  %v14933_v57 = vmul.f32 %v10987_v33, %v14774_v48  ;;  %v17316_v36 = vpack.c.bf16 %v17314_v60, %v17315_v61  ;;  %10147 = vmatmul.mubr.msk.bf16.gmra.mxu1 %vm8282_vm11, %v16863_v20  ;;  %v17320_v60 = vld [vmem:[#allocation113_spill] sm:$0xff]  ;;  %v17321_v61 = vld [vmem:[#allocation114_spill] sm:$0xff] }
 0x2df   : > { %11000 = vrcp.f32 %v2094_v2  ;;  %v1721_v25 = vsub.f32 0.0, %v14927_v39  ;;  %v9761_v35 = vpop.f32.mrf.mxu1  ;;  %10150 = vmatprep.mubr.msk.bf16.mxu1 %vm17246_vm1, %v16860_v47  ;;  %vm3903_vm2 = vcmp.eq.s32.totalorder %v11893_v34, %v17320_v60  ;;  %vm3902_vm5 = vcmp.eq.s32.totalorder %v11893_v34, %v17321_v61 }
 0x2e0   : > { %v10989_v28 = vpop.eup %10988  ;;  %17312 = vst [vmem:[#allocation110_spill] sm:$0xff] %v14933_v57  ;;  %11002 = vpow2.f32 %v1970_v15  ;;  %v14935_v23 = vpop.f32.mrf.mxu0  ;;  %vm8284_vm10 = vmpackc.low %vm3903_vm2, %vm3902_vm5 }
 0x2e1   : > { %17313 = vst [vmem:[#allocation226_spill] sm:$0xff] %v14935_v23  ;;  %v10991_v49 = vpop.eup %10990  ;;  %v2095_v38 = vadd.f32 1.0, %v10989_v28  ;;  %v1972_v26 = vmul.f32 1.442695, %v1721_v25  ;;  %v14940_v8 = vpop.f32.mrf.mxu1  ;;  %v17324_v28 = vpack.c.bf16 %v13469_v14, %v13456_v0  ;;  %v17332_v23 = vld [vmem:[#allocation135_spill] sm:$0xff] }
 0x2e2   : > { %9939 = vmatmul.mubr.bf16.gmra.mxu0 %v17316_v36  ;;  %17317 = vst [vmem:[#allocation124_spill] sm:$0xff] %v14940_v8  ;;  %v14946_v48 = vmul.f32 %v10991_v49, %v14791_v27  ;;  %v9844_v35 = vpop.f32.mrf.mxu0 }
 0x2e3   : > { %9942 = vmatprep.mubr.msk.bf16.mxu0 %vm17246_vm1, %v16860_v47  ;;  %11004 = vrcp.f32 %v2095_v38  ;;  %v9764_v33 = vpop.f32.mrf.mxu1 }
 0x2e4   : > { %17318 = vst [vmem:[#allocation123_spill] sm:$0xff] %v14946_v48  ;;  %v10993_v2 = vpop.eup %10992  ;;  %11006 = vpow2.f32 %v1972_v26  ;;  %v14952_v15 = vpop.f32.mrf.mxu0 }
 0x2e5   : > { %17319 = vst [vmem:[#allocation227_spill] sm:$0xff] %v14952_v15  ;;  %v10995_v25 = vpop.eup %10994  ;;  %v2096_v27 = vadd.f32 1.0, %v10993_v2  ;;  %v14958_v36 = vpop.f32.mrf.mxu1 }
 0x2e6   : > { %17322 = vst [vmem:[#allocation113_spill] sm:$0xff] %v14958_v36  ;;  %v9845_v49 = vpop.f32.mrf.mxu0  ;;  %v14961_v33 = vmul.f32 %v10995_v25, %v14803_v42  ;;  %10151 = vmatmul.mubr.msk.bf16.gmra.mxu1 %vm8284_vm10, %v16863_v20 }
 0x2e7   : > { %11008 = vrcp.f32 %v2096_v27  ;;  %v9765_v38 = vpop.f32.mrf.mxu1  ;;  %10154 = vmatprep.mubr.msk.bf16.mxu1 %vm17246_vm1, %v16860_v47  ;;  %v17327_v49 = vld [vmem:[#allocation16_spill] sm:$0xff] }
 0x2e8   : > { %v10997_v35 = vpop.eup %10996  ;;  %17323 = vst [vmem:[#allocation114_spill] sm:$0xff] %v14961_v33  ;;  %v14963_v26 = vpop.f32.mrf.mxu0  ;;  %vm3905_vm11 = vcmp.eq.s32.totalorder %v11893_v34, %v17327_v49  ;;  %v17328_v38 = vld [vmem:[#allocation115_spill] sm:$0xff]  ;;  %v17419_v33 = vld [vmem:[#allocation24_spill] sm:$0xff] }
 0x2e9   : > { %v10999_v60 = vpop.eup %10998  ;;  %v2097_v15 = vadd.f32 1.0, %v10997_v35  ;;  %v14968_v61 = vpop.f32.mrf.mxu1  ;;  %vm3904_vm2 = vcmp.eq.s32.totalorder %v11893_v34, %v17328_v38 }
 0x2ea   : > { %9943 = vmatmul.mubr.bf16.gmra.mxu0 %v17324_v28  ;;  %17325 = vst [vmem:[#allocation228_spill] sm:$0xff] %v14968_v61  ;;  %v14974_v2 = vmul.f32 %v10999_v60, %v14823_v50  ;;  %v9848_v42 = vpop.f32.mrf.mxu0  ;;  %vm8286_vm5 = vmpackc.low %vm3905_vm11, %vm3904_vm2  ;;  %v17331_v61 = vld [vmem:[#allocation138_spill] sm:$0xff] }
 0x2eb   : > { %9946 = vmatprep.mubr.msk.bf16.mxu0 %vm17246_vm1, %v16860_v47  ;;  %11010 = vrcp.f32 %v2097_v15  ;;  %v9768_v25 = vpop.f32.mrf.mxu1  ;;  %v17333_v36 = vpack.c.bf16 %v17331_v61, %v17332_v23 }
 0x2ec   : > { %17326 = vst [vmem:[#allocation229_spill] sm:$0xff] %v14974_v2  ;;  %v11001_v0 = vpop.eup %11000  ;;  %v14980_v28 = vpop.f32.mrf.mxu0 }
 0x2ed   : > { %v11003_v27 = vpop.eup %11002  ;;  %v14986_v50 = vpop.f32.mrf.mxu1  ;;  %v14989_v15 = vmul.f32 %v11001_v0, %v14838_v58 }
 0x2ee   : > { %17329 = vst [vmem:[#allocation16_spill] sm:$0xff] %v14986_v50  ;;  %v2098_v35 = vadd.f32 1.0, %v11003_v27  ;;  %v9849_v60 = vpop.f32.mrf.mxu0  ;;  %10155 = vmatmul.mubr.msk.bf16.gmra.mxu1 %vm8286_vm5, %v16863_v20  ;;  %v17336_v27 = vld [vmem:[#allocation118_spill] sm:$0xff] }
 0x2ef   : > { %17330 = vst [vmem:[#allocation115_spill] sm:$0xff] %v14989_v15  ;;  %v9769_v42 = vpop.f32.mrf.mxu1  ;;  %10158 = vmatprep.mubr.msk.bf16.mxu1 %vm17246_vm1, %v16860_v47  ;;  %vm3907_vm10 = vcmp.eq.s32.totalorder %v11893_v34, %v17336_v27 }
 0x2f0   : > { %v11005_v25 = vpop.eup %11004  ;;  %11012 = vrcp.f32 %v2098_v35  ;;  %v14991_v14 = vpop.f32.mrf.mxu0  ;;  %v17337_v35 = vld [vmem:[#allocation120_spill] sm:$0xff] }
 0x2f1   : > { %v11007_v49 = vpop.eup %11006  ;;  %v14997_v38 = vmul.f32 %v11005_v25, %v14863_v12  ;;  %v14999_v50 = vpop.f32.mrf.mxu1  ;;  %vm3906_vm11 = vcmp.eq.s32.totalorder %v11893_v34, %v17337_v35 }
 0x2f2   : > { %9947 = vmatmul.mubr.bf16.gmra.mxu0 %v17333_v36  ;;  %17335 = vst [vmem:[#allocation135_spill] sm:$0xff] %v14999_v50  ;;  %v2099_v58 = vadd.f32 1.0, %v11007_v49  ;;  %v9852_v0 = vpop.f32.mrf.mxu0  ;;  %vm8288_vm2 = vmpackc.low %vm3907_vm10, %vm3906_vm11 }
 0x2f3   : > { %17334 = vst [vmem:[#allocation138_spill] sm:$0xff] %v14997_v38  ;;  %9950 = vmatprep.mubr.msk.bf16.mxu0 %vm17246_vm1, %v16860_v47  ;;  %v9772_v36 = vpop.f32.mrf.mxu1 }
 0x2f4   : > { %v11009_v61 = vpop.eup %11008  ;;  %11014 = vrcp.f32 %v2099_v58  ;;  %v15008_v12 = vpop.f32.mrf.mxu0  ;;  %v17340_v58 = vpack.c.bf16 %v13577_v24, %v13562_v56 }
 0x2f5   : > { %v15014_v60 = vpop.f32.mrf.mxu1  ;;  %v15017_v25 = vmul.f32 %v11009_v61, %v14878_v9  ;;  %v17348_v61 = vld [vmem:[#allocation147_spill] sm:$0xff] }
 0x2f6   : > { %17338 = vst [vmem:[#allocation118_spill] sm:$0xff] %v15014_v60  ;;  %v9853_v42 = vpop.f32.mrf.mxu0  ;;  %10159 = vmatmul.mubr.msk.bf16.gmra.mxu1 %vm8288_vm2, %v16863_v20 }
 0x2f7   : > { %17339 = vst [vmem:[#allocation120_spill] sm:$0xff] %v15017_v25  ;;  %v9773_v49 = vpop.f32.mrf.mxu1  ;;  %10162 = vmatprep.mubr.msk.bf16.mxu1 %vm17246_vm1, %v16860_v47  ;;  %v17344_v42 = vld [vmem:[#allocation122_spill] sm:$0xff] }
 0x2f8   : > { %v11011_v0 = vpop.eup %11010  ;;  %v15019_v36 = vpop.f32.mrf.mxu0  ;;  %vm3908_vm10 = vcmp.eq.s32.totalorder %v11893_v34, %v17344_v42 }
 0x2f9   : > { %v15025_v27 = vmul.f32 %v11011_v0, %v14895_v43  ;;  %v15027_v23 = vpop.f32.mrf.mxu1  ;;  %v17343_v43 = vld [vmem:[#allocation121_spill] sm:$0xff] }
 0x2fa   : > { %9951 = vmatmul.mubr.bf16.gmra.mxu0 %v17340_v58  ;;  %17342 = vst [vmem:[#allocation231_spill] sm:$0xff] %v15027_v23  ;;  %v9856_v9 = vpop.f32.mrf.mxu0  ;;  %vm3909_vm5 = vcmp.eq.s32.totalorder %v11893_v34, %v17343_v43 }
 0x2fb   : > { %17341 = vst [vmem:[#allocation230_spill] sm:$0xff] %v15025_v27  ;;  %9954 = vmatprep.mubr.msk.bf16.mxu0 %vm17246_vm1, %v16860_v47  ;;  %v9776_v35 = vpop.f32.mrf.mxu1  ;;  %vm8290_vm11 = vmpackc.low %vm3909_vm5, %vm3908_vm10 }
 0x2fc   : > { %v15036_v56 = vpop.f32.mrf.mxu0  ;;  %v17347_v35 = vld [vmem:[#allocation148_spill] sm:$0xff] }
 0x2fd   : > { %v11013_v24 = vpop.eup %11012  ;;  %v15042_v49 = vpop.f32.mrf.mxu1  ;;  %v17349_v60 = vpack.c.bf16 %v17347_v35, %v17348_v61  ;;  %v17358_v61 = vld [vmem:[#allocation128_spill] sm:$0xff] }
 0x2fe   : > { %17345 = vst [vmem:[#allocation121_spill] sm:$0xff] %v15042_v49  ;;  %v9857_v0 = vpop.f32.mrf.mxu0  ;;  %v15045_v9 = vmul.f32 %v11013_v24, %v14910_v46  ;;  %10163 = vmatmul.mubr.msk.bf16.gmra.mxu1 %vm8290_vm11, %v16863_v20  ;;  %v17352_v24 = vld [vmem:[#allocation126_spill] sm:$0xff] }
 0x2ff   : > { %v9777_v58 = vpop.f32.mrf.mxu1  ;;  %10166 = vmatprep.mubr.msk.bf16.mxu1 %vm17246_vm1, %v16860_v47  ;;  %vm3911_vm2 = vcmp.eq.s32.totalorder %v11893_v34, %v17352_v24  ;;  %v17353_v0 = vld [vmem:[#allocation127_spill] sm:$0xff] }
 0x300   : > { %17346 = vst [vmem:[#allocation122_spill] sm:$0xff] %v15045_v9  ;;  %v15047_v23 = vpop.f32.mrf.mxu0  ;;  %vm3910_vm5 = vcmp.eq.s32.totalorder %v11893_v34, %v17353_v0  ;;  %v17374_v9 = vld [vmem:[#allocation172_spill] sm:$0xff] }
 0x301   : > { %v11015_v50 = vpop.eup %11014  ;;  %v15052_v8 = vpop.f32.mrf.mxu1  ;;  %vm8292_vm10 = vmpackc.low %vm3911_vm2, %vm3910_vm5  ;;  %vm3912_vm2 = vcmp.eq.s32.totalorder %v11893_v34, %v17358_v61 }
 0x302   : > { %9955 = vmatmul.mubr.bf16.gmra.mxu0 %v17349_v60  ;;  %17350 = vst [vmem:[#allocation148_spill] sm:$0xff] %v15052_v8  ;;  %v15058_v43 = vmul.f32 %v11015_v50, %v14927_v39  ;;  %v9860_v42 = vpop.f32.mrf.mxu0  ;;  %v17367_v8 = vld [vmem:[#allocation165_spill] sm:$0xff] }
 0x303   : > { %9958 = vmatprep.mubr.msk.bf16.mxu0 %vm17246_vm1, %v16860_v47  ;;  %v9780_v46 = vpop.f32.mrf.mxu1  ;;  %v17355_v42 = vpack.c.bf16 %v13665_v51, %v13652_v16 }
 0x304   : > { %17351 = vst [vmem:[#allocation147_spill] sm:$0xff] %v15058_v43  ;;  %v15064_v60 = vpop.f32.mrf.mxu0 }
 0x305   : > { %v15070_v58 = vpop.f32.mrf.mxu1 }
 0x306   : > { %17354 = vst [vmem:[#allocation126_spill] sm:$0xff] %v15070_v58  ;;  %v9861_v39 = vpop.f32.mrf.mxu0  ;;  %10167 = vmatmul.mubr.msk.bf16.gmra.mxu1 %vm8292_vm10, %v16863_v20 }
 0x307   : > { %v9781_v50 = vpop.f32.mrf.mxu1  ;;  %10170 = vmatprep.mubr.msk.bf16.mxu1 %vm17246_vm1, %v16860_v47 }
 0x308   : > { %v15072_v35 = vpop.f32.mrf.mxu0  ;;  %v17357_v50 = vld [vmem:[#allocation21_spill] sm:$0xff] }
 0x309   : > { %v15077_v46 = vpop.f32.mrf.mxu1  ;;  %vm3913_vm11 = vcmp.eq.s32.totalorder %v11893_v34, %v17357_v50 }
 0x30a   : > { %9959 = vmatmul.mubr.bf16.gmra.mxu0 %v17355_v42  ;;  %17356 = vst [vmem:[#allocation127_spill] sm:$0xff] %v15077_v46  ;;  %v9864_v24 = vpop.f32.mrf.mxu0  ;;  %vm8294_vm5 = vmpackc.low %vm3913_vm11, %vm3912_vm2 }
 0x30b   : > { %9962 = vmatprep.mubr.msk.bf16.mxu0 %vm17246_vm1, %v16860_v47  ;;  %v9784_v0 = vpop.f32.mrf.mxu1  ;;  %v17360_v24 = vld [vmem:[#allocation159_spill] sm:$0xff] }
 0x30c   : > { %v15084_v39 = vpop.f32.mrf.mxu0  ;;  %v17361_v58 = vpack.c.bf16 %v13729_v5, %v17360_v24 }
 0x30d   : > { %v15090_v16 = vpop.f32.mrf.mxu1 }
 0x30e   : > { %17359 = vst [vmem:[#allocation21_spill] sm:$0xff] %v15090_v16  ;;  %v9865_v51 = vpop.f32.mrf.mxu0  ;;  %10171 = vmatmul.mubr.msk.bf16.gmra.mxu1 %vm8294_vm5, %v16863_v20  ;;  %v17364_v16 = vld [vmem:[#allocation131_spill] sm:$0xff] }
 0x30f   : > { %v9785_v42 = vpop.f32.mrf.mxu1  ;;  %10174 = vmatprep.mubr.msk.bf16.mxu1 %vm17246_vm1, %v16860_v47  ;;  %vm3914_vm11 = vcmp.eq.s32.totalorder %v11893_v34, %v17364_v16 }
 0x310   : > { %v15092_v46 = vpop.f32.mrf.mxu0  ;;  %v17363_v42 = vld [vmem:[#allocation130_spill] sm:$0xff] }
 0x311   : > { %v15097_v0 = vpop.f32.mrf.mxu1  ;;  %vm3915_vm10 = vcmp.eq.s32.totalorder %v11893_v34, %v17363_v42 }
 0x312   : > { %9963 = vmatmul.mubr.bf16.gmra.mxu0 %v17361_v58  ;;  %17362 = vst [vmem:[#allocation128_spill] sm:$0xff] %v15097_v0  ;;  %v9868_v50 = vpop.f32.mrf.mxu0  ;;  %vm8296_vm2 = vmpackc.low %vm3915_vm10, %vm3914_vm11 }
 0x313   : > { %9966 = vmatprep.mubr.msk.bf16.mxu0 %vm17246_vm1, %v16860_v47  ;;  %v9788_v61 = vpop.f32.mrf.mxu1  ;;  %v17366_v50 = vld [vmem:[#allocation168_spill] sm:$0xff] }
 0x314   : > { %v15104_v51 = vpop.f32.mrf.mxu0  ;;  %v17368_v49 = vpack.c.bf16 %v17366_v50, %v17367_v8 }
 0x315   : > { %v15110_v5 = vpop.f32.mrf.mxu1 }
 0x316   : > { %17365 = vst [vmem:[#allocation159_spill] sm:$0xff] %v15110_v5  ;;  %v9869_v58 = vpop.f32.mrf.mxu0  ;;  %10175 = vmatmul.mubr.msk.bf16.gmra.mxu1 %vm8296_vm2, %v16863_v20  ;;  %v17371_v5 = vld [vmem:[#allocation134_spill] sm:$0xff] }
 0x317   : > { %v9789_v24 = vpop.f32.mrf.mxu1  ;;  %10178 = vmatprep.mubr.msk.bf16.mxu1 %vm17246_vm1, %v16860_v47  ;;  %vm3916_vm10 = vcmp.eq.s32.totalorder %v11893_v34, %v17371_v5 }
 0x318   : > { %v15112_v0 = vpop.f32.mrf.mxu0  ;;  %v17370_v24 = vld [vmem:[#allocation133_spill] sm:$0xff] }
 0x319   : > { %v15117_v61 = vpop.f32.mrf.mxu1  ;;  %vm3917_vm5 = vcmp.eq.s32.totalorder %v11893_v34, %v17370_v24 }
 0x31a   : > { %9967 = vmatmul.mubr.bf16.gmra.mxu0 %v17368_v49  ;;  %17369 = vst [vmem:[#allocation130_spill] sm:$0xff] %v15117_v61  ;;  %v9872_v42 = vpop.f32.mrf.mxu0  ;;  %vm8298_vm11 = vmpackc.low %vm3917_vm5, %vm3916_vm10 }
 0x31b   : > { %9970 = vmatprep.mubr.msk.bf16.mxu0 %vm17246_vm1, %v16860_v47  ;;  %v9792_v16 = vpop.f32.mrf.mxu1  ;;  %v17373_v42 = vld [vmem:[#allocation173_spill] sm:$0xff] }
 0x31c   : > { %v15124_v58 = vpop.f32.mrf.mxu0  ;;  %v17375_v43 = vpack.c.bf16 %v17373_v42, %v17374_v9 }
 0x31d   : > { %v15130_v8 = vpop.f32.mrf.mxu1 }
 0x31e   : > { %17372 = vst [vmem:[#allocation131_spill] sm:$0xff] %v15130_v8  ;;  %v9873_v49 = vpop.f32.mrf.mxu0  ;;  %10179 = vmatmul.mubr.msk.bf16.gmra.mxu1 %vm8298_vm11, %v16863_v20  ;;  %v17378_v8 = vld [vmem:[#allocation139_spill] sm:$0xff] }
 0x31f   : > { %v9793_v50 = vpop.f32.mrf.mxu1  ;;  %10182 = vmatprep.mubr.msk.bf16.mxu1 %vm17246_vm1, %v16860_v47  ;;  %vm3918_vm5 = vcmp.eq.s32.totalorder %v11893_v34, %v17378_v8 }
 0x320   : > { %v15132_v61 = vpop.f32.mrf.mxu0  ;;  %v17377_v50 = vld [vmem:[#allocation137_spill] sm:$0xff] }
 0x321   : > { %v15137_v16 = vpop.f32.mrf.mxu1  ;;  %vm3919_vm2 = vcmp.eq.s32.totalorder %v11893_v34, %v17377_v50 }
 0x322   : > { %9971 = vmatmul.mubr.bf16.gmra.mxu0 %v17375_v43  ;;  %17376 = vst [vmem:[#allocation168_spill] sm:$0xff] %v15137_v16  ;;  %v9876_v24 = vpop.f32.mrf.mxu0  ;;  %vm8300_vm10 = vmpackc.low %vm3919_vm2, %vm3918_vm5 }
 0x323   : > { %9974 = vmatprep.mubr.msk.bf16.mxu0 %vm17246_vm1, %v16860_v47  ;;  %v9796_v5 = vpop.f32.mrf.mxu1  ;;  %v17380_v24 = vpack.c.bf16 %v13872_v21, %v13859_v13 }
 0x324   : > { %v15144_v49 = vpop.f32.mrf.mxu0 }
 0x325   : > { %v15150_v9 = vpop.f32.mrf.mxu1 }
 0x326   : > { %17379 = vst [vmem:[#allocation165_spill] sm:$0xff] %v15150_v9  ;;  %v9877_v43 = vpop.f32.mrf.mxu0  ;;  %10183 = vmatmul.mubr.msk.bf16.gmra.mxu1 %vm8300_vm10, %v16863_v20  ;;  %v17383_v9 = vld [vmem:[#allocation140_spill] sm:$0xff] }
 0x327   : > { %v9797_v42 = vpop.f32.mrf.mxu1  ;;  %10186 = vmatprep.mubr.msk.bf16.mxu1 %vm17246_vm1, %v16860_v47  ;;  %vm3920_vm2 = vcmp.eq.s32.totalorder %v11893_v34, %v17383_v9 }
 0x328   : > { %v17382_v42 = vld [vmem:[#allocation25_spill] sm:$0xff] }
 0x329   : > { %v15152_v16 = vpop.f32.mrf.mxu0  ;;  %v15157_v5 = vpop.f32.mrf.mxu1  ;;  %vm3921_vm11 = vcmp.eq.s32.totalorder %v11893_v34, %v17382_v42 }
 0x32a   : > { %9975 = vmatmul.mubr.bf16.gmra.mxu0 %v17380_v24  ;;  %17381 = vst [vmem:[#allocation133_spill] sm:$0xff] %v15157_v5  ;;  %vm8302_vm5 = vmpackc.low %vm3921_vm11, %vm3920_vm2 }
 0x32b   : > { %9978 = vmatprep.mubr.msk.bf16.mxu0 %vm17246_vm1, %v16860_v47  ;;  %v9880_v50 = vpop.f32.mrf.mxu0  ;;  %v9800_v8 = vpop.f32.mrf.mxu1 }
 0x32c   : > { %v17385_v50 = vpack.c.bf16 %v13925_v45, %v13909_v54 }
 0x32d   : > { %v15164_v43 = vpop.f32.mrf.mxu0  ;;  %v15170_v13 = vpop.f32.mrf.mxu1 }
 0x32e   : > { %17384 = vst [vmem:[#allocation134_spill] sm:$0xff] %v15170_v13  ;;  %10187 = vmatmul.mubr.msk.bf16.gmra.mxu1 %vm8302_vm5, %v16863_v20  ;;  %v17388_v13 = vld [vmem:[#allocation143_spill] sm:$0xff] }
 0x32f   : > { %v9881_v21 = vpop.f32.mrf.mxu0  ;;  %v9801_v24 = vpop.f32.mrf.mxu1  ;;  %10190 = vmatprep.mubr.msk.bf16.mxu1 %vm17246_vm1, %v16860_v47  ;;  %vm3922_vm11 = vcmp.eq.s32.totalorder %v11893_v34, %v17388_v13 }
 0x330   : > { %v17387_v24 = vld [vmem:[#allocation142_spill] sm:$0xff] }
 0x331   : > { %v15172_v5 = vpop.f32.mrf.mxu0  ;;  %v15177_v8 = vpop.f32.mrf.mxu1  ;;  %vm3923_vm10 = vcmp.eq.s32.totalorder %v11893_v34, %v17387_v24 }
 0x332   : > { %9979 = vmatmul.mubr.bf16.gmra.mxu0 %v17385_v50  ;;  %17386 = vst [vmem:[#allocation173_spill] sm:$0xff] %v15177_v8  ;;  %vm8304_vm2 = vmpackc.low %vm3923_vm10, %vm3922_vm11 }
 0x333   : > { %9982 = vmatprep.mubr.msk.bf16.mxu0 %vm17246_vm1, %v16860_v47  ;;  %v9884_v42 = vpop.f32.mrf.mxu0  ;;  %v9804_v9 = vpop.f32.mrf.mxu1 }
 0x334   : > { %v17390_v42 = vpack.c.bf16 %v13979_v44, %v13963_v19 }
 0x335   : > { %v15184_v21 = vpop.f32.mrf.mxu0  ;;  %v15190_v54 = vpop.f32.mrf.mxu1 }
 0x336   : > { %17389 = vst [vmem:[#allocation172_spill] sm:$0xff] %v15190_v54  ;;  %10191 = vmatmul.mubr.msk.bf16.gmra.mxu1 %vm8304_vm2, %v16863_v20  ;;  %v17393_v54 = vld [vmem:[#allocation146_spill] sm:$0xff] }
 0x337   : > { %v9885_v45 = vpop.f32.mrf.mxu0  ;;  %v9805_v50 = vpop.f32.mrf.mxu1  ;;  %10194 = vmatprep.mubr.msk.bf16.mxu1 %vm17246_vm1, %v16860_v47  ;;  %vm3924_vm10 = vcmp.eq.s32.totalorder %v11893_v34, %v17393_v54 }
 0x338   : > { %v17392_v50 = vld [vmem:[#allocation145_spill] sm:$0xff] }
 0x339   : > { %v15192_v8 = vpop.f32.mrf.mxu0  ;;  %v15197_v9 = vpop.f32.mrf.mxu1  ;;  %vm3925_vm5 = vcmp.eq.s32.totalorder %v11893_v34, %v17392_v50 }
 0x33a   : > { %9983 = vmatmul.mubr.bf16.gmra.mxu0 %v17390_v42  ;;  %17391 = vst [vmem:[#allocation137_spill] sm:$0xff] %v15197_v9  ;;  %vm8306_vm11 = vmpackc.low %vm3925_vm5, %vm3924_vm10 }
 0x33b   : > { %9986 = vmatprep.mubr.msk.bf16.mxu0 %vm17246_vm1, %v16860_v47  ;;  %v9888_v24 = vpop.f32.mrf.mxu0  ;;  %v9808_v13 = vpop.f32.mrf.mxu1 }
 0x33c   : > { %v17395_v24 = vld [vmem:[#allocation189_spill] sm:$0xff] }
 0x33d   : > { %v15204_v45 = vpop.f32.mrf.mxu0  ;;  %v15210_v19 = vpop.f32.mrf.mxu1  ;;  %v17396_v25 = vpack.c.bf16 %v14023_v10, %v17395_v24 }
 0x33e   : > { %17394 = vst [vmem:[#allocation139_spill] sm:$0xff] %v15210_v19  ;;  %10195 = vmatmul.mubr.msk.bf16.gmra.mxu1 %vm8306_vm11, %v16863_v20  ;;  %v17399_v19 = vld [vmem:[#allocation151_spill] sm:$0xff] }
 0x33f   : > { %v9889_v44 = vpop.f32.mrf.mxu0  ;;  %v9809_v42 = vpop.f32.mrf.mxu1  ;;  %10198 = vmatprep.mubr.msk.bf16.mxu1 %vm17246_vm1, %v16860_v47  ;;  %vm3926_vm5 = vcmp.eq.s32.totalorder %v11893_v34, %v17399_v19 }
 0x340   : > { %v17398_v42 = vld [vmem:[#allocation150_spill] sm:$0xff] }
 0x341   : > { %v15212_v9 = vpop.f32.mrf.mxu0  ;;  %v15217_v13 = vpop.f32.mrf.mxu1  ;;  %vm3927_vm2 = vcmp.eq.s32.totalorder %v11893_v34, %v17398_v42 }
 0x342   : > { %9987 = vmatmul.mubr.bf16.gmra.mxu0 %v17396_v25  ;;  %17397 = vst [vmem:[#allocation25_spill] sm:$0xff] %v15217_v13  ;;  %vm8308_vm10 = vmpackc.low %vm3927_vm2, %vm3926_vm5 }
 0x343   : > { %9990 = vmatprep.mubr.msk.bf16.mxu0 %vm17246_vm1, %v16860_v47  ;;  %v9892_v50 = vpop.f32.mrf.mxu0  ;;  %v9812_v54 = vpop.f32.mrf.mxu1 }
 0x344   : > { %v17401_v50 = vld [vmem:[#allocation192_spill] sm:$0xff] }
 0x345   : > { %v15224_v44 = vpop.f32.mrf.mxu0  ;;  %v15230_v10 = vpop.f32.mrf.mxu1  ;;  %v17402_v27 = vpack.c.bf16 %v14077_v30, %v17401_v50 }
 0x346   : > { %17400 = vst [vmem:[#allocation140_spill] sm:$0xff] %v15230_v10  ;;  %10199 = vmatmul.mubr.msk.bf16.gmra.mxu1 %vm8308_vm10, %v16863_v20  ;;  %v17405_v10 = vld [vmem:[#allocation152_spill] sm:$0xff] }
 0x347   : > { %v9893_v25 = vpop.f32.mrf.mxu0  ;;  %v9813_v24 = vpop.f32.mrf.mxu1  ;;  %10202 = vmatprep.mubr.msk.bf16.mxu1 %vm17246_vm1, %v16860_v47  ;;  %vm3928_vm2 = vcmp.eq.s32.totalorder %v11893_v34, %v17405_v10 }
 0x348   : > { %v17404_v24 = vld [vmem:[#allocation29_spill] sm:$0xff] }
 0x349   : > { %v15237_v54 = vpop.f32.mrf.mxu1  ;;  %vm3929_vm11 = vcmp.eq.s32.totalorder %v11893_v34, %v17404_v24 }
 0x34a   : > { %v15232_v13 = vpop.f32.mrf.mxu0  ;;  %9991 = vmatmul.mubr.bf16.gmra.mxu0 %v17402_v27  ;;  %17403 = vst [vmem:[#allocation142_spill] sm:$0xff] %v15237_v54  ;;  %vm8310_vm5 = vmpackc.low %vm3929_vm11, %vm3928_vm2 }
 0x34b   : > { %9994 = vmatprep.mubr.msk.bf16.mxu0 %vm17246_vm1, %v16860_v47  ;;  %v9816_v19 = vpop.f32.mrf.mxu1 }
 0x34c   : > { %v9896_v42 = vpop.f32.mrf.mxu0 }
 0x34d   : > { %v15250_v30 = vpop.f32.mrf.mxu1  ;;  %v17407_v42 = vpack.c.bf16 %v14135_v17, %v14119_v4 }
 0x34e   : > { %v15244_v25 = vpop.f32.mrf.mxu0  ;;  %17406 = vst [vmem:[#allocation143_spill] sm:$0xff] %v15250_v30  ;;  %10203 = vmatmul.mubr.msk.bf16.gmra.mxu1 %vm8310_vm5, %v16863_v20  ;;  %v17410_v30 = vld [vmem:[#allocation155_spill] sm:$0xff] }
 0x34f   : > { %v9817_v50 = vpop.f32.mrf.mxu1  ;;  %10206 = vmatprep.mubr.msk.bf16.mxu1 %vm17246_vm1, %v16860_v47  ;;  %vm3930_vm11 = vcmp.eq.s32.totalorder %v11893_v34, %v17410_v30 }
 0x350   : > { %v9897_v27 = vpop.f32.mrf.mxu0  ;;  %v17409_v50 = vld [vmem:[#allocation154_spill] sm:$0xff] }
 0x351   : > { %v15257_v19 = vpop.f32.mrf.mxu1  ;;  %vm3931_vm10 = vcmp.eq.s32.totalorder %v11893_v34, %v17409_v50 }
 0x352   : > { %v15252_v54 = vpop.f32.mrf.mxu0  ;;  %9995 = vmatmul.mubr.bf16.gmra.mxu0 %v17407_v42  ;;  %17408 = vst [vmem:[#allocation145_spill] sm:$0xff] %v15257_v19  ;;  %vm8312_vm2 = vmpackc.low %vm3931_vm10, %vm3930_vm11 }
 0x353   : > { %9998 = vmatprep.mubr.msk.bf16.mxu0 %vm17246_vm1, %v16860_v47  ;;  %v9820_v10 = vpop.f32.mrf.mxu1 }
 0x354   : > { %v9900_v24 = vpop.f32.mrf.mxu0 }
 0x355   : > { %v15270_v4 = vpop.f32.mrf.mxu1  ;;  %v17412_v24 = vld [vmem:[#allocation200_spill] sm:$0xff] }
 0x356   : > { %v15264_v27 = vpop.f32.mrf.mxu0  ;;  %17411 = vst [vmem:[#allocation146_spill] sm:$0xff] %v15270_v4  ;;  %v17413_v15 = vpack.c.bf16 %v14178_v31, %v17412_v24  ;;  %10207 = vmatmul.mubr.msk.bf16.gmra.mxu1 %vm8312_vm2, %v16863_v20  ;;  %v17416_v4 = vld [vmem:[#allocation158_spill] sm:$0xff] }
 0x357   : > { %v9821_v42 = vpop.f32.mrf.mxu1  ;;  %10210 = vmatprep.mubr.msk.bf16.mxu1 %vm17246_vm1, %v16860_v47  ;;  %vm3932_vm10 = vcmp.eq.s32.totalorder %v11893_v34, %v17416_v4 }
 0x358   : > { %v9901_v17 = vpop.f32.mrf.mxu0  ;;  %v17415_v42 = vld [vmem:[#allocation157_spill] sm:$0xff] }
 0x359   : > { %v15277_v10 = vpop.f32.mrf.mxu1  ;;  %vm3933_vm5 = vcmp.eq.s32.totalorder %v11893_v34, %v17415_v42 }
 0x35a   : > { %v15272_v19 = vpop.f32.mrf.mxu0  ;;  %9999 = vmatmul.mubr.bf16.gmra.mxu0 %v17413_v15  ;;  %17414 = vst [vmem:[#allocation189_spill] sm:$0xff] %v15277_v10  ;;  %vm8314_vm11 = vmpackc.low %vm3933_vm5, %vm3932_vm10  ;;  %v17418_v10 = vld [vmem:[#allocation51_spill] sm:$0xff] }
 0x35b   : > { %10002 = vmatprep.mubr.msk.bf16.mxu0 %vm17246_vm1, %v16860_v47  ;;  %v9824_v30 = vpop.f32.mrf.mxu1 }
 0x35c   : > { %v9904_v50 = vpop.f32.mrf.mxu0  ;;  %v17420_v30 = vld [vmem:[#allocation204_spill] sm:$0xff] }
 0x35d   : > { %v15290_v31 = vpop.f32.mrf.mxu1  ;;  %v5015_v50 = vadd.f32 %v14963_v26, %v17418_v10  ;;  %v17421_v2 = vpack.c.bf16 %v17419_v33, %v17420_v30  ;;  %v17422_v26 = vld [vmem:[#allocation53_spill] sm:$0xff]  ;;  %v17424_v30 = vld [vmem:[#allocation162_spill] sm:$0xff] }
 0x35e   : > { %v15284_v17 = vpop.f32.mrf.mxu0  ;;  %17417 = vst [vmem:[#allocation150_spill] sm:$0xff] %v15290_v31  ;;  %10211 = vmatmul.mubr.msk.bf16.gmra.mxu1 %vm8314_vm11, %v16863_v20  ;;  %v5018_v10 = vadd.f32 %v14980_v28, %v17422_v26  ;;  %vm3934_vm5 = vcmp.eq.s32.totalorder %v11893_v34, %v17424_v30 }
 0x35f   : > { %v9825_v24 = vpop.f32.mrf.mxu1  ;;  %10214 = vmatprep.mubr.msk.bf16.mxu1 %vm17246_vm1, %v16860_v47 }
 0x360   : > { %v9905_v15 = vpop.f32.mrf.mxu0 }
 0x361   : > { %v5615_v57 = vpop.f32.mrf.mxu1 }
 0x362   : > { %v15294_v38 = vpop.f32.mrf.mxu0  ;;  %10003 = vmatmul.mubr.bf16.gmra.mxu0 %v17421_v2  ;;  %v15302_v4 = vadd.f32 %v5615_v57, %v5015_v50  ;;  %v17423_v2 = vld [vmem:[#allocation161_spill] sm:$0xff] }
 0x363   : > { %10006 = vmatprep.mubr.msk.bf16.mxu0 %vm17246_vm1, %v16860_v47  ;;  %v10116_v15 = vpop.f32.mrf.mxu1  ;;  %vm3935_vm2 = vcmp.eq.s32.totalorder %v11893_v34, %v17423_v2  ;;  %v17426_v2 = vpack.c.bf16 %v14248_v63, %v14241_v37 }
 0x364   : > { %v9908_v42 = vpop.f32.mrf.mxu0  ;;  %v6238_v24 = vsub.f32 0.0, %v15302_v4  ;;  %vm8316_vm10 = vmpackc.low %vm3935_vm2, %vm3934_vm5  ;;  %v17425_v15 = vld [vmem:[#allocation57_spill] sm:$0xff] }
 0x365   : > { %v5618_v57 = vpop.f32.mrf.mxu1  ;;  %v5023_v28 = vadd.f32 %v14991_v14, %v17425_v15  ;;  %v17430_v15 = vld [vmem:[#allocation164_spill] sm:$0xff] }
 0x366   : > { %v15309_v33 = vpop.f32.mrf.mxu0  ;;  %v6366_v50 = vmul.f32 1.442695, %v6238_v24  ;;  %v15315_v42 = vadd.f32 %v5618_v57, %v5018_v10  ;;  %10215 = vmatmul.mubr.msk.bf16.gmra.mxu1 %vm8316_vm10, %v16863_v20  ;;  %v17427_v24 = vld [vmem:[#allocation60_spill] sm:$0xff]  ;;  %vm3936_vm2 = vcmp.eq.s32.totalorder %v11893_v34, %v17430_v15 }
 0x367   : > { %v10117_v48 = vpop.f32.mrf.mxu1  ;;  %10218 = vmatprep.mubr.msk.bf16.mxu1 %vm17246_vm1, %v16860_v47  ;;  %v5026_v57 = vadd.f32 %v15008_v12, %v17427_v24 }
 0x368   : > { %v9909_v31 = vpop.f32.mrf.mxu0  ;;  %11016 = vpow2.f32 %v6366_v50  ;;  %v6239_v26 = vsub.f32 0.0, %v15315_v42  ;;  %v17429_v50 = vld [vmem:[#allocation163_spill] sm:$0xff] }
 0x369   : > { %v5623_v30 = vpop.f32.mrf.mxu1  ;;  %vm3937_vm11 = vcmp.eq.s32.totalorder %v11893_v34, %v17429_v50  ;;  %v17434_v50 = vld [vmem:[#allocation212_spill] sm:$0xff] }
 0x36a   : > { %v15320_v59 = vpop.f32.mrf.mxu0  ;;  %10007 = vmatmul.mubr.bf16.gmra.mxu0 %v17426_v2  ;;  %v6368_v48 = vmul.f32 1.442695, %v6239_v26  ;;  %v15328_v31 = vadd.f32 %v5623_v30, %v5023_v28  ;;  %vm8318_vm5 = vmpackc.low %vm3937_vm11, %vm3936_vm2 }
 0x36b   : > { %10010 = vmatprep.mubr.msk.bf16.mxu0 %vm17246_vm1, %v16860_v47  ;;  %v10120_v14 = vpop.f32.mrf.mxu1 }
 0x36c   : > { %v9912_v10 = vpop.f32.mrf.mxu0  ;;  %11018 = vpow2.f32 %v6368_v48  ;;  %v6240_v37 = vsub.f32 0.0, %v15328_v31  ;;  %v17431_v14 = vld [vmem:[#allocation62_spill] sm:$0xff] }
 0x36d   : > { %v5626_v28 = vpop.f32.mrf.mxu1  ;;  %v5031_v12 = vadd.f32 %v15019_v36, %v17431_v14  ;;  %v17438_v14 = vld [vmem:[#allocation167_spill] sm:$0xff] }
 0x36e   : > { %v15335_v63 = vpop.f32.mrf.mxu0  ;;  %v6370_v26 = vmul.f32 1.442695, %v6240_v37  ;;  %v15341_v2 = vadd.f32 %v5626_v28, %v5026_v57  ;;  %10219 = vmatmul.mubr.msk.bf16.gmra.mxu1 %vm8318_vm5, %v16863_v20  ;;  %vm3939_vm10 = vcmp.eq.s32.totalorder %v11893_v34, %v17438_v14  ;;  %v17442_v14 = vpack.c.bf16 %v14357_v6, %v14337_v41  ;;  %v17443_v41 = vld [vmem:[#allocation72_spill] sm:$0xff] }
 0x36f   : > { %17428 = vst [vmem:[#allocation151_spill] sm:$0xff] %v15335_v63  ;;  %v10121_v10 = vpop.f32.mrf.mxu1  ;;  %v17433_v63 = vld [vmem:[#allocation30_spill] sm:$0xff]  ;;  %10222 = vmatprep.mubr.msk.bf16.mxu1 %vm17246_vm1, %v16860_v47  ;;  %v5042_v6 = vadd.f32 %v15064_v60, %v17443_v41 }
 0x370   : > { %v9913_v30 = vpop.f32.mrf.mxu0  ;;  %11020 = vpow2.f32 %v6370_v26  ;;  %v6241_v48 = vsub.f32 0.0, %v15341_v2  ;;  %v17435_v53 = vpack.c.bf16 %v17433_v63, %v17434_v50  ;;  %v17436_v26 = vld [vmem:[#allocation65_spill] sm:$0xff] }
 0x371   : > { %v5631_v15 = vpop.f32.mrf.mxu1  ;;  %v5034_v30 = vadd.f32 %v15036_v56, %v17436_v26  ;;  %v17440_v56 = vld [vmem:[#allocation68_spill] sm:$0xff] }
 0x372   : > { %v15346_v24 = vpop.f32.mrf.mxu0  ;;  %10011 = vmatmul.mubr.bf16.gmra.mxu0 %v17435_v53  ;;  %v6372_v57 = vmul.f32 1.442695, %v6241_v48  ;;  %v15354_v37 = vadd.f32 %v5631_v15, %v5031_v12  ;;  %v17439_v48 = vld [vmem:[#allocation169_spill] sm:$0xff] }
 0x373   : > { %17432 = vst [vmem:[#allocation192_spill] sm:$0xff] %v15346_v24  ;;  %10014 = vmatprep.mubr.msk.bf16.mxu0 %vm17246_vm1, %v16860_v47  ;;  %v10124_v36 = vpop.f32.mrf.mxu1  ;;  %vm3938_vm11 = vcmp.eq.s32.totalorder %v11893_v34, %v17439_v48 }
 0x374   : > { %v9916_v28 = vpop.f32.mrf.mxu0  ;;  %11022 = vpow2.f32 %v6372_v57  ;;  %v6242_v53 = vsub.f32 0.0, %v15354_v37  ;;  %vm8320_vm2 = vmpackc.low %vm3939_vm10, %vm3938_vm11  ;;  %v5039_v57 = vadd.f32 %v15047_v23, %v17440_v56 }
 0x375   : > { %v11017_v10 = vpop.eup %11016  ;;  %v5634_v12 = vpop.f32.mrf.mxu1 }
 0x376   : > { %v15361_v63 = vpop.f32.mrf.mxu0  ;;  %v6616_v50 = vadd.f32 1.0, %v11017_v10  ;;  %v6374_v15 = vmul.f32 1.442695, %v6242_v53  ;;  %v15367_v28 = vadd.f32 %v5634_v12, %v5034_v30  ;;  %10223 = vmatmul.mubr.msk.bf16.gmra.mxu1 %vm8320_vm2, %v16863_v20 }
 0x377   : > { %17437 = vst [vmem:[#allocation29_spill] sm:$0xff] %v15361_v63  ;;  %v10125_v24 = vpop.f32.mrf.mxu1  ;;  %10226 = vmatprep.mubr.msk.bf16.mxu1 %vm17246_vm1, %v16860_v47 }
 0x378   : > { %v9917_v36 = vpop.f32.mrf.mxu0  ;;  %v6243_v26 = vsub.f32 0.0, %v15367_v28  ;;  %11024 = vpow2.f32 %v6374_v15 }
 0x379   : > { %v11019_v48 = vpop.eup %11018  ;;  %v5639_v10 = vpop.f32.mrf.mxu1  ;;  %11026 = vrcp.f32 %v6616_v50  ;;  %v17446_v50 = vld [vmem:[#allocation171_spill] sm:$0xff] }
 0x37a   : > { %v15372_v63 = vpop.f32.mrf.mxu0  ;;  %10015 = vmatmul.mubr.bf16.gmra.mxu0 %v17442_v14  ;;  %v6617_v24 = vadd.f32 1.0, %v11019_v48  ;;  %v6376_v30 = vmul.f32 1.442695, %v6243_v26  ;;  %v15380_v23 = vadd.f32 %v5639_v10, %v5039_v57  ;;  %v17445_v14 = vld [vmem:[#allocation170_spill] sm:$0xff]  ;;  %vm3940_vm10 = vcmp.eq.s32.totalorder %v11893_v34, %v17446_v50 }
 0x37b   : > { %17441 = vst [vmem:[#allocation152_spill] sm:$0xff] %v15372_v63  ;;  %10018 = vmatprep.mubr.msk.bf16.mxu0 %vm17246_vm1, %v16860_v47  ;;  %v10128_v12 = vpop.f32.mrf.mxu1  ;;  %vm3941_vm5 = vcmp.eq.s32.totalorder %v11893_v34, %v17445_v14  ;;  %v17448_v14 = vld [vmem:[#allocation40_spill] sm:$0xff]  ;;  %v17449_v63 = vld [vmem:[#allocation215_spill] sm:$0xff] }
 0x37c   : > { %v9920_v53 = vpop.f32.mrf.mxu0  ;;  %11028 = vrcp.f32 %v6617_v24  ;;  %v6244_v15 = vsub.f32 0.0, %v15380_v23  ;;  %vm8322_vm11 = vmpackc.low %vm3941_vm5, %vm3940_vm10  ;;  %v17447_v24 = vld [vmem:[#allocation75_spill] sm:$0xff]  ;;  %v17450_v50 = vpack.c.bf16 %v17448_v14, %v17449_v63 }
 0x37d   : > { %v11021_v56 = vpop.eup %11020  ;;  %11030 = vpow2.f32 %v6376_v30  ;;  %v5642_v57 = vpop.f32.mrf.mxu1  ;;  %v5047_v12 = vadd.f32 %v15072_v35, %v17447_v24 }
 0x37e   : > { %v15387_v36 = vpop.f32.mrf.mxu0  ;;  %v6618_v26 = vadd.f32 1.0, %v11021_v56  ;;  %v6378_v48 = vmul.f32 1.442695, %v6244_v15  ;;  %v15393_v10 = vadd.f32 %v5642_v57, %v5042_v6  ;;  %10227 = vmatmul.mubr.msk.bf16.gmra.mxu1 %vm8322_vm11, %v16863_v20 }
 0x37f   : > { %17444 = vst [vmem:[#allocation154_spill] sm:$0xff] %v15387_v36  ;;  %v10129_v60 = vpop.f32.mrf.mxu1  ;;  %10230 = vmatprep.mubr.msk.bf16.mxu1 %vm17246_vm1, %v16860_v47 }
 0x380   : > { %v9921_v53 = vpop.f32.mrf.mxu0  ;;  %v6245_v41 = vsub.f32 0.0, %v15393_v10  ;;  %11032 = vpow2.f32 %v6378_v48 }
 0x381   : > { %v11023_v30 = vpop.eup %11022  ;;  %v5647_v15 = vpop.f32.mrf.mxu1  ;;  %11034 = vrcp.f32 %v6618_v26  ;;  %v17451_v53 = vld [vmem:[#allocation77_spill] sm:$0xff]  ;;  %v17453_v26 = vld [vmem:[#allocation175_spill] sm:$0xff] }
 0x382   : > { %v15398_v36 = vpop.f32.mrf.mxu0  ;;  %10019 = vmatmul.mubr.bf16.gmra.mxu0 %v17450_v50  ;;  %v6619_v6 = vadd.f32 1.0, %v11023_v30  ;;  %v6380_v35 = vmul.f32 1.442695, %v6245_v41  ;;  %v15406_v56 = vadd.f32 %v5647_v15, %v5047_v12  ;;  %v5050_v48 = vadd.f32 %v15084_v39, %v17451_v53  ;;  %v17454_v12 = vld [vmem:[#allocation176_spill] sm:$0xff] }
 0x383   : > { %10022 = vmatprep.mubr.msk.bf16.mxu0 %vm17246_vm1, %v16860_v47  ;;  %v10132_v63 = vpop.f32.mrf.mxu1  ;;  %vm3943_vm2 = vcmp.eq.s32.totalorder %v11893_v34, %v17453_v26  ;;  %vm3942_vm5 = vcmp.eq.s32.totalorder %v11893_v34, %v17454_v12 }
 0x384   : > { %v9924_v57 = vpop.f32.mrf.mxu0  ;;  %11036 = vrcp.f32 %v6619_v6  ;;  %v6246_v60 = vsub.f32 0.0, %v15406_v56  ;;  %vm8324_vm10 = vmpackc.low %vm3943_vm2, %vm3942_vm5  ;;  %v17455_v63 = vld [vmem:[#allocation82_spill] sm:$0xff] }
 0x385   : > { %11038 = vpow2.f32 %v6380_v35  ;;  %v5650_v41 = vpop.f32.mrf.mxu1  ;;  %v11025_v14 = vpop.eup %11024  ;;  %v5055_v53 = vadd.f32 %v15092_v46, %v17455_v63 }
 0x386   : > { %v15414_v24 = vpop.f32.mrf.mxu0  ;;  %v6382_v50 = vmul.f32 1.442695, %v6246_v60  ;;  %v15420_v30 = vadd.f32 %v5650_v41, %v5050_v48  ;;  %v11027_v39 = vpop.eup %11026  ;;  %v6620_v6 = vadd.f32 1.0, %v11025_v14  ;;  %v17457_v60 = vld [vmem:[#allocation217_spill] sm:$0xff]  ;;  %10231 = vmatmul.mubr.msk.bf16.gmra.mxu1 %vm8324_vm10, %v16863_v20 }
 0x387   : > { %17452 = vst [vmem:[#allocation155_spill] sm:$0xff] %v15414_v24  ;;  %v10133_v57 = vpop.f32.mrf.mxu1  ;;  %v17458_v48 = vpack.c.bf16 %v14450_v32, %v17457_v60  ;;  %10234 = vmatprep.mubr.msk.bf16.mxu1 %vm17246_vm1, %v16860_v47 }
 0x388   : > { %v9925_v15 = vpop.f32.mrf.mxu0  ;;  %11040 = vpow2.f32 %v6382_v50  ;;  %v6247_v26 = vsub.f32 0.0, %v15420_v30 }
 0x389   : > { %v11029_v12 = vpop.eup %11028  ;;  %v5655_v41 = vpop.f32.mrf.mxu1  ;;  %v6868_v15 = vmul.f32 %v11027_v39, %v15302_v4  ;;  %11042 = vrcp.f32 %v6620_v6 }
 0x38a   : > { %v15429_v35 = vpop.f32.mrf.mxu0  ;;  %10023 = vmatmul.mubr.bf16.gmra.mxu0 %v17458_v48  ;;  %v11031_v14 = vpop.eup %11030  ;;  %v6869_v46 = vmul.f32 %v11029_v12, %v15315_v42  ;;  %v6384_v50 = vmul.f32 1.442695, %v6247_v26  ;;  %v15439_v57 = vadd.f32 %v5655_v41, %v5055_v53  ;;  %v17459_v48 = vld [vmem:[#allocation85_spill] sm:$0xff] }
 0x38b   : > { %17456 = vst [vmem:[#allocation200_spill] sm:$0xff] %v15429_v35  ;;  %10026 = vmatprep.mubr.msk.bf16.mxu0 %vm17246_vm1, %v16860_v47  ;;  %v6621_v32 = vadd.f32 1.0, %v11031_v14  ;;  %v10136_v60 = vpop.f32.mrf.mxu1  ;;  %v5058_v35 = vadd.f32 %v15104_v51, %v17459_v48  ;;  %v17460_v42 = vld [vmem:[#allocation37_spill] sm:$0xff]  ;;  %v17463_v48 = vld [vmem:[#allocation220_spill] sm:$0xff] }
 0x38c   : > { %v9928_v63 = vpop.f32.mrf.mxu0  ;;  %v8658_v24 = vpack.c.bf16 %v6869_v46, %v6868_v15  ;;  %11044 = vpow2.f32 %v6384_v50  ;;  %v6248_v4 = vsub.f32 0.0, %v15439_v57  ;;  %vm3945_vm11 = vcmp.eq.s32.totalorder %v11893_v34, %v17460_v42  ;;  %v17461_v53 = vld [vmem:[#allocation177_spill] sm:$0xff]  ;;  %v17462_v50 = vld [vmem:[#allocation87_spill] sm:$0xff] }
 0x38d   : > { %vm3944_vm2 = vcmp.eq.s32.totalorder %v11893_v34, %v17461_v53  ;;  %11046 = vrcp.f32 %v6621_v32  ;;  %v5658_v26 = vpop.f32.mrf.mxu1  ;;  %v11033_v6 = vpop.eup %11032  ;;  %v5063_v63 = vadd.f32 %v15112_v0, %v17462_v50  ;;  %v17464_v42 = vpack.c.bf16 %v14510_v18, %v17463_v48 }
 0x38e   : > { %v15446_v39 = vpop.f32.mrf.mxu0  ;;  %8965 = vst [vmem:[%s15453_s17 + $0x8] sm:$0xff] %v8658_v24   ;;  %v6386_v51 = vmul.f32 1.442695, %v6248_v4  ;;  %v15456_v12 = vadd.f32 %v5658_v26, %v5058_v35  ;;  %v11035_v14 = vpop.eup %11034  ;;  %v6622_v15 = vadd.f32 1.0, %v11033_v6  ;;  %vm8326_vm5 = vmpackc.low %vm3945_vm11, %vm3944_vm2 }
 0x38f   : > { %v10137_v46 = vpop.f32.mrf.mxu1  ;;  %10235 = vmatmul.mubr.msk.bf16.gmra.mxu1 %vm8326_vm5, %v16863_v20  ;;  %v6870_v53 = vmul.f32 %v11035_v14, %v15328_v31 }
 0x390   : > { %v9929_v41 = vpop.f32.mrf.mxu0  ;;  %11048 = vpow2.f32 %v6386_v51  ;;  %v6249_v32 = vsub.f32 0.0, %v15456_v12  ;;  %10238 = vmatprep.mubr.msk.bf16.mxu1 %vm17246_vm1, %v16860_v47  ;;  %v17465_v46 = vld [vmem:[#allocation89_spill] sm:$0xff] }
 0x391   : > { %v11037_v24 = vpop.eup %11036  ;;  %v5663_v35 = vpop.f32.mrf.mxu1  ;;  %11050 = vrcp.f32 %v6622_v15  ;;  %v5066_v50 = vadd.f32 %v15124_v58, %v17465_v46  ;;  %v17469_v46 = vld [vmem:[#allocation222_spill] sm:$0xff] }
 0x392   : > { %v15461_v60 = vpop.f32.mrf.mxu0  ;;  %10027 = vmatmul.mubr.bf16.gmra.mxu0 %v17464_v42  ;;  %v11039_v4 = vpop.eup %11038  ;;  %v6871_v0 = vmul.f32 %v11037_v24, %v15341_v2  ;;  %v6388_v26 = vmul.f32 1.442695, %v6249_v32  ;;  %v15471_v6 = vadd.f32 %v5663_v35, %v5063_v63  ;;  %v17466_v63 = vld [vmem:[#allocation179_spill] sm:$0xff]  ;;  %v17467_v32 = vld [vmem:[#allocation180_spill] sm:$0xff] }
 0x393   : > { %10030 = vmatprep.mubr.msk.bf16.mxu0 %vm17246_vm1, %v16860_v47  ;;  %v6623_v18 = vadd.f32 1.0, %v11039_v4  ;;  %v10140_v41 = vpop.f32.mrf.mxu1  ;;  %vm3947_vm10 = vcmp.eq.s32.totalorder %v11893_v34, %v17466_v63  ;;  %vm3946_vm11 = vcmp.eq.s32.totalorder %v11893_v34, %v17467_v32 }
 0x394   : > { %v9932_v51 = vpop.f32.mrf.mxu0  ;;  %v8663_v48 = vpack.c.bf16 %v6871_v0, %v6870_v53  ;;  %11052 = vpow2.f32 %v6388_v26  ;;  %v6250_v31 = vsub.f32 0.0, %v15471_v6  ;;  %vm8328_vm2 = vmpackc.low %vm3947_vm10, %vm3946_vm11  ;;  %v17468_v0 = vld [vmem:[#allocation92_spill] sm:$0xff] }
 0x395   : > { %v11041_v2 = vpop.eup %11040  ;;  %11054 = vrcp.f32 %v6623_v18  ;;  %v5666_v15 = vpop.f32.mrf.mxu1  ;;  %v5071_v26 = vadd.f32 %v15132_v61, %v17468_v0  ;;  %v17470_v18 = vpack.c.bf16 %v14563_v29, %v17469_v46  ;;  %v17473_v46 = vld [vmem:[#allocation183_spill] sm:$0xff] }
 0x396   : > { %v15478_v14 = vpop.f32.mrf.mxu0  ;;  %8966 = vst [vmem:[%s15453_s17 + $0x10] sm:$0xff] %v8663_v48   ;;  %v6624_v42 = vadd.f32 1.0, %v11041_v2  ;;  %v6390_v24 = vmul.f32 1.442695, %v6250_v31  ;;  %v15485_v35 = vadd.f32 %v5666_v15, %v5066_v50  ;;  %v11043_v53 = vpop.eup %11042  ;;  %vm3948_vm10 = vcmp.eq.s32.totalorder %v11893_v34, %v17473_v46 }
 0x397   : > { %v10141_v4 = vpop.f32.mrf.mxu1  ;;  %10239 = vmatmul.mubr.msk.bf16.gmra.mxu1 %vm8328_vm2, %v16863_v20  ;;  %v6872_v29 = vmul.f32 %v11043_v53, %v15354_v37 }
 0x398   : > { %v9933_v58 = vpop.f32.mrf.mxu0  ;;  %v6251_v51 = vsub.f32 0.0, %v15485_v35  ;;  %11056 = vpow2.f32 %v6390_v24  ;;  %10242 = vmatprep.mubr.msk.bf16.mxu1 %vm17246_vm1, %v16860_v47 }
 0x399   : > { %v11045_v48 = vpop.eup %11044  ;;  %v5671_v31 = vpop.f32.mrf.mxu1  ;;  %11058 = vrcp.f32 %v6624_v42  ;;  %v17471_v58 = vld [vmem:[#allocation96_spill] sm:$0xff] }
 0x39a   : > { %v15490_v41 = vpop.f32.mrf.mxu0  ;;  %10031 = vmatmul.mubr.bf16.gmra.mxu0 %v17470_v18  ;;  %v11047_v50 = vpop.eup %11046  ;;  %v6625_v2 = vadd.f32 1.0, %v11045_v48  ;;  %v6392_v61 = vmul.f32 1.442695, %v6251_v51  ;;  %v15498_v63 = vadd.f32 %v5671_v31, %v5071_v26  ;;  %v5074_v4 = vadd.f32 %v15144_v49, %v17471_v58  ;;  %v17472_v51 = vld [vmem:[#allocation182_spill] sm:$0xff] }
 0x39b   : > { %10034 = vmatprep.mubr.msk.bf16.mxu0 %vm17246_vm1, %v16860_v47  ;;  %v6873_v15 = vmul.f32 %v11047_v50, %v15367_v28  ;;  %v10144_v24 = vpop.f32.mrf.mxu1  ;;  %vm3949_vm5 = vcmp.eq.s32.totalorder %v11893_v34, %v17472_v51  ;;  %v17475_v51 = vld [vmem:[#allocation63_spill] sm:$0xff] }
 0x39c   : > { %v9936_v32 = vpop.f32.mrf.mxu0  ;;  %11060 = vrcp.f32 %v6625_v2  ;;  %v6252_v42 = vsub.f32 0.0, %v15498_v63  ;;  %vm8330_vm11 = vmpackc.low %vm3949_vm5, %vm3948_vm10  ;;  %v17474_v2 = vld [vmem:[#allocation99_spill] sm:$0xff] }
 0x39d   : > { %v11049_v26 = vpop.eup %11048  ;;  %v8668_v37 = vpack.c.bf16 %v6873_v15, %v6872_v29  ;;  %11062 = vpow2.f32 %v6392_v61  ;;  %v5674_v28 = vpop.f32.mrf.mxu1  ;;  %v5079_v32 = vadd.f32 %v15152_v16, %v17474_v2  ;;  %v17476_v29 = vld [vmem:[#allocation79_spill] sm:$0xff] }
 0x39e   : > { %v15507_v0 = vpop.f32.mrf.mxu0  ;;  %v6626_v53 = vadd.f32 1.0, %v11049_v26  ;;  %v6394_v18 = vmul.f32 1.442695, %v6252_v42  ;;  %v15513_v48 = vadd.f32 %v5674_v28, %v5074_v4  ;;  %v11051_v50 = vpop.eup %11050  ;;  %v17477_v61 = vpack.c.bf16 %v17475_v51, %v17476_v29 }
 0x39f   : > { %8967 = vst [vmem:[%s15453_s17 + $0x18] sm:$0xff] %v8668_v37   ;;  %v10145_v31 = vpop.f32.mrf.mxu1  ;;  %10243 = vmatmul.mubr.msk.bf16.gmra.mxu1 %vm8330_vm11, %v16863_v20  ;;  %v6874_v28 = vmul.f32 %v11051_v50, %v15380_v23 }
 0x3a0   : > { %v9937_v49 = vpop.f32.mrf.mxu0  ;;  %v6253_v24 = vsub.f32 0.0, %v15513_v48  ;;  %11064 = vpow2.f32 %v6394_v18  ;;  %10246 = vmatprep.mubr.msk.bf16.mxu1 %vm17246_vm1, %v16860_v47  ;;  %v17478_v31 = vld [vmem:[#allocation102_spill] sm:$0xff] }
 0x3a1   : > { %v11053_v15 = vpop.eup %11052  ;;  %v5679_v4 = vpop.f32.mrf.mxu1  ;;  %11066 = vrcp.f32 %v6626_v53  ;;  %v5082_v2 = vadd.f32 %v15164_v43, %v17478_v31 }
 0x3a2   : > { %v15519_v58 = vpop.f32.mrf.mxu0  ;;  %10035 = vmatmul.mubr.bf16.gmra.mxu0 %v17477_v61  ;;  %v11055_v42 = vpop.eup %11054  ;;  %v6627_v26 = vadd.f32 1.0, %v11053_v15  ;;  %v6396_v16 = vmul.f32 1.442695, %v6253_v24  ;;  %v15527_v46 = vadd.f32 %v5679_v4, %v5079_v32  ;;  %v17479_v32 = vld [vmem:[#allocation5_spill] sm:$0xff]  ;;  %v17480_v24 = vld [vmem:[#allocation184_spill] sm:$0xff] }
 0x3a3   : > { %10038 = vmatprep.mubr.msk.bf16.mxu0 %vm17246_vm1, %v16860_v47  ;;  %v6875_v18 = vmul.f32 %v11055_v42, %v15393_v10  ;;  %v10148_v49 = vpop.f32.mrf.mxu1  ;;  %vm3951_vm2 = vcmp.eq.s32.totalorder %v11893_v34, %v17479_v32  ;;  %vm3950_vm5 = vcmp.eq.s32.totalorder %v11893_v34, %v17480_v24 }
 0x3a4   : > { %v9940_v37 = vpop.f32.mrf.mxu0  ;;  %11068 = vrcp.f32 %v6627_v26  ;;  %v6254_v53 = vsub.f32 0.0, %v15527_v46  ;;  %vm8332_vm10 = vmpackc.low %vm3951_vm2, %vm3950_vm5  ;;  %v17481_v26 = vld [vmem:[#allocation105_spill] sm:$0xff] }
 0x3a5   : > { %v8673_v29 = vpack.c.bf16 %v6875_v18, %v6874_v28  ;;  %11070 = vpow2.f32 %v6396_v16  ;;  %v5682_v23 = vpop.f32.mrf.mxu1  ;;  %v11057_v10 = vpop.eup %11056  ;;  %v5087_v37 = vadd.f32 %v15172_v5, %v17481_v26  ;;  %v17482_v16 = vld [vmem:[#allocation84_spill] sm:$0xff]  ;;  %v17486_v26 = vld [vmem:[#allocation185_spill] sm:$0xff] }
 0x3a6   : > { %v15536_v51 = vpop.f32.mrf.mxu0  ;;  %v6398_v50 = vmul.f32 1.442695, %v6254_v53  ;;  %v15542_v61 = vadd.f32 %v5682_v23, %v5082_v2  ;;  %v11059_v43 = vpop.eup %11058  ;;  %v6628_v4 = vadd.f32 1.0, %v11057_v10  ;;  %v17483_v28 = vpack.c.bf16 %v14640_v52, %v17482_v16 }
 0x3a7   : > { %8968 = vst [vmem:[%s15453_s17 + $0x20] sm:$0xff] %v8673_v29   ;;  %v10149_v42 = vpop.f32.mrf.mxu1  ;;  %10247 = vmatmul.mubr.msk.bf16.gmra.mxu1 %vm8332_vm10, %v16863_v20  ;;  %v6876_v32 = vmul.f32 %v11059_v43, %v15406_v56  ;;  %vm3952_vm2 = vcmp.eq.s32.totalorder %v11893_v34, %v17486_v26  ;;  %v17489_v26 = vld [vmem:[#allocation15_spill] sm:$0xff] }
 0x3a8   : > { %v9941_v15 = vpop.f32.mrf.mxu0  ;;  %11072 = vpow2.f32 %v6398_v50  ;;  %v6255_v49 = vsub.f32 0.0, %v15542_v61  ;;  %10250 = vmatprep.mubr.msk.bf16.mxu1 %vm17246_vm1, %v16860_v47  ;;  %v17484_v50 = vld [vmem:[#allocation108_spill] sm:$0xff] }
 0x3a9   : > { %v11061_v18 = vpop.eup %11060  ;;  %v5687_v2 = vpop.f32.mrf.mxu1  ;;  %11074 = vrcp.f32 %v6628_v4  ;;  %v5090_v15 = vadd.f32 %v15184_v21, %v17484_v50 }
 0x3aa   : > { %v15548_v31 = vpop.f32.mrf.mxu0  ;;  %10039 = vmatmul.mubr.bf16.gmra.mxu0 %v17483_v28  ;;  %v11063_v53 = vpop.eup %11062  ;;  %v6877_v5 = vmul.f32 %v11061_v18, %v15420_v30  ;;  %v6400_v24 = vmul.f32 1.442695, %v6255_v49  ;;  %v15558_v29 = vadd.f32 %v5687_v2, %v5087_v37  ;;  %v17485_v30 = vld [vmem:[#allocation41_spill] sm:$0xff] }
 0x3ab   : > { %10042 = vmatprep.mubr.msk.bf16.mxu0 %vm17246_vm1, %v16860_v47  ;;  %v6629_v52 = vadd.f32 1.0, %v11063_v53  ;;  %v10152_v10 = vpop.f32.mrf.mxu1  ;;  %vm3953_vm11 = vcmp.eq.s32.totalorder %v11893_v34, %v17485_v30  ;;  %v17487_v53 = vld [vmem:[#allocation112_spill] sm:$0xff] }
 0x3ac   : > { %v9944_v23 = vpop.f32.mrf.mxu0  ;;  %v8678_v42 = vpack.c.bf16 %v6877_v5, %v6876_v32  ;;  %11076 = vpow2.f32 %v6400_v24  ;;  %v6256_v56 = vsub.f32 0.0, %v15558_v29  ;;  %vm8334_vm5 = vmpackc.low %vm3953_vm11, %vm3952_vm2  ;;  %v5095_v32 = vadd.f32 %v15192_v8, %v17487_v53 }
 0x3ad   : > { %11078 = vrcp.f32 %v6629_v52  ;;  %v5690_v37 = vpop.f32.mrf.mxu1  ;;  %v11065_v4 = vpop.eup %11064  ;;  %v17488_v23 = vpack.c.bf16 %v14680_v1, %v14666_v7 }
 0x3ae   : > { %v15565_v43 = vpop.f32.mrf.mxu0  ;;  %8969 = vst [vmem:[%s15453_s17 + $0x28] sm:$0xff] %v8678_v42   ;;  %v6402_v49 = vmul.f32 1.442695, %v6256_v56  ;;  %v15572_v16 = vadd.f32 %v5690_v37, %v5090_v15  ;;  %v11067_v28 = vpop.eup %11066  ;;  %v6630_v18 = vadd.f32 1.0, %v11065_v4  ;;  %v5098_v37 = vadd.f32 %v15204_v45, %v17489_v26 }
 0x3af   : > { %v10153_v2 = vpop.f32.mrf.mxu1  ;;  %10251 = vmatmul.mubr.msk.bf16.gmra.mxu1 %vm8334_vm5, %v16863_v20  ;;  %v6878_v15 = vmul.f32 %v11067_v28, %v15439_v57  ;;  %v17491_v28 = vld [vmem:[#allocation186_spill] sm:$0xff] }
 0x3b0   : > { %v9945_v21 = vpop.f32.mrf.mxu0  ;;  %11080 = vpow2.f32 %v6402_v49  ;;  %v6257_v5 = vsub.f32 0.0, %v15572_v16  ;;  %10254 = vmatprep.mubr.msk.bf16.mxu1 %vm17246_vm1, %v16860_v47  ;;  %vm3954_vm11 = vcmp.eq.s32.totalorder %v11893_v34, %v17491_v28 }
 0x3b1   : > { %v11069_v52 = vpop.eup %11068  ;;  %v5695_v10 = vpop.f32.mrf.mxu1  ;;  %11082 = vrcp.f32 %v6630_v18  ;;  %v17490_v21 = vld [vmem:[#allocation7_spill] sm:$0xff] }
 0x3b2   : > { %v15577_v24 = vpop.f32.mrf.mxu0  ;;  %10043 = vmatmul.mubr.bf16.gmra.mxu0 %v17488_v23  ;;  %v11071_v50 = vpop.eup %11070  ;;  %v6879_v8 = vmul.f32 %v11069_v52, %v15456_v12  ;;  %v6404_v42 = vmul.f32 1.442695, %v6257_v5  ;;  %v15587_v56 = vadd.f32 %v5695_v10, %v5095_v32  ;;  %vm3955_vm10 = vcmp.eq.s32.totalorder %v11893_v34, %v17490_v21  ;;  %v17492_v52 = vld [vmem:[#allocation117_spill] sm:$0xff] }
 0x3b3   : > { %10046 = vmatprep.mubr.msk.bf16.mxu0 %vm17246_vm1, %v16860_v47  ;;  %v6631_v7 = vadd.f32 1.0, %v11071_v50  ;;  %v10156_v1 = vpop.f32.mrf.mxu1  ;;  %vm8336_vm2 = vmpackc.low %vm3955_vm10, %vm3954_vm11  ;;  %v5103_v10 = vadd.f32 %v15212_v9, %v17492_v52 }
 0x3b4   : > { %v9948_v30 = vpop.f32.mrf.mxu0  ;;  %v8683_v4 = vpack.c.bf16 %v6879_v8, %v6878_v15  ;;  %11084 = vpow2.f32 %v6404_v42  ;;  %v6258_v57 = vsub.f32 0.0, %v15587_v56  ;;  %v17493_v8 = vpack.c.bf16 %v14715_v22, %v14701_v55 }
 0x3b5   : > { %v11073_v12 = vpop.eup %11072  ;;  %11086 = vrcp.f32 %v6631_v7  ;;  %v5698_v18 = vpop.f32.mrf.mxu1 }
 0x3b6   : > { %v15594_v49 = vpop.f32.mrf.mxu0  ;;  %8970 = vst [vmem:[%s15453_s17 + $0x30] sm:$0xff] %v8683_v4   ;;  %v6632_v2 = vadd.f32 1.0, %v11073_v12  ;;  %v6406_v53 = vmul.f32 1.442695, %v6258_v57  ;;  %v15601_v32 = vadd.f32 %v5698_v18, %v5098_v37  ;;  %v11075_v23 = vpop.eup %11074  ;;  %v17494_v57 = vld [vmem:[#allocation17_spill] sm:$0xff] }
 0x3b7   : > { %v10157_v5 = vpop.f32.mrf.mxu1  ;;  %10255 = vmatmul.mubr.msk.bf16.gmra.mxu1 %vm8336_vm2, %v16863_v20  ;;  %v6880_v55 = vmul.f32 %v11075_v23, %v15471_v6  ;;  %v5106_v12 = vadd.f32 %v15224_v44, %v17494_v57 }
 0x3b8   : > { %v9949_v45 = vpop.f32.mrf.mxu0  ;;  %v6259_v50 = vsub.f32 0.0, %v15601_v32  ;;  %11088 = vpow2.f32 %v6406_v53  ;;  %10258 = vmatprep.mubr.msk.bf16.mxu1 %vm17246_vm1, %v16860_v47  ;;  %v17496_v53 = vld [vmem:[#allocation188_spill] sm:$0xff] }
 0x3b9   : > { %v11077_v42 = vpop.eup %11076  ;;  %v5703_v30 = vpop.f32.mrf.mxu1  ;;  %11090 = vrcp.f32 %v6632_v2  ;;  %v17495_v2 = vld [vmem:[#allocation187_spill] sm:$0xff]  ;;  %vm3956_vm10 = vcmp.eq.s32.totalorder %v11893_v34, %v17496_v53  ;;  %v17501_v53 = vld [vmem:[#allocation20_spill] sm:$0xff] }
 0x3ba   : > { %v15606_v15 = vpop.f32.mrf.mxu0  ;;  %10047 = vmatmul.mubr.bf16.gmra.mxu0 %v17493_v8  ;;  %v11079_v7 = vpop.eup %11078  ;;  %v6633_v1 = vadd.f32 1.0, %v11077_v42  ;;  %v6408_v9 = vmul.f32 1.442695, %v6259_v50  ;;  %v15614_v26 = vadd.f32 %v5703_v30, %v5103_v10  ;;  %vm3957_vm5 = vcmp.eq.s32.totalorder %v11893_v34, %v17495_v2  ;;  %v17497_v50 = vld [vmem:[#allocation125_spill] sm:$0xff] }
 0x3bb   : > { %10050 = vmatprep.mubr.msk.bf16.mxu0 %vm17246_vm1, %v16860_v47  ;;  %v6881_v22 = vmul.f32 %v11079_v7, %v15485_v35  ;;  %v10160_v4 = vpop.f32.mrf.mxu1  ;;  %vm8338_vm11 = vmpackc.low %vm3957_vm5, %vm3956_vm10  ;;  %v5111_v8 = vadd.f32 %v15232_v13, %v17497_v50  ;;  %v17498_v7 = vld [vmem:[#allocation88_spill] sm:$0xff] }
 0x3bc   : > { %v9952_v37 = vpop.f32.mrf.mxu0  ;;  %11092 = vrcp.f32 %v6633_v1  ;;  %v6260_v21 = vsub.f32 0.0, %v15614_v26  ;;  %v17499_v1 = vld [vmem:[#allocation90_spill] sm:$0xff] }
 0x3bd   : > { %v11081_v18 = vpop.eup %11080  ;;  %v8688_v6 = vpack.c.bf16 %v6881_v22, %v6880_v55  ;;  %11094 = vpow2.f32 %v6408_v9  ;;  %v5706_v35 = vpop.f32.mrf.mxu1  ;;  %v17500_v9 = vpack.c.bf16 %v17498_v7, %v17499_v1  ;;  %v17504_v1 = vld [vmem:[#allocation129_spill] sm:$0xff] }
 0x3be   : > { %v15623_v28 = vpop.f32.mrf.mxu0  ;;  %v6634_v45 = vadd.f32 1.0, %v11081_v18  ;;  %v6410_v5 = vmul.f32 1.442695, %v6260_v21  ;;  %v15629_v23 = vadd.f32 %v5706_v35, %v5106_v12  ;;  %v11083_v10 = vpop.eup %11082 }
 0x3bf   : > { %8971 = vst [vmem:[%s15453_s17 + $0x38] sm:$0xff] %v8688_v6   ;;  %v10161_v52 = vpop.f32.mrf.mxu1  ;;  %10259 = vmatmul.mubr.msk.bf16.gmra.mxu1 %vm8338_vm11, %v16863_v20  ;;  %v6882_v21 = vmul.f32 %v11083_v10, %v15498_v63  ;;  %v5114_v6 = vadd.f32 %v15244_v25, %v17501_v53 }
 0x3c0   : > { %v9953_v44 = vpop.f32.mrf.mxu0  ;;  %v6261_v42 = vsub.f32 0.0, %v15629_v23  ;;  %11096 = vpow2.f32 %v6410_v5  ;;  %10262 = vmatprep.mubr.msk.bf16.mxu1 %vm17246_vm1, %v16860_v47  ;;  %v17502_v5 = vld [vmem:[#allocation9_spill] sm:$0xff] }
 0x3c1   : > { %v11085_v37 = vpop.eup %11084  ;;  %v5711_v55 = vpop.f32.mrf.mxu1  ;;  %11098 = vrcp.f32 %v6634_v45  ;;  %vm3959_vm2 = vcmp.eq.s32.totalorder %v11893_v34, %v17502_v5  ;;  %v17503_v44 = vld [vmem:[#allocation190_spill] sm:$0xff] }
 0x3c2   : > { %v15635_v30 = vpop.f32.mrf.mxu0  ;;  %10051 = vmatmul.mubr.bf16.gmra.mxu0 %v17500_v9  ;;  %v11087_v22 = vpop.eup %11086  ;;  %v6635_v4 = vadd.f32 1.0, %v11085_v37  ;;  %v6412_v13 = vmul.f32 1.442695, %v6261_v42  ;;  %v15643_v57 = vadd.f32 %v5711_v55, %v5111_v8  ;;  %vm3958_vm5 = vcmp.eq.s32.totalorder %v11893_v34, %v17503_v44 }
 0x3c3   : > { %10054 = vmatprep.mubr.msk.bf16.mxu0 %vm17246_vm1, %v16860_v47  ;;  %v6883_v18 = vmul.f32 %v11087_v22, %v15513_v48  ;;  %v10164_v2 = vpop.f32.mrf.mxu1  ;;  %vm8340_vm10 = vmpackc.low %vm3959_vm2, %vm3958_vm5  ;;  %v5119_v9 = vadd.f32 %v15252_v54, %v17504_v1  ;;  %v17505_v22 = vld [vmem:[#allocation94_spill] sm:$0xff] }
 0x3c4   : > { %v9956_v12 = vpop.f32.mrf.mxu0  ;;  %11100 = vrcp.f32 %v6635_v4  ;;  %v6262_v35 = vsub.f32 0.0, %v15643_v57  ;;  %v17506_v4 = vld [vmem:[#allocation95_spill] sm:$0xff] }
 0x3c5   : > { %v8693_v52 = vpack.c.bf16 %v6883_v18, %v6882_v21  ;;  %11102 = vpow2.f32 %v6412_v13  ;;  %v5714_v63 = vpop.f32.mrf.mxu1  ;;  %v11089_v48 = vpop.eup %11088  ;;  %v17507_v13 = vpack.c.bf16 %v17505_v22, %v17506_v4  ;;  %v17511_v4 = vld [vmem:[#allocation136_spill] sm:$0xff] }
 0x3c6   : > { %v15652_v45 = vpop.f32.mrf.mxu0  ;;  %v6414_v10 = vmul.f32 1.442695, %v6262_v35  ;;  %v15658_v50 = vadd.f32 %v5714_v63, %v5114_v6  ;;  %v11091_v25 = vpop.eup %11090  ;;  %v6636_v42 = vadd.f32 1.0, %v11089_v48 }
 0x3c7   : > { %8972 = vst [vmem:[%s15453_s17 + $0x40] sm:$0xff] %v8693_v52   ;;  %v10165_v7 = vpop.f32.mrf.mxu1  ;;  %10263 = vmatmul.mubr.msk.bf16.gmra.mxu1 %vm8340_vm10, %v16863_v20  ;;  %v6884_v2 = vmul.f32 %v11091_v25, %v15527_v46  ;;  %v17508_v52 = vld [vmem:[#allocation132_spill] sm:$0xff] }
 0x3c8   : > { %v9957_v8 = vpop.f32.mrf.mxu0  ;;  %11104 = vpow2.f32 %v6414_v10  ;;  %v6263_v37 = vsub.f32 0.0, %v15658_v50  ;;  %10266 = vmatprep.mubr.msk.bf16.mxu1 %vm17246_vm1, %v16860_v47  ;;  %v5122_v63 = vadd.f32 %v15264_v27, %v17508_v52 }
 0x3c9   : > { %v11093_v12 = vpop.eup %11092  ;;  %v5719_v21 = vpop.f32.mrf.mxu1  ;;  %11106 = vrcp.f32 %v6636_v42  ;;  %v17510_v8 = vld [vmem:[#allocation191_spill] sm:$0xff] }
 0x3ca   : > { %v15664_v55 = vpop.f32.mrf.mxu0  ;;  %10055 = vmatmul.mubr.bf16.gmra.mxu0 %v17507_v13  ;;  %v11095_v18 = vpop.eup %11094  ;;  %v6885_v54 = vmul.f32 %v11093_v12, %v15542_v61  ;;  %v6416_v53 = vmul.f32 1.442695, %v6263_v37  ;;  %v15674_v6 = vadd.f32 %v5719_v21, %v5119_v9  ;;  %v17509_v61 = vld [vmem:[#allocation47_spill] sm:$0xff]  ;;  %vm3960_vm2 = vcmp.eq.s32.totalorder %v11893_v34, %v17510_v8 }
 0x3cb   : > { %10058 = vmatprep.mubr.msk.bf16.mxu0 %vm17246_vm1, %v16860_v47  ;;  %v6637_v5 = vadd.f32 1.0, %v11095_v18  ;;  %v10168_v44 = vpop.f32.mrf.mxu1  ;;  %vm3961_vm11 = vcmp.eq.s32.totalorder %v11893_v34, %v17509_v61  ;;  %v5127_v13 = vadd.f32 %v15272_v19, %v17511_v4  ;;  %v17512_v18 = vpack.c.bf16 %v14811_v40, %v14797_v11  ;;  %v17514_v8 = vld [vmem:[#allocation11_spill] sm:$0xff]  ;;  %v17516_v4 = vld [vmem:[#allocation141_spill] sm:$0xff] }
 0x3cc   : > { %v9960_v35 = vpop.f32.mrf.mxu0  ;;  %v8698_v48 = vpack.c.bf16 %v6885_v54, %v6884_v2  ;;  %11108 = vpow2.f32 %v6416_v53  ;;  %v6264_v46 = vsub.f32 0.0, %v15674_v6  ;;  %vm8342_vm5 = vmpackc.low %vm3961_vm11, %vm3960_vm2  ;;  %vm3963_vm10 = vcmp.eq.s32.totalorder %v11893_v34, %v17514_v8  ;;  %v17520_v8 = vld [vmem:[#allocation196_spill] sm:$0xff] }
 0x3cd   : > { %11110 = vrcp.f32 %v6637_v5  ;;  %v5722_v25 = vpop.f32.mrf.mxu1  ;;  %v11097_v42 = vpop.eup %11096 }
 0x3ce   : > { %v15681_v10 = vpop.f32.mrf.mxu0  ;;  %8973 = vst [vmem:[%s15453_s17 + $0x48] sm:$0xff] %v8698_v48   ;;  %v6418_v7 = vmul.f32 1.442695, %v6264_v46  ;;  %v15688_v1 = vadd.f32 %v5722_v25, %v5122_v63  ;;  %v11099_v9 = vpop.eup %11098  ;;  %v6638_v37 = vadd.f32 1.0, %v11097_v42  ;;  %v17513_v63 = vld [vmem:[#allocation23_spill] sm:$0xff]  ;;  %v17515_v25 = vld [vmem:[#allocation193_spill] sm:$0xff] }
 0x3cf   : > { %v10169_v22 = vpop.f32.mrf.mxu1  ;;  %10267 = vmatmul.mubr.msk.bf16.gmra.mxu1 %vm8342_vm5, %v16863_v20  ;;  %v6886_v35 = vmul.f32 %v11099_v9, %v15558_v29  ;;  %v5130_v48 = vadd.f32 %v15284_v17, %v17513_v63  ;;  %vm3962_vm11 = vcmp.eq.s32.totalorder %v11893_v34, %v17515_v25 }
 0x3d0   : > { %v9961_v27 = vpop.f32.mrf.mxu0  ;;  %11112 = vpow2.f32 %v6418_v7  ;;  %v6265_v12 = vsub.f32 0.0, %v15688_v1  ;;  %10270 = vmatprep.mubr.msk.bf16.mxu1 %vm17246_vm1, %v16860_v47  ;;  %vm8344_vm2 = vmpackc.low %vm3963_vm10, %vm3962_vm11  ;;  %vm3964_vm10 = vcmp.eq.s32.totalorder %v11893_v34, %v17520_v8 }
 0x3d1   : > { %v11101_v2 = vpop.eup %11100  ;;  %v5727_v54 = vpop.f32.mrf.mxu1  ;;  %11114 = vrcp.f32 %v6638_v37 }
 0x3d2   : > { %v15693_v21 = vpop.f32.mrf.mxu0  ;;  %10059 = vmatmul.mubr.bf16.gmra.mxu0 %v17512_v18  ;;  %v11103_v53 = vpop.eup %11102  ;;  %v6887_v19 = vmul.f32 %v11101_v2, %v15572_v16  ;;  %v6420_v5 = vmul.f32 1.442695, %v6265_v12  ;;  %v15703_v44 = vadd.f32 %v5727_v54, %v5127_v13  ;;  %v5135_v13 = vadd.f32 %v15294_v38, %v17516_v4 }
 0x3d3   : > { %10062 = vmatprep.mubr.msk.bf16.mxu0 %vm17246_vm1, %v16860_v47  ;;  %v6639_v11 = vadd.f32 1.0, %v11103_v53  ;;  %v10172_v40 = vpop.f32.mrf.mxu1  ;;  %v17517_v2 = vpack.c.bf16 %v14846_v3, %v14832_v62 }
 0x3d4   : > { %v9964_v52 = vpop.f32.mrf.mxu0  ;;  %v8703_v46 = vpack.c.bf16 %v6887_v19, %v6886_v35  ;;  %11116 = vpow2.f32 %v6420_v5  ;;  %v6266_v29 = vsub.f32 0.0, %v15703_v44  ;;  %v17518_v40 = vld [vmem:[#allocation144_spill] sm:$0xff] }
 0x3d5   : > { %v11105_v16 = vpop.eup %11104  ;;  %11118 = vrcp.f32 %v6639_v11  ;;  %v5730_v42 = vpop.f32.mrf.mxu1  ;;  %v5138_v63 = vadd.f32 %v15309_v33, %v17518_v40 }
 0x3d6   : > { %v15710_v61 = vpop.f32.mrf.mxu0  ;;  %8974 = vst [vmem:[%s15453_s17 + $0x50] sm:$0xff] %v8703_v46   ;;  %v6640_v7 = vadd.f32 1.0, %v11105_v16  ;;  %v6422_v27 = vmul.f32 1.442695, %v6266_v29  ;;  %v15717_v9 = vadd.f32 %v5730_v42, %v5130_v48  ;;  %v11107_v22 = vpop.eup %11106  ;;  %v17519_v16 = vld [vmem:[#allocation195_spill] sm:$0xff] }
 0x3d7   : > { %v10173_v37 = vpop.f32.mrf.mxu1  ;;  %10271 = vmatmul.mubr.msk.bf16.gmra.mxu1 %vm8344_vm2, %v16863_v20  ;;  %v6888_v62 = vmul.f32 %v11107_v22, %v15587_v56  ;;  %vm3965_vm5 = vcmp.eq.s32.totalorder %v11893_v34, %v17519_v16 }
 0x3d8   : > { %v9965_v17 = vpop.f32.mrf.mxu0  ;;  %v6267_v12 = vsub.f32 0.0, %v15717_v9  ;;  %11120 = vpow2.f32 %v6422_v27  ;;  %10274 = vmatprep.mubr.msk.bf16.mxu1 %vm17246_vm1, %v16860_v47  ;;  %vm8346_vm11 = vmpackc.low %vm3965_vm5, %vm3964_vm10  ;;  %v17521_v37 = vld [vmem:[#allocation149_spill] sm:$0xff] }
 0x3d9   : > { %v11109_v54 = vpop.eup %11108  ;;  %v5735_v53 = vpop.f32.mrf.mxu1  ;;  %11122 = vrcp.f32 %v6640_v7  ;;  %v5143_v22 = vadd.f32 %v15320_v59, %v17521_v37 }
 0x3da   : > { %v15722_v18 = vpop.f32.mrf.mxu0  ;;  %10063 = vmatmul.mubr.bf16.gmra.mxu0 %v17517_v2  ;;  %v11111_v35 = vpop.eup %11110  ;;  %v6641_v19 = vadd.f32 1.0, %v11109_v54  ;;  %v6424_v38 = vmul.f32 1.442695, %v6267_v12  ;;  %v15730_v5 = vadd.f32 %v5735_v53, %v5135_v13  ;;  %v17522_v12 = vld [vmem:[#allocation104_spill] sm:$0xff]  ;;  %v17523_v2 = vld [vmem:[#allocation103_spill] sm:$0xff] }
 0x3db   : > { %10066 = vmatprep.mubr.msk.bf16.mxu0 %vm17246_vm1, %v16860_v47  ;;  %v6889_v3 = vmul.f32 %v11111_v35, %v15601_v32  ;;  %v10176_v11 = vpop.f32.mrf.mxu1  ;;  %v17524_v54 = vpack.c.bf16 %v17522_v12, %v17523_v2  ;;  %v17530_v12 = vld [vmem:[#allocation192_spill] sm:$0xff] }
 0x3dc   : > { %v9968_v52 = vpop.f32.mrf.mxu0  ;;  %11124 = vrcp.f32 %v6641_v19  ;;  %v6268_v48 = vsub.f32 0.0, %v15730_v5 }
 0x3dd   : > { %v11113_v29 = vpop.eup %11112  ;;  %v8708_v56 = vpack.c.bf16 %v6889_v3, %v6888_v62  ;;  %11126 = vpow2.f32 %v6424_v38  ;;  %v5738_v32 = vpop.f32.mrf.mxu1 }
 0x3de   : > { %v15739_v46 = vpop.f32.mrf.mxu0  ;;  %v6642_v25 = vadd.f32 1.0, %v11113_v29  ;;  %v6426_v42 = vmul.f32 1.442695, %v6268_v48  ;;  %v15745_v7 = vadd.f32 %v5738_v32, %v5138_v63  ;;  %v11115_v17 = vpop.eup %11114  ;;  %v17525_v63 = vld [vmem:[#allocation27_spill] sm:$0xff]  ;;  %v17528_v32 = vld [vmem:[#allocation197_spill] sm:$0xff] }
 0x3df   : > { %8975 = vst [vmem:[%s15453_s17 + $0x58] sm:$0xff] %v8708_v56   ;;  %v10177_v27 = vpop.f32.mrf.mxu1  ;;  %10275 = vmatmul.mubr.msk.bf16.gmra.mxu1 %vm8346_vm11, %v16863_v20  ;;  %v6890_v3 = vmul.f32 %v11115_v17, %v15614_v26  ;;  %v17526_v48 = vld [vmem:[#allocation151_spill] sm:$0xff]  ;;  %v17527_v56 = vld [vmem:[#allocation13_spill] sm:$0xff]  ;;  %vm3966_vm5 = vcmp.eq.s32.totalorder %v11893_v34, %v17528_v32  ;;  %v17534_v32 = vld [vmem:[#allocation156_spill] sm:$0xff] }
 0x3e0   : > { %v9969_v33 = vpop.f32.mrf.mxu0  ;;  %v6269_v4 = vsub.f32 0.0, %v15745_v7  ;;  %11128 = vpow2.f32 %v6426_v42  ;;  %10278 = vmatprep.mubr.msk.bf16.mxu1 %vm17246_vm1, %v16860_v47  ;;  %v5146_v29 = vadd.f32 %v17526_v48, %v17525_v63  ;;  %vm3967_vm2 = vcmp.eq.s32.totalorder %v11893_v34, %v17527_v56 }
 0x3e1   : > { %v11117_v53 = vpop.eup %11116  ;;  %v5743_v35 = vpop.f32.mrf.mxu1  ;;  %11130 = vrcp.f32 %v6642_v25  ;;  %vm8348_vm10 = vmpackc.low %vm3967_vm2, %vm3966_vm5 }
 0x3e2   : > { %v15751_v13 = vpop.f32.mrf.mxu0  ;;  %10067 = vmatmul.mubr.bf16.gmra.mxu0 %v17524_v54  ;;  %v11119_v19 = vpop.eup %11118  ;;  %v6643_v38 = vadd.f32 1.0, %v11117_v53  ;;  %v6428_v59 = vmul.f32 1.442695, %v6269_v4  ;;  %v15759_v52 = vadd.f32 %v5743_v35, %v5143_v22  ;;  %v17529_v4 = vld [vmem:[#allocation153_spill] sm:$0xff]  ;;  %v17531_v35 = vld [vmem:[#allocation119_spill] sm:$0xff] }
 0x3e3   : > { %10070 = vmatprep.mubr.msk.bf16.mxu0 %vm17246_vm1, %v16860_v47  ;;  %v6891_v11 = vmul.f32 %v11119_v19, %v15629_v23  ;;  %v10180_v40 = vpop.f32.mrf.mxu1  ;;  %v5151_v2 = vadd.f32 %v17530_v12, %v17529_v4  ;;  %v17532_v19 = vld [vmem:[#allocation107_spill] sm:$0xff] }
 0x3e4   : > { %v9972_v62 = vpop.f32.mrf.mxu0  ;;  %11132 = vrcp.f32 %v6643_v38  ;;  %v6270_v16 = vsub.f32 0.0, %v15759_v52  ;;  %v17533_v38 = vpack.c.bf16 %v17531_v35, %v17532_v19  ;;  %v17538_v19 = vld [vmem:[#allocation160_spill] sm:$0xff] }
 0x3e5   : > { %v8713_v25 = vpack.c.bf16 %v6891_v11, %v6890_v3  ;;  %11134 = vpow2.f32 %v6428_v59  ;;  %v5746_v26 = vpop.f32.mrf.mxu1  ;;  %v11121_v23 = vpop.eup %11120 }
 0x3e6   : > { %v15768_v8 = vpop.f32.mrf.mxu0  ;;  %v6430_v42 = vmul.f32 1.442695, %v6270_v16  ;;  %v15774_v33 = vadd.f32 %v5746_v26, %v5146_v29  ;;  %v11123_v17 = vpop.eup %11122  ;;  %v6644_v37 = vadd.f32 1.0, %v11121_v23 }
 0x3e7   : > { %8976 = vst [vmem:[%s15453_s17 + $0x60] sm:$0xff] %v8713_v25   ;;  %v10181_v22 = vpop.f32.mrf.mxu1  ;;  %10279 = vmatmul.mubr.msk.bf16.gmra.mxu1 %vm8348_vm10, %v16863_v20  ;;  %v6892_v11 = vmul.f32 %v11123_v17, %v15643_v57  ;;  %v17535_v25 = vld [vmem:[#allocation29_spill] sm:$0xff] }
 0x3e8   : > { %v9973_v27 = vpop.f32.mrf.mxu0  ;;  %11136 = vpow2.f32 %v6430_v42  ;;  %v6271_v54 = vsub.f32 0.0, %v15774_v33  ;;  %10282 = vmatprep.mubr.msk.bf16.mxu1 %vm17246_vm1, %v16860_v47  ;;  %v5154_v26 = vadd.f32 %v17535_v25, %v17534_v32 }
 0x3e9   : > { %v11125_v59 = vpop.eup %11124  ;;  %v5751_v62 = vpop.f32.mrf.mxu1  ;;  %11138 = vrcp.f32 %v6644_v37  ;;  %v17537_v27 = vld [vmem:[#allocation199_spill] sm:$0xff] }
 0x3ea   : > { %v15780_v53 = vpop.f32.mrf.mxu0  ;;  %10071 = vmatmul.mubr.bf16.gmra.mxu0 %v17533_v38  ;;  %v11127_v3 = vpop.eup %11126  ;;  %v6893_v40 = vmul.f32 %v11125_v59, %v15658_v50  ;;  %v6432_v63 = vmul.f32 1.442695, %v6271_v54  ;;  %v15790_v48 = vadd.f32 %v5751_v62, %v5151_v2  ;;  %v17536_v50 = vld [vmem:[#allocation198_spill] sm:$0xff]  ;;  %vm3968_vm2 = vcmp.eq.s32.totalorder %v11893_v34, %v17537_v27  ;;  %v17539_v38 = vld [vmem:[#allocation152_spill] sm:$0xff] }
 0x3eb   : > { %10074 = vmatprep.mubr.msk.bf16.mxu0 %vm17246_vm1, %v16860_v47  ;;  %v6645_v16 = vadd.f32 1.0, %v11127_v3  ;;  %v10184_v56 = vpop.f32.mrf.mxu1  ;;  %vm3969_vm11 = vcmp.eq.s32.totalorder %v11893_v34, %v17536_v50  ;;  %v5159_v59 = vadd.f32 %v17539_v38, %v17538_v19  ;;  %v17546_v19 = vld [vmem:[#allocation201_spill] sm:$0xff] }
 0x3ec   : > { %v9976_v29 = vpop.f32.mrf.mxu0  ;;  %v8718_v23 = vpack.c.bf16 %v6893_v40, %v6892_v11  ;;  %11140 = vpow2.f32 %v6432_v63  ;;  %v6272_v57 = vsub.f32 0.0, %v15790_v48  ;;  %vm8350_vm5 = vmpackc.low %vm3969_vm11, %vm3968_vm2  ;;  %v17540_v11 = vld [vmem:[#allocation123_spill] sm:$0xff]  ;;  %v17541_v40 = vld [vmem:[#allocation110_spill] sm:$0xff]  ;;  %vm3970_vm11 = vcmp.eq.s32.totalorder %v11893_v34, %v17546_v19 }
 0x3ed   : > { %11142 = vrcp.f32 %v6645_v16  ;;  %v5754_v17 = vpop.f32.mrf.mxu1  ;;  %v11129_v37 = vpop.eup %11128  ;;  %v17542_v63 = vpack.c.bf16 %v17540_v11, %v17541_v40  ;;  %v17551_v19 = vld [vmem:[#allocation33_spill] sm:$0xff] }
 0x3ee   : > { %v15797_v42 = vpop.f32.mrf.mxu0  ;;  %8977 = vst [vmem:[%s15453_s17 + $0x68] sm:$0xff] %v8718_v23   ;;  %v6434_v22 = vmul.f32 1.442695, %v6272_v57  ;;  %v15804_v4 = vadd.f32 %v5754_v17, %v5154_v26  ;;  %v11131_v2 = vpop.eup %11130  ;;  %v6646_v54 = vadd.f32 1.0, %v11129_v37  ;;  %v17543_v17 = vld [vmem:[#allocation32_spill] sm:$0xff]  ;;  %v17544_v37 = vld [vmem:[#allocation154_spill] sm:$0xff] }
 0x3ef   : > { %v10185_v35 = vpop.f32.mrf.mxu1  ;;  %10283 = vmatmul.mubr.msk.bf16.gmra.mxu1 %vm8350_vm5, %v16863_v20  ;;  %v6894_v32 = vmul.f32 %v11131_v2, %v15674_v6 }
 0x3f0   : > { %v9977_v12 = vpop.f32.mrf.mxu0  ;;  %11144 = vpow2.f32 %v6434_v22  ;;  %v6273_v62 = vsub.f32 0.0, %v15804_v4  ;;  %10286 = vmatprep.mubr.msk.bf16.mxu1 %vm17246_vm1, %v16860_v47  ;;  %v5162_v22 = vadd.f32 %v17544_v37, %v17543_v17  ;;  %v17545_v35 = vld [vmem:[#allocation18_spill] sm:$0xff] }
 0x3f1   : > { %v11133_v29 = vpop.eup %11132  ;;  %v5759_v16 = vpop.f32.mrf.mxu1  ;;  %11146 = vrcp.f32 %v6646_v54  ;;  %vm3971_vm10 = vcmp.eq.s32.totalorder %v11893_v34, %v17545_v35 }
 0x3f2   : > { %v15809_v3 = vpop.f32.mrf.mxu0  ;;  %10075 = vmatmul.mubr.bf16.gmra.mxu0 %v17542_v63  ;;  %v11135_v56 = vpop.eup %11134  ;;  %v6895_v25 = vmul.f32 %v11133_v29, %v15688_v1  ;;  %v6436_v26 = vmul.f32 1.442695, %v6273_v62  ;;  %v15819_v23 = vadd.f32 %v5759_v16, %v5159_v59  ;;  %vm8352_vm2 = vmpackc.low %vm3971_vm10, %vm3970_vm11  ;;  %v17547_v29 = vld [vmem:[#allocation166_spill] sm:$0xff] }
 0x3f3   : > { %10078 = vmatprep.mubr.msk.bf16.mxu0 %vm17246_vm1, %v16860_v47  ;;  %v6647_v50 = vadd.f32 1.0, %v11135_v56  ;;  %v10188_v27 = vpop.f32.mrf.mxu1  ;;  %v5167_v16 = vadd.f32 %v15398_v36, %v17547_v29  ;;  %v17553_v29 = vld [vmem:[#allocation202_spill] sm:$0xff] }
 0x3f4   : > { %v9980_v57 = vpop.f32.mrf.mxu0  ;;  %v8723_v12 = vpack.c.bf16 %v6895_v25, %v6894_v32  ;;  %11148 = vpow2.f32 %v6436_v26  ;;  %v6274_v6 = vsub.f32 0.0, %v15819_v23  ;;  %v17548_v25 = vld [vmem:[#allocation229_spill] sm:$0xff]  ;;  %v17549_v26 = vld [vmem:[#allocation114_spill] sm:$0xff]  ;;  %vm3973_vm5 = vcmp.eq.s32.totalorder %v11893_v34, %v17553_v29 }
 0x3f5   : > { %v11137_v1 = vpop.eup %11136  ;;  %11150 = vrcp.f32 %v6647_v50  ;;  %v5762_v54 = vpop.f32.mrf.mxu1  ;;  %v17550_v57 = vpack.c.bf16 %v17548_v25, %v17549_v26 }
 0x3f6   : > { %v15826_v2 = vpop.f32.mrf.mxu0  ;;  %8978 = vst [vmem:[%s15453_s17 + $0x70] sm:$0xff] %v8723_v12   ;;  %v6648_v38 = vadd.f32 1.0, %v11137_v1  ;;  %v6438_v59 = vmul.f32 1.442695, %v6274_v6  ;;  %v15833_v62 = vadd.f32 %v5762_v54, %v5162_v22  ;;  %v11139_v63 = vpop.eup %11138  ;;  %v17552_v54 = vld [vmem:[#allocation155_spill] sm:$0xff] }
 0x3f7   : > { %v10189_v40 = vpop.f32.mrf.mxu1  ;;  %10287 = vmatmul.mubr.msk.bf16.gmra.mxu1 %vm8352_vm2, %v16863_v20  ;;  %v6896_v6 = vmul.f32 %v11139_v63, %v15703_v44 }
 0x3f8   : > { %v9981_v11 = vpop.f32.mrf.mxu0  ;;  %v6275_v56 = vsub.f32 0.0, %v15833_v62  ;;  %11152 = vpow2.f32 %v6438_v59  ;;  %10290 = vmatprep.mubr.msk.bf16.mxu1 %vm17246_vm1, %v16860_v47  ;;  %v5170_v59 = vadd.f32 %v17552_v54, %v17551_v19  ;;  %v17557_v19 = vld [vmem:[#allocation138_spill] sm:$0xff] }
 0x3f9   : > { %v11141_v50 = vpop.eup %11140  ;;  %v5767_v27 = vpop.f32.mrf.mxu1  ;;  %11154 = vrcp.f32 %v6648_v38 }
 0x3fa   : > { %v15838_v32 = vpop.f32.mrf.mxu0  ;;  %10079 = vmatmul.mubr.bf16.gmra.mxu0 %v17550_v57  ;;  %v11143_v17 = vpop.eup %11142  ;;  %v6649_v37 = vadd.f32 1.0, %v11141_v50  ;;  %v6440_v36 = vmul.f32 1.442695, %v6275_v56  ;;  %v15846_v22 = vadd.f32 %v5767_v27, %v5167_v16  ;;  %v17554_v16 = vld [vmem:[#allocation203_spill] sm:$0xff]  ;;  %v17555_v27 = vld [vmem:[#allocation174_spill] sm:$0xff] }
 0x3fb   : > { %10082 = vmatprep.mubr.msk.bf16.mxu0 %vm17246_vm1, %v16860_v47  ;;  %v6897_v1 = vmul.f32 %v11143_v17, %v15717_v9  ;;  %v10192_v35 = vpop.f32.mrf.mxu1  ;;  %vm3972_vm10 = vcmp.eq.s32.totalorder %v11893_v34, %v17554_v16  ;;  %v17556_v17 = vld [vmem:[#allocation200_spill] sm:$0xff] }
 0x3fc   : > { %v9984_v12 = vpop.f32.mrf.mxu0  ;;  %11156 = vrcp.f32 %v6649_v37  ;;  %v6276_v38 = vsub.f32 0.0, %v15846_v22  ;;  %vm8354_vm11 = vmpackc.low %vm3973_vm5, %vm3972_vm10  ;;  %v5175_v37 = vadd.f32 %v17556_v17, %v17555_v27  ;;  %v17561_v17 = vld [vmem:[#allocation205_spill] sm:$0xff] }
 0x3fd   : > { %v11145_v40 = vpop.eup %11144  ;;  %v8728_v44 = vpack.c.bf16 %v6897_v1, %v6896_v6  ;;  %11158 = vpow2.f32 %v6440_v36  ;;  %v5770_v9 = vpop.f32.mrf.mxu1  ;;  %v17558_v6 = vld [vmem:[#allocation115_spill] sm:$0xff]  ;;  %vm3975_vm2 = vcmp.eq.s32.totalorder %v11893_v34, %v17561_v17 }
 0x3fe   : > { %v15855_v11 = vpop.f32.mrf.mxu0  ;;  %v6650_v63 = vadd.f32 1.0, %v11145_v40  ;;  %v6442_v56 = vmul.f32 1.442695, %v6276_v38  ;;  %v15861_v25 = vadd.f32 %v5770_v9, %v5170_v59  ;;  %v11147_v50 = vpop.eup %11146  ;;  %v17559_v36 = vpack.c.bf16 %v17557_v19, %v17558_v6 }
 0x3ff   : > { %8979 = vst [vmem:[%s15453_s17 + $0x78] sm:$0xff] %v8728_v44   ;;  %v10193_v57 = vpop.f32.mrf.mxu1  ;;  %10291 = vmatmul.mubr.msk.bf16.gmra.mxu1 %vm8354_vm11, %v16863_v20  ;;  %v6898_v44 = vmul.f32 %v11147_v50, %v15730_v5 }
 0x400   : > { %v9985_v26 = vpop.f32.mrf.mxu0  ;;  %v6277_v12 = vsub.f32 0.0, %v15861_v25  ;;  %11160 = vpow2.f32 %v6442_v56  ;;  %10294 = vmatprep.mubr.msk.bf16.mxu1 %vm17246_vm1, %v16860_v47 }
 0x401   : > { %v11149_v1 = vpop.eup %11148  ;;  %v5775_v54 = vpop.f32.mrf.mxu1  ;;  %11162 = vrcp.f32 %v6650_v63  ;;  %v17560_v26 = vld [vmem:[#allocation36_spill] sm:$0xff] }
 0x402   : > { %v15867_v35 = vpop.f32.mrf.mxu0  ;;  %10083 = vmatmul.mubr.bf16.gmra.mxu0 %v17559_v36  ;;  %v11151_v59 = vpop.eup %11150  ;;  %v6651_v38 = vadd.f32 1.0, %v11149_v1  ;;  %v6444_v40 = vmul.f32 1.442695, %v6277_v12  ;;  %v15875_v29 = vadd.f32 %v5775_v54, %v5175_v37  ;;  %v5178_v57 = vadd.f32 %v15446_v39, %v17560_v26  ;;  %v17562_v37 = vld [vmem:[#allocation206_spill] sm:$0xff] }
 0x403   : > { %10086 = vmatprep.mubr.msk.bf16.mxu0 %vm17246_vm1, %v16860_v47  ;;  %v6899_v9 = vmul.f32 %v11151_v59, %v15745_v7  ;;  %v10196_v56 = vpop.f32.mrf.mxu1  ;;  %vm3974_vm5 = vcmp.eq.s32.totalorder %v11893_v34, %v17562_v37  ;;  %v17563_v54 = vld [vmem:[#allocation178_spill] sm:$0xff] }
 0x404   : > { %v9988_v16 = vpop.f32.mrf.mxu0  ;;  %11164 = vrcp.f32 %v6651_v38  ;;  %v6278_v63 = vsub.f32 0.0, %v15875_v29  ;;  %vm8356_vm10 = vmpackc.low %vm3975_vm2, %vm3974_vm5  ;;  %v5183_v59 = vadd.f32 %v15461_v60, %v17563_v54  ;;  %v17569_v54 = vld [vmem:[#allocation207_spill] sm:$0xff] }
 0x405   : > { %v8733_v12 = vpack.c.bf16 %v6899_v9, %v6898_v44  ;;  %11166 = vpow2.f32 %v6444_v40  ;;  %v5778_v5 = vpop.f32.mrf.mxu1  ;;  %v11153_v7 = vpop.eup %11152  ;;  %v17564_v40 = vld [vmem:[#allocation230_spill] sm:$0xff]  ;;  %v17565_v44 = vld [vmem:[#allocation120_spill] sm:$0xff]  ;;  %vm3976_vm2 = vcmp.eq.s32.totalorder %v11893_v34, %v17569_v54 }
 0x406   : > { %v15884_v27 = vpop.f32.mrf.mxu0  ;;  %v6446_v50 = vmul.f32 1.442695, %v6278_v63  ;;  %v15890_v19 = vadd.f32 %v5778_v5, %v5178_v57  ;;  %v11155_v39 = vpop.eup %11154  ;;  %v6652_v36 = vadd.f32 1.0, %v11153_v7  ;;  %v17566_v9 = vpack.c.bf16 %v17564_v40, %v17565_v44 }
 0x407   : > { %8980 = vst [vmem:[%s15453_s17 + $0x80] sm:$0xff] %v8733_v12   ;;  %v10197_v1 = vpop.f32.mrf.mxu1  ;;  %10295 = vmatmul.mubr.msk.bf16.gmra.mxu1 %vm8356_vm10, %v16863_v20  ;;  %v6900_v63 = vmul.f32 %v11155_v39, %v15759_v52 }
 0x408   : > { %v9989_v6 = vpop.f32.mrf.mxu0  ;;  %11168 = vpow2.f32 %v6446_v50  ;;  %v6279_v38 = vsub.f32 0.0, %v15890_v19  ;;  %10298 = vmatprep.mubr.msk.bf16.mxu1 %vm17246_vm1, %v16860_v47  ;;  %v17567_v50 = vld [vmem:[#allocation181_spill] sm:$0xff] }
 0x409   : > { %v11157_v56 = vpop.eup %11156  ;;  %v5783_v26 = vpop.f32.mrf.mxu1  ;;  %11170 = vrcp.f32 %v6652_v36  ;;  %v5186_v6 = vadd.f32 %v15478_v14, %v17567_v50 }
 0x40a   : > { %v15896_v16 = vpop.f32.mrf.mxu0  ;;  %10087 = vmatmul.mubr.bf16.gmra.mxu0 %v17566_v9  ;;  %v11159_v57 = vpop.eup %11158  ;;  %v6901_v60 = vmul.f32 %v11157_v56, %v15774_v33  ;;  %v6448_v17 = vmul.f32 1.442695, %v6279_v38  ;;  %v15906_v37 = vadd.f32 %v5783_v26, %v5183_v59  ;;  %v17568_v33 = vld [vmem:[#allocation59_spill] sm:$0xff] }
 0x40b   : > { %10090 = vmatprep.mubr.msk.bf16.mxu0 %vm17246_vm1, %v16860_v47  ;;  %v6653_v5 = vadd.f32 1.0, %v11159_v57  ;;  %v10200_v7 = vpop.f32.mrf.mxu1  ;;  %vm3977_vm11 = vcmp.eq.s32.totalorder %v11893_v34, %v17568_v33  ;;  %v3509_v9 = vpop.permute.xlu1 %3508 }
 0x40c   : > { %v9992_v12 = vpop.f32.mrf.mxu0  ;;  %v8738_v1 = vpack.c.bf16 %v6901_v60, %v6900_v63  ;;  %11172 = vpow2.f32 %v6448_v17  ;;  %v6280_v52 = vsub.f32 0.0, %v15906_v37  ;;  %vm8358_vm5 = vmpackc.low %vm3977_vm11, %vm3976_vm2  ;;  %v3506_v57 = vpop.permute.xlu0 %3505  ;;  %v17570_v63 = vld [vmem:[#allocation6_spill] sm:$0xff]  ;;  %vm3883_vm10 = vcmp.eq.s32.totalorder %v11893_v34, %v3509_v9 }
 0x40d   : > { %11174 = vrcp.f32 %v6653_v5  ;;  %v5786_v59 = vpop.f32.mrf.mxu1  ;;  %v11161_v36 = vpop.eup %11160  ;;  %v5191_v60 = vadd.f32 %v15490_v41, %v17570_v63  ;;  %v17571_v5 = vld [vmem:[#allocation147_spill] sm:$0xff]  ;;  %v17572_v7 = vld [vmem:[#allocation122_spill] sm:$0xff]  ;;  %vm3882_vm11 = vcmp.eq.s32.totalorder %v11893_v34, %v3506_v57 }
 0x40e   : > { %v15913_v39 = vpop.f32.mrf.mxu0  ;;  %8981 = vst [vmem:[%s15453_s17 + $0x88] sm:$0xff] %v8738_v1   ;;  %v6450_v38 = vmul.f32 1.442695, %v6280_v52  ;;  %v15920_v40 = vadd.f32 %v5786_v59, %v5186_v6  ;;  %v11163_v44 = vpop.eup %11162  ;;  %v6654_v56 = vadd.f32 1.0, %v11161_v36  ;;  %v17573_v50 = vpack.c.bf16 %v17571_v5, %v17572_v7  ;;  %v17576_v5 = vld [vmem:[#allocation208_spill] sm:$0xff]  ;;  %vm8264_vm15 = vmpackc.low %vm3883_vm10, %vm3882_vm11 }
 0x40f   : > { %v10201_v26 = vpop.f32.mrf.mxu1  ;;  %10299 = vmatmul.mubr.msk.bf16.gmra.mxu1 %vm8358_vm5, %v16863_v20  ;;  %v6902_v33 = vmul.f32 %v11163_v44, %v15790_v48  ;;  %vm3978_vm5 = vcmp.eq.s32.totalorder %v11893_v34, %v17576_v5 }
 0x410   : > { %v9993_v14 = vpop.f32.mrf.mxu0  ;;  %11176 = vpow2.f32 %v6450_v38  ;;  %v6281_v17 = vsub.f32 0.0, %v15920_v40  ;;  %10302 = vmatprep.mubr.msk.bf16.mxu1 %vm17246_vm1, %v16860_v47  ;;  %v17574_v26 = vld [vmem:[#allocation39_spill] sm:$0xff] }
 0x411   : > { %v11165_v6 = vpop.eup %11164  ;;  %v5791_v1 = vpop.f32.mrf.mxu1  ;;  %11178 = vrcp.f32 %v6654_v56  ;;  %v5194_v48 = vadd.f32 %v15507_v0, %v17574_v26 }
 0x412   : > { %v15925_v12 = vpop.f32.mrf.mxu0  ;;  %10091 = vmatmul.mubr.bf16.gmra.mxu0 %v17573_v50  ;;  %v11167_v52 = vpop.eup %11166  ;;  %v6903_v41 = vmul.f32 %v11165_v6, %v15804_v4  ;;  %v6452_v54 = vmul.f32 1.442695, %v6281_v17  ;;  %v15935_v59 = vadd.f32 %v5791_v1, %v5191_v60  ;;  %v17575_v17 = vld [vmem:[#allocation26_spill] sm:$0xff] }
 0x413   : > { %10110 = vmatprep.mubr.msk.bf16.mxu0 %vm17246_vm1, %v16860_v47  ;;  %v6655_v38 = vadd.f32 1.0, %v11167_v52  ;;  %v10204_v14 = vpop.f32.mrf.mxu1  ;;  %vm3979_vm2 = vcmp.eq.s32.totalorder %v11893_v34, %v17575_v17  ;;  %v17578_v17 = vld [vmem:[#allocation42_spill] sm:$0xff] }
 0x414   : > { %v9996_v36 = vpop.f32.mrf.mxu0  ;;  %v8743_v44 = vpack.c.bf16 %v6903_v41, %v6902_v33  ;;  %11180 = vpow2.f32 %v6452_v54  ;;  %v6282_v4 = vsub.f32 0.0, %v15935_v59  ;;  %vm8360_vm0 = vmpackc.low %vm3979_vm2, %vm3978_vm5  ;;  %v17577_v33 = vld [vmem:[#allocation8_spill] sm:$0xff]  ;;  %v5202_v5 = vadd.f32 %v15536_v51, %v17578_v17 }
 0x415   : > { %v11169_v60 = vpop.eup %11168  ;;  %11182 = vrcp.f32 %v6655_v38  ;;  %v5794_v56 = vpop.f32.mrf.mxu1  ;;  %v5199_v41 = vadd.f32 %v15519_v58, %v17577_v33 }
 0x416   : > { %v15944_v63 = vpop.f32.mrf.mxu0  ;;  %8982 = vst [vmem:[%s15453_s17 + $0x90] sm:$0xff] %v8743_v44   ;;  %v6656_v7 = vadd.f32 1.0, %v11169_v60  ;;  %v6454_v50 = vmul.f32 1.442695, %v6282_v4  ;;  %v15951_v6 = vadd.f32 %v5794_v56, %v5194_v48  ;;  %v11171_v52 = vpop.eup %11170 }
 0x417   : > { %v10205_v1 = vpop.f32.mrf.mxu1  ;;  %10303 = vmatmul.mubr.msk.bf16.gmra.mxu1 %vm8360_vm0, %v16863_v20  ;;  %v6904_v58 = vmul.f32 %v11171_v52, %v15819_v23 }
 0x418   : > { %v9997_v0 = vpop.f32.mrf.mxu0  ;;  %v6283_v54 = vsub.f32 0.0, %v15951_v6  ;;  %11184 = vpow2.f32 %v6454_v50  ;;  %10306 = vmatprep.mubr.msk.bf16.mxu1 %vm17246_vm1, %v16860_v47  ;;  %v17580_v1 = vld [vmem:[#allocation211_spill] sm:$0xff] }
 0x419   : > { %v11173_v38 = vpop.eup %11172  ;;  %v5799_v14 = vpop.f32.mrf.mxu1  ;;  %11186 = vrcp.f32 %v6656_v7  ;;  %v17579_v0 = vld [vmem:[#allocation210_spill] sm:$0xff] }
 0x41a   : > { %v15960_v36 = vpop.f32.mrf.mxu0  ;;  %10111 = vmatmul.mubr.msk.bf16.vlgmr.msra.gmra.mxu0 %vm8264_vm15, %v16863_v20  ;;  %v11175_v57 = vpop.eup %11174  ;;  %v6657_v9 = vadd.f32 1.0, %v11173_v38  ;;  %v6456_v26 = vmul.f32 1.442695, %v6283_v54  ;;  %v15964_v48 = vadd.f32 %v5799_v14, %v5199_v41  ;;  %vm3981_vm0 = vcmp.eq.s32.totalorder %v11893_v34, %v17579_v0  ;;  %v17581_v14 = vld [vmem:[#allocation10_spill] sm:$0xff] }
 0x41b   : > { %v6905_v4 = vmul.f32 %v11175_v57, %v15833_v62  ;;  %v10208_v60 = vpop.f32.mrf.mxu1  ;;  %vm3980_vm15 = vcmp.eq.s32.totalorder %v11893_v34, %v17580_v1  ;;  %v5207_v57 = vadd.f32 %v15548_v31, %v17581_v14  ;;  %v17582_v1 = vld [vmem:[#allocation45_spill] sm:$0xff] }
 0x41c   : > { %v10000_v44 = vpop.f32.mrf.mxu0  ;;  %11188 = vrcp.f32 %v6657_v9  ;;  %v6284_v56 = vsub.f32 0.0, %v15964_v48  ;;  %vm8362_vm10 = vmpackc.low %vm3981_vm0, %vm3980_vm15 }
 0x41d   : > { %v11177_v50 = vpop.eup %11176  ;;  %v8748_v23 = vpack.c.bf16 %v6905_v4, %v6904_v58  ;;  %11190 = vpow2.f32 %v6456_v26  ;;  %v5802_v62 = vpop.f32.mrf.mxu1 }
 0x41e   : > { %v15973_v7 = vpop.f32.mrf.mxu0  ;;  %v6658_v52 = vadd.f32 1.0, %v11177_v50  ;;  %v6458_v33 = vmul.f32 1.442695, %v6284_v56  ;;  %v15979_v41 = vadd.f32 %v5802_v62, %v5202_v5  ;;  %v11179_v38 = vpop.eup %11178 }
 0x41f   : > { %8983 = vst [vmem:[%s15453_s17 + $0x98] sm:$0xff] %v8748_v23   ;;  %v10209_v54 = vpop.f32.mrf.mxu1  ;;  %10307 = vmatmul.mubr.msk.bf16.gmra.mxu1 %vm8362_vm10, %v16863_v20  ;;  %v6906_v31 = vmul.f32 %v11179_v38, %v15846_v22  ;;  %v5210_v23 = vadd.f32 %v15565_v43, %v17582_v1 }
 0x420   : > { %v10001_v51 = vpop.f32.mrf.mxu0  ;;  %v6285_v9 = vsub.f32 0.0, %v15979_v41  ;;  %11192 = vpow2.f32 %v6458_v33  ;;  %10310 = vmatprep.mubr.msk.bf16.mxu1 %vm17246_vm1, %v16860_v47 }
 0x421   : > { %v11181_v60 = vpop.eup %11180  ;;  %v5807_v26 = vpop.f32.mrf.mxu1  ;;  %11194 = vrcp.f32 %v6658_v52 }
 0x422   : > { %v15985_v44 = vpop.f32.mrf.mxu0  ;;  %v11183_v58 = vpop.eup %11182  ;;  %v6659_v4 = vadd.f32 1.0, %v11181_v60  ;;  %v6460_v17 = vmul.f32 1.442695, %v6285_v9  ;;  %v15988_v5 = vadd.f32 %v5807_v26, %v5207_v57  ;;  %v17583_v60 = vld [vmem:[#allocation12_spill] sm:$0xff] }
 0x423   : > { %v6907_v50 = vmul.f32 %v11183_v58, %v15861_v25  ;;  %v10212_v0 = vpop.f32.mrf.mxu1  ;;  %v5215_v43 = vadd.f32 %v15577_v24, %v17583_v60 }
 0x424   : > { %v10004_v56 = vpop.f32.mrf.mxu0  ;;  %11196 = vrcp.f32 %v6659_v4  ;;  %v6286_v62 = vsub.f32 0.0, %v15988_v5 }
 0x425   : > { %v8753_v33 = vpack.c.bf16 %v6907_v50, %v6906_v31  ;;  %11198 = vpow2.f32 %v6460_v17  ;;  %v5810_v51 = vpop.f32.mrf.mxu1  ;;  %v11185_v54 = vpop.eup %11184 }
 0x426   : > { %v15997_v52 = vpop.f32.mrf.mxu0  ;;  %v6462_v14 = vmul.f32 1.442695, %v6286_v62  ;;  %v15999_v57 = vadd.f32 %v5810_v51, %v5210_v23  ;;  %v11187_v22 = vpop.eup %11186  ;;  %v6660_v25 = vadd.f32 1.0, %v11185_v54  ;;  %v17585_v51 = vld [vmem:[#allocation194_spill] sm:$0xff] }
 0x427   : > { %8984 = vst [vmem:[%s15453_s17 + $0xa0] sm:$0xff] %v8753_v33   ;;  %v10213_v38 = vpop.f32.mrf.mxu1  ;;  %10311 = vmatmul.mubr.msk.bf16.gmra.mxu1 %vm14317_vm4, %v16863_v20  ;;  %v6908_v50 = vmul.f32 %v11187_v22, %v15875_v29  ;;  %v5218_v54 = vadd.f32 %v15594_v49, %v17585_v51 }
 0x428   : > { %v10005_v9 = vpop.f32.mrf.mxu0  ;;  %11200 = vpow2.f32 %v6462_v14  ;;  %v6287_v26 = vsub.f32 0.0, %v15999_v57  ;;  %10314 = vmatprep.mubr.msk.bf16.mxu1 %vm17246_vm1, %v16860_v47 }
 0x429   : > { %v11189_v4 = vpop.eup %11188  ;;  %v5815_v17 = vpop.f32.mrf.mxu1  ;;  %11202 = vrcp.f32 %v6660_v25 }
 0x42a   : > { %v16005_v58 = vpop.f32.mrf.mxu0  ;;  %v11191_v31 = vpop.eup %11190  ;;  %v6909_v0 = vmul.f32 %v11189_v4, %v15890_v19  ;;  %v6464_v1 = vmul.f32 1.442695, %v6287_v26  ;;  %v16012_v23 = vadd.f32 %v5815_v17, %v5215_v43  ;;  %v17586_v17 = vld [vmem:[#allocation14_spill] sm:$0xff] }
 0x42b   : > { %v6661_v62 = vadd.f32 1.0, %v11191_v31  ;;  %v10216_v33 = vpop.f32.mrf.mxu1  ;;  %v5223_v49 = vadd.f32 %v15606_v15, %v17586_v17 }
 0x42c   : > { %v10008_v24 = vpop.f32.mrf.mxu0  ;;  %v8758_v14 = vpack.c.bf16 %v6909_v0, %v6908_v50  ;;  %11204 = vpow2.f32 %v6464_v1  ;;  %v6288_v29 = vsub.f32 0.0, %v16012_v23 }
 0x42d   : > { %11206 = vrcp.f32 %v6661_v62  ;;  %v5818_v19 = vpop.f32.mrf.mxu1  ;;  %v11193_v22 = vpop.eup %11192 }
 0x42e   : > { %v16019_v9 = vpop.f32.mrf.mxu0  ;;  %8985 = vst [vmem:[%s15453_s17 + $0xa8] sm:$0xff] %v8758_v14   ;;  %v6466_v38 = vmul.f32 1.442695, %v6288_v29  ;;  %v16022_v60 = vadd.f32 %v5818_v19, %v5218_v54  ;;  %v11195_v25 = vpop.eup %11194  ;;  %v6662_v26 = vadd.f32 1.0, %v11193_v22  ;;  %v17588_v19 = vld [vmem:[#allocation52_spill] sm:$0xff] }
 0x42f   : > { %v10217_v4 = vpop.f32.mrf.mxu1  ;;  %10315 = vmatmul.mubr.msk.bf16.gmra.mxu1 %vm14339_vm8, %v16863_v20  ;;  %v6910_v62 = vmul.f32 %v11195_v25, %v15906_v37  ;;  %v5226_v22 = vadd.f32 %v15623_v28, %v17588_v19 }
 0x430   : > { %v10009_v43 = vpop.f32.mrf.mxu0  ;;  %11208 = vpow2.f32 %v6466_v38  ;;  %v6289_v56 = vsub.f32 0.0, %v16022_v60  ;;  %10318 = vmatprep.mubr.msk.bf16.mxu1 %vm17246_vm1, %v16860_v47 }
 0x431   : > { %v11197_v50 = vpop.eup %11196  ;;  %v5823_v0 = vpop.f32.mrf.mxu1  ;;  %11210 = vrcp.f32 %v6662_v26 }
 0x432   : > { %v16027_v31 = vpop.f32.mrf.mxu0  ;;  %v11199_v24 = vpop.eup %11198  ;;  %v6911_v33 = vmul.f32 %v11197_v50, %v15920_v40  ;;  %v6468_v51 = vmul.f32 1.442695, %v6289_v56  ;;  %v16034_v54 = vadd.f32 %v5823_v0, %v5223_v49  ;;  %v17589_v0 = vld [vmem:[#allocation19_spill] sm:$0xff] }
 0x433   : > { %v6663_v14 = vadd.f32 1.0, %v11199_v24  ;;  %v10220_v29 = vpop.f32.mrf.mxu1  ;;  %v5231_v28 = vadd.f32 %v15635_v30, %v17589_v0 }
 0x434   : > { %v10012_v15 = vpop.f32.mrf.mxu0  ;;  %v8763_v38 = vpack.c.bf16 %v6911_v33, %v6910_v62  ;;  %11212 = vpow2.f32 %v6468_v51  ;;  %v6290_v37 = vsub.f32 0.0, %v16034_v54 }
 0x435   : > { %v11201_v40 = vpop.eup %11200  ;;  %11214 = vrcp.f32 %v6663_v14  ;;  %v5826_v25 = vpop.f32.mrf.mxu1 }
 0x436   : > { %v16041_v43 = vpop.f32.mrf.mxu0  ;;  %8986 = vst [vmem:[%s15453_s17 + $0xb0] sm:$0xff] %v8763_v38   ;;  %v6664_v4 = vadd.f32 1.0, %v11201_v40  ;;  %v6470_v17 = vmul.f32 1.442695, %v6290_v37  ;;  %v16044_v49 = vadd.f32 %v5826_v25, %v5226_v22  ;;  %v11203_v50 = vpop.eup %11202  ;;  %v17591_v40 = vld [vmem:[#allocation54_spill] sm:$0xff] }
 0x437   : > { %v10221_v56 = vpop.f32.mrf.mxu1  ;;  %10319 = vmatmul.mubr.msk.bf16.gmra.mxu1 %vm14370_vm13, %v16863_v20  ;;  %v6912_v30 = vmul.f32 %v11203_v50, %v15935_v59  ;;  %v5234_v25 = vadd.f32 %v15652_v45, %v17591_v40 }
 0x438   : > { %v10013_v26 = vpop.f32.mrf.mxu0  ;;  %v6291_v1 = vsub.f32 0.0, %v16044_v49  ;;  %11216 = vpow2.f32 %v6470_v17  ;;  %10322 = vmatprep.mubr.msk.bf16.mxu1 %vm17246_vm1, %v16860_v47 }
 0x439   : > { %v11205_v62 = vpop.eup %11204  ;;  %v5831_v33 = vpop.f32.mrf.mxu1  ;;  %11218 = vrcp.f32 %v6664_v4 }
 0x43a   : > { %v16049_v24 = vpop.f32.mrf.mxu0  ;;  %v11207_v15 = vpop.eup %11206  ;;  %v6665_v14 = vadd.f32 1.0, %v11205_v62  ;;  %v6472_v29 = vmul.f32 1.442695, %v6291_v1  ;;  %v16054_v19 = vadd.f32 %v5831_v33, %v5231_v28  ;;  %v17592_v33 = vld [vmem:[#allocation22_spill] sm:$0xff] }
 0x43b   : > { %v6913_v38 = vmul.f32 %v11207_v15, %v15951_v6  ;;  %v10224_v37 = vpop.f32.mrf.mxu1  ;;  %v5239_v45 = vadd.f32 %v15664_v55, %v17592_v33 }
 0x43c   : > { %v10016_v22 = vpop.f32.mrf.mxu0  ;;  %11220 = vrcp.f32 %v6665_v14  ;;  %v6292_v4 = vsub.f32 0.0, %v16054_v19 }
 0x43d   : > { %v11209_v26 = vpop.eup %11208  ;;  %v8768_v56 = vpack.c.bf16 %v6913_v38, %v6912_v30  ;;  %11222 = vpow2.f32 %v6472_v29  ;;  %v5834_v0 = vpop.f32.mrf.mxu1 }
 0x43e   : > { %v16063_v17 = vpop.f32.mrf.mxu0  ;;  %v6666_v28 = vadd.f32 1.0, %v11209_v26  ;;  %v6474_v1 = vmul.f32 1.442695, %v6292_v4  ;;  %v16065_v62 = vadd.f32 %v5834_v0, %v5234_v25  ;;  %v11211_v50 = vpop.eup %11210 }
 0x43f   : > { %8987 = vst [vmem:[%s15453_s17 + $0xb8] sm:$0xff] %v8768_v56   ;;  %v10225_v6 = vpop.f32.mrf.mxu1  ;;  %10323 = vmatmul.mubr.msk.bf16.gmra.mxu1 %vm14392_vm3, %v16863_v20  ;;  %v6914_v55 = vmul.f32 %v11211_v50, %v15964_v48  ;;  %v17594_v56 = vld [vmem:[#allocation58_spill] sm:$0xff] }
 0x440   : > { %v10017_v59 = vpop.f32.mrf.mxu0  ;;  %v6293_v51 = vsub.f32 0.0, %v16065_v62  ;;  %11224 = vpow2.f32 %v6474_v1  ;;  %10326 = vmatprep.mubr.msk.bf16.mxu1 %vm17246_vm1, %v16860_v47  ;;  %v5242_v0 = vadd.f32 %v15681_v10, %v17594_v56 }
 0x441   : > { %v11213_v14 = vpop.eup %11212  ;;  %v5839_v22 = vpop.f32.mrf.mxu1  ;;  %11226 = vrcp.f32 %v6666_v28 }
 0x442   : > { %v16071_v15 = vpop.f32.mrf.mxu0  ;;  %v11215_v30 = vpop.eup %11214  ;;  %v6667_v38 = vadd.f32 1.0, %v11213_v14  ;;  %v6476_v37 = vmul.f32 1.442695, %v6293_v51  ;;  %v16076_v40 = vadd.f32 %v5839_v22, %v5239_v45  ;;  %v17595_v22 = vld [vmem:[#allocation28_spill] sm:$0xff] }
 0x443   : > { %v6915_v4 = vmul.f32 %v11215_v30, %v15979_v41  ;;  %v10228_v26 = vpop.f32.mrf.mxu1  ;;  %v5247_v10 = vadd.f32 %v15693_v21, %v17595_v22 }
 0x444   : > { %v10020_v25 = vpop.f32.mrf.mxu0  ;;  %11228 = vrcp.f32 %v6667_v38  ;;  %v6294_v28 = vsub.f32 0.0, %v16076_v40 }
 0x445   : > { %v8773_v59 = vpack.c.bf16 %v6915_v4, %v6914_v55  ;;  %11230 = vpow2.f32 %v6476_v37  ;;  %v5842_v6 = vpop.f32.mrf.mxu1  ;;  %v11217_v33 = vpop.eup %11216 }
 0x446   : > { %v16085_v1 = vpop.f32.mrf.mxu0  ;;  %v6478_v45 = vmul.f32 1.442695, %v6294_v28  ;;  %v16087_v51 = vadd.f32 %v5842_v6, %v5242_v0  ;;  %v11219_v48 = vpop.eup %11218  ;;  %v6668_v41 = vadd.f32 1.0, %v11217_v33  ;;  %v17597_v6 = vld [vmem:[#allocation209_spill] sm:$0xff] }
 0x447   : > { %8988 = vst [vmem:[%s15453_s17 + $0xc0] sm:$0xff] %v8773_v59   ;;  %v10229_v50 = vpop.f32.mrf.mxu1  ;;  %10327 = vmatmul.mubr.msk.bf16.gmra.mxu1 %vm14423_vm9, %v16863_v20  ;;  %v6916_v4 = vmul.f32 %v11219_v48, %v15988_v5  ;;  %v5250_v33 = vadd.f32 %v15710_v61, %v17597_v6 }
 0x448   : > { %v10021_v14 = vpop.f32.mrf.mxu0  ;;  %11232 = vpow2.f32 %v6478_v45  ;;  %v6295_v29 = vsub.f32 0.0, %v16087_v51  ;;  %10330 = vmatprep.mubr.msk.bf16.mxu1 %vm17246_vm1, %v16860_v47 }
 0x449   : > { %v11221_v38 = vpop.eup %11220  ;;  %v5847_v37 = vpop.f32.mrf.mxu1  ;;  %11234 = vrcp.f32 %v6668_v41 }
 0x44a   : > { %v16093_v30 = vpop.f32.mrf.mxu0  ;;  %v11223_v55 = vpop.eup %11222  ;;  %v6917_v26 = vmul.f32 %v11221_v38, %v15999_v57  ;;  %v6480_v56 = vmul.f32 1.442695, %v6295_v29  ;;  %v16100_v0 = vadd.f32 %v5847_v37, %v5247_v10  ;;  %v17598_v37 = vld [vmem:[#allocation31_spill] sm:$0xff] }
 0x44b   : > { %v6669_v28 = vadd.f32 1.0, %v11223_v55  ;;  %v10232_v59 = vpop.f32.mrf.mxu1  ;;  %v5255_v61 = vadd.f32 %v15722_v18, %v17598_v37 }
 0x44c   : > { %v10024_v21 = vpop.f32.mrf.mxu0  ;;  %v8778_v45 = vpack.c.bf16 %v6917_v26, %v6916_v4  ;;  %11236 = vpow2.f32 %v6480_v56  ;;  %v6296_v5 = vsub.f32 0.0, %v16100_v0 }
 0x44d   : > { %11238 = vrcp.f32 %v6669_v28  ;;  %v5850_v57 = vpop.f32.mrf.mxu1  ;;  %v11225_v48 = vpop.eup %11224 }
 0x44e   : > { %v16107_v14 = vpop.f32.mrf.mxu0  ;;  %8989 = vst [vmem:[%s15453_s17 + $0xc8] sm:$0xff] %v8778_v45   ;;  %v6482_v50 = vmul.f32 1.442695, %v6296_v5  ;;  %v16110_v22 = vadd.f32 %v5850_v57, %v5250_v33  ;;  %v11227_v41 = vpop.eup %11226  ;;  %v6670_v29 = vadd.f32 1.0, %v11225_v48  ;;  %v17600_v57 = vld [vmem:[#allocation213_spill] sm:$0xff] }
 0x44f   : > { %v10233_v38 = vpop.f32.mrf.mxu1  ;;  %10331 = vmatmul.mubr.msk.bf16.gmra.mxu1 %vm14442_vm14, %v16863_v20  ;;  %v6918_v28 = vmul.f32 %v11227_v41, %v16012_v23  ;;  %v5258_v48 = vadd.f32 %v15739_v46, %v17600_v57 }
 0x450   : > { %v10025_v10 = vpop.f32.mrf.mxu0  ;;  %11240 = vpow2.f32 %v6482_v50  ;;  %v6297_v25 = vsub.f32 0.0, %v16110_v22  ;;  %10334 = vmatprep.mubr.msk.bf16.mxu1 %vm17246_vm1, %v16860_v47 }
 0x451   : > { %v11229_v4 = vpop.eup %11228  ;;  %v5855_v26 = vpop.f32.mrf.mxu1  ;;  %11242 = vrcp.f32 %v6670_v29 }
 0x452   : > { %v16115_v55 = vpop.f32.mrf.mxu0  ;;  %v11231_v21 = vpop.eup %11230  ;;  %v6919_v59 = vmul.f32 %v11229_v4, %v16022_v60  ;;  %v6484_v6 = vmul.f32 1.442695, %v6297_v25  ;;  %v16122_v33 = vadd.f32 %v5855_v26, %v5255_v61  ;;  %v17601_v26 = vld [vmem:[#allocation35_spill] sm:$0xff] }
 0x453   : > { %v6671_v45 = vadd.f32 1.0, %v11231_v21  ;;  %v10236_v5 = vpop.f32.mrf.mxu1  ;;  %v5263_v46 = vadd.f32 %v15751_v13, %v17601_v26 }
 0x454   : > { %v10028_v18 = vpop.f32.mrf.mxu0  ;;  %v8783_v50 = vpack.c.bf16 %v6919_v59, %v6918_v28  ;;  %11244 = vpow2.f32 %v6484_v6  ;;  %v6298_v23 = vsub.f32 0.0, %v16122_v33 }
 0x455   : > { %v11233_v60 = vpop.eup %11232  ;;  %11246 = vrcp.f32 %v6671_v45  ;;  %v5858_v41 = vpop.f32.mrf.mxu1 }
 0x456   : > { %v16129_v10 = vpop.f32.mrf.mxu0  ;;  %8990 = vst [vmem:[%s15453_s17 + $0xd0] sm:$0xff] %v8783_v50   ;;  %v6672_v38 = vadd.f32 1.0, %v11233_v60  ;;  %v6486_v37 = vmul.f32 1.442695, %v6298_v23  ;;  %v16132_v61 = vadd.f32 %v5858_v41, %v5258_v48  ;;  %v11235_v4 = vpop.eup %11234  ;;  %v17603_v60 = vld [vmem:[#allocation66_spill] sm:$0xff] }
 0x457   : > { %v10237_v25 = vpop.f32.mrf.mxu1  ;;  %10335 = vmatmul.mubr.msk.bf16.gmra.mxu1 %vm14473_vm6, %v16863_v20  ;;  %v6920_v13 = vmul.f32 %v11235_v4, %v16034_v54  ;;  %v5266_v41 = vadd.f32 %v15768_v8, %v17603_v60 }
 0x458   : > { %v10029_v29 = vpop.f32.mrf.mxu0  ;;  %v6299_v56 = vsub.f32 0.0, %v16132_v61  ;;  %11248 = vpow2.f32 %v6486_v37  ;;  %10338 = vmatprep.mubr.msk.bf16.mxu1 %vm17246_vm1, %v16860_v47 }
 0x459   : > { %v11237_v28 = vpop.eup %11236  ;;  %v5863_v59 = vpop.f32.mrf.mxu1  ;;  %11250 = vrcp.f32 %v6672_v38 }
 0x45a   : > { %v16137_v21 = vpop.f32.mrf.mxu0  ;;  %v11239_v18 = vpop.eup %11238  ;;  %v6673_v45 = vadd.f32 1.0, %v11237_v28  ;;  %v6488_v5 = vmul.f32 1.442695, %v6299_v56  ;;  %v16142_v57 = vadd.f32 %v5863_v59, %v5263_v46  ;;  %v17604_v59 = vld [vmem:[#allocation38_spill] sm:$0xff] }
 0x45b   : > { %v6921_v50 = vmul.f32 %v11239_v18, %v16044_v49  ;;  %v10240_v23 = vpop.f32.mrf.mxu1  ;;  %v5271_v8 = vadd.f32 %v15780_v53, %v17604_v59 }
 0x45c   : > { %v10032_v48 = vpop.f32.mrf.mxu0  ;;  %11252 = vrcp.f32 %v6673_v45  ;;  %v6300_v38 = vsub.f32 0.0, %v16142_v57 }
 0x45d   : > { %v11241_v29 = vpop.eup %11240  ;;  %v8788_v25 = vpack.c.bf16 %v6921_v50, %v6920_v13  ;;  %11254 = vpow2.f32 %v6488_v5  ;;  %v5866_v26 = vpop.f32.mrf.mxu1 }
 0x45e   : > { %v16151_v37 = vpop.f32.mrf.mxu0  ;;  %v6674_v46 = vadd.f32 1.0, %v11241_v29  ;;  %v6490_v56 = vmul.f32 1.442695, %v6300_v38  ;;  %v16153_v28 = vadd.f32 %v5866_v26, %v5266_v41  ;;  %v11243_v4 = vpop.eup %11242 }
 0x45f   : > { %8991 = vst [vmem:[%s15453_s17 + $0xd8] sm:$0xff] %v8788_v25   ;;  %v10241_v49 = vpop.f32.mrf.mxu1  ;;  %10339 = vmatmul.mubr.msk.bf16.gmra.mxu1 %vm14492_vm12, %v16863_v20  ;;  %v6922_v53 = vmul.f32 %v11243_v4, %v16054_v19  ;;  %v17606_v25 = vld [vmem:[#allocation71_spill] sm:$0xff] }
 0x460   : > { %v10033_v54 = vpop.f32.mrf.mxu0  ;;  %v6301_v6 = vsub.f32 0.0, %v16153_v28  ;;  %11256 = vpow2.f32 %v6490_v56  ;;  %10342 = vmatprep.mubr.msk.bf16.mxu1 %vm17246_vm1, %v16860_v47  ;;  %v5274_v26 = vadd.f32 %v15797_v42, %v17606_v25 }
 0x461   : > { %v11245_v45 = vpop.eup %11244  ;;  %v5871_v48 = vpop.f32.mrf.mxu1  ;;  %11258 = vrcp.f32 %v6674_v46 }
 0x462   : > { %v16159_v18 = vpop.f32.mrf.mxu0  ;;  %v11247_v13 = vpop.eup %11246  ;;  %v6675_v50 = vadd.f32 1.0, %v11245_v45  ;;  %v6492_v23 = vmul.f32 1.442695, %v6301_v6  ;;  %v16164_v60 = vadd.f32 %v5871_v48, %v5271_v8  ;;  %v17607_v48 = vld [vmem:[#allocation46_spill] sm:$0xff] }
 0x463   : > { %v6923_v38 = vmul.f32 %v11247_v13, %v16065_v62  ;;  %v10244_v29 = vpop.f32.mrf.mxu1  ;;  %v5279_v42 = vadd.f32 %v15809_v3, %v17607_v48 }
 0x464   : > { %v10036_v41 = vpop.f32.mrf.mxu0  ;;  %11260 = vrcp.f32 %v6675_v50  ;;  %v6302_v46 = vsub.f32 0.0, %v16164_v60 }
 0x465   : > { %v8793_v54 = vpack.c.bf16 %v6923_v38, %v6922_v53  ;;  %11262 = vpow2.f32 %v6492_v23  ;;  %v5874_v49 = vpop.f32.mrf.mxu1  ;;  %v11249_v59 = vpop.eup %11248 }
 0x466   : > { %v16173_v56 = vpop.f32.mrf.mxu0  ;;  %v6494_v8 = vmul.f32 1.442695, %v6302_v46  ;;  %v16175_v6 = vadd.f32 %v5874_v49, %v5274_v26  ;;  %v11251_v19 = vpop.eup %11250  ;;  %v6676_v62 = vadd.f32 1.0, %v11249_v59  ;;  %v17609_v49 = vld [vmem:[#allocation219_spill] sm:$0xff] }
 0x467   : > { %8992 = vst [vmem:[%s15453_s17 + $0xe0] sm:$0xff] %v8793_v54   ;;  %v10245_v4 = vpop.f32.mrf.mxu1  ;;  %10343 = vmatmul.mubr.msk.bf16.gmra.mxu1 %vm14523_vm7, %v16863_v20  ;;  %v6924_v38 = vmul.f32 %v11251_v19, %v16076_v40  ;;  %v5282_v59 = vadd.f32 %v15826_v2, %v17609_v49 }
 0x468   : > { %v10037_v45 = vpop.f32.mrf.mxu0  ;;  %11264 = vpow2.f32 %v6494_v8  ;;  %v6303_v5 = vsub.f32 0.0, %v16175_v6  ;;  %10346 = vmatprep.mubr.msk.bf16.mxu1 %vm17246_vm1, %v16860_v47 }
 0x469   : > { %v11253_v50 = vpop.eup %11252  ;;  %v5879_v23 = vpop.f32.mrf.mxu1  ;;  %11266 = vrcp.f32 %v6676_v62 }
 0x46a   : > { %v16181_v13 = vpop.f32.mrf.mxu0  ;;  %v11255_v53 = vpop.eup %11254  ;;  %v6925_v29 = vmul.f32 %v11253_v50, %v16087_v51  ;;  %v6496_v25 = vmul.f32 1.442695, %v6303_v5  ;;  %v16188_v26 = vadd.f32 %v5879_v23, %v5279_v42  ;;  %v17610_v23 = vld [vmem:[#allocation50_spill] sm:$0xff] }
 0x46b   : > { %v6677_v46 = vadd.f32 1.0, %v11255_v53  ;;  %v10248_v54 = vpop.f32.mrf.mxu1  ;;  %v5287_v2 = vadd.f32 %v15838_v32, %v17610_v23 }
 0x46c   : > { %v10040_v3 = vpop.f32.mrf.mxu0  ;;  %v8798_v8 = vpack.c.bf16 %v6925_v29, %v6924_v38  ;;  %11268 = vpow2.f32 %v6496_v25  ;;  %v6304_v40 = vsub.f32 0.0, %v16188_v26  ;;  %v17611_v25 = vld [vmem:[#allocation223_spill] sm:$0xff] }
 0x46d   : > { %11270 = vrcp.f32 %v6677_v46  ;;  %v5882_v51 = vpop.f32.mrf.mxu1  ;;  %v11257_v19 = vpop.eup %11256  ;;  %vm17612_vm4 = vnez %v17611_v25 }
 0x46e   : > { %v16195_v45 = vpop.f32.mrf.mxu0  ;;  %8993 = vst [vmem:[%s15453_s17 + $0xe8] sm:$0xff] %v8798_v8   ;;  %v6498_v4 = vmul.f32 1.442695, %v6304_v40  ;;  %v16198_v48 = vadd.f32 %v5882_v51, %v5282_v59  ;;  %v11259_v62 = vpop.eup %11258  ;;  %v6678_v5 = vadd.f32 1.0, %v11257_v19  ;;  %v17613_v51 = vld [vmem:[#allocation76_spill] sm:$0xff] }
 0x46f   : > { %v10249_v50 = vpop.f32.mrf.mxu1  ;;  %10347 = vmatmul.mubr.msk.bf16.gmra.mxu1 %vm17612_vm4, %v16863_v20  ;;  %v6926_v46 = vmul.f32 %v11259_v62, %v16100_v0  ;;  %v5290_v19 = vadd.f32 %v15855_v11, %v17613_v51 }
 0x470   : > { %v10041_v42 = vpop.f32.mrf.mxu0  ;;  %11272 = vpow2.f32 %v6498_v4  ;;  %v6305_v41 = vsub.f32 0.0, %v16198_v48  ;;  %10350 = vmatprep.mubr.msk.bf16.mxu1 %vm17246_vm1, %v16860_v47 }
 0x471   : > { %v11261_v38 = vpop.eup %11260  ;;  %v5887_v29 = vpop.f32.mrf.mxu1  ;;  %11274 = vrcp.f32 %v6678_v5 }
 0x472   : > { %v16203_v53 = vpop.f32.mrf.mxu0  ;;  %v11263_v3 = vpop.eup %11262  ;;  %v6927_v54 = vmul.f32 %v11261_v38, %v16110_v22  ;;  %v6500_v49 = vmul.f32 1.442695, %v6305_v41  ;;  %v16210_v59 = vadd.f32 %v5887_v29, %v5287_v2  ;;  %v17614_v29 = vld [vmem:[#allocation56_spill] sm:$0xff] }
 0x473   : > { %v6679_v8 = vadd.f32 1.0, %v11263_v3  ;;  %v10252_v40 = vpop.f32.mrf.mxu1  ;;  %v5295_v11 = vadd.f32 %v15867_v35, %v17614_v29 }
 0x474   : > { %v10044_v32 = vpop.f32.mrf.mxu0  ;;  %v8803_v4 = vpack.c.bf16 %v6927_v54, %v6926_v46  ;;  %11276 = vpow2.f32 %v6500_v49  ;;  %v6306_v0 = vsub.f32 0.0, %v16210_v59  ;;  %v17615_v49 = vld [vmem:[#allocation55_spill] sm:$0xff] }
 0x475   : > { %v11265_v22 = vpop.eup %11264  ;;  %11278 = vrcp.f32 %v6679_v8  ;;  %v5890_v62 = vpop.f32.mrf.mxu1  ;;  %vm17616_vm8 = vnez %v17615_v49 }
 0x476   : > { %v16217_v42 = vpop.f32.mrf.mxu0  ;;  %8994 = vst [vmem:[%s15453_s17 + $0xf0] sm:$0xff] %v8803_v4   ;;  %v6680_v50 = vadd.f32 1.0, %v11265_v22  ;;  %v6502_v23 = vmul.f32 1.442695, %v6306_v0  ;;  %v16220_v2 = vadd.f32 %v5890_v62, %v5290_v19  ;;  %v11267_v38 = vpop.eup %11266  ;;  %v17617_v22 = vld [vmem:[#allocation78_spill] sm:$0xff] }
 0x477   : > { %v10253_v41 = vpop.f32.mrf.mxu1  ;;  %10351 = vmatmul.mubr.msk.bf16.gmra.mxu1 %vm17616_vm8, %v16863_v20  ;;  %v6928_v35 = vmul.f32 %v11267_v38, %v16122_v33  ;;  %v5298_v62 = vadd.f32 %v15884_v27, %v17617_v22 }
 0x478   : > { %v10045_v5 = vpop.f32.mrf.mxu0  ;;  %v6307_v25 = vsub.f32 0.0, %v16220_v2  ;;  %11280 = vpow2.f32 %v6502_v23  ;;  %10354 = vmatprep.mubr.msk.bf16.mxu1 %vm17246_vm1, %v16860_v47 }
 0x479   : > { %v11269_v46 = vpop.eup %11268  ;;  %v5895_v54 = vpop.f32.mrf.mxu1  ;;  %11282 = vrcp.f32 %v6680_v50 }
 0x47a   : > { %v16225_v3 = vpop.f32.mrf.mxu0  ;;  %v11271_v32 = vpop.eup %11270  ;;  %v6681_v8 = vadd.f32 1.0, %v11269_v46  ;;  %v6504_v40 = vmul.f32 1.442695, %v6307_v25  ;;  %v16230_v51 = vadd.f32 %v5895_v54, %v5295_v11  ;;  %v17618_v54 = vld [vmem:[#allocation61_spill] sm:$0xff] }
 0x47b   : > { %v6929_v4 = vmul.f32 %v11271_v32, %v16132_v61  ;;  %v10256_v0 = vpop.f32.mrf.mxu1  ;;  %v5303_v27 = vadd.f32 %v15896_v16, %v17618_v54 }
 0x47c   : > { %v10048_v19 = vpop.f32.mrf.mxu0  ;;  %11284 = vrcp.f32 %v6681_v8  ;;  %v6308_v50 = vsub.f32 0.0, %v16230_v51  ;;  %v3878_v0 = vpop.permute.xlu0 %3877 }
 0x47d   : > { %v11273_v5 = vpop.eup %11272  ;;  %v8808_v41 = vpack.c.bf16 %v6929_v4, %v6928_v35  ;;  %11286 = vpow2.f32 %v6504_v40  ;;  %v5898_v29 = vpop.f32.mrf.mxu1  ;;  %v17619_v35 = vld [vmem:[#allocation224_spill] sm:$0xff]  ;;  %vm4006_vm9 = vcmp.eq.s32.totalorder %v11893_v34, %v3878_v0 }
 0x47e   : > { %v16239_v23 = vpop.f32.mrf.mxu0  ;;  %v6682_v11 = vadd.f32 1.0, %v11273_v5  ;;  %v6506_v25 = vmul.f32 1.442695, %v6308_v50  ;;  %v16241_v46 = vadd.f32 %v5898_v29, %v5298_v62  ;;  %v11275_v38 = vpop.eup %11274  ;;  %vm17620_vm13 = vnez %v17619_v35 }
 0x47f   : > { %8995 = vst [vmem:[%s15453_s17 + $0xf8] sm:$0xff] %v8808_v41   ;;  %v10257_v61 = vpop.f32.mrf.mxu1  ;;  %v3881_v19 = vpop.permute.xlu1 %3880  ;;  %10355 = vmatmul.mubr.msk.bf16.gmra.mxu1 %vm17620_vm13, %v16863_v20  ;;  %v6930_v5 = vmul.f32 %v11275_v38, %v16142_v57 }
 0x480   : > { %v10049_v33 = vpop.f32.mrf.mxu0  ;;  %v6309_v49 = vsub.f32 0.0, %v16241_v46  ;;  %11288 = vpow2.f32 %v6506_v25  ;;  %10358 = vmatprep.mubr.msk.bf16.mxu1 %vm17246_vm1, %v16860_v47  ;;  %v17621_v25 = vld [vmem:[#allocation83_spill] sm:$0xff]  ;;  %vm4007_vm3 = vcmp.eq.s32.totalorder %v11893_v34, %v3881_v19 }
 0x481   : > { %v11277_v8 = vpop.eup %11276  ;;  %v5903_v40 = vpop.f32.mrf.mxu1  ;;  %11290 = vrcp.f32 %v6682_v11  ;;  %v5306_v33 = vadd.f32 %v15913_v39, %v17621_v25  ;;  %vm8388_vm14 = vmpackc.low %vm4007_vm3, %vm4006_vm9 }
 0x482   : > { %v16247_v32 = vpop.f32.mrf.mxu0  ;;  %v11279_v4 = vpop.eup %11278  ;;  %v6683_v22 = vadd.f32 1.0, %v11277_v8  ;;  %v6508_v62 = vmul.f32 1.442695, %v6309_v49  ;;  %v16252_v50 = vadd.f32 %v5903_v40, %v5303_v27  ;;  %v17622_v40 = vld [vmem:[#allocation70_spill] sm:$0xff] }
 0x483   : > { %v6931_v41 = vmul.f32 %v11279_v4, %v16153_v28  ;;  %v10260_v29 = vpop.f32.mrf.mxu1  ;;  %v5311_v35 = vadd.f32 %v15925_v12, %v17622_v40  ;;  %v17624_v40 = vld [vmem:[#allocation74_spill] sm:$0xff] }
 0x484   : > { %v10052_v16 = vpop.f32.mrf.mxu0  ;;  %11292 = vrcp.f32 %v6683_v22  ;;  %v6310_v11 = vsub.f32 0.0, %v16252_v50 }
 0x485   : > { %v8813_v54 = vpack.c.bf16 %v6931_v41, %v6930_v5  ;;  %11294 = vpow2.f32 %v6508_v62  ;;  %v5906_v47 = vpop.f32.mrf.mxu1  ;;  %v11281_v57 = vpop.eup %11280 }
 0x486   : > { %v16261_v61 = vpop.f32.mrf.mxu0  ;;  %v6510_v38 = vmul.f32 1.442695, %v6310_v11  ;;  %v16265_v28 = vadd.f32 %v5906_v47, %v5306_v33  ;;  %v11283_v49 = vpop.eup %11282  ;;  %v6684_v39 = vadd.f32 1.0, %v11281_v57  ;;  %v17623_v33 = vld [vmem:[#allocation67_spill] sm:$0xff] }
 0x487   : > { %8996 = vst [vmem:[%s15453_s17 + $0x100] sm:$0xff] %v8813_v54   ;;  %v10261_v8 = vpop.f32.mrf.mxu1  ;;  %10359 = vmatmul.mubr.msk.bf16.gmra.mxu1 %vm8388_vm14, %v16863_v20  ;;  %v6932_v62 = vmul.f32 %v11283_v49, %v16164_v60  ;;  %v5314_v11 = vadd.f32 %v15944_v63, %v17623_v33  ;;  %v5319_v63 = vadd.f32 %v15960_v36, %v17624_v40  ;;  %v17625_v33 = vld [vmem:[#allocation73_spill] sm:$0xff] }
 0x488   : > { %v10053_v27 = vpop.f32.mrf.mxu0  ;;  %11296 = vpow2.f32 %v6510_v38  ;;  %v6311_v19 = vsub.f32 0.0, %v16265_v28  ;;  %v17626_v40 = vld [vmem:[#allocation81_spill] sm:$0xff] }
 0x489   : > { %v11285_v4 = vpop.eup %11284  ;;  %v5911_v0 = vpop.f32.mrf.mxu1  ;;  %11298 = vrcp.f32 %v6684_v39 }
 0x48a   : > { %v16271_v34 = vpop.f32.mrf.mxu0  ;;  %v11287_v22 = vpop.eup %11286  ;;  %v6933_v16 = vmul.f32 %v11285_v4, %v16175_v6  ;;  %v6512_v5 = vmul.f32 1.442695, %v6311_v19  ;;  %v16276_v41 = vadd.f32 %v5911_v0, %v5311_v35 }
 0x48b   : > { %v6685_v12 = vadd.f32 1.0, %v11287_v22  ;;  %v10264_v25 = vpop.f32.mrf.mxu1 }
 0x48c   : > { %v10056_v29 = vpop.f32.mrf.mxu0  ;;  %v8818_v54 = vpack.c.bf16 %v6933_v16, %v6932_v62  ;;  %11300 = vpow2.f32 %v6512_v5  ;;  %v6312_v20 = vsub.f32 0.0, %v16276_v41 }
 0x48d   : > { %11302 = vrcp.f32 %v6685_v12  ;;  %v5914_v60 = vpop.f32.mrf.mxu1  ;;  %v11289_v57 = vpop.eup %11288 }
 0x48e   : > { %v16281_v47 = vpop.f32.mrf.mxu0  ;;  %8997 = vst [vmem:[%s15453_s17 + $0x108] sm:$0xff] %v8818_v54   ;;  %v6514_v6 = vmul.f32 1.442695, %v6312_v20  ;;  %v16284_v38 = vadd.f32 %v5914_v60, %v5314_v11  ;;  %v11291_v49 = vpop.eup %11290  ;;  %v6686_v39 = vadd.f32 1.0, %v11289_v57  ;;  %v5322_v11 = vadd.f32 %v15973_v7, %v17625_v33  ;;  %v17627_v33 = vld [vmem:[#allocation80_spill] sm:$0xff] }
 0x48f   : > { %v10265_v8 = vpop.f32.mrf.mxu1  ;;  %v6934_v62 = vmul.f32 %v11291_v49, %v16188_v26  ;;  %v5327_v7 = vadd.f32 %v15985_v44, %v17626_v40  ;;  %v17628_v40 = vld [vmem:[#allocation86_spill] sm:$0xff] }
 0x490   : > { %v10057_v27 = vpop.f32.mrf.mxu0  ;;  %11304 = vpow2.f32 %v6514_v6  ;;  %v6313_v35 = vsub.f32 0.0, %v16284_v38 }
 0x491   : > { %v11293_v4 = vpop.eup %11292  ;;  %v5919_v0 = vpop.f32.mrf.mxu1  ;;  %11306 = vrcp.f32 %v6686_v39 }
 0x492   : > { %v16289_v19 = vpop.f32.mrf.mxu0  ;;  %v11295_v22 = vpop.eup %11294  ;;  %v6935_v16 = vmul.f32 %v11293_v4, %v16198_v48  ;;  %v6516_v5 = vmul.f32 1.442695, %v6313_v35  ;;  %v16293_v29 = vadd.f32 %v5919_v0, %v5319_v63 }
 0x493   : > { %v6687_v25 = vadd.f32 1.0, %v11295_v22  ;;  %v10268_v36 = vpop.f32.mrf.mxu1 }
 0x494   : > { %v10060_v12 = vpop.f32.mrf.mxu0  ;;  %v8823_v54 = vpack.c.bf16 %v6935_v16, %v6934_v62  ;;  %11308 = vpow2.f32 %v6516_v5  ;;  %v6314_v20 = vsub.f32 0.0, %v16293_v29 }
 0x495   : > { %v11297_v26 = vpop.eup %11296  ;;  %11310 = vrcp.f32 %v6687_v25  ;;  %v5922_v57 = vpop.f32.mrf.mxu1 }
 0x496   : > { %v16298_v60 = vpop.f32.mrf.mxu0  ;;  %8998 = vst [vmem:[%s15453_s17 + $0x110] sm:$0xff] %v8823_v54   ;;  %v6688_v48 = vadd.f32 1.0, %v11297_v26  ;;  %v6518_v6 = vmul.f32 1.442695, %v6314_v20  ;;  %v16301_v27 = vadd.f32 %v5922_v57, %v5322_v11  ;;  %v11299_v8 = vpop.eup %11298  ;;  %v5330_v11 = vadd.f32 %v15997_v52, %v17627_v33  ;;  %v17629_v33 = vld [vmem:[#allocation93_spill] sm:$0xff] }
 0x497   : > { %v10269_v39 = vpop.f32.mrf.mxu1  ;;  %v6936_v25 = vmul.f32 %v11299_v8, %v16210_v59  ;;  %v5335_v52 = vadd.f32 %v16005_v58, %v17628_v40  ;;  %v17630_v40 = vld [vmem:[#allocation91_spill] sm:$0xff] }
 0x498   : > { %v10061_v49 = vpop.f32.mrf.mxu0  ;;  %v6315_v63 = vsub.f32 0.0, %v16301_v27  ;;  %11312 = vpow2.f32 %v6518_v6 }
 0x499   : > { %v11301_v4 = vpop.eup %11300  ;;  %v5927_v0 = vpop.f32.mrf.mxu1  ;;  %11314 = vrcp.f32 %v6688_v48 }
 0x49a   : > { %v16306_v35 = vpop.f32.mrf.mxu0  ;;  %v11303_v22 = vpop.eup %11302  ;;  %v6689_v62 = vadd.f32 1.0, %v11301_v4  ;;  %v6520_v16 = vmul.f32 1.442695, %v6315_v63  ;;  %v16308_v5 = vadd.f32 %v5927_v0, %v5327_v7 }
 0x49b   : > { %v6937_v36 = vmul.f32 %v11303_v22, %v16220_v2  ;;  %v10272_v44 = vpop.f32.mrf.mxu1 }
 0x49c   : > { %v10064_v12 = vpop.f32.mrf.mxu0  ;;  %11316 = vrcp.f32 %v6689_v62  ;;  %v6316_v54 = vsub.f32 0.0, %v16308_v5 }
 0x49d   : > { %v11305_v26 = vpop.eup %11304  ;;  %v8828_v57 = vpack.c.bf16 %v6937_v36, %v6936_v25  ;;  %11318 = vpow2.f32 %v6520_v16  ;;  %v5930_v48 = vpop.f32.mrf.mxu1 }
 0x49e   : > { %v16315_v20 = vpop.f32.mrf.mxu0  ;;  %v6690_v6 = vadd.f32 1.0, %v11305_v26  ;;  %v6522_v49 = vmul.f32 1.442695, %v6316_v54  ;;  %v16317_v39 = vadd.f32 %v5930_v48, %v5330_v11  ;;  %v11307_v8 = vpop.eup %11306  ;;  %v5338_v11 = vadd.f32 %v16019_v9, %v17629_v33  ;;  %v17631_v33 = vld [vmem:[#allocation225_spill] sm:$0xff] }
 0x49f   : > { %8999 = vst [vmem:[%s15453_s17 + $0x118] sm:$0xff] %v8828_v57   ;;  %v10273_v2 = vpop.f32.mrf.mxu1  ;;  %v6938_v36 = vmul.f32 %v11307_v8, %v16230_v51  ;;  %v5343_v9 = vadd.f32 %v16027_v31, %v17630_v40  ;;  %v17632_v40 = vld [vmem:[#allocation98_spill] sm:$0xff] }
 0x4a0   : > { %v10065_v59 = vpop.f32.mrf.mxu0  ;;  %v6317_v7 = vsub.f32 0.0, %v16317_v39  ;;  %11320 = vpow2.f32 %v6522_v49 }
 0x4a1   : > { %v11309_v4 = vpop.eup %11308  ;;  %v5935_v0 = vpop.f32.mrf.mxu1  ;;  %11322 = vrcp.f32 %v6690_v6 }
 0x4a2   : > { %v16323_v63 = vpop.f32.mrf.mxu0  ;;  %v11311_v22 = vpop.eup %11310  ;;  %v6691_v62 = vadd.f32 1.0, %v11309_v4  ;;  %v6524_v16 = vmul.f32 1.442695, %v6317_v7  ;;  %v16325_v12 = vadd.f32 %v5935_v0, %v5335_v52 }
 0x4a3   : > { %v6939_v44 = vmul.f32 %v11311_v22, %v16241_v46  ;;  %v10276_v58 = vpop.f32.mrf.mxu1 }
 0x4a4   : > { %v10068_v25 = vpop.f32.mrf.mxu0  ;;  %11324 = vrcp.f32 %v6691_v62  ;;  %v6318_v54 = vsub.f32 0.0, %v16325_v12 }
 0x4a5   : > { %v8833_v57 = vpack.c.bf16 %v6939_v44, %v6938_v36  ;;  %11326 = vpow2.f32 %v6524_v16  ;;  %v5938_v48 = vpop.f32.mrf.mxu1  ;;  %v11313_v6 = vpop.eup %11312 }
 0x4a6   : > { %v16332_v26 = vpop.f32.mrf.mxu0  ;;  %v6526_v49 = vmul.f32 1.442695, %v6318_v54  ;;  %v16334_v59 = vadd.f32 %v5938_v48, %v5338_v11  ;;  %v11315_v51 = vpop.eup %11314  ;;  %v6692_v46 = vadd.f32 1.0, %v11313_v6  ;;  %v5346_v11 = vadd.f32 %v16041_v43, %v17631_v33  ;;  %v17633_v33 = vld [vmem:[#allocation97_spill] sm:$0xff] }
 0x4a7   : > { %9000 = vst [vmem:[%s15453_s17 + $0x120] sm:$0xff] %v8833_v57   ;;  %v10277_v8 = vpop.f32.mrf.mxu1  ;;  %v6940_v62 = vmul.f32 %v11315_v51, %v16252_v50  ;;  %v5351_v43 = vadd.f32 %v16049_v24, %v17632_v40  ;;  %v17634_v40 = vld [vmem:[#allocation100_spill] sm:$0xff] }
 0x4a8   : > { %v10069_v2 = vpop.f32.mrf.mxu0  ;;  %11328 = vpow2.f32 %v6526_v49  ;;  %v6319_v52 = vsub.f32 0.0, %v16334_v59 }
 0x4a9   : > { %v11317_v4 = vpop.eup %11316  ;;  %v5943_v0 = vpop.f32.mrf.mxu1  ;;  %11330 = vrcp.f32 %v6692_v46 }
 0x4aa   : > { %v16340_v7 = vpop.f32.mrf.mxu0  ;;  %v11319_v22 = vpop.eup %11318  ;;  %v6941_v16 = vmul.f32 %v11317_v4, %v16265_v28  ;;  %v6528_v25 = vmul.f32 1.442695, %v6319_v52  ;;  %v16344_v36 = vadd.f32 %v5943_v0, %v5343_v9 }
 0x4ab   : > { %v6693_v58 = vadd.f32 1.0, %v11319_v22  ;;  %v10280_v31 = vpop.f32.mrf.mxu1 }
 0x4ac   : > { %v10072_v44 = vpop.f32.mrf.mxu0  ;;  %v8838_v54 = vpack.c.bf16 %v6941_v16, %v6940_v62  ;;  %11332 = vpow2.f32 %v6528_v25  ;;  %v6320_v57 = vsub.f32 0.0, %v16344_v36 }
 0x4ad   : > { %11334 = vrcp.f32 %v6693_v58  ;;  %v5946_v50 = vpop.f32.mrf.mxu1  ;;  %v11321_v6 = vpop.eup %11320 }
 0x4ae   : > { %v16349_v48 = vpop.f32.mrf.mxu0  ;;  %9001 = vst [vmem:[%s15453_s17 + $0x128] sm:$0xff] %v8838_v54   ;;  %v6530_v28 = vmul.f32 1.442695, %v6320_v57  ;;  %v16352_v49 = vadd.f32 %v5946_v50, %v5346_v11  ;;  %v11323_v51 = vpop.eup %11322  ;;  %v6694_v46 = vadd.f32 1.0, %v11321_v6  ;;  %v5354_v11 = vadd.f32 %v16063_v17, %v17633_v33  ;;  %v17635_v33 = vld [vmem:[#allocation101_spill] sm:$0xff] }
 0x4af   : > { %v10281_v8 = vpop.f32.mrf.mxu1  ;;  %v6942_v62 = vmul.f32 %v11323_v51, %v16276_v41  ;;  %v5359_v17 = vadd.f32 %v16071_v15, %v17634_v40  ;;  %v17636_v40 = vld [vmem:[#allocation111_spill] sm:$0xff] }
 0x4b0   : > { %v10073_v2 = vpop.f32.mrf.mxu0  ;;  %11336 = vpow2.f32 %v6530_v28  ;;  %v6321_v9 = vsub.f32 0.0, %v16352_v49 }
 0x4b1   : > { %v11325_v4 = vpop.eup %11324  ;;  %v5951_v0 = vpop.f32.mrf.mxu1  ;;  %11338 = vrcp.f32 %v6694_v46 }
 0x4b2   : > { %v16357_v52 = vpop.f32.mrf.mxu0  ;;  %v11327_v22 = vpop.eup %11326  ;;  %v6943_v16 = vmul.f32 %v11325_v4, %v16284_v38  ;;  %v6532_v25 = vmul.f32 1.442695, %v6321_v9  ;;  %v16361_v44 = vadd.f32 %v5951_v0, %v5351_v43 }
 0x4b3   : > { %v6695_v31 = vadd.f32 1.0, %v11327_v22  ;;  %v10284_v24 = vpop.f32.mrf.mxu1 }
 0x4b4   : > { %v10076_v58 = vpop.f32.mrf.mxu0  ;;  %v8843_v54 = vpack.c.bf16 %v6943_v16, %v6942_v62  ;;  %11340 = vpow2.f32 %v6532_v25  ;;  %v6322_v57 = vsub.f32 0.0, %v16361_v44 }
 0x4b5   : > { %v11329_v41 = vpop.eup %11328  ;;  %11342 = vrcp.f32 %v6695_v31  ;;  %v5954_v6 = vpop.f32.mrf.mxu1 }
 0x4b6   : > { %v16366_v50 = vpop.f32.mrf.mxu0  ;;  %9002 = vst [vmem:[%s15453_s17 + $0x130] sm:$0xff] %v8843_v54   ;;  %v6696_v38 = vadd.f32 1.0, %v11329_v41  ;;  %v6534_v28 = vmul.f32 1.442695, %v6322_v57  ;;  %v16369_v2 = vadd.f32 %v5954_v6, %v5354_v11  ;;  %v11331_v8 = vpop.eup %11330  ;;  %v5362_v11 = vadd.f32 %v16085_v1, %v17635_v33  ;;  %v17637_v33 = vld [vmem:[#allocation106_spill] sm:$0xff] }
 0x4b7   : > { %v10285_v46 = vpop.f32.mrf.mxu1  ;;  %v6944_v31 = vmul.f32 %v11331_v8, %v16293_v29  ;;  %v5367_v1 = vadd.f32 %v16093_v30, %v17636_v40  ;;  %v17638_v40 = vld [vmem:[#allocation116_spill] sm:$0xff] }
 0x4b8   : > { %v10077_v51 = vpop.f32.mrf.mxu0  ;;  %v6323_v43 = vsub.f32 0.0, %v16369_v2  ;;  %11344 = vpow2.f32 %v6534_v28 }
 0x4b9   : > { %v11333_v4 = vpop.eup %11332  ;;  %v5959_v0 = vpop.f32.mrf.mxu1  ;;  %11346 = vrcp.f32 %v6696_v38 }
 0x4ba   : > { %v16374_v9 = vpop.f32.mrf.mxu0  ;;  %v11335_v22 = vpop.eup %11334  ;;  %v6697_v62 = vadd.f32 1.0, %v11333_v4  ;;  %v6536_v16 = vmul.f32 1.442695, %v6323_v43  ;;  %v16376_v25 = vadd.f32 %v5959_v0, %v5359_v17 }
 0x4bb   : > { %v6945_v24 = vmul.f32 %v11335_v22, %v16301_v27  ;;  %v10288_v15 = vpop.f32.mrf.mxu1 }
 0x4bc   : > { %v10080_v58 = vpop.f32.mrf.mxu0  ;;  %11348 = vrcp.f32 %v6697_v62  ;;  %v6324_v54 = vsub.f32 0.0, %v16376_v25 }
 0x4bd   : > { %v11337_v41 = vpop.eup %11336  ;;  %v8848_v6 = vpack.c.bf16 %v6945_v24, %v6944_v31  ;;  %11350 = vpow2.f32 %v6536_v16  ;;  %v5962_v38 = vpop.f32.mrf.mxu1 }
 0x4be   : > { %v16383_v57 = vpop.f32.mrf.mxu0  ;;  %v6698_v28 = vadd.f32 1.0, %v11337_v41  ;;  %v6538_v51 = vmul.f32 1.442695, %v6324_v54  ;;  %v16385_v46 = vadd.f32 %v5962_v38, %v5362_v11  ;;  %v11339_v8 = vpop.eup %11338  ;;  %v5370_v11 = vadd.f32 %v16107_v14, %v17637_v33  ;;  %v17639_v33 = vld [vmem:[#allocation109_spill] sm:$0xff] }
 0x4bf   : > { %9003 = vst [vmem:[%s15453_s17 + $0x138] sm:$0xff] %v8848_v6   ;;  %v10289_v27 = vpop.f32.mrf.mxu1  ;;  %v6946_v24 = vmul.f32 %v11339_v8, %v16308_v5  ;;  %v5375_v14 = vadd.f32 %v16115_v55, %v17638_v40  ;;  %v17640_v40 = vld [vmem:[#allocation124_spill] sm:$0xff] }
 0x4c0   : > { %v10081_v29 = vpop.f32.mrf.mxu0  ;;  %v6325_v17 = vsub.f32 0.0, %v16385_v46  ;;  %11352 = vpow2.f32 %v6538_v51 }
 0x4c1   : > { %v11341_v4 = vpop.eup %11340  ;;  %v5967_v0 = vpop.f32.mrf.mxu1  ;;  %11354 = vrcp.f32 %v6698_v28 }
 0x4c2   : > { %v16391_v43 = vpop.f32.mrf.mxu0  ;;  %v11343_v22 = vpop.eup %11342  ;;  %v6699_v62 = vadd.f32 1.0, %v11341_v4  ;;  %v6540_v16 = vmul.f32 1.442695, %v6325_v17  ;;  %v16393_v58 = vadd.f32 %v5967_v0, %v5367_v1 }
 0x4c3   : > { %v6947_v15 = vmul.f32 %v11343_v22, %v16317_v39  ;;  %v10292_v30 = vpop.f32.mrf.mxu1 }
 0x4c4   : > { %v10084_v31 = vpop.f32.mrf.mxu0  ;;  %11356 = vrcp.f32 %v6699_v62  ;;  %v6326_v54 = vsub.f32 0.0, %v16393_v58 }
 0x4c5   : > { %v8853_v6 = vpack.c.bf16 %v6947_v15, %v6946_v24  ;;  %11358 = vpow2.f32 %v6540_v16  ;;  %v5970_v38 = vpop.f32.mrf.mxu1  ;;  %v11345_v28 = vpop.eup %11344 }
 0x4c6   : > { %v16400_v41 = vpop.f32.mrf.mxu0  ;;  %v6542_v51 = vmul.f32 1.442695, %v6326_v54  ;;  %v16402_v29 = vadd.f32 %v5970_v38, %v5370_v11  ;;  %v11347_v5 = vpop.eup %11346  ;;  %v6700_v39 = vadd.f32 1.0, %v11345_v28  ;;  %v5378_v11 = vadd.f32 %v16129_v10, %v17639_v33  ;;  %v17641_v33 = vld [vmem:[#allocation113_spill] sm:$0xff] }
 0x4c7   : > { %9004 = vst [vmem:[%s15453_s17 + $0x140] sm:$0xff] %v8853_v6   ;;  %v10293_v8 = vpop.f32.mrf.mxu1  ;;  %v6948_v62 = vmul.f32 %v11347_v5, %v16325_v12  ;;  %v5383_v10 = vadd.f32 %v16137_v21, %v17640_v40 }
 0x4c8   : > { %v10085_v27 = vpop.f32.mrf.mxu0  ;;  %11360 = vpow2.f32 %v6542_v51  ;;  %v6327_v1 = vsub.f32 0.0, %v16402_v29 }
 0x4c9   : > { %v11349_v4 = vpop.eup %11348  ;;  %v5975_v0 = vpop.f32.mrf.mxu1  ;;  %11362 = vrcp.f32 %v6700_v39 }
 0x4ca   : > { %v16408_v17 = vpop.f32.mrf.mxu0  ;;  %v11351_v22 = vpop.eup %11350  ;;  %v6949_v16 = vmul.f32 %v11349_v4, %v16334_v59  ;;  %v6544_v31 = vmul.f32 1.442695, %v6327_v1  ;;  %v16412_v24 = vadd.f32 %v5975_v0, %v5375_v14 }
 0x4cb   : > { %v6701_v30 = vadd.f32 1.0, %v11351_v22  ;;  %v10296_v55 = vpop.f32.mrf.mxu1 }
 0x4cc   : > { %v10088_v15 = vpop.f32.mrf.mxu0  ;;  %v8858_v54 = vpack.c.bf16 %v6949_v16, %v6948_v62  ;;  %11364 = vpow2.f32 %v6544_v31  ;;  %v6328_v6 = vsub.f32 0.0, %v16412_v24 }
 0x4cd   : > { %11366 = vrcp.f32 %v6701_v30  ;;  %v5978_v12 = vpop.f32.mrf.mxu1  ;;  %v11353_v28 = vpop.eup %11352 }
 0x4ce   : > { %v16417_v38 = vpop.f32.mrf.mxu0  ;;  %9005 = vst [vmem:[%s15453_s17 + $0x148] sm:$0xff] %v8858_v54   ;;  %v6546_v59 = vmul.f32 1.442695, %v6328_v6  ;;  %v16420_v51 = vadd.f32 %v5978_v12, %v5378_v11  ;;  %v11355_v5 = vpop.eup %11354  ;;  %v6702_v39 = vadd.f32 1.0, %v11353_v28  ;;  %v5386_v11 = vadd.f32 %v16151_v37, %v17641_v33 }
 0x4cf   : > { %v10297_v8 = vpop.f32.mrf.mxu1  ;;  %v6950_v62 = vmul.f32 %v11355_v5, %v16344_v36 }
 0x4d0   : > { %v10089_v27 = vpop.f32.mrf.mxu0  ;;  %11368 = vpow2.f32 %v6546_v59  ;;  %v6329_v14 = vsub.f32 0.0, %v16420_v51  ;;  %v17643_v8 = vld [vmem:[#allocation226_spill] sm:$0xff] }
 0x4d1   : > { %v11357_v4 = vpop.eup %11356  ;;  %v5983_v0 = vpop.f32.mrf.mxu1  ;;  %11370 = vrcp.f32 %v6702_v39  ;;  %v17642_v39 = vld [vmem:[#allocation44_spill] sm:$0xff] }
 0x4d2   : > { %v16425_v1 = vpop.f32.mrf.mxu0  ;;  %v11359_v22 = vpop.eup %11358  ;;  %v6951_v16 = vmul.f32 %v11357_v4, %v16352_v49  ;;  %v6548_v31 = vmul.f32 1.442695, %v6329_v14  ;;  %v16429_v15 = vadd.f32 %v5983_v0, %v5383_v10  ;;  %v5007_v40 = vadd.f32 %v17643_v8, %v17642_v39  ;;  %v17644_v14 = vld [vmem:[#allocation228_spill] sm:$0xff] }
 0x4d3   : > { %v6703_v55 = vadd.f32 1.0, %v11359_v22  ;;  %v10300_v21 = vpop.f32.mrf.mxu1  ;;  %v5391_v4 = vadd.f32 %v16159_v18, %v17644_v14  ;;  %v17647_v39 = vld [vmem:[#allocation16_spill] sm:$0xff] }
 0x4d4   : > { %v10092_v30 = vpop.f32.mrf.mxu0  ;;  %v8863_v54 = vpack.c.bf16 %v6951_v16, %v6950_v62  ;;  %11372 = vpow2.f32 %v6548_v31  ;;  %v6330_v6 = vsub.f32 0.0, %v16429_v15  ;;  %v5394_v8 = vadd.f32 %v16173_v56, %v17647_v39 }
 0x4d5   : > { %v11361_v36 = vpop.eup %11360  ;;  %11374 = vrcp.f32 %v6703_v55  ;;  %v5986_v28 = vpop.f32.mrf.mxu1 }
 0x4d6   : > { %v16434_v12 = vpop.f32.mrf.mxu0  ;;  %9006 = vst [vmem:[%s15453_s17 + $0x150] sm:$0xff] %v8863_v54   ;;  %v6704_v49 = vadd.f32 1.0, %v11361_v36  ;;  %v6550_v59 = vmul.f32 1.442695, %v6330_v6  ;;  %v16437_v27 = vadd.f32 %v5986_v28, %v5386_v11  ;;  %v11363_v37 = vpop.eup %11362  ;;  %v17645_v54 = vld [vmem:[#allocation48_spill] sm:$0xff]  ;;  %v17646_v6 = vld [vmem:[#allocation227_spill] sm:$0xff] }
 0x4d7   : > { %v10301_v10 = vpop.f32.mrf.mxu1  ;;  %v5010_v36 = vadd.f32 %v17646_v6, %v17645_v54  ;;  %v6952_v18 = vmul.f32 %v11363_v37, %v16361_v44 }
 0x4d8   : > { %v10093_v5 = vpop.f32.mrf.mxu0  ;;  %v6331_v0 = vsub.f32 0.0, %v16437_v27  ;;  %11376 = vpow2.f32 %v6550_v59 }
 0x4d9   : > { %v11365_v62 = vpop.eup %11364  ;;  %v5991_v31 = vpop.f32.mrf.mxu1  ;;  %11378 = vrcp.f32 %v6704_v49 }
 0x4da   : > { %v5607_v22 = vpop.f32.mrf.mxu0  ;;  %v11367_v30 = vpop.eup %11366  ;;  %v6705_v55 = vadd.f32 1.0, %v11365_v62  ;;  %v6552_v21 = vmul.f32 1.442695, %v6331_v0  ;;  %v16446_v33 = vadd.f32 %v5991_v31, %v5391_v4 }
 0x4db   : > { %v16444_v16 = vadd.f32 %v5607_v22, %v5007_v40  ;;  %v6953_v28 = vmul.f32 %v11367_v30, %v16369_v2  ;;  %v10304_v59 = vpop.f32.mrf.mxu1 }
 0x4dc   : > { %v10112_v11 = vpop.f32.mrf.mxu0  ;;  %11380 = vrcp.f32 %v6705_v55  ;;  %v6332_v49 = vsub.f32 0.0, %v16446_v33  ;;  %v17648_v55 = vld [vmem:[#allocation135_spill] sm:$0xff] }
 0x4dd   : > { %v6236_v5 = vsub.f32 0.0, %v16444_v16  ;;  %v11369_v10 = vpop.eup %11368  ;;  %v8868_v14 = vpack.c.bf16 %v6953_v28, %v6952_v18  ;;  %11382 = vpow2.f32 %v6552_v21  ;;  %v5994_v44 = vpop.f32.mrf.mxu1  ;;  %v5399_v11 = vadd.f32 %v16181_v13, %v17648_v55  ;;  %v17649_v13 = vld [vmem:[#allocation118_spill] sm:$0xff] }
 0x4de   : > { %v5610_v40 = vpop.f32.mrf.mxu0  ;;  %v6706_v37 = vadd.f32 1.0, %v11369_v10  ;;  %v6554_v2 = vmul.f32 1.442695, %v6332_v49  ;;  %v16458_v22 = vadd.f32 %v5994_v44, %v5394_v8  ;;  %v11371_v30 = vpop.eup %11370 }
 0x4df   : > { %v6362_v4 = vmul.f32 1.442695, %v6236_v5  ;;  %v16456_v0 = vadd.f32 %v5610_v40, %v5010_v36  ;;  %9007 = vst [vmem:[%s15453_s17 + $0x158] sm:$0xff] %v8868_v14   ;;  %v10305_v31 = vpop.f32.mrf.mxu1  ;;  %v6954_v39 = vmul.f32 %v11371_v30, %v16376_v25  ;;  %v5402_v40 = vadd.f32 %v16195_v45, %v17649_v13 }
 0x4e0   : > { %v10113_v62 = vpop.f32.mrf.mxu0  ;;  %v6333_v21 = vsub.f32 0.0, %v16458_v22 }
 0x4e1   : > { %11384 = vpow2.f32 %v6362_v4  ;;  %v6237_v56 = vsub.f32 0.0, %v16456_v0  ;;  %v11373_v54 = vpop.eup %11372  ;;  %v5999_v36 = vpop.f32.mrf.mxu1 }
 0x4e2   : > { %11386 = vrcp.f32 %v6706_v37  ;;  %v11375_v18 = vpop.eup %11374  ;;  %v6707_v28 = vadd.f32 1.0, %v11373_v54  ;;  %v6556_v5 = vmul.f32 1.442695, %v6333_v21  ;;  %v16465_v59 = vadd.f32 %v5999_v36, %v5399_v11 }
 0x4e3   : > { %11388 = vpow2.f32 %v6554_v2  ;;  %v6364_v6 = vmul.f32 1.442695, %v6237_v56  ;;  %v6955_v8 = vmul.f32 %v11375_v18, %v16385_v46  ;;  %v10308_v49 = vpop.f32.mrf.mxu1  ;;  %v17650_v46 = vld [vmem:[#allocation231_spill] sm:$0xff] }
 0x4e4   : > { %v6334_v10 = vsub.f32 0.0, %v16465_v59  ;;  %v5407_v31 = vadd.f32 %v16203_v53, %v17650_v46 }
 0x4e5   : > { %11390 = vpow2.f32 %v6364_v6  ;;  %v8873_v14 = vpack.c.bf16 %v6955_v8, %v6954_v39  ;;  %v6002_v4 = vpop.f32.mrf.mxu1  ;;  %v11377_v44 = vpop.eup %11376  ;;  %v17651_v39 = vld [vmem:[#allocation121_spill] sm:$0xff] }
 0x4e6   : > { %11392 = vrcp.f32 %v6707_v28  ;;  %v6558_v37 = vmul.f32 1.442695, %v6334_v10  ;;  %v16472_v2 = vadd.f32 %v6002_v4, %v5402_v40  ;;  %v11379_v62 = vpop.eup %11378  ;;  %v6708_v25 = vadd.f32 1.0, %v11377_v44 }
 0x4e7   : > { %11394 = vpow2.f32 %v6556_v5  ;;  %9008 = vst [vmem:[%s15453_s17 + $0x160] sm:$0xff] %v8873_v14   ;;  %v10309_v56 = vpop.f32.mrf.mxu1  ;;  %v6956_v21 = vmul.f32 %v11379_v62, %v16393_v58  ;;  %v5410_v53 = vadd.f32 %v16217_v42, %v17651_v39  ;;  %v17652_v62 = vld [vmem:[#allocation148_spill] sm:$0xff] }
 0x4e8   : > { %11396 = vpow2.f32 %v6558_v37  ;;  %v6335_v45 = vsub.f32 0.0, %v16472_v2 }
 0x4e9   : > { %v11381_v30 = vpop.eup %11380  ;;  %v6007_v55 = vpop.f32.mrf.mxu1  ;;  %11398 = vrcp.f32 %v6708_v25  ;;  %v5415_v25 = vadd.f32 %v16225_v3, %v17652_v62 }
 0x4ea   : > { %v11383_v11 = vpop.eup %11382  ;;  %v6957_v54 = vmul.f32 %v11381_v30, %v16402_v29  ;;  %v6560_v6 = vmul.f32 1.442695, %v6335_v45  ;;  %v16480_v36 = vadd.f32 %v6007_v55, %v5407_v31 }
 0x4eb   : > { %v6709_v18 = vadd.f32 1.0, %v11383_v11  ;;  %v10312_v28 = vpop.f32.mrf.mxu1 }
 0x4ec   : > { %v8878_v8 = vpack.c.bf16 %v6957_v54, %v6956_v21  ;;  %11400 = vpow2.f32 %v6560_v6  ;;  %v6336_v49 = vsub.f32 0.0, %v16480_v36  ;;  %v17653_v6 = vld [vmem:[#allocation126_spill] sm:$0xff] }
 0x4ed   : > { %11402 = vrcp.f32 %v6709_v18  ;;  %v6010_v40 = vpop.f32.mrf.mxu1  ;;  %v5418_v18 = vadd.f32 %v16239_v23, %v17653_v6 }
 0x4ee   : > { %v11385_v5 = vpop.eup %11384  ;;  %9009 = vst [vmem:[%s15453_s17 + $0x168] sm:$0xff] %v8878_v8   ;;  %v6562_v10 = vmul.f32 1.442695, %v6336_v49  ;;  %v16486_v14 = vadd.f32 %v6010_v40, %v5410_v53 }
 0x4ef   : > { %v11387_v13 = vpop.eup %11386  ;;  %v6614_v58 = vadd.f32 1.0, %v11385_v5  ;;  %v10313_v44 = vpop.f32.mrf.mxu1 }
 0x4f0   : > { %v11389_v29 = vpop.eup %11388  ;;  %11404 = vpow2.f32 %v6562_v10  ;;  %v6337_v42 = vsub.f32 0.0, %v16486_v14  ;;  %v6958_v46 = vmul.f32 %v11387_v13, %v16412_v24 }
 0x4f1   : > { %v6710_v4 = vadd.f32 1.0, %v11389_v29  ;;  %11406 = vrcp.f32 %v6614_v58  ;;  %v6015_v45 = vpop.f32.mrf.mxu1  ;;  %v17654_v58 = vld [vmem:[#allocation127_spill] sm:$0xff] }
 0x4f2   : > { %v11391_v37 = vpop.eup %11390  ;;  %v6564_v11 = vmul.f32 1.442695, %v6337_v42  ;;  %v16493_v21 = vadd.f32 %v6015_v45, %v5415_v25  ;;  %v5423_v40 = vadd.f32 %v16247_v32, %v17654_v58 }
 0x4f3   : > { %v11393_v56 = vpop.eup %11392  ;;  %v6615_v31 = vadd.f32 1.0, %v11391_v37  ;;  %11408 = vrcp.f32 %v6710_v4  ;;  %v10316_v3 = vpop.f32.mrf.mxu1 }
 0x4f4   : > { %v11395_v30 = vpop.eup %11394  ;;  %v6959_v55 = vmul.f32 %v11393_v56, %v16420_v51  ;;  %v6338_v24 = vsub.f32 0.0, %v16493_v21 }
 0x4f5   : > { %11410 = vrcp.f32 %v6615_v31  ;;  %v6711_v54 = vadd.f32 1.0, %v11395_v30  ;;  %v11397_v5 = vpop.eup %11396  ;;  %v6018_v39 = vpop.f32.mrf.mxu1 }
 0x4f6   : > { %v8883_v28 = vpack.c.bf16 %v6959_v55, %v6958_v46  ;;  %11412 = vpow2.f32 %v6564_v11  ;;  %v6712_v53 = vadd.f32 1.0, %v11397_v5  ;;  %v6566_v51 = vmul.f32 1.442695, %v6338_v24  ;;  %v11399_v13 = vpop.eup %11398  ;;  %v17655_v46 = vld [vmem:[#allocation21_spill] sm:$0xff] }
 0x4f7   : > { %11414 = vrcp.f32 %v6711_v54  ;;  %v16499_v8 = vadd.f32 %v6018_v39, %v5418_v18  ;;  %v10317_v49 = vpop.f32.mrf.mxu1  ;;  %v6960_v25 = vmul.f32 %v11399_v13, %v16429_v15  ;;  %v5426_v32 = vadd.f32 %v16261_v61, %v17655_v46 }
 0x4f8   : > { %9010 = vst [vmem:[%s15453_s17 + $0x170] sm:$0xff] %v8883_v28   ;;  %11416 = vpow2.f32 %v6566_v51  ;;  %v17656_v28 = vld [vmem:[#allocation128_spill] sm:$0xff] }
 0x4f9   : > { %v6339_v29 = vsub.f32 0.0, %v16499_v8  ;;  %v11401_v23 = vpop.eup %11400  ;;  %v6023_v10 = vpop.f32.mrf.mxu1  ;;  %11418 = vrcp.f32 %v6712_v53  ;;  %v5431_v24 = vadd.f32 %v16271_v34, %v17656_v28  ;;  %v17659_v28 = vld [vmem:[#allocation131_spill] sm:$0xff] }
 0x4fa   : > { %v11403_v4 = vpop.eup %11402  ;;  %v6713_v44 = vadd.f32 1.0, %v11401_v23  ;;  %v16504_v62 = vadd.f32 %v6023_v10, %v5423_v40 }
 0x4fb   : > { %v6568_v37 = vmul.f32 1.442695, %v6339_v29  ;;  %v6961_v42 = vmul.f32 %v11403_v4, %v16437_v27  ;;  %v10320_v56 = vpop.f32.mrf.mxu1  ;;  %v17657_v4 = vld [vmem:[#allocation159_spill] sm:$0xff] }
 0x4fc   : > { %11420 = vrcp.f32 %v6713_v44  ;;  %v6340_v31 = vsub.f32 0.0, %v16504_v62 }
 0x4fd   : > { %v11405_v45 = vpop.eup %11404  ;;  %v8888_v30 = vpack.c.bf16 %v6961_v42, %v6960_v25  ;;  %11422 = vpow2.f32 %v6568_v37  ;;  %v6026_v55 = vpop.f32.mrf.mxu1 }
 0x4fe   : > { %v11407_v11 = vpop.eup %11406  ;;  %v6714_v54 = vadd.f32 1.0, %v11405_v45  ;;  %v6570_v3 = vmul.f32 1.442695, %v6340_v31  ;;  %v16511_v6 = vadd.f32 %v6026_v55, %v5426_v32 }
 0x4ff   : > { %9011 = vst [vmem:[%s15453_s17 + $0x178] sm:$0xff] %v8888_v30   ;;  %v10321_v15 = vpop.f32.mrf.mxu1  ;;  %v6866_v39 = vmul.f32 %v11407_v11, %v16444_v16  ;;  %v5434_v16 = vadd.f32 %v16281_v47, %v17657_v4 }
 0x500   : > { %v11409_v18 = vpop.eup %11408  ;;  %v6341_v61 = vsub.f32 0.0, %v16511_v6  ;;  %11424 = vpow2.f32 %v6570_v3 }
 0x501   : > { %v6031_v51 = vpop.f32.mrf.mxu1  ;;  %11426 = vrcp.f32 %v6714_v54  ;;  %v6962_v29 = vmul.f32 %v11409_v18, %v16446_v33 }
 0x502   : > { %v11411_v27 = vpop.eup %11410  ;;  %v6572_v58 = vmul.f32 1.442695, %v6341_v61  ;;  %v16519_v40 = vadd.f32 %v6031_v51, %v5431_v24 }
 0x503   : > { %v11413_v5 = vpop.eup %11412  ;;  %v6867_v53 = vmul.f32 %v11411_v27, %v16456_v0  ;;  %v10324_v10 = vpop.f32.mrf.mxu1 }
 0x504   : > { %v11415_v49 = vpop.eup %11414  ;;  %v6715_v13 = vadd.f32 1.0, %v11413_v5  ;;  %v6342_v0 = vsub.f32 0.0, %v16519_v40 }
 0x505   : > { %v8653_v34 = vpack.c.bf16 %v6867_v53, %v6866_v39  ;;  %v6963_v23 = vmul.f32 %v11415_v49, %v16458_v22  ;;  %v6034_v37 = vpop.f32.mrf.mxu1  ;;  %v11417_v25 = vpop.eup %11416  ;;  %v17658_v22 = vld [vmem:[#allocation130_spill] sm:$0xff] }
 0x506   : > { %11428 = vrcp.f32 %v6715_v13  ;;  %v6574_v42 = vmul.f32 1.442695, %v6342_v0  ;;  %v16527_v56 = vadd.f32 %v6034_v37, %v5434_v16  ;;  %v11419_v46 = vpop.eup %11418  ;;  %v6716_v33 = vadd.f32 1.0, %v11417_v25  ;;  %v17660_v13 = vld [vmem:[#allocation168_spill] sm:$0xff]  ;;  %v17661_v25 = vld [vmem:[#allocation165_spill] sm:$0xff] }
 0x507   : > { %8654 = vst [vmem:[%s15453_s17] sm:$0xff] %v8653_v34   ;;  %v8893_v44 = vpack.c.bf16 %v6963_v23, %v6962_v29  ;;  %11430 = vpow2.f32 %v6572_v58  ;;  %v10325_v32 = vpop.f32.mrf.mxu1  ;;  %v5439_v31 = vadd.f32 %v16289_v19, %v17658_v22  ;;  %v6964_v11 = vmul.f32 %v11419_v46, %v16465_v59 }
 0x508   : > { %11432 = vpow2.f32 %v6574_v42  ;;  %v6343_v47 = vsub.f32 0.0, %v16527_v56  ;;  %v5442_v19 = vadd.f32 %v16298_v60, %v17659_v28  ;;  %v5447_v58 = vadd.f32 %v16306_v35, %v17660_v13 }
 0x509   : > { %9012 = vst [vmem:[%s15453_s17 + $0x180] sm:$0xff] %v8893_v44   ;;  %v11421_v45 = vpop.eup %11420  ;;  %v6039_v30 = vpop.f32.mrf.mxu1  ;;  %11434 = vrcp.f32 %v6716_v33  ;;  %v5450_v35 = vadd.f32 %v16315_v20, %v17661_v25 }
 0x50a   : > { %v11423_v55 = vpop.eup %11422  ;;  %v6965_v54 = vmul.f32 %v11421_v45, %v16472_v2  ;;  %v6576_v3 = vmul.f32 1.442695, %v6343_v47  ;;  %v16535_v18 = vadd.f32 %v6039_v30, %v5439_v31  ;;  %v17662_v45 = vld [vmem:[#allocation133_spill] sm:$0xff] }
 0x50b   : > { %v6717_v15 = vadd.f32 1.0, %v11423_v55  ;;  %v10328_v27 = vpop.f32.mrf.mxu1  ;;  %v5455_v30 = vadd.f32 %v16323_v63, %v17662_v45  ;;  %v17666_v45 = vld [vmem:[#allocation137_spill] sm:$0xff] }
 0x50c   : > { %v8898_v24 = vpack.c.bf16 %v6965_v54, %v6964_v11  ;;  %11436 = vpow2.f32 %v6576_v3  ;;  %v6344_v61 = vsub.f32 0.0, %v16535_v18 }
 0x50d   : > { %11438 = vrcp.f32 %v6717_v15  ;;  %v6042_v5 = vpop.f32.mrf.mxu1  ;;  %v11425_v39 = vpop.eup %11424 }
 0x50e   : > { %9013 = vst [vmem:[%s15453_s17 + $0x188] sm:$0xff] %v8898_v24   ;;  %v6578_v59 = vmul.f32 1.442695, %v6344_v61  ;;  %v16541_v53 = vadd.f32 %v6042_v5, %v5442_v19  ;;  %v11427_v2 = vpop.eup %11426  ;;  %v6718_v51 = vadd.f32 1.0, %v11425_v39  ;;  %v17663_v61 = vld [vmem:[#allocation134_spill] sm:$0xff] }
 0x50f   : > { %v10329_v49 = vpop.f32.mrf.mxu1  ;;  %v6966_v10 = vmul.f32 %v11427_v2, %v16480_v36  ;;  %v5458_v63 = vadd.f32 %v16332_v26, %v17663_v61 }
 0x510   : > { %11440 = vpow2.f32 %v6578_v59  ;;  %v6345_v60 = vsub.f32 0.0, %v16541_v53 }
 0x511   : > { %v6047_v34 = vpop.f32.mrf.mxu1  ;;  %11442 = vrcp.f32 %v6718_v51 }
 0x512   : > { %v6580_v16 = vmul.f32 1.442695, %v6345_v60  ;;  %v16548_v0 = vadd.f32 %v6047_v34, %v5447_v58  ;;  %v17664_v60 = vld [vmem:[#allocation173_spill] sm:$0xff] }
 0x513   : > { %v11429_v29 = vpop.eup %11428  ;;  %v10332_v37 = vpop.f32.mrf.mxu1 }
 0x514   : > { %v11431_v23 = vpop.eup %11430  ;;  %v6967_v4 = vmul.f32 %v11429_v29, %v16486_v14  ;;  %11444 = vpow2.f32 %v6580_v16  ;;  %v6346_v46 = vsub.f32 0.0, %v16548_v0 }
 0x515   : > { %v6719_v44 = vadd.f32 1.0, %v11431_v23  ;;  %v11433_v33 = vpop.eup %11432  ;;  %v6050_v32 = vpop.f32.mrf.mxu1 }
 0x516   : > { %v8903_v42 = vpack.c.bf16 %v6967_v4, %v6966_v10  ;;  %v6720_v36 = vadd.f32 1.0, %v11433_v33  ;;  %v6582_v22 = vmul.f32 1.442695, %v6346_v46  ;;  %v16554_v14 = vadd.f32 %v6050_v32, %v5450_v35  ;;  %v11435_v47 = vpop.eup %11434  ;;  %v17665_v35 = vld [vmem:[#allocation172_spill] sm:$0xff] }
 0x517   : > { %11446 = vrcp.f32 %v6719_v44  ;;  %v10333_v31 = vpop.f32.mrf.mxu1  ;;  %v6968_v28 = vmul.f32 %v11435_v47, %v16493_v21 }
 0x518   : > { %9014 = vst [vmem:[%s15453_s17 + $0x190] sm:$0xff] %v8903_v42   ;;  %v6347_v55 = vsub.f32 0.0, %v16554_v14  ;;  %11448 = vpow2.f32 %v6582_v22 }
 0x519   : > { %v11437_v20 = vpop.eup %11436  ;;  %v6055_v11 = vpop.f32.mrf.mxu1  ;;  %11450 = vrcp.f32 %v6720_v36 }
 0x51a   : > { %v11439_v54 = vpop.eup %11438  ;;  %v6721_v3 = vadd.f32 1.0, %v11437_v20  ;;  %v6584_v15 = vmul.f32 1.442695, %v6347_v55  ;;  %v16559_v27 = vadd.f32 %v6055_v11, %v5455_v30 }
 0x51b   : > { %v6969_v19 = vmul.f32 %v11439_v54, %v16499_v8  ;;  %v10336_v24 = vpop.f32.mrf.mxu1  ;;  %v5463_v8 = vadd.f32 %v16340_v7, %v17664_v60  ;;  %v5466_v7 = vadd.f32 %v16349_v48, %v17665_v35 }
 0x51c   : > { %11452 = vrcp.f32 %v6721_v3  ;;  %v6348_v5 = vsub.f32 0.0, %v16559_v27  ;;  %v17667_v24 = vld [vmem:[#allocation139_spill] sm:$0xff] }
 0x51d   : > { %v11441_v39 = vpop.eup %11440  ;;  %v8908_v59 = vpack.c.bf16 %v6969_v19, %v6968_v28  ;;  %11454 = vpow2.f32 %v6584_v15  ;;  %v6058_v2 = vpop.f32.mrf.mxu1 }
 0x51e   : > { %v6722_v51 = vadd.f32 1.0, %v11441_v39  ;;  %v6586_v49 = vmul.f32 1.442695, %v6348_v5  ;;  %v16566_v13 = vadd.f32 %v6058_v2, %v5458_v63  ;;  %v11443_v21 = vpop.eup %11442 }
 0x51f   : > { %9015 = vst [vmem:[%s15453_s17 + $0x198] sm:$0xff] %v8908_v59   ;;  %v10337_v58 = vpop.f32.mrf.mxu1  ;;  %v6970_v44 = vmul.f32 %v11443_v21, %v16504_v62 }
 0x520   : > { %v6349_v29 = vsub.f32 0.0, %v16566_v13  ;;  %11456 = vpow2.f32 %v6586_v49  ;;  %v17668_v49 = vld [vmem:[#allocation25_spill] sm:$0xff] }
 0x521   : > { %v11445_v26 = vpop.eup %11444  ;;  %v6063_v34 = vpop.f32.mrf.mxu1  ;;  %11458 = vrcp.f32 %v6722_v51  ;;  %v5479_v58 = vadd.f32 %v16374_v9, %v17668_v49 }
 0x522   : > { %v6723_v10 = vadd.f32 1.0, %v11445_v26  ;;  %v6588_v4 = vmul.f32 1.442695, %v6349_v29  ;;  %v16572_v16 = vadd.f32 %v6063_v34, %v5463_v8 }
 0x523   : > { %v10340_v25 = vpop.f32.mrf.mxu1 }
 0x524   : > { %v11447_v23 = vpop.eup %11446  ;;  %11460 = vrcp.f32 %v6723_v10  ;;  %v6350_v42 = vsub.f32 0.0, %v16572_v16 }
 0x525   : > { %v6971_v37 = vmul.f32 %v11447_v23, %v16511_v6  ;;  %11462 = vpow2.f32 %v6588_v4  ;;  %v6066_v33 = vpop.f32.mrf.mxu1  ;;  %v11449_v32 = vpop.eup %11448  ;;  %v5471_v6 = vadd.f32 %v16357_v52, %v17666_v45  ;;  %v5474_v52 = vadd.f32 %v16366_v50, %v17667_v24 }
 0x526   : > { %v6590_v36 = vmul.f32 1.442695, %v6350_v42  ;;  %v16579_v22 = vadd.f32 %v6066_v33, %v5466_v7  ;;  %v11451_v31 = vpop.eup %11450  ;;  %v6724_v47 = vadd.f32 1.0, %v11449_v32  ;;  %v17670_v32 = vld [vmem:[#allocation142_spill] sm:$0xff] }
 0x527   : > { %v8913_v46 = vpack.c.bf16 %v6971_v37, %v6970_v44  ;;  %v10341_v62 = vpop.f32.mrf.mxu1  ;;  %v6972_v11 = vmul.f32 %v11451_v31, %v16519_v40  ;;  %v17669_v44 = vld [vmem:[#allocation140_spill] sm:$0xff] }
 0x528   : > { %11464 = vpow2.f32 %v6590_v36  ;;  %v6351_v48 = vsub.f32 0.0, %v16579_v22  ;;  %v5482_v9 = vadd.f32 %v16383_v57, %v17669_v44  ;;  %v5487_v36 = vadd.f32 %v16391_v43, %v17670_v32 }
 0x529   : > { %9016 = vst [vmem:[%s15453_s17 + $0x1a0] sm:$0xff] %v8913_v46   ;;  %v11453_v30 = vpop.eup %11452  ;;  %v6071_v55 = vpop.f32.mrf.mxu1  ;;  %11466 = vrcp.f32 %v6724_v47 }
 0x52a   : > { %v11455_v20 = vpop.eup %11454  ;;  %v6973_v54 = vmul.f32 %v11453_v30, %v16527_v56  ;;  %v6592_v3 = vmul.f32 1.442695, %v6351_v48  ;;  %v16587_v15 = vadd.f32 %v6071_v55, %v5471_v6 }
 0x52b   : > { %v6725_v28 = vadd.f32 1.0, %v11455_v20  ;;  %v10344_v19 = vpop.f32.mrf.mxu1 }
 0x52c   : > { %v8918_v61 = vpack.c.bf16 %v6973_v54, %v6972_v11  ;;  %11468 = vpow2.f32 %v6592_v3  ;;  %v6352_v63 = vsub.f32 0.0, %v16587_v15  ;;  %v17671_v11 = vld [vmem:[#allocation143_spill] sm:$0xff] }
 0x52d   : > { %11470 = vrcp.f32 %v6725_v28  ;;  %v6074_v5 = vpop.f32.mrf.mxu1  ;;  %v11457_v39 = vpop.eup %11456  ;;  %v5490_v43 = vadd.f32 %v16400_v41, %v17671_v11 }
 0x52e   : > { %9017 = vst [vmem:[%s15453_s17 + $0x1a8] sm:$0xff] %v8918_v61   ;;  %v6594_v40 = vmul.f32 1.442695, %v6352_v63  ;;  %v16593_v59 = vadd.f32 %v6074_v5, %v5474_v52  ;;  %v11459_v56 = vpop.eup %11458  ;;  %v6726_v2 = vadd.f32 1.0, %v11457_v39  ;;  %v17672_v5 = vld [vmem:[#allocation145_spill] sm:$0xff] }
 0x52f   : > { %v10345_v51 = vpop.f32.mrf.mxu1  ;;  %v6974_v29 = vmul.f32 %v11459_v56, %v16535_v18 }
 0x530   : > { %11472 = vpow2.f32 %v6594_v40  ;;  %v6353_v50 = vsub.f32 0.0, %v16593_v59 }
 0x531   : > { %v11461_v21 = vpop.eup %11460  ;;  %v6079_v60 = vpop.f32.mrf.mxu1  ;;  %11474 = vrcp.f32 %v6726_v2 }
 0x532   : > { %v11463_v8 = vpop.eup %11462  ;;  %v6975_v26 = vmul.f32 %v11461_v21, %v16541_v53  ;;  %v6596_v34 = vmul.f32 1.442695, %v6353_v50  ;;  %v16600_v23 = vadd.f32 %v6079_v60, %v5479_v58  ;;  %v17673_v60 = vld [vmem:[#allocation146_spill] sm:$0xff] }
 0x533   : > { %v6727_v10 = vadd.f32 1.0, %v11463_v8  ;;  %v10348_v4 = vpop.f32.mrf.mxu1 }
 0x534   : > { %v8923_v37 = vpack.c.bf16 %v6975_v26, %v6974_v29  ;;  %11476 = vpow2.f32 %v6596_v34  ;;  %v6354_v25 = vsub.f32 0.0, %v16600_v23 }
 0x535   : > { %v11465_v35 = vpop.eup %11464  ;;  %11478 = vrcp.f32 %v6727_v10  ;;  %v6082_v7 = vpop.f32.mrf.mxu1 }
 0x536   : > { %9018 = vst [vmem:[%s15453_s17 + $0x1b0] sm:$0xff] %v8923_v37   ;;  %v6728_v18 = vadd.f32 1.0, %v11465_v35  ;;  %v6598_v42 = vmul.f32 1.442695, %v6354_v25  ;;  %v16606_v53 = vadd.f32 %v6082_v7, %v5482_v9  ;;  %v11467_v33 = vpop.eup %11466  ;;  %v17674_v37 = vld [vmem:[#allocation189_spill] sm:$0xff] }
 0x537   : > { %v10349_v46 = vpop.f32.mrf.mxu1  ;;  %v6976_v30 = vmul.f32 %v11467_v33, %v16548_v0 }
 0x538   : > { %v6355_v31 = vsub.f32 0.0, %v16606_v53  ;;  %11480 = vpow2.f32 %v6598_v42 }
 0x539   : > { %v11469_v57 = vpop.eup %11468  ;;  %v6087_v47 = vpop.f32.mrf.mxu1  ;;  %11482 = vrcp.f32 %v6728_v18 }
 0x53a   : > { %v11471_v62 = vpop.eup %11470  ;;  %v6729_v45 = vadd.f32 1.0, %v11469_v57  ;;  %v6600_v6 = vmul.f32 1.442695, %v6355_v31  ;;  %v16611_v48 = vadd.f32 %v6087_v47, %v5487_v36  ;;  %v17675_v31 = vld [vmem:[#allocation150_spill] sm:$0xff] }
 0x53b   : > { %v6977_v55 = vmul.f32 %v11471_v62, %v16554_v14  ;;  %v10352_v20 = vpop.f32.mrf.mxu1  ;;  %v5495_v14 = vadd.f32 %v16408_v17, %v17672_v5  ;;  %v5498_v17 = vadd.f32 %v16417_v38, %v17673_v60  ;;  %v5506_v57 = vadd.f32 %v16434_v12, %v17675_v31 }
 0x53c   : > { %11484 = vrcp.f32 %v6729_v45  ;;  %v6356_v54 = vsub.f32 0.0, %v16611_v48 }
 0x53d   : > { %v11473_v3 = vpop.eup %11472  ;;  %v8928_v28 = vpack.c.bf16 %v6977_v55, %v6976_v30  ;;  %11486 = vpow2.f32 %v6600_v6  ;;  %v6090_v19 = vpop.f32.mrf.mxu1 }
 0x53e   : > { %v6730_v24 = vadd.f32 1.0, %v11473_v3  ;;  %v6602_v52 = vmul.f32 1.442695, %v6356_v54  ;;  %v16618_v61 = vadd.f32 %v6090_v19, %v5490_v43  ;;  %v11475_v0 = vpop.eup %11474 }
 0x53f   : > { %9019 = vst [vmem:[%s15453_s17 + $0x1b8] sm:$0xff] %v8928_v28   ;;  %v10353_v63 = vpop.f32.mrf.mxu1  ;;  %v6978_v58 = vmul.f32 %v11475_v0, %v16559_v27 }
 0x540   : > { %v6357_v39 = vsub.f32 0.0, %v16618_v61  ;;  %11488 = vpow2.f32 %v6602_v52 }
 0x541   : > { %v11477_v41 = vpop.eup %11476  ;;  %v6095_v40 = vpop.f32.mrf.mxu1  ;;  %11490 = vrcp.f32 %v6730_v24 }
 0x542   : > { %v11479_v56 = vpop.eup %11478  ;;  %v6731_v2 = vadd.f32 1.0, %v11477_v41  ;;  %v6604_v51 = vmul.f32 1.442695, %v6357_v39  ;;  %v16624_v49 = vadd.f32 %v6095_v40, %v5495_v14 }
 0x543   : > { %v6979_v50 = vmul.f32 %v11479_v56, %v16566_v13  ;;  %v10356_v21 = vpop.f32.mrf.mxu1  ;;  %v5503_v13 = vadd.f32 %v16425_v1, %v17674_v37 }
 0x544   : > { %11492 = vrcp.f32 %v6731_v2  ;;  %v6358_v8 = vsub.f32 0.0, %v16624_v49 }
 0x545   : > { %v8933_v29 = vpack.c.bf16 %v6979_v50, %v6978_v58  ;;  %11494 = vpow2.f32 %v6604_v51  ;;  %v6098_v26 = vpop.f32.mrf.mxu1  ;;  %v11481_v34 = vpop.eup %11480 }
 0x546   : > { %v6606_v10 = vmul.f32 1.442695, %v6358_v8  ;;  %v16631_v4 = vadd.f32 %v6098_v26, %v5498_v17  ;;  %v11483_v44 = vpop.eup %11482  ;;  %v6732_v9 = vadd.f32 1.0, %v11481_v34 }
 0x547   : > { %9020 = vst [vmem:[%s15453_s17 + $0x1c0] sm:$0xff] %v8933_v29   ;;  %v10357_v27 = vpop.f32.mrf.mxu1  ;;  %v6980_v18 = vmul.f32 %v11483_v44, %v16572_v16 }
 0x548   : > { %11496 = vpow2.f32 %v6606_v10  ;;  %v6359_v38 = vsub.f32 0.0, %v16631_v4 }
 0x549   : > { %v11485_v25 = vpop.eup %11484  ;;  %v6103_v35 = vpop.f32.mrf.mxu1  ;;  %11498 = vrcp.f32 %v6732_v9 }
 0x54a   : > { %v11487_v7 = vpop.eup %11486  ;;  %v6981_v42 = vmul.f32 %v11485_v25, %v16579_v22  ;;  %v6608_v46 = vmul.f32 1.442695, %v6359_v38  ;;  %v6234_v33 = vadd.f32 %v6103_v35, %v5503_v13 }
 0x54b   : > { %v6733_v32 = vadd.f32 1.0, %v11487_v7  ;;  %v10360_v36 = vpop.f32.mrf.mxu1 }
 0x54c   : > { %v8938_v1 = vpack.c.bf16 %v6981_v42, %v6980_v18  ;;  %11500 = vpow2.f32 %v6608_v46  ;;  %v6360_v47 = vsub.f32 0.0, %v6234_v33 }
 0x54d   : > { %11502 = vrcp.f32 %v6733_v32  ;;  %v6106_v62 = vpop.f32.mrf.mxu1  ;;  %v11489_v45 = vpop.eup %11488 }
 0x54e   : > { %9021 = vst [vmem:[%s15453_s17 + $0x1c8] sm:$0xff] %v8938_v1   ;;  %v6610_v6 = vmul.f32 1.442695, %v6360_v47  ;;  %v6235_v30 = vadd.f32 %v6106_v62, %v5506_v57  ;;  %v11491_v16 = vpop.eup %11490  ;;  %v6734_v22 = vadd.f32 1.0, %v11489_v45 }
 0x54f   : > { %v10361_v55 = vpop.f32.mrf.mxu1  ;;  %v6982_v54 = vmul.f32 %v11491_v16, %v16587_v15 }
 0x550   : > { %11504 = vpow2.f32 %v6610_v6  ;;  %v6361_v20 = vsub.f32 0.0, %v6235_v30 }
 0x551   : > { %v11493_v11 = vpop.eup %11492  ;;  %11506 = vrcp.f32 %v6734_v22 }
 0x552   : > { %v11495_v43 = vpop.eup %11494  ;;  %v6983_v12 = vmul.f32 %v11493_v11, %v16593_v59  ;;  %v6612_v3 = vmul.f32 1.442695, %v6361_v20 }
 0x553   : > { %v6735_v28 = vadd.f32 1.0, %v11495_v43 }
 0x554   : > { %v8943_v19 = vpack.c.bf16 %v6983_v12, %v6982_v54  ;;  %11508 = vpow2.f32 %v6612_v3 }
 0x555   : > { %v11497_v24 = vpop.eup %11496  ;;  %11510 = vrcp.f32 %v6735_v28 }
 0x556   : > { %9022 = vst [vmem:[%s15453_s17 + $0x1d0] sm:$0xff] %v8943_v19   ;;  %v6736_v52 = vadd.f32 1.0, %v11497_v24  ;;  %v11499_v63 = vpop.eup %11498 }
 0x557   : > { %v6984_v39 = vmul.f32 %v11499_v63, %v16600_v23 }
 0x558   : > { %11512 = vrcp.f32 %v6736_v52 }
 0x559   : > { %v11501_v0 = vpop.eup %11500 }
 0x55a   : > { %v11503_v5 = vpop.eup %11502  ;;  %v6737_v14 = vadd.f32 1.0, %v11501_v0 }
 0x55b   : > { %v6985_v15 = vmul.f32 %v11503_v5, %v16606_v53 }
 0x55c   : > { %11514 = vrcp.f32 %v6737_v14 }
 0x55d   : > { %v11505_v59 = vpop.eup %11504  ;;  %v8948_v41 = vpack.c.bf16 %v6985_v15, %v6984_v39 }
 0x55e   : > { %v6738_v40 = vadd.f32 1.0, %v11505_v59  ;;  %v11507_v56 = vpop.eup %11506 }
 0x55f   : > { %9023 = vst [vmem:[%s15453_s17 + $0x1d8] sm:$0xff] %v8948_v41   ;;  %v6986_v50 = vmul.f32 %v11507_v56, %v16611_v48 }
 0x560   : > { %11516 = vrcp.f32 %v6738_v40 }
 0x561   : > { %v11509_v2 = vpop.eup %11508 }
 0x562   : > { %v11511_v51 = vpop.eup %11510  ;;  %v6739_v58 = vadd.f32 1.0, %v11509_v2 }
 0x563   : > { %v6987_v21 = vmul.f32 %v11511_v51, %v16618_v61 }
 0x564   : > { %11518 = vrcp.f32 %v6739_v58 }
 0x565   : > { %v8953_v23 = vpack.c.bf16 %v6987_v21, %v6986_v50  ;;  %v11513_v53 = vpop.eup %11512 }
 0x566   : > { %v6988_v17 = vmul.f32 %v11513_v53, %v16624_v49 }
 0x567   : > { %9024 = vst [vmem:[%s15453_s17 + $0x1e0] sm:$0xff] %v8953_v23  }
 0x569   : > { %v11515_v60 = vpop.eup %11514 }
 0x56a   : > { %v6989_v8 = vmul.f32 %v11515_v60, %v16631_v4 }
 0x56c   : > { %v8958_v29 = vpack.c.bf16 %v6989_v8, %v6988_v17 }
 0x56d   : > { %v11517_v26 = vpop.eup %11516 }
 0x56e   : > { %9025 = vst [vmem:[%s15453_s17 + $0x1e8] sm:$0xff] %v8958_v29   ;;  %v6990_v10 = vmul.f32 %v11517_v26, %v6234_v33 }
 0x571   : > { %v11519_v34 = vpop.eup %11518 }
 0x572   : > { %v6991_v44 = vmul.f32 %v11519_v34, %v6235_v30  ;;  %7629 = sbr.rel (!%p11684_p5) target bundleno = 1426 (0x592), region = 56 }
 0x574   : > { %v8963_v48 = vpack.c.bf16 %v6991_v44, %v6990_v10 }
 0x576   : > { %9026 = vst [vmem:[%s15453_s17 + $0x1f0] sm:$0xff] %v8963_v48  }
 0x577   : > { %s17681_s22 = smov (!%p7632_p11, %s7631_s22), 126 }
 0x578   : > { %s16662_s25 = sshll.u32 %s17681_s22, 6 }
 0x579   : > { %s7636_s20 = ssub.s32 8064, %s16662_s25 }
 0x57a   : > { %7637 = vsyncadd %s16657_s18, %s7636_s20  ;;  %p8517_p12 = scmp.ne.s32.totalorder %s16662_s25, 0  ;;  %s8649_s21 = smul.u32 8064, %s11667_s9 }
 0x57b   : > { %s7642_s13 = sshll.u32 %s15453_s17, 4  ;;  %s11598_s26 = smov [#allocation2]   ;;  %s16674_s13 = int_to_ptr.vmem [resolvable:$true] %s7642_s13 }
 0x57c   : > { %s16672_s24 = scalar_lea.hbm %s16725_s8, %s8649_s21  ;;  %s11532_s19 = scalar_lea.vmem %s16674_s13, %s16662_s25 }
 0x57d   : > { %p11533_p13 = scmp.ne.s32.totalorder %s16674_s13, %s11532_s19  ;;  %s11536_s10 = sshll.u32 %s11598_s26, 4  ;;  %s11537_s10 = int_to_ptr.vmem [resolvable:$false] %s11536_s10 }
 0x57e   : > { %s11538_s9 = scalar_lea.vmem %s11537_s10, 16128  ;;  %p11539_p2 = scmp.lt.s32.totalorder %s16674_s13, %s11537_s10 }
 0x57f   : > { %p11534_p0 = pnand %p11533_p13, %p8517_p12  ;;  %p11540_p3 = scmp.lt.s32.totalorder %s11538_s9, %s11532_s19 }
 0x581   : > { %p11535_p1 = pneg %p11534_p0  ;;  %p11541_p4 = por %p11540_p3, %p11539_p2 }
 0x583   : > { %p11542_p5 = pnand %p11541_p4, %p11535_p1 }
 0x585   : > { %11545 = shalt.err (!%p11542_p5)
}
 0x586   : > { %s11546_s12 = scalar_lea.hbm %s16672_s24, %s16662_s25  ;;  %s11550_s20 = scalar_lea.hbm %s16725_s8, 16000 }
 0x587   : > { %p11547_p7 = scmp.ne.s32.totalorder %s16672_s24, %s11546_s12  ;;  %p11551_p10 = scmp.lt.s32.totalorder %s16672_s24, %s16725_s8 }
 0x588   : > { %p11552_p11 = scmp.lt.s32.totalorder %s11550_s20, %s11546_s12 }
 0x589   : > { %p11548_p8 = pnand %p11547_p7, %p8517_p12 }
 0x58a   : > { %p11553_p13 = por %p11552_p11, %p11551_p10 }
 0x58b   : > { %p11549_p9 = pneg %p11548_p8 }
 0x58d   : > { %p11554_p0 = pnand %p11553_p13, %p11549_p9 }
 0x58f   : > { %11557 = shalt.err (!%p11554_p0)
}
 0x590   : > { %s11599_s23 = smov 64   ;;  %s11600_s19 = smov 4  }
 0x591   : > { %7648 = dma.vmem_to_hbm [thread:$0]  (%p8517_p12), %s16674_s13, %s16662_s25, %s16672_s24, %s16657_s18, %s11599_s23, %s11599_s23, %s11600_s19  }
 0x592 PF: > { %p10384_p1 = scmp.ge.s32.totalorder %s11592_s30, 2  ;;  %s7657_s26 = sand.u32 1, %s11580_s27  }
 0x593   : > { %s7658_s10 = scalar_lea.sflag [#allocation3], %s7657_s26 }
 0x594   : > { %p10381_p2 = pnand %p10384_p1, %p11688_p6 }
 0x596   : > { %p10382_p3 = pneg %p10381_p2 }
 0x598   : > { %11575 = dma.done.wait (%p10382_p3), %s7658_s10, 8064  }
 0x599   : > { %11577 = vsyncadd (%p10382_p3), %s7658_s10, 4294959232  ;;  %p18_p4 = scmp.ge.s32.totalorder %s11671_s11, 4   ;;  %s17676_s27 = smov %s11584_s28 }
 0x59a   : > { %s17677_s28 = smov %s11588_s29  ;;  %s17678_s29 = smov %s11682_s14 }
 0x59b   : > { %s17679_s30 = smov %s11671_s11  ;;  %20 = sbr.rel (!%p18_p4) target bundleno = 3 (0x3), region = 93 }
 0x5a0   :  { %7663 = vsyncpa [#allocation3], 1 }
 0x5a1   :  { %7665 = vsyncpa [#allocation3 + $0x1], 1 }

</bundles_post_ra>
